<compile_context>
chip_gen: v7x
topology: tpu7x:2x2x1
jax: 0.10.0
libtpu: 0.0.40
codegen_flags: <defaults>
</compile_context>

<pallas_src>
import functools
import numpy as np
import jax
import jax.numpy as jnp
from jax.experimental import pallas as pl
from jax.experimental.pallas import tpu as pltpu


# Stream the two large classifier weights as bf16 (accumulation stays f32 in-kernel).
# Set to jnp.float32 to restore bit-exact f32 classifier numerics.
FC_WEIGHT_DTYPE = jnp.bfloat16


# ------------------------ conv1 + ReLU + maxpool(2,2) ------------------------
# Output is written into the interior of a (Ho+2, Wo+2) zero-halo buffer so the next
# conv consumes it directly (no wrapper-side jnp.pad of the 64-channel activation).

def _conv1_relu_maxpool_kernel(x_ref, w_ref, b_ref, se_ref, so_ref, o_ref):
    # x_ref: (1, H+2, W+2, Cin) padded input sample
    # w_ref: (9, Cin, Cout) tap-major conv weights;  b_ref: (1, Cout)
    # se_ref/so_ref: (Wo, W) stride-2 column-selection matrices (host-built constants)
    # o_ref: (1, Ho+2, Wo+2, Cout) pre-padded pooled output (zero halo)
    _, hp, wp, cin = x_ref.shape
    w = wp - 2
    _, hop, wop, cout = o_ref.shape
    ho, wo = hop - 2, wop - 2

    bias = b_ref[...]                                   # (1, Cout)
    s_even = se_ref[...]                                # (Wo, W)
    s_odd = so_ref[...]
    wts = [w_ref[t] for t in range(9)]                  # 9 x (Cin, Cout), tiny

    # Zero the whole block once (gives the halo); interior rows are overwritten below.
    o_ref[...] = jnp.zeros_like(o_ref)

    def row_body(r, carry):
        # padded rows [2r, 2r+4) cover the taps of conv rows 2r and 2r+1
        rows = x_ref[0, pl.ds(2 * r, 4), :, :]          # (4, W+2, Cin)
        acc0 = jnp.zeros((w, cout), jnp.float32)        # conv row 2r
        acc1 = jnp.zeros((w, cout), jnp.float32)        # conv row 2r+1
        for kh in range(3):
            row0 = rows[kh]
            row1 = rows[kh + 1]
            for kw in range(3):
                wt = wts[kh * 3 + kw]
                acc0 = acc0 + jnp.dot(row0[kw:kw + w, :], wt,
                                      preferred_element_type=jnp.float32)
                acc1 = acc1 + jnp.dot(row1[kw:kw + w, :], wt,
                                      preferred_element_type=jnp.float32)
        m = jnp.maximum(acc0, acc1)                     # pool along H
        pooled = jnp.maximum(                           # pool along W via selection matmuls
            jnp.dot(s_even, m, preferred_element_type=jnp.float32),
            jnp.dot(s_odd, m, preferred_element_type=jnp.float32))
        # bias/ReLU commute with max-pool (same per-channel bias, ReLU monotone)
        out = jnp.maximum(pooled + bias, 0.0).astype(o_ref.dtype)
        o_ref[0, pl.ds(r + 1, 1), pl.ds(1, wo), :] = out[None]
        return carry

    jax.lax.fori_loop(0, ho, row_body, 0)


def _stride2_select_matrices(w):
    wo = w // 2
    col = np.arange(w)[None, :]
    tgt = 2 * np.arange(wo)[:, None]
    s_even = (col == tgt).astype(np.float32)            # picks conv col 2c
    s_odd = (col == tgt + 1).astype(np.float32)         # picks conv col 2c+1
    return jnp.asarray(s_even), jnp.asarray(s_odd)


def conv3x3_relu_maxpool2(x_nhwc, w, b):
    """Fused 3x3 'same' conv + bias + ReLU + MaxPool2d(2,2).

    Returns (N, H/2 + 2, W/2 + 2, Cout) with a zero 1-pixel halo (ready for the next conv).
    """
    n, h, wd, cin = x_nhwc.shape
    assert h % 2 == 0 and wd % 2 == 0, "maxpool(2,2) path assumes even spatial dims"
    cout = w.shape[-1]
    ho, wo = h // 2, wd // 2
    xp = jnp.pad(x_nhwc, ((0, 0), (1, 1), (1, 1), (0, 0)))   # tiny, raw 3-channel input
    wt = w.reshape(9, cin, cout)
    bt = b.reshape(1, cout)
    s_even, s_odd = _stride2_select_matrices(wd)
    return pl.pallas_call(
        _conv1_relu_maxpool_kernel,
        out_shape=jax.ShapeDtypeStruct((n, ho + 2, wo + 2, cout), x_nhwc.dtype),
        grid_spec=pltpu.PrefetchScalarGridSpec(
            num_scalar_prefetch=0, grid=(n,),
            in_specs=[
                pl.BlockSpec((1, h + 2, wd + 2, cin), lambda i: (i, 0, 0, 0)),
                pl.BlockSpec((9, cin, cout), lambda i: (0, 0, 0)),
                pl.BlockSpec((1, cout), lambda i: (0, 0)),
                pl.BlockSpec((wo, wd), lambda i: (0, 0)),
                pl.BlockSpec((wo, wd), lambda i: (0, 0)),
            ],
            out_specs=pl.BlockSpec((1, ho + 2, wo + 2, cout), lambda i: (i, 0, 0, 0)),
        ),
        compiler_params=pltpu.CompilerParams(dimension_semantics=("parallel",)),
    )(xp, wt, bt, s_even, s_odd)


# -------------------- conv2 + ReLU + adaptive avgpool(7,7) -------------------
# Row(pixel)-tiled: per tile we do 9 accumulating K=Cin matmuls on window slices of the
# VMEM-resident padded input (no im2col scratch), bias+ReLU, then accumulate the partial
# (49, hw_tile) x (hw_tile, Cout) pooling matmul into a small VMEM scratch.

def _conv2_relu_avgpool_kernel(x_ref, w_ref, b_ref, p_ref, o_ref, acc_ref):
    # x_ref: (1, H+2, W+2, Cin) pre-padded activation (whole sample, VMEM-resident)
    # w_ref: (9, Cin, Cout); b_ref: (1, Cout)
    # p_ref: (Po, th*W) column block of the adaptive-avg-pool matrix for this row tile
    # o_ref: (1, Po, Cout); acc_ref: (Po, Cout) f32 pooling accumulator
    t = pl.program_id(1)
    _, hp, wp, cin = x_ref.shape
    wc = wp - 2
    cout = w_ref.shape[-1]
    th = p_ref.shape[1] // wc                            # conv rows handled this step

    @pl.when(t == 0)
    def _():
        acc_ref[...] = jnp.zeros_like(acc_ref)

    r0 = t * th
    conv = jnp.zeros((th * wc, cout), jnp.float32)
    for kh in range(3):
        rows = x_ref[0, pl.ds(r0 + kh, th), :, :]        # (th, W+2, Cin)
        for kw in range(3):
            win = rows[:, kw:kw + wc, :].reshape(th * wc, cin)
            conv = conv + jnp.dot(win, w_ref[kh * 3 + kw],
                                  preferred_element_type=jnp.float32)
    act = jnp.maximum(conv + b_ref[...], 0.0)            # bias + ReLU (before pooling)
    acc_ref[...] += jnp.dot(p_ref[...], act, preferred_element_type=jnp.float32)

    @pl.when(t == pl.num_programs(1) - 1)
    def _():
        o_ref[0] = acc_ref[...].astype(o_ref.dtype)


def _adaptive_pool_matrix(h, w, ho, wo):
    # Exact PyTorch AdaptiveAvgPool2d windows [floor(i*H/Ho), ceil((i+1)*H/Ho)).
    pm = np.zeros((ho * wo, h * w), np.float32)
    for i in range(ho):
        hs, he = (i * h) // ho, -((-(i + 1) * h) // ho)
        for j in range(wo):
            ws, we = (j * w) // wo, -((-(j + 1) * w) // wo)
            cnt = (he - hs) * (we - ws)
            for hh in range(hs, he):
                for ww in range(ws, we):
                    pm[i * wo + j, hh * w + ww] = 1.0 / cnt
    return pm


def _pick_row_tile(h, w, target_pixels=512):
    """Row tile th (divisor of h). Prefer pixel counts that are 256-multiples (MXU pass
    on v6e/v7x) and >= target; else any 128-aligned tile; else the whole image."""
    for th in range(1, h + 1):
        if h % th == 0 and (th * w) % 256 == 0 and th * w >= target_pixels:
            return th
    for th in range(1, h + 1):
        if h % th == 0 and (th * w) % 128 == 0:
            return th
    return h


def conv3x3_relu_avgpool(xp_nhwc, w, b, out_hw=(7, 7)):
    """Fused 3x3 'same' conv + bias + ReLU + AdaptiveAvgPool2d(out_hw).

    `xp_nhwc` must already carry a zero 1-pixel halo: (N, H+2, W+2, Cin).
    Returns (N, out_h*out_w, Cout), pixel-major / channel-minor (lane-dense)."""
    n, hp, wp, cin = xp_nhwc.shape
    h, wd = hp - 2, wp - 2
    cout = w.shape[-1]
    ho, wo = out_hw
    po = ho * wo
    th = _pick_row_tile(h, wd)
    wt = w.reshape(9, cin, cout)
    bt = b.reshape(1, cout)
    pmat = jnp.asarray(_adaptive_pool_matrix(h, wd, ho, wo))
    flops = n * (2 * h * wd * 9 * cin * cout + 2 * po * h * wd * cout)
    bytes_accessed = (xp_nhwc.size + wt.size + bt.size + pmat.size + n * po * cout) * 4
    return pl.pallas_call(
        _conv2_relu_avgpool_kernel,
        out_shape=jax.ShapeDtypeStruct((n, po, cout), xp_nhwc.dtype),
        grid_spec=pltpu.PrefetchScalarGridSpec(
            num_scalar_prefetch=0, grid=(n, h // th),
            in_specs=[
                pl.BlockSpec((1, hp, wp, cin), lambda i, t: (i, 0, 0, 0)),
                pl.BlockSpec((9, cin, cout), lambda i, t: (0, 0, 0)),
                pl.BlockSpec((1, cout), lambda i, t: (0, 0)),
                pl.BlockSpec((po, th * wd), lambda i, t: (0, t)),
            ],
            out_specs=pl.BlockSpec((1, po, cout), lambda i, t: (i, 0, 0)),
            scratch_shapes=[pltpu.VMEM((po, cout), jnp.float32)],
        ),
        compiler_params=pltpu.CompilerParams(
            dimension_semantics=("parallel", "arbitrary"),
            vmem_limit_bytes=32 * 1024 * 1024),
        cost_estimate=pl.CostEstimate(flops=flops, transcendentals=0,
                                      bytes_accessed=bytes_accessed),
    )(xp_nhwc, wt, bt, pmat)


# --------------------------------- linear ------------------------------------

def _linear_kernel(x_ref, w_ref, b_ref, o_ref, acc_ref, *, relu):
    k = pl.program_id(1)

    @pl.when(k == 0)
    def _():
        acc_ref[...] = jnp.zeros_like(acc_ref)

    # Cast the (tiny, batch-2) x tile to the streamed weight dtype (bf16 for fc1/fc2,
    # f32 for fc3); accumulation is always f32 in the VMEM scratch.
    acc_ref[...] += jnp.dot(x_ref[...].astype(w_ref.dtype), w_ref[...],
                            preferred_element_type=jnp.float32)

    @pl.when(k == pl.num_programs(1) - 1)
    def _():
        r = acc_ref[...] + b_ref[...]
        if relu:
            r = jnp.maximum(r, 0.0)
        o_ref[...] = r.astype(o_ref.dtype)


def _pick_tile(dim, max_tile, align):
    """Largest divisor of `dim` that is <= max_tile and a multiple of `align`.
    Falls back to the full dim if no aligned divisor exists (fine for the dims used here;
    a padding path would be needed for arbitrary huge non-divisible dims)."""
    if dim <= max_tile:
        return dim
    t = (max_tile // align) * align
    while t >= align:
        if dim % t == 0:
            return t
        t -= align
    return dim


def linear(x, w, b, *, relu, max_tk=8192, max_tm=512):
    """y = x @ w + b (optionally ReLU).  x: (N,K) f32; w: (K,M) f32 or bf16; b: (M,) f32.

    Grid = (M tiles [parallel → megacore on v7x], K tiles [arbitrary, reduction]).
    bf16 weight streaming halves HBM bytes on the bandwidth-bound classifier; large K
    tiles (fc1: tk=6272 → 4 steps) cut per-step pipeline overhead while the
    double-buffered weight block stays well inside the explicit 32 MiB VMEM limit."""
    n, kdim = x.shape
    m = w.shape[1]
    tk = _pick_tile(kdim, max_tk, 128)
    tm = _pick_tile(m, max_tm, 128)
    wbytes = jnp.dtype(w.dtype).itemsize
    flops = 2 * n * kdim * m
    bytes_accessed = x.size * 4 + w.size * wbytes + m * 4 + n * m * 4
    return pl.pallas_call(
        functools.partial(_linear_kernel, relu=relu),
        out_shape=jax.ShapeDtypeStruct((n, m), x.dtype),
        grid_spec=pltpu.PrefetchScalarGridSpec(
            num_scalar_prefetch=0, grid=(m // tm, kdim // tk),
            in_specs=[
                pl.BlockSpec((n, tk), lambda j, k: (0, k)),
                pl.BlockSpec((tk, tm), lambda j, k: (k, j)),
                pl.BlockSpec((1, tm), lambda j, k: (0, j)),
            ],
            out_specs=pl.BlockSpec((n, tm), lambda j, k: (0, j)),
            scratch_shapes=[pltpu.VMEM((n, tm), jnp.float32)],
        ),
        compiler_params=pltpu.CompilerParams(
            dimension_semantics=("parallel", "arbitrary"),
            vmem_limit_bytes=32 * 1024 * 1024),
        cost_estimate=pl.CostEstimate(flops=flops, transcendentals=0,
                                      bytes_accessed=bytes_accessed),
    )(x, w, b.reshape(1, m))


# --------------------------- parameters / forward ----------------------------

def init_params(key, num_classes):
    """Deterministic init matching VGG._initialize_weights distributions."""
    keys = jax.random.split(key, 5)

    def conv_w(k, cin, cout):                       # kaiming_normal_, fan_out, relu
        std = float(np.sqrt(2.0 / (cout * 9)))
        return std * jax.random.normal(k, (3, 3, cin, cout), jnp.float32)

    def lin_w(k, fin, fout, dtype):                 # normal(0, 0.01)
        return (0.01 * jax.random.normal(k, (fin, fout), jnp.float32)).astype(dtype)

    return {
        "conv1_w": conv_w(keys[0], 3, 64),   "conv1_b": jnp.zeros((64,), jnp.float32),
        "conv2_w": conv_w(keys[1], 64, 512), "conv2_b": jnp.zeros((512,), jnp.float32),
        # NOTE: fc1_w rows are stored in the (h*w, c) pixel-major order produced by the
        # fused conv2+avgpool kernel (torch.flatten is channel-major); loading pretrained
        # torch fc1 weights would require a one-time row permutation + transpose.
        "fc1_w": lin_w(keys[2], 7 * 7 * 512, 1024, FC_WEIGHT_DTYPE),
        "fc1_b": jnp.zeros((1024,), jnp.float32),
        "fc2_w": lin_w(keys[3], 1024, 128, FC_WEIGHT_DTYPE),
        "fc2_b": jnp.zeros((128,), jnp.float32),
        "fc3_w": lin_w(keys[4], 128, num_classes, jnp.float32),
        "fc3_b": jnp.zeros((num_classes,), jnp.float32),
    }


def vgg_forward(params, x_nchw):
    # features (VGG-style cfg [64, 'M', 512]): Conv+ReLU, MaxPool2, Conv+ReLU,
    # then AdaptiveAvgPool2d((7,7)).  Pool stages are fused into the conv kernels and the
    # inter-layer halo padding is produced directly by the conv1 kernel (no jnp.pad).
    x = jnp.transpose(x_nchw, (0, 2, 3, 1))                             # NCHW -> NHWC
    x = conv3x3_relu_maxpool2(x, params["conv1_w"], params["conv1_b"])  # (N, H/2+2, W/2+2, 64)
    x = conv3x3_relu_avgpool(x, params["conv2_w"], params["conv2_b"],
                             (7, 7))                                    # (N, 49, 512)
    # Flatten permutation folded into fc1_w row order at init -> plain reshape only.
    n = x.shape[0]
    x = x.reshape(n, 7 * 7 * 512)
    x = linear(x, params["fc1_w"], params["fc1_b"], relu=True)
    # TODO(synk): nn.Dropout is treated as inference-mode identity (train-mode RNG not reproduced).
    x = linear(x, params["fc2_w"], params["fc2_b"], relu=True)
    x = linear(x, params["fc3_w"], params["fc3_b"], relu=False)
    return x


if __name__ == "__main__":
    num_classes = 10                                          # small stand-in for 1000
    key = jax.random.PRNGKey(0)
    pkey, xkey = jax.random.split(key)
    params = init_params(pkey, num_classes)
    x = jax.random.normal(xkey, (2, 3, 16, 16), jnp.float32)  # NCHW, like PyTorch
    out = jax.jit(vgg_forward)(params, x)
    out = jax.block_until_ready(out)
    assert out.shape == (2, num_classes) and out.dtype == jnp.float32
    print("KERNEL_OK")
</pallas_src>

<mosaic_0001>
module attributes {stable_mosaic.version = 11 : i64} {
  func.func @_conv1_relu_maxpool_kernel(%arg0: i32, %arg1: memref<1x18x18x3xf32, #tpu.memory_space<vmem>>, %arg2: memref<9x3x64xf32, #tpu.memory_space<vmem>>, %arg3: memref<1x64xf32, #tpu.memory_space<vmem>>, %arg4: memref<8x16xf32, #tpu.memory_space<vmem>>, %arg5: memref<8x16xf32, #tpu.memory_space<vmem>>, %arg6: memref<1x10x10x64xf32, #tpu.memory_space<vmem>>) attributes {dimension_semantics = [#tpu.dimension_semantics<parallel>], iteration_bounds = array<i64: 2>, scalar_prefetch = 0 : i64, scratch_operands = 0 : i64, tpu.core_type = #tpu.core_type<tc>, window_params = [{transform_indices = @transform_0, window_bounds = array<i64: 1, 18, 18, 3>}, {pipeline_mode = #tpu.pipeline_mode<synchronous>, transform_indices = @transform_1, window_bounds = array<i64: 9, 3, 64>}, {pipeline_mode = #tpu.pipeline_mode<synchronous>, transform_indices = @transform_2, window_bounds = array<i64: 1, 64>}, {pipeline_mode = #tpu.pipeline_mode<synchronous>, transform_indices = @transform_3, window_bounds = array<i64: 8, 16>}, {pipeline_mode = #tpu.pipeline_mode<synchronous>, transform_indices = @transform_4, window_bounds = array<i64: 8, 16>}, {transform_indices = @transform_5, window_bounds = array<i64: 1, 10, 10, 64>}]} {
    %c0 = arith.constant 0 : index
    %c0_0 = arith.constant 0 : index
    %0 = vector.load %arg3[%c0, %c0_0] : memref<1x64xf32, #tpu.memory_space<vmem>>, vector<1x64xf32>
    %c0_1 = arith.constant 0 : index
    %c0_2 = arith.constant 0 : index
    %1 = vector.load %arg4[%c0_1, %c0_2] : memref<8x16xf32, #tpu.memory_space<vmem>>, vector<8x16xf32>
    %c0_3 = arith.constant 0 : index
    %c0_4 = arith.constant 0 : index
    %2 = vector.load %arg5[%c0_3, %c0_4] : memref<8x16xf32, #tpu.memory_space<vmem>>, vector<8x16xf32>
    %c0_5 = arith.constant 0 : index
    %c0_6 = arith.constant 0 : index
    %c0_7 = arith.constant 0 : index
    %3 = vector.load %arg2[%c0_5, %c0_6, %c0_7] : memref<9x3x64xf32, #tpu.memory_space<vmem>>, vector<1x3x64xf32>
    %4 = vector.shape_cast %3 : vector<1x3x64xf32> to vector<3x64xf32>
    %c1 = arith.constant 1 : index
    %c0_8 = arith.constant 0 : index
    %c0_9 = arith.constant 0 : index
    %5 = vector.load %arg2[%c1, %c0_8, %c0_9] : memref<9x3x64xf32, #tpu.memory_space<vmem>>, vector<1x3x64xf32>
    %6 = vector.shape_cast %5 : vector<1x3x64xf32> to vector<3x64xf32>
    %c2 = arith.constant 2 : index
    %c0_10 = arith.constant 0 : index
    %c0_11 = arith.constant 0 : index
    %7 = vector.load %arg2[%c2, %c0_10, %c0_11] : memref<9x3x64xf32, #tpu.memory_space<vmem>>, vector<1x3x64xf32>
    %8 = vector.shape_cast %7 : vector<1x3x64xf32> to vector<3x64xf32>
    %c3 = arith.constant 3 : index
    %c0_12 = arith.constant 0 : index
    %c0_13 = arith.constant 0 : index
    %9 = vector.load %arg2[%c3, %c0_12, %c0_13] : memref<9x3x64xf32, #tpu.memory_space<vmem>>, vector<1x3x64xf32>
    %10 = vector.shape_cast %9 : vector<1x3x64xf32> to vector<3x64xf32>
    %c4 = arith.constant 4 : index
    %c0_14 = arith.constant 0 : index
    %c0_15 = arith.constant 0 : index
    %11 = vector.load %arg2[%c4, %c0_14, %c0_15] : memref<9x3x64xf32, #tpu.memory_space<vmem>>, vector<1x3x64xf32>
    %12 = vector.shape_cast %11 : vector<1x3x64xf32> to vector<3x64xf32>
    %c5 = arith.constant 5 : index
    %c0_16 = arith.constant 0 : index
    %c0_17 = arith.constant 0 : index
    %13 = vector.load %arg2[%c5, %c0_16, %c0_17] : memref<9x3x64xf32, #tpu.memory_space<vmem>>, vector<1x3x64xf32>
    %14 = vector.shape_cast %13 : vector<1x3x64xf32> to vector<3x64xf32>
    %c6 = arith.constant 6 : index
    %c0_18 = arith.constant 0 : index
    %c0_19 = arith.constant 0 : index
    %15 = vector.load %arg2[%c6, %c0_18, %c0_19] : memref<9x3x64xf32, #tpu.memory_space<vmem>>, vector<1x3x64xf32>
    %16 = vector.shape_cast %15 : vector<1x3x64xf32> to vector<3x64xf32>
    %c7 = arith.constant 7 : index
    %c0_20 = arith.constant 0 : index
    %c0_21 = arith.constant 0 : index
    %17 = vector.load %arg2[%c7, %c0_20, %c0_21] : memref<9x3x64xf32, #tpu.memory_space<vmem>>, vector<1x3x64xf32>
    %18 = vector.shape_cast %17 : vector<1x3x64xf32> to vector<3x64xf32>
    %c8 = arith.constant 8 : index
    %c0_22 = arith.constant 0 : index
    %c0_23 = arith.constant 0 : index
    %19 = vector.load %arg2[%c8, %c0_22, %c0_23] : memref<9x3x64xf32, #tpu.memory_space<vmem>>, vector<1x3x64xf32>
    %20 = vector.shape_cast %19 : vector<1x3x64xf32> to vector<3x64xf32>
    %cst = arith.constant 0.000000e+00 : f32
    %21 = vector.broadcast %cst : f32 to vector<1x10x10x64xf32>
    %c0_24 = arith.constant 0 : index
    %c0_25 = arith.constant 0 : index
    %c0_26 = arith.constant 0 : index
    %c0_27 = arith.constant 0 : index
    %22 = vector.load %arg6[%c0_24, %c0_25, %c0_26, %c0_27] : memref<1x10x10x64xf32, #tpu.memory_space<vmem>>, vector<1x10x10x64xf32>
    tpu.vector_store %arg6[%c0_24, %c0_25, %c0_26, %c0_27], %21 {strides = array<i32>} : memref<1x10x10x64xf32, #tpu.memory_space<vmem>>, vector<1x10x10x64xf32>,
    %c0_i32 = arith.constant 0 : i32
    %c8_i32 = arith.constant 8 : i32
    %23 = arith.addi %c0_i32, %c8_i32 : i32
    %c1_i32 = arith.constant 1 : i32
    scf.for %arg7 = %c0_i32 to %23 step %c1_i32  : i32 {
      %c2_i32 = arith.constant 2 : i32
      %24 = arith.muli %c2_i32, %arg7 : i32
      %c0_29 = arith.constant 0 : index
      %25 = arith.index_cast %24 : i32 to index
      %c0_30 = arith.constant 0 : index
      %c0_31 = arith.constant 0 : index
      %26 = vector.load %arg1[%c0_29, %25, %c0_30, %c0_31] : memref<1x18x18x3xf32, #tpu.memory_space<vmem>>, vector<1x4x18x3xf32>
      %27 = vector.shape_cast %26 : vector<1x4x18x3xf32> to vector<4x18x3xf32>
      %cst_32 = arith.constant 0.000000e+00 : f32
      %28 = vector.broadcast %cst_32 : f32 to vector<16x64xf32>
      %cst_33 = arith.constant 0.000000e+00 : f32
      %29 = vector.broadcast %cst_33 : f32 to vector<16x64xf32>
      %30 = vector.extract_strided_slice %27 {offsets = [0, 0, 0], sizes = [1, 18, 3], strides = [1, 1, 1]} : vector<4x18x3xf32> to vector<1x18x3xf32>
      %31 = vector.shape_cast %30 : vector<1x18x3xf32> to vector<18x3xf32>
      %32 = vector.extract_strided_slice %27 {offsets = [1, 0, 0], sizes = [1, 18, 3], strides = [1, 1, 1]} : vector<4x18x3xf32> to vector<1x18x3xf32>
      %33 = vector.shape_cast %32 : vector<1x18x3xf32> to vector<18x3xf32>
      %34 = vector.extract_strided_slice %31 {offsets = [0, 0], sizes = [16, 3], strides = [1, 1]} : vector<18x3xf32> to vector<16x3xf32>
      %cst_34 = arith.constant dense<0.000000e+00> : vector<16x64xf32>
      %35 = tpu.matmul %34, %4, %cst_34 {dimension_numbers = #tpu.dot_dimension_numbers<[1], [0], [0], [1], [0, 0, 1, 1], [], []>} : vector<16x3xf32>, vector<3x64xf32>, vector<16x64xf32> -> vector<16x64xf32>
      %36 = arith.addf %28, %35 : vector<16x64xf32>
      %37 = vector.extract_strided_slice %33 {offsets = [0, 0], sizes = [16, 3], strides = [1, 1]} : vector<18x3xf32> to vector<16x3xf32>
      %cst_35 = arith.constant dense<0.000000e+00> : vector<16x64xf32>
      %38 = tpu.matmul %37, %4, %cst_35 {dimension_numbers = #tpu.dot_dimension_numbers<[1], [0], [0], [1], [0, 0, 1, 1], [], []>} : vector<16x3xf32>, vector<3x64xf32>, vector<16x64xf32> -> vector<16x64xf32>
      %39 = arith.addf %29, %38 : vector<16x64xf32>
      %40 = vector.extract_strided_slice %31 {offsets = [1, 0], sizes = [16, 3], strides = [1, 1]} : vector<18x3xf32> to vector<16x3xf32>
      %cst_36 = arith.constant dense<0.000000e+00> : vector<16x64xf32>
      %41 = tpu.matmul %40, %6, %cst_36 {dimension_numbers = #tpu.dot_dimension_numbers<[1], [0], [0], [1], [0, 0, 1, 1], [], []>} : vector<16x3xf32>, vector<3x64xf32>, vector<16x64xf32> -> vector<16x64xf32>
      %42 = arith.addf %36, %41 : vector<16x64xf32>
      %43 = vector.extract_strided_slice %33 {offsets = [1, 0], sizes = [16, 3], strides = [1, 1]} : vector<18x3xf32> to vector<16x3xf32>
      %cst_37 = arith.constant dense<0.000000e+00> : vector<16x64xf32>
      %44 = tpu.matmul %43, %6, %cst_37 {dimension_numbers = #tpu.dot_dimension_numbers<[1], [0], [0], [1], [0, 0, 1, 1], [], []>} : vector<16x3xf32>, vector<3x64xf32>, vector<16x64xf32> -> vector<16x64xf32>
      %45 = arith.addf %39, %44 : vector<16x64xf32>
      %46 = vector.extract_strided_slice %31 {offsets = [2, 0], sizes = [16, 3], strides = [1, 1]} : vector<18x3xf32> to vector<16x3xf32>
      %cst_38 = arith.constant dense<0.000000e+00> : vector<16x64xf32>
      %47 = tpu.matmul %46, %8, %cst_38 {dimension_numbers = #tpu.dot_dimension_numbers<[1], [0], [0], [1], [0, 0, 1, 1], [], []>} : vector<16x3xf32>, vector<3x64xf32>, vector<16x64xf32> -> vector<16x64xf32>
      %48 = arith.addf %42, %47 : vector<16x64xf32>
      %49 = vector.extract_strided_slice %33 {offsets = [2, 0], sizes = [16, 3], strides = [1, 1]} : vector<18x3xf32> to vector<16x3xf32>
      %cst_39 = arith.constant dense<0.000000e+00> : vector<16x64xf32>
      %50 = tpu.matmul %49, %8, %cst_39 {dimension_numbers = #tpu.dot_dimension_numbers<[1], [0], [0], [1], [0, 0, 1, 1], [], []>} : vector<16x3xf32>, vector<3x64xf32>, vector<16x64xf32> -> vector<16x64xf32>
      %51 = arith.addf %45, %50 : vector<16x64xf32>
      %52 = vector.extract_strided_slice %27 {offsets = [1, 0, 0], sizes = [1, 18, 3], strides = [1, 1, 1]} : vector<4x18x3xf32> to vector<1x18x3xf32>
      %53 = vector.shape_cast %52 : vector<1x18x3xf32> to vector<18x3xf32>
      %54 = vector.extract_strided_slice %27 {offsets = [2, 0, 0], sizes = [1, 18, 3], strides = [1, 1, 1]} : vector<4x18x3xf32> to vector<1x18x3xf32>
      %55 = vector.shape_cast %54 : vector<1x18x3xf32> to vector<18x3xf32>
      %56 = vector.extract_strided_slice %53 {offsets = [0, 0], sizes = [16, 3], strides = [1, 1]} : vector<18x3xf32> to vector<16x3xf32>
      %cst_40 = arith.constant dense<0.000000e+00> : vector<16x64xf32>
      %57 = tpu.matmul %56, %10, %cst_40 {dimension_numbers = #tpu.dot_dimension_numbers<[1], [0], [0], [1], [0, 0, 1, 1], [], []>} : vector<16x3xf32>, vector<3x64xf32>, vector<16x64xf32> -> vector<16x64xf32>
      %58 = arith.addf %48, %57 : vector<16x64xf32>
      %59 = vector.extract_strided_slice %55 {offsets = [0, 0], sizes = [16, 3], strides = [1, 1]} : vector<18x3xf32> to vector<16x3xf32>
      %cst_41 = arith.constant dense<0.000000e+00> : vector<16x64xf32>
      %60 = tpu.matmul %59, %10, %cst_41 {dimension_numbers = #tpu.dot_dimension_numbers<[1], [0], [0], [1], [0, 0, 1, 1], [], []>} : vector<16x3xf32>, vector<3x64xf32>, vector<16x64xf32> -> vector<16x64xf32>
      %61 = arith.addf %51, %60 : vector<16x64xf32>
      %62 = vector.extract_strided_slice %53 {offsets = [1, 0], sizes = [16, 3], strides = [1, 1]} : vector<18x3xf32> to vector<16x3xf32>
      %cst_42 = arith.constant dense<0.000000e+00> : vector<16x64xf32>
      %63 = tpu.matmul %62, %12, %cst_42 {dimension_numbers = #tpu.dot_dimension_numbers<[1], [0], [0], [1], [0, 0, 1, 1], [], []>} : vector<16x3xf32>, vector<3x64xf32>, vector<16x64xf32> -> vector<16x64xf32>
      %64 = arith.addf %58, %63 : vector<16x64xf32>
      %65 = vector.extract_strided_slice %55 {offsets = [1, 0], sizes = [16, 3], strides = [1, 1]} : vector<18x3xf32> to vector<16x3xf32>
      %cst_43 = arith.constant dense<0.000000e+00> : vector<16x64xf32>
      %66 = tpu.matmul %65, %12, %cst_43 {dimension_numbers = #tpu.dot_dimension_numbers<[1], [0], [0], [1], [0, 0, 1, 1], [], []>} : vector<16x3xf32>, vector<3x64xf32>, vector<16x64xf32> -> vector<16x64xf32>
      %67 = arith.addf %61, %66 : vector<16x64xf32>
      %68 = vector.extract_strided_slice %53 {offsets = [2, 0], sizes = [16, 3], strides = [1, 1]} : vector<18x3xf32> to vector<16x3xf32>
      %cst_44 = arith.constant dense<0.000000e+00> : vector<16x64xf32>
      %69 = tpu.matmul %68, %14, %cst_44 {dimension_numbers = #tpu.dot_dimension_numbers<[1], [0], [0], [1], [0, 0, 1, 1], [], []>} : vector<16x3xf32>, vector<3x64xf32>, vector<16x64xf32> -> vector<16x64xf32>
      %70 = arith.addf %64, %69 : vector<16x64xf32>
      %71 = vector.extract_strided_slice %55 {offsets = [2, 0], sizes = [16, 3], strides = [1, 1]} : vector<18x3xf32> to vector<16x3xf32>
      %cst_45 = arith.constant dense<0.000000e+00> : vector<16x64xf32>
      %72 = tpu.matmul %71, %14, %cst_45 {dimension_numbers = #tpu.dot_dimension_numbers<[1], [0], [0], [1], [0, 0, 1, 1], [], []>} : vector<16x3xf32>, vector<3x64xf32>, vector<16x64xf32> -> vector<16x64xf32>
      %73 = arith.addf %67, %72 : vector<16x64xf32>
      %74 = vector.extract_strided_slice %27 {offsets = [2, 0, 0], sizes = [1, 18, 3], strides = [1, 1, 1]} : vector<4x18x3xf32> to vector<1x18x3xf32>
      %75 = vector.shape_cast %74 : vector<1x18x3xf32> to vector<18x3xf32>
      %76 = vector.extract_strided_slice %27 {offsets = [3, 0, 0], sizes = [1, 18, 3], strides = [1, 1, 1]} : vector<4x18x3xf32> to vector<1x18x3xf32>
      %77 = vector.shape_cast %76 : vector<1x18x3xf32> to vector<18x3xf32>
      %78 = vector.extract_strided_slice %75 {offsets = [0, 0], sizes = [16, 3], strides = [1, 1]} : vector<18x3xf32> to vector<16x3xf32>
      %cst_46 = arith.constant dense<0.000000e+00> : vector<16x64xf32>
      %79 = tpu.matmul %78, %16, %cst_46 {dimension_numbers = #tpu.dot_dimension_numbers<[1], [0], [0], [1], [0, 0, 1, 1], [], []>} : vector<16x3xf32>, vector<3x64xf32>, vector<16x64xf32> -> vector<16x64xf32>
      %80 = arith.addf %70, %79 : vector<16x64xf32>
      %81 = vector.extract_strided_slice %77 {offsets = [0, 0], sizes = [16, 3], strides = [1, 1]} : vector<18x3xf32> to vector<16x3xf32>
      %cst_47 = arith.constant dense<0.000000e+00> : vector<16x64xf32>
      %82 = tpu.matmul %81, %16, %cst_47 {dimension_numbers = #tpu.dot_dimension_numbers<[1], [0], [0], [1], [0, 0, 1, 1], [], []>} : vector<16x3xf32>, vector<3x64xf32>, vector<16x64xf32> -> vector<16x64xf32>
      %83 = arith.addf %73, %82 : vector<16x64xf32>
      %84 = vector.extract_strided_slice %75 {offsets = [1, 0], sizes = [16, 3], strides = [1, 1]} : vector<18x3xf32> to vector<16x3xf32>
      %cst_48 = arith.constant dense<0.000000e+00> : vector<16x64xf32>
      %85 = tpu.matmul %84, %18, %cst_48 {dimension_numbers = #tpu.dot_dimension_numbers<[1], [0], [0], [1], [0, 0, 1, 1], [], []>} : vector<16x3xf32>, vector<3x64xf32>, vector<16x64xf32> -> vector<16x64xf32>
      %86 = arith.addf %80, %85 : vector<16x64xf32>
      %87 = vector.extract_strided_slice %77 {offsets = [1, 0], sizes = [16, 3], strides = [1, 1]} : vector<18x3xf32> to vector<16x3xf32>
      %cst_49 = arith.constant dense<0.000000e+00> : vector<16x64xf32>
      %88 = tpu.matmul %87, %18, %cst_49 {dimension_numbers = #tpu.dot_dimension_numbers<[1], [0], [0], [1], [0, 0, 1, 1], [], []>} : vector<16x3xf32>, vector<3x64xf32>, vector<16x64xf32> -> vector<16x64xf32>
      %89 = arith.addf %83, %88 : vector<16x64xf32>
      %90 = vector.extract_strided_slice %75 {offsets = [2, 0], sizes = [16, 3], strides = [1, 1]} : vector<18x3xf32> to vector<16x3xf32>
      %cst_50 = arith.constant dense<0.000000e+00> : vector<16x64xf32>
      %91 = tpu.matmul %90, %20, %cst_50 {dimension_numbers = #tpu.dot_dimension_numbers<[1], [0], [0], [1], [0, 0, 1, 1], [], []>} : vector<16x3xf32>, vector<3x64xf32>, vector<16x64xf32> -> vector<16x64xf32>
      %92 = arith.addf %86, %91 : vector<16x64xf32>
      %93 = vector.extract_strided_slice %77 {offsets = [2, 0], sizes = [16, 3], strides = [1, 1]} : vector<18x3xf32> to vector<16x3xf32>
      %cst_51 = arith.constant dense<0.000000e+00> : vector<16x64xf32>
      %94 = tpu.matmul %93, %20, %cst_51 {dimension_numbers = #tpu.dot_dimension_numbers<[1], [0], [0], [1], [0, 0, 1, 1], [], []>} : vector<16x3xf32>, vector<3x64xf32>, vector<16x64xf32> -> vector<16x64xf32>
      %95 = arith.addf %89, %94 : vector<16x64xf32>
      %96 = arith.maximumf %92, %95 : vector<16x64xf32>
      %cst_52 = arith.constant dense<0.000000e+00> : vector<8x64xf32>
      %97 = tpu.matmul %1, %96, %cst_52 {dimension_numbers = #tpu.dot_dimension_numbers<[1], [0], [0], [1], [0, 0, 1, 1], [], []>} : vector<8x16xf32>, vector<16x64xf32>, vector<8x64xf32> -> vector<8x64xf32>
      %cst_53 = arith.constant dense<0.000000e+00> : vector<8x64xf32>
      %98 = tpu.matmul %2, %96, %cst_53 {dimension_numbers = #tpu.dot_dimension_numbers<[1], [0], [0], [1], [0, 0, 1, 1], [], []>} : vector<8x16xf32>, vector<16x64xf32>, vector<8x64xf32> -> vector<8x64xf32>
      %99 = arith.maximumf %97, %98 : vector<8x64xf32>
      %100 = vector.broadcast %0 : vector<1x64xf32> to vector<8x64xf32>
      %101 = arith.addf %99, %100 : vector<8x64xf32>
      %cst_54 = arith.constant 0.000000e+00 : f32
      %102 = vector.broadcast %cst_54 : f32 to vector<8x64xf32>
      %103 = arith.maximumf %101, %102 : vector<8x64xf32>
      %104 = vector.shape_cast %103 : vector<8x64xf32> to vector<1x8x64xf32>
      %c1_i32_55 = arith.constant 1 : i32
      %105 = arith.addi %arg7, %c1_i32_55 : i32
      %c0_56 = arith.constant 0 : index
      %106 = arith.index_cast %105 : i32 to index
      %c1_57 = arith.constant 1 : index
      %c0_58 = arith.constant 0 : index
      %107 = vector.load %arg6[%c0_56, %106, %c1_57, %c0_58] : memref<1x10x10x64xf32, #tpu.memory_space<vmem>>, vector<1x1x8x64xf32>
      %108 = vector.shape_cast %107 : vector<1x1x8x64xf32> to vector<1x8x64xf32>
      %109 = vector.shape_cast %104 : vector<1x8x64xf32> to vector<1x1x8x64xf32>
      tpu.vector_store %arg6[%c0_56, %106, %c1_57, %c0_58], %109 {strides = array<i32>} : memref<1x10x10x64xf32, #tpu.memory_space<vmem>>, vector<1x1x8x64xf32>,
    }
    %c8_i32_28 = arith.constant 8 : i32
    return
  }
  func.func @transform_0(%arg0: i32) -> (i32, i32, i32, i32) {
    %c0_i32 = arith.constant 0 : i32
    %c0_i32_0 = arith.constant 0 : i32
    %c0_i32_1 = arith.constant 0 : i32
    %c0_i32_2 = arith.constant 0 : i32
    return %arg0, %c0_i32, %c0_i32_0, %c0_i32_1 : i32, i32, i32, i32
  }
  func.func @transform_1(%arg0: i32) -> (i32, i32, i32) {
    %c0_i32 = arith.constant 0 : i32
    %c0_i32_0 = arith.constant 0 : i32
    %c0_i32_1 = arith.constant 0 : i32
    %c0_i32_2 = arith.constant 0 : i32
    return %c0_i32, %c0_i32_0, %c0_i32_1 : i32, i32, i32
  }
  func.func @transform_2(%arg0: i32) -> (i32, i32) {
    %c0_i32 = arith.constant 0 : i32
    %c0_i32_0 = arith.constant 0 : i32
    %c0_i32_1 = arith.constant 0 : i32
    return %c0_i32, %c0_i32_0 : i32, i32
  }
  func.func @transform_3(%arg0: i32) -> (i32, i32) {
    %c0_i32 = arith.constant 0 : i32
    %c0_i32_0 = arith.constant 0 : i32
    %c0_i32_1 = arith.constant 0 : i32
    return %c0_i32, %c0_i32_0 : i32, i32
  }
  func.func @transform_4(%arg0: i32) -> (i32, i32) {
    %c0_i32 = arith.constant 0 : i32
    %c0_i32_0 = arith.constant 0 : i32
    %c0_i32_1 = arith.constant 0 : i32
    return %c0_i32, %c0_i32_0 : i32, i32
  }
  func.func @transform_5(%arg0: i32) -> (i32, i32, i32, i32) {
    %c0_i32 = arith.constant 0 : i32
    %c0_i32_0 = arith.constant 0 : i32
    %c0_i32_1 = arith.constant 0 : i32
    %c0_i32_2 = arith.constant 0 : i32
    return %arg0, %c0_i32, %c0_i32_0, %c0_i32_1 : i32, i32, i32, i32
  }
}

module attributes {stable_mosaic.version = 11 : i64} {
  func.func @_conv2_relu_avgpool_kernel(%arg0: i32, %arg1: i32, %arg2: memref<1x10x10x64xf32, #tpu.memory_space<vmem>>, %arg3: memref<9x64x512xf32, #tpu.memory_space<vmem>>, %arg4: memref<1x512xf32, #tpu.memory_space<vmem>>, %arg5: memref<49x64xf32, #tpu.memory_space<vmem>>, %arg6: memref<1x49x512xf32, #tpu.memory_space<vmem>>, %arg7: memref<49x512xf32, #tpu.memory_space<vmem>>) attributes {dimension_semantics = [#tpu.dimension_semantics<parallel>, #tpu.dimension_semantics<arbitrary>], iteration_bounds = array<i64: 2, 1>, scalar_prefetch = 0 : i64, scratch_operands = 1 : i64, tpu.core_type = #tpu.core_type<tc>, window_params = [{transform_indices = @transform_0, window_bounds = array<i64: 1, 10, 10, 64>}, {pipeline_mode = #tpu.pipeline_mode<synchronous>, transform_indices = @transform_1, window_bounds = array<i64: 9, 64, 512>}, {pipeline_mode = #tpu.pipeline_mode<synchronous>, transform_indices = @transform_2, window_bounds = array<i64: 1, 512>}, {transform_indices = @transform_3, window_bounds = array<i64: 49, 64>}, {transform_indices = @transform_4, window_bounds = array<i64: 1, 49, 512>}]} {
    %c0_i32 = arith.constant 0 : i32
    %0 = arith.cmpi eq, %arg1, %c0_i32 : i32
    %1 = arith.extui %0 : i1 to i32
    %c0_i32_0 = arith.constant 0 : i32
    %2 = arith.cmpi ne, %1, %c0_i32_0 : i32
    scf.if %2 {
      %cst_50 = arith.constant 0.000000e+00 : f32
      %84 = vector.broadcast %cst_50 : f32 to vector<49x512xf32>
      %c0_51 = arith.constant 0 : index
      %c0_52 = arith.constant 0 : index
      %85 = vector.load %arg7[%c0_51, %c0_52] : memref<49x512xf32, #tpu.memory_space<vmem>>, vector<49x512xf32>
      tpu.vector_store %arg7[%c0_51, %c0_52], %84 {strides = array<i32>} : memref<49x512xf32, #tpu.memory_space<vmem>>, vector<49x512xf32>,
    } else {
    }
    %c8_i32 = arith.constant 8 : i32
    %3 = arith.muli %arg1, %c8_i32 : i32
    %cst = arith.constant 0.000000e+00 : f32
    %4 = vector.broadcast %cst : f32 to vector<64x512xf32>
    %c0_i32_1 = arith.constant 0 : i32
    %5 = arith.addi %3, %c0_i32_1 : i32
    %c0 = arith.constant 0 : index
    %6 = arith.index_cast %5 : i32 to index
    %c0_2 = arith.constant 0 : index
    %c0_3 = arith.constant 0 : index
    %7 = vector.load %arg2[%c0, %6, %c0_2, %c0_3] : memref<1x10x10x64xf32, #tpu.memory_space<vmem>>, vector<1x8x10x64xf32>
    %8 = vector.shape_cast %7 : vector<1x8x10x64xf32> to vector<8x10x64xf32>
    %9 = vector.extract_strided_slice %8 {offsets = [0, 0, 0], sizes = [8, 8, 64], strides = [1, 1, 1]} : vector<8x10x64xf32> to vector<8x8x64xf32>
    %10 = vector.shape_cast %9 : vector<8x8x64xf32> to vector<64x64xf32>
    %c0_4 = arith.constant 0 : index
    %c0_5 = arith.constant 0 : index
    %c0_6 = arith.constant 0 : index
    %11 = vector.load %arg3[%c0_4, %c0_5, %c0_6] : memref<9x64x512xf32, #tpu.memory_space<vmem>>, vector<1x64x512xf32>
    %12 = vector.shape_cast %11 : vector<1x64x512xf32> to vector<64x512xf32>
    %cst_7 = arith.constant dense<0.000000e+00> : vector<64x512xf32>
    %13 = tpu.matmul %10, %12, %cst_7 {dimension_numbers = #tpu.dot_dimension_numbers<[1], [0], [0], [1], [0, 0, 1, 1], [], []>} : vector<64x64xf32>, vector<64x512xf32>, vector<64x512xf32> -> vector<64x512xf32>
    %14 = arith.addf %4, %13 : vector<64x512xf32>
    %15 = vector.extract_strided_slice %8 {offsets = [0, 1, 0], sizes = [8, 8, 64], strides = [1, 1, 1]} : vector<8x10x64xf32> to vector<8x8x64xf32>
    %16 = vector.shape_cast %15 : vector<8x8x64xf32> to vector<64x64xf32>
    %c1 = arith.constant 1 : index
    %c0_8 = arith.constant 0 : index
    %c0_9 = arith.constant 0 : index
    %17 = vector.load %arg3[%c1, %c0_8, %c0_9] : memref<9x64x512xf32, #tpu.memory_space<vmem>>, vector<1x64x512xf32>
    %18 = vector.shape_cast %17 : vector<1x64x512xf32> to vector<64x512xf32>
    %cst_10 = arith.constant dense<0.000000e+00> : vector<64x512xf32>
    %19 = tpu.matmul %16, %18, %cst_10 {dimension_numbers = #tpu.dot_dimension_numbers<[1], [0], [0], [1], [0, 0, 1, 1], [], []>} : vector<64x64xf32>, vector<64x512xf32>, vector<64x512xf32> -> vector<64x512xf32>
    %20 = arith.addf %14, %19 : vector<64x512xf32>
    %21 = vector.extract_strided_slice %8 {offsets = [0, 2, 0], sizes = [8, 8, 64], strides = [1, 1, 1]} : vector<8x10x64xf32> to vector<8x8x64xf32>
    %22 = vector.shape_cast %21 : vector<8x8x64xf32> to vector<64x64xf32>
    %c2 = arith.constant 2 : index
    %c0_11 = arith.constant 0 : index
    %c0_12 = arith.constant 0 : index
    %23 = vector.load %arg3[%c2, %c0_11, %c0_12] : memref<9x64x512xf32, #tpu.memory_space<vmem>>, vector<1x64x512xf32>
    %24 = vector.shape_cast %23 : vector<1x64x512xf32> to vector<64x512xf32>
    %cst_13 = arith.constant dense<0.000000e+00> : vector<64x512xf32>
    %25 = tpu.matmul %22, %24, %cst_13 {dimension_numbers = #tpu.dot_dimension_numbers<[1], [0], [0], [1], [0, 0, 1, 1], [], []>} : vector<64x64xf32>, vector<64x512xf32>, vector<64x512xf32> -> vector<64x512xf32>
    %26 = arith.addf %20, %25 : vector<64x512xf32>
    %c1_i32 = arith.constant 1 : i32
    %27 = arith.addi %3, %c1_i32 : i32
    %c0_14 = arith.constant 0 : index
    %28 = arith.index_cast %27 : i32 to index
    %c0_15 = arith.constant 0 : index
    %c0_16 = arith.constant 0 : index
    %29 = vector.load %arg2[%c0_14, %28, %c0_15, %c0_16] : memref<1x10x10x64xf32, #tpu.memory_space<vmem>>, vector<1x8x10x64xf32>
    %30 = vector.shape_cast %29 : vector<1x8x10x64xf32> to vector<8x10x64xf32>
    %31 = vector.extract_strided_slice %30 {offsets = [0, 0, 0], sizes = [8, 8, 64], strides = [1, 1, 1]} : vector<8x10x64xf32> to vector<8x8x64xf32>
    %32 = vector.shape_cast %31 : vector<8x8x64xf32> to vector<64x64xf32>
    %c3 = arith.constant 3 : index
    %c0_17 = arith.constant 0 : index
    %c0_18 = arith.constant 0 : index
    %33 = vector.load %arg3[%c3, %c0_17, %c0_18] : memref<9x64x512xf32, #tpu.memory_space<vmem>>, vector<1x64x512xf32>
    %34 = vector.shape_cast %33 : vector<1x64x512xf32> to vector<64x512xf32>
    %cst_19 = arith.constant dense<0.000000e+00> : vector<64x512xf32>
    %35 = tpu.matmul %32, %34, %cst_19 {dimension_numbers = #tpu.dot_dimension_numbers<[1], [0], [0], [1], [0, 0, 1, 1], [], []>} : vector<64x64xf32>, vector<64x512xf32>, vector<64x512xf32> -> vector<64x512xf32>
    %36 = arith.addf %26, %35 : vector<64x512xf32>
    %37 = vector.extract_strided_slice %30 {offsets = [0, 1, 0], sizes = [8, 8, 64], strides = [1, 1, 1]} : vector<8x10x64xf32> to vector<8x8x64xf32>
    %38 = vector.shape_cast %37 : vector<8x8x64xf32> to vector<64x64xf32>
    %c4 = arith.constant 4 : index
    %c0_20 = arith.constant 0 : index
    %c0_21 = arith.constant 0 : index
    %39 = vector.load %arg3[%c4, %c0_20, %c0_21] : memref<9x64x512xf32, #tpu.memory_space<vmem>>, vector<1x64x512xf32>
    %40 = vector.shape_cast %39 : vector<1x64x512xf32> to vector<64x512xf32>
    %cst_22 = arith.constant dense<0.000000e+00> : vector<64x512xf32>
    %41 = tpu.matmul %38, %40, %cst_22 {dimension_numbers = #tpu.dot_dimension_numbers<[1], [0], [0], [1], [0, 0, 1, 1], [], []>} : vector<64x64xf32>, vector<64x512xf32>, vector<64x512xf32> -> vector<64x512xf32>
    %42 = arith.addf %36, %41 : vector<64x512xf32>
    %43 = vector.extract_strided_slice %30 {offsets = [0, 2, 0], sizes = [8, 8, 64], strides = [1, 1, 1]} : vector<8x10x64xf32> to vector<8x8x64xf32>
    %44 = vector.shape_cast %43 : vector<8x8x64xf32> to vector<64x64xf32>
    %c5 = arith.constant 5 : index
    %c0_23 = arith.constant 0 : index
    %c0_24 = arith.constant 0 : index
    %45 = vector.load %arg3[%c5, %c0_23, %c0_24] : memref<9x64x512xf32, #tpu.memory_space<vmem>>, vector<1x64x512xf32>
    %46 = vector.shape_cast %45 : vector<1x64x512xf32> to vector<64x512xf32>
    %cst_25 = arith.constant dense<0.000000e+00> : vector<64x512xf32>
    %47 = tpu.matmul %44, %46, %cst_25 {dimension_numbers = #tpu.dot_dimension_numbers<[1], [0], [0], [1], [0, 0, 1, 1], [], []>} : vector<64x64xf32>, vector<64x512xf32>, vector<64x512xf32> -> vector<64x512xf32>
    %48 = arith.addf %42, %47 : vector<64x512xf32>
    %c2_i32 = arith.constant 2 : i32
    %49 = arith.addi %3, %c2_i32 : i32
    %c0_26 = arith.constant 0 : index
    %50 = arith.index_cast %49 : i32 to index
    %c0_27 = arith.constant 0 : index
    %c0_28 = arith.constant 0 : index
    %51 = vector.load %arg2[%c0_26, %50, %c0_27, %c0_28] : memref<1x10x10x64xf32, #tpu.memory_space<vmem>>, vector<1x8x10x64xf32>
    %52 = vector.shape_cast %51 : vector<1x8x10x64xf32> to vector<8x10x64xf32>
    %53 = vector.extract_strided_slice %52 {offsets = [0, 0, 0], sizes = [8, 8, 64], strides = [1, 1, 1]} : vector<8x10x64xf32> to vector<8x8x64xf32>
    %54 = vector.shape_cast %53 : vector<8x8x64xf32> to vector<64x64xf32>
    %c6 = arith.constant 6 : index
    %c0_29 = arith.constant 0 : index
    %c0_30 = arith.constant 0 : index
    %55 = vector.load %arg3[%c6, %c0_29, %c0_30] : memref<9x64x512xf32, #tpu.memory_space<vmem>>, vector<1x64x512xf32>
    %56 = vector.shape_cast %55 : vector<1x64x512xf32> to vector<64x512xf32>
    %cst_31 = arith.constant dense<0.000000e+00> : vector<64x512xf32>
    %57 = tpu.matmul %54, %56, %cst_31 {dimension_numbers = #tpu.dot_dimension_numbers<[1], [0], [0], [1], [0, 0, 1, 1], [], []>} : vector<64x64xf32>, vector<64x512xf32>, vector<64x512xf32> -> vector<64x512xf32>
    %58 = arith.addf %48, %57 : vector<64x512xf32>
    %59 = vector.extract_strided_slice %52 {offsets = [0, 1, 0], sizes = [8, 8, 64], strides = [1, 1, 1]} : vector<8x10x64xf32> to vector<8x8x64xf32>
    %60 = vector.shape_cast %59 : vector<8x8x64xf32> to vector<64x64xf32>
    %c7 = arith.constant 7 : index
    %c0_32 = arith.constant 0 : index
    %c0_33 = arith.constant 0 : index
    %61 = vector.load %arg3[%c7, %c0_32, %c0_33] : memref<9x64x512xf32, #tpu.memory_space<vmem>>, vector<1x64x512xf32>
    %62 = vector.shape_cast %61 : vector<1x64x512xf32> to vector<64x512xf32>
    %cst_34 = arith.constant dense<0.000000e+00> : vector<64x512xf32>
    %63 = tpu.matmul %60, %62, %cst_34 {dimension_numbers = #tpu.dot_dimension_numbers<[1], [0], [0], [1], [0, 0, 1, 1], [], []>} : vector<64x64xf32>, vector<64x512xf32>, vector<64x512xf32> -> vector<64x512xf32>
    %64 = arith.addf %58, %63 : vector<64x512xf32>
    %65 = vector.extract_strided_slice %52 {offsets = [0, 2, 0], sizes = [8, 8, 64], strides = [1, 1, 1]} : vector<8x10x64xf32> to vector<8x8x64xf32>
    %66 = vector.shape_cast %65 : vector<8x8x64xf32> to vector<64x64xf32>
    %c8 = arith.constant 8 : index
    %c0_35 = arith.constant 0 : index
    %c0_36 = arith.constant 0 : index
    %67 = vector.load %arg3[%c8, %c0_35, %c0_36] : memref<9x64x512xf32, #tpu.memory_space<vmem>>, vector<1x64x512xf32>
    %68 = vector.shape_cast %67 : vector<1x64x512xf32> to vector<64x512xf32>
    %cst_37 = arith.constant dense<0.000000e+00> : vector<64x512xf32>
    %69 = tpu.matmul %66, %68, %cst_37 {dimension_numbers = #tpu.dot_dimension_numbers<[1], [0], [0], [1], [0, 0, 1, 1], [], []>} : vector<64x64xf32>, vector<64x512xf32>, vector<64x512xf32> -> vector<64x512xf32>
    %70 = arith.addf %64, %69 : vector<64x512xf32>
    %c0_38 = arith.constant 0 : index
    %c0_39 = arith.constant 0 : index
    %71 = vector.load %arg4[%c0_38, %c0_39] : memref<1x512xf32, #tpu.memory_space<vmem>>, vector<1x512xf32>
    %72 = vector.broadcast %71 : vector<1x512xf32> to vector<64x512xf32>
    %73 = arith.addf %70, %72 : vector<64x512xf32>
    %cst_40 = arith.constant 0.000000e+00 : f32
    %74 = vector.broadcast %cst_40 : f32 to vector<64x512xf32>
    %75 = arith.maximumf %73, %74 : vector<64x512xf32>
    %c0_41 = arith.constant 0 : index
    %c0_42 = arith.constant 0 : index
    %76 = vector.load %arg7[%c0_41, %c0_42] : memref<49x512xf32, #tpu.memory_space<vmem>>, vector<49x512xf32>
    %c0_43 = arith.constant 0 : index
    %c0_44 = arith.constant 0 : index
    %77 = vector.load %arg5[%c0_43, %c0_44] : memref<49x64xf32, #tpu.memory_space<vmem>>, vector<49x64xf32>
    %cst_45 = arith.constant dense<0.000000e+00> : vector<49x512xf32>
    %78 = tpu.matmul %77, %75, %cst_45 {dimension_numbers = #tpu.dot_dimension_numbers<[1], [0], [0], [1], [0, 0, 1, 1], [], []>} : vector<49x64xf32>, vector<64x512xf32>, vector<49x512xf32> -> vector<49x512xf32>
    %79 = arith.addf %76, %78 : vector<49x512xf32>
    %c0_46 = arith.constant 0 : index
    %c0_47 = arith.constant 0 : index
    %80 = vector.load %arg7[%c0_46, %c0_47] : memref<49x512xf32, #tpu.memory_space<vmem>>, vector<49x512xf32>
    tpu.vector_store %arg7[%c0_46, %c0_47], %79 {strides = array<i32>} : memref<49x512xf32, #tpu.memory_space<vmem>>, vector<49x512xf32>,
    %c0_i32_48 = arith.constant 0 : i32
    %81 = arith.cmpi eq, %arg1, %c0_i32_48 : i32
    %82 = arith.extui %81 : i1 to i32
    %c0_i32_49 = arith.constant 0 : i32
    %83 = arith.cmpi ne, %82, %c0_i32_49 : i32
    scf.if %83 {
      %c0_50 = arith.constant 0 : index
      %c0_51 = arith.constant 0 : index
      %84 = vector.load %arg7[%c0_50, %c0_51] : memref<49x512xf32, #tpu.memory_space<vmem>>, vector<49x512xf32>
      %c0_52 = arith.constant 0 : index
      %c0_53 = arith.constant 0 : index
      %c0_54 = arith.constant 0 : index
      %85 = vector.load %arg6[%c0_52, %c0_53, %c0_54] : memref<1x49x512xf32, #tpu.memory_space<vmem>>, vector<1x49x512xf32>
      %86 = vector.shape_cast %85 : vector<1x49x512xf32> to vector<49x512xf32>
      %87 = vector.shape_cast %84 : vector<49x512xf32> to vector<1x49x512xf32>
      tpu.vector_store %arg6[%c0_52, %c0_53, %c0_54], %87 {strides = array<i32>} : memref<1x49x512xf32, #tpu.memory_space<vmem>>, vector<1x49x512xf32>,
    } else {
    }
    return
  }
  func.func @transform_0(%arg0: i32, %arg1: i32) -> (i32, i32, i32, i32) {
    %c0_i32 = arith.constant 0 : i32
    %c0_i32_0 = arith.constant 0 : i32
    %c0_i32_1 = arith.constant 0 : i32
    %c0_i32_2 = arith.constant 0 : i32
    return %arg0, %c0_i32, %c0_i32_0, %c0_i32_1 : i32, i32, i32, i32
  }
  func.func @transform_1(%arg0: i32, %arg1: i32) -> (i32, i32, i32) {
    %c0_i32 = arith.constant 0 : i32
    %c0_i32_0 = arith.constant 0 : i32
    %c0_i32_1 = arith.constant 0 : i32
    %c0_i32_2 = arith.constant 0 : i32
    return %c0_i32, %c0_i32_0, %c0_i32_1 : i32, i32, i32
  }
  func.func @transform_2(%arg0: i32, %arg1: i32) -> (i32, i32) {
    %c0_i32 = arith.constant 0 : i32
    %c0_i32_0 = arith.constant 0 : i32
    %c0_i32_1 = arith.constant 0 : i32
    return %c0_i32, %c0_i32_0 : i32, i32
  }
  func.func @transform_3(%arg0: i32, %arg1: i32) -> (i32, i32) {
    %c0_i32 = arith.constant 0 : i32
    %c0_i32_0 = arith.constant 0 : i32
    return %c0_i32, %arg1 : i32, i32
  }
  func.func @transform_4(%arg0: i32, %arg1: i32) -> (i32, i32, i32) {
    %c0_i32 = arith.constant 0 : i32
    %c0_i32_0 = arith.constant 0 : i32
    %c0_i32_1 = arith.constant 0 : i32
    return %arg0, %c0_i32, %c0_i32_0 : i32, i32, i32
  }
}

module attributes {stable_mosaic.version = 11 : i64} {
  func.func @_linear_kernel(%arg0: i32, %arg1: i32, %arg2: memref<2x6272xf32, #tpu.memory_space<vmem>>, %arg3: memref<6272x512xbf16, #tpu.memory_space<vmem>>, %arg4: memref<1x512xf32, #tpu.memory_space<vmem>>, %arg5: memref<2x512xf32, #tpu.memory_space<vmem>>, %arg6: memref<2x512xf32, #tpu.memory_space<vmem>>) attributes {dimension_semantics = [#tpu.dimension_semantics<parallel>, #tpu.dimension_semantics<arbitrary>], iteration_bounds = array<i64: 2, 4>, scalar_prefetch = 0 : i64, scratch_operands = 1 : i64, tpu.core_type = #tpu.core_type<tc>, window_params = [{transform_indices = @transform_0, window_bounds = array<i64: 2, 6272>}, {transform_indices = @transform_1, window_bounds = array<i64: 6272, 512>}, {transform_indices = @transform_2, window_bounds = array<i64: 1, 512>}, {transform_indices = @transform_3, window_bounds = array<i64: 2, 512>}]} {
    %c0_i32 = arith.constant 0 : i32
    %0 = arith.cmpi eq, %arg1, %c0_i32 : i32
    %1 = arith.extui %0 : i1 to i32
    %c0_i32_0 = arith.constant 0 : i32
    %2 = arith.cmpi ne, %1, %c0_i32_0 : i32
    scf.if %2 {
      %cst_9 = arith.constant 0.000000e+00 : f32
      %13 = vector.broadcast %cst_9 : f32 to vector<2x512xf32>
      %c0_10 = arith.constant 0 : index
      %c0_11 = arith.constant 0 : index
      %14 = vector.load %arg6[%c0_10, %c0_11] : memref<2x512xf32, #tpu.memory_space<vmem>>, vector<2x512xf32>
      tpu.vector_store %arg6[%c0_10, %c0_11], %13 {strides = array<i32>} : memref<2x512xf32, #tpu.memory_space<vmem>>, vector<2x512xf32>,
    } else {
    }
    %c0 = arith.constant 0 : index
    %c0_1 = arith.constant 0 : index
    %3 = vector.load %arg6[%c0, %c0_1] : memref<2x512xf32, #tpu.memory_space<vmem>>, vector<2x512xf32>
    %c0_2 = arith.constant 0 : index
    %c0_3 = arith.constant 0 : index
    %4 = vector.load %arg2[%c0_2, %c0_3] : memref<2x6272xf32, #tpu.memory_space<vmem>>, vector<2x6272xf32>
    %5 = arith.truncf %4 : vector<2x6272xf32> to vector<2x6272xbf16>
    %c0_4 = arith.constant 0 : index
    %c0_5 = arith.constant 0 : index
    %6 = vector.load %arg3[%c0_4, %c0_5] : memref<6272x512xbf16, #tpu.memory_space<vmem>>, vector<6272x512xbf16>
    %cst = arith.constant dense<0.000000e+00> : vector<2x512xf32>
    %7 = tpu.matmul %5, %6, %cst {dimension_numbers = #tpu.dot_dimension_numbers<[1], [0], [0], [1], [0, 0, 1, 1], [], []>} : vector<2x6272xbf16>, vector<6272x512xbf16>, vector<2x512xf32> -> vector<2x512xf32>
    %8 = arith.addf %3, %7 : vector<2x512xf32>
    %c0_6 = arith.constant 0 : index
    %c0_7 = arith.constant 0 : index
    %9 = vector.load %arg6[%c0_6, %c0_7] : memref<2x512xf32, #tpu.memory_space<vmem>>, vector<2x512xf32>
    tpu.vector_store %arg6[%c0_6, %c0_7], %8 {strides = array<i32>} : memref<2x512xf32, #tpu.memory_space<vmem>>, vector<2x512xf32>,
    %c3_i32 = arith.constant 3 : i32
    %10 = arith.cmpi eq, %arg1, %c3_i32 : i32
    %11 = arith.extui %10 : i1 to i32
    %c0_i32_8 = arith.constant 0 : i32
    %12 = arith.cmpi ne, %11, %c0_i32_8 : i32
    scf.if %12 {
      %c0_9 = arith.constant 0 : index
      %c0_10 = arith.constant 0 : index
      %13 = vector.load %arg6[%c0_9, %c0_10] : memref<2x512xf32, #tpu.memory_space<vmem>>, vector<2x512xf32>
      %c0_11 = arith.constant 0 : index
      %c0_12 = arith.constant 0 : index
      %14 = vector.load %arg4[%c0_11, %c0_12] : memref<1x512xf32, #tpu.memory_space<vmem>>, vector<1x512xf32>
      %15 = vector.broadcast %14 : vector<1x512xf32> to vector<2x512xf32>
      %16 = arith.addf %13, %15 : vector<2x512xf32>
      %cst_13 = arith.constant 0.000000e+00 : f32
      %17 = vector.broadcast %cst_13 : f32 to vector<2x512xf32>
      %18 = arith.maximumf %16, %17 : vector<2x512xf32>
      %c0_14 = arith.constant 0 : index
      %c0_15 = arith.constant 0 : index
      %19 = vector.load %arg5[%c0_14, %c0_15] : memref<2x512xf32, #tpu.memory_space<vmem>>, vector<2x512xf32>
      tpu.vector_store %arg5[%c0_14, %c0_15], %18 {strides = array<i32>} : memref<2x512xf32, #tpu.memory_space<vmem>>, vector<2x512xf32>,
    } else {
    }
    return
  }
  func.func @transform_0(%arg0: i32, %arg1: i32) -> (i32, i32) {
    %c0_i32 = arith.constant 0 : i32
    %c0_i32_0 = arith.constant 0 : i32
    return %c0_i32, %arg1 : i32, i32
  }
  func.func @transform_1(%arg0: i32, %arg1: i32) -> (i32, i32) {
    %c0_i32 = arith.constant 0 : i32
    return %arg1, %arg0 : i32, i32
  }
  func.func @transform_2(%arg0: i32, %arg1: i32) -> (i32, i32) {
    %c0_i32 = arith.constant 0 : i32
    %c0_i32_0 = arith.constant 0 : i32
    return %c0_i32, %arg0 : i32, i32
  }
  func.func @transform_3(%arg0: i32, %arg1: i32) -> (i32, i32) {
    %c0_i32 = arith.constant 0 : i32
    %c0_i32_0 = arith.constant 0 : i32
    return %c0_i32, %arg0 : i32, i32
  }
}

module attributes {stable_mosaic.version = 11 : i64} {
  func.func @_linear_kernel(%arg0: i32, %arg1: i32, %arg2: memref<2x1024xf32, #tpu.memory_space<vmem>>, %arg3: memref<1024x128xbf16, #tpu.memory_space<vmem>>, %arg4: memref<1x128xf32, #tpu.memory_space<vmem>>, %arg5: memref<2x128xf32, #tpu.memory_space<vmem>>, %arg6: memref<2x128xf32, #tpu.memory_space<vmem>>) attributes {dimension_semantics = [#tpu.dimension_semantics<parallel>, #tpu.dimension_semantics<arbitrary>], iteration_bounds = array<i64: 1, 1>, scalar_prefetch = 0 : i64, scratch_operands = 1 : i64, tpu.core_type = #tpu.core_type<tc>, window_params = [{transform_indices = @transform_0, window_bounds = array<i64: 2, 1024>}, {transform_indices = @transform_1, window_bounds = array<i64: 1024, 128>}, {transform_indices = @transform_2, window_bounds = array<i64: 1, 128>}, {transform_indices = @transform_3, window_bounds = array<i64: 2, 128>}]} {
    %c0_i32 = arith.constant 0 : i32
    %0 = arith.cmpi eq, %arg1, %c0_i32 : i32
    %1 = arith.extui %0 : i1 to i32
    %c0_i32_0 = arith.constant 0 : i32
    %2 = arith.cmpi ne, %1, %c0_i32_0 : i32
    scf.if %2 {
      %cst_10 = arith.constant 0.000000e+00 : f32
      %13 = vector.broadcast %cst_10 : f32 to vector<2x128xf32>
      %c0_11 = arith.constant 0 : index
      %c0_12 = arith.constant 0 : index
      %14 = vector.load %arg6[%c0_11, %c0_12] : memref<2x128xf32, #tpu.memory_space<vmem>>, vector<2x128xf32>
      tpu.vector_store %arg6[%c0_11, %c0_12], %13 {strides = array<i32>} : memref<2x128xf32, #tpu.memory_space<vmem>>, vector<2x128xf32>,
    } else {
    }
    %c0 = arith.constant 0 : index
    %c0_1 = arith.constant 0 : index
    %3 = vector.load %arg6[%c0, %c0_1] : memref<2x128xf32, #tpu.memory_space<vmem>>, vector<2x128xf32>
    %c0_2 = arith.constant 0 : index
    %c0_3 = arith.constant 0 : index
    %4 = vector.load %arg2[%c0_2, %c0_3] : memref<2x1024xf32, #tpu.memory_space<vmem>>, vector<2x1024xf32>
    %5 = arith.truncf %4 : vector<2x1024xf32> to vector<2x1024xbf16>
    %c0_4 = arith.constant 0 : index
    %c0_5 = arith.constant 0 : index
    %6 = vector.load %arg3[%c0_4, %c0_5] : memref<1024x128xbf16, #tpu.memory_space<vmem>>, vector<1024x128xbf16>
    %cst = arith.constant dense<0.000000e+00> : vector<2x128xf32>
    %7 = tpu.matmul %5, %6, %cst {dimension_numbers = #tpu.dot_dimension_numbers<[1], [0], [0], [1], [0, 0, 1, 1], [], []>} : vector<2x1024xbf16>, vector<1024x128xbf16>, vector<2x128xf32> -> vector<2x128xf32>
    %8 = arith.addf %3, %7 : vector<2x128xf32>
    %c0_6 = arith.constant 0 : index
    %c0_7 = arith.constant 0 : index
    %9 = vector.load %arg6[%c0_6, %c0_7] : memref<2x128xf32, #tpu.memory_space<vmem>>, vector<2x128xf32>
    tpu.vector_store %arg6[%c0_6, %c0_7], %8 {strides = array<i32>} : memref<2x128xf32, #tpu.memory_space<vmem>>, vector<2x128xf32>,
    %c0_i32_8 = arith.constant 0 : i32
    %10 = arith.cmpi eq, %arg1, %c0_i32_8 : i32
    %11 = arith.extui %10 : i1 to i32
    %c0_i32_9 = arith.constant 0 : i32
    %12 = arith.cmpi ne, %11, %c0_i32_9 : i32
    scf.if %12 {
      %c0_10 = arith.constant 0 : index
      %c0_11 = arith.constant 0 : index
      %13 = vector.load %arg6[%c0_10, %c0_11] : memref<2x128xf32, #tpu.memory_space<vmem>>, vector<2x128xf32>
      %c0_12 = arith.constant 0 : index
      %c0_13 = arith.constant 0 : index
      %14 = vector.load %arg4[%c0_12, %c0_13] : memref<1x128xf32, #tpu.memory_space<vmem>>, vector<1x128xf32>
      %15 = vector.broadcast %14 : vector<1x128xf32> to vector<2x128xf32>
      %16 = arith.addf %13, %15 : vector<2x128xf32>
      %cst_14 = arith.constant 0.000000e+00 : f32
      %17 = vector.broadcast %cst_14 : f32 to vector<2x128xf32>
      %18 = arith.maximumf %16, %17 : vector<2x128xf32>
      %c0_15 = arith.constant 0 : index
      %c0_16 = arith.constant 0 : index
      %19 = vector.load %arg5[%c0_15, %c0_16] : memref<2x128xf32, #tpu.memory_space<vmem>>, vector<2x128xf32>
      tpu.vector_store %arg5[%c0_15, %c0_16], %18 {strides = array<i32>} : memref<2x128xf32, #tpu.memory_space<vmem>>, vector<2x128xf32>,
    } else {
    }
    return
  }
  func.func @transform_0(%arg0: i32, %arg1: i32) -> (i32, i32) {
    %c0_i32 = arith.constant 0 : i32
    %c0_i32_0 = arith.constant 0 : i32
    return %c0_i32, %arg1 : i32, i32
  }
  func.func @transform_1(%arg0: i32, %arg1: i32) -> (i32, i32) {
    %c0_i32 = arith.constant 0 : i32
    return %arg1, %arg0 : i32, i32
  }
  func.func @transform_2(%arg0: i32, %arg1: i32) -> (i32, i32) {
    %c0_i32 = arith.constant 0 : i32
    %c0_i32_0 = arith.constant 0 : i32
    return %c0_i32, %arg0 : i32, i32
  }
  func.func @transform_3(%arg0: i32, %arg1: i32) -> (i32, i32) {
    %c0_i32 = arith.constant 0 : i32
    %c0_i32_0 = arith.constant 0 : i32
    return %c0_i32, %arg0 : i32, i32
  }
}

module attributes {stable_mosaic.version = 11 : i64} {
  func.func @_linear_kernel(%arg0: i32, %arg1: i32, %arg2: memref<2x128xf32, #tpu.memory_space<vmem>>, %arg3: memref<128x10xf32, #tpu.memory_space<vmem>>, %arg4: memref<1x10xf32, #tpu.memory_space<vmem>>, %arg5: memref<2x10xf32, #tpu.memory_space<vmem>>, %arg6: memref<2x10xf32, #tpu.memory_space<vmem>>) attributes {dimension_semantics = [#tpu.dimension_semantics<parallel>, #tpu.dimension_semantics<arbitrary>], iteration_bounds = array<i64: 1, 1>, scalar_prefetch = 0 : i64, scratch_operands = 1 : i64, tpu.core_type = #tpu.core_type<tc>, window_params = [{transform_indices = @transform_0, window_bounds = array<i64: 2, 128>}, {transform_indices = @transform_1, window_bounds = array<i64: 128, 10>}, {transform_indices = @transform_2, window_bounds = array<i64: 1, 10>}, {transform_indices = @transform_3, window_bounds = array<i64: 2, 10>}]} {
    %c0_i32 = arith.constant 0 : i32
    %0 = arith.cmpi eq, %arg1, %c0_i32 : i32
    %1 = arith.extui %0 : i1 to i32
    %c0_i32_0 = arith.constant 0 : i32
    %2 = arith.cmpi ne, %1, %c0_i32_0 : i32
    scf.if %2 {
      %cst_10 = arith.constant 0.000000e+00 : f32
      %12 = vector.broadcast %cst_10 : f32 to vector<2x10xf32>
      %c0_11 = arith.constant 0 : index
      %c0_12 = arith.constant 0 : index
      %13 = vector.load %arg6[%c0_11, %c0_12] : memref<2x10xf32, #tpu.memory_space<vmem>>, vector<2x10xf32>
      tpu.vector_store %arg6[%c0_11, %c0_12], %12 {strides = array<i32>} : memref<2x10xf32, #tpu.memory_space<vmem>>, vector<2x10xf32>,
    } else {
    }
    %c0 = arith.constant 0 : index
    %c0_1 = arith.constant 0 : index
    %3 = vector.load %arg6[%c0, %c0_1] : memref<2x10xf32, #tpu.memory_space<vmem>>, vector<2x10xf32>
    %c0_2 = arith.constant 0 : index
    %c0_3 = arith.constant 0 : index
    %4 = vector.load %arg2[%c0_2, %c0_3] : memref<2x128xf32, #tpu.memory_space<vmem>>, vector<2x128xf32>
    %c0_4 = arith.constant 0 : index
    %c0_5 = arith.constant 0 : index
    %5 = vector.load %arg3[%c0_4, %c0_5] : memref<128x10xf32, #tpu.memory_space<vmem>>, vector<128x10xf32>
    %cst = arith.constant dense<0.000000e+00> : vector<2x10xf32>
    %6 = tpu.matmul %4, %5, %cst {dimension_numbers = #tpu.dot_dimension_numbers<[1], [0], [0], [1], [0, 0, 1, 1], [], []>} : vector<2x128xf32>, vector<128x10xf32>, vector<2x10xf32> -> vector<2x10xf32>
    %7 = arith.addf %3, %6 : vector<2x10xf32>
    %c0_6 = arith.constant 0 : index
    %c0_7 = arith.constant 0 : index
    %8 = vector.load %arg6[%c0_6, %c0_7] : memref<2x10xf32, #tpu.memory_space<vmem>>, vector<2x10xf32>
    tpu.vector_store %arg6[%c0_6, %c0_7], %7 {strides = array<i32>} : memref<2x10xf32, #tpu.memory_space<vmem>>, vector<2x10xf32>,
    %c0_i32_8 = arith.constant 0 : i32
    %9 = arith.cmpi eq, %arg1, %c0_i32_8 : i32
    %10 = arith.extui %9 : i1 to i32
    %c0_i32_9 = arith.constant 0 : i32
    %11 = arith.cmpi ne, %10, %c0_i32_9 : i32
    scf.if %11 {
      %c0_10 = arith.constant 0 : index
      %c0_11 = arith.constant 0 : index
      %12 = vector.load %arg6[%c0_10, %c0_11] : memref<2x10xf32, #tpu.memory_space<vmem>>, vector<2x10xf32>
      %c0_12 = arith.constant 0 : index
      %c0_13 = arith.constant 0 : index
      %13 = vector.load %arg4[%c0_12, %c0_13] : memref<1x10xf32, #tpu.memory_space<vmem>>, vector<1x10xf32>
      %14 = vector.broadcast %13 : vector<1x10xf32> to vector<2x10xf32>
      %15 = arith.addf %12, %14 : vector<2x10xf32>
      %c0_14 = arith.constant 0 : index
      %c0_15 = arith.constant 0 : index
      %16 = vector.load %arg5[%c0_14, %c0_15] : memref<2x10xf32, #tpu.memory_space<vmem>>, vector<2x10xf32>
      tpu.vector_store %arg5[%c0_14, %c0_15], %15 {strides = array<i32>} : memref<2x10xf32, #tpu.memory_space<vmem>>, vector<2x10xf32>,
    } else {
    }
    return
  }
  func.func @transform_0(%arg0: i32, %arg1: i32) -> (i32, i32) {
    %c0_i32 = arith.constant 0 : i32
    %c0_i32_0 = arith.constant 0 : i32
    return %c0_i32, %arg1 : i32, i32
  }
  func.func @transform_1(%arg0: i32, %arg1: i32) -> (i32, i32) {
    %c0_i32 = arith.constant 0 : i32
    return %arg1, %arg0 : i32, i32
  }
  func.func @transform_2(%arg0: i32, %arg1: i32) -> (i32, i32) {
    %c0_i32 = arith.constant 0 : i32
    %c0_i32_0 = arith.constant 0 : i32
    return %c0_i32, %arg0 : i32, i32
  }
  func.func @transform_3(%arg0: i32, %arg1: i32) -> (i32, i32) {
    %c0_i32 = arith.constant 0 : i32
    %c0_i32_0 = arith.constant 0 : i32
    return %c0_i32, %arg0 : i32, i32
  }
}

</mosaic_0001>

<bundles_post_ra>
// kernel: vgg_forward.5
= control target key start
LH: loop header
LB: loop body
LE: loop exit
PB: predicated region body
PF: predicated region fallthrough
CT: control target
= control target key end

     0   :  { %10 = vsyncpa [#allocation3], 0  ;;  %s3016_s0 = inlined_call_operand.vmem [shape: f32[2,18,18,3], index: 0, kind: input, shape index: {}]   ;;  %s3017_s1 = inlined_call_operand.hbm [shape: f32[9,3,64], index: 1, kind: input, shape index: {}]   ;;  %s3018_s2 = inlined_call_operand.hbm [shape: f32[1,64], index: 2, kind: input, shape index: {}]   ;;  %s3019_s3 = inlined_call_operand.hbm [shape: f32[8,16], index: 3, kind: input, shape index: {}]   ;;  %s3020_s4 = inlined_call_operand.hbm [shape: f32[8,16], index: 4, kind: input, shape index: {}]   ;;  %s3021_s5 = inlined_call_operand.vmem [shape: f32[2,10,10,64], index: 5, kind: output, shape index: {}]  }
   0x1   :  { %11 = vsyncpa [#allocation5], 0 }
   0x2   :  { %12 = vsyncpa [#allocation8], 0  ;;  %s2643_s18 = smov 0  }
   0x3 LB: > { %s2603_s19 = smov [#allocation4]   ;;  %s2649_s21 = sadd.s32 4294967295, %s2597_s18   ;;  %s2597_s18 = sphi %s2643_s18, %s18_s18  }
   0x4   : > { %s185_s20 = sshll.u32 %s2603_s19, 4  ;;  %p2120_p0 = scmp.ge.s32.totalorder %s2597_s18, 1  ;;  %s2654_s20 = int_to_ptr.vmem [resolvable:$true] %s185_s20 }
   0x5   : > { %p159_p1 = scmp.lt.s32.totalorder %s2597_s18, 3  ;;  %p3022_p2 = scmp.eq.s32.totalorder %s2649_s21, 0 }
   0x6   : > { %s2604_s23 = smov [#allocation2]   ;;  %s2605_s26 = smov [#allocation6]  }
   0x7   : > { %p2656_p3 = pnand %p2120_p0, %p159_p1  ;;  %s171_s24 = sshll.u32 %s2604_s23, 4  ;;  %s2662_s24 = int_to_ptr.vmem [resolvable:$true] %s171_s24 }
   0x8   : > { %s196_s27 = sshll.u32 %s2605_s26, 4  ;;  %s2606_s28 = smov [#allocation7]   ;;  %s2670_s27 = int_to_ptr.vmem [resolvable:$true] %s196_s27 }
   0x9   : > { %s3024_s22 = scalar_select %p2656_p3, 1, 0 }
   0xa   : > { %p2416_p4 = pneg %p2656_p3  ;;  %s2672_s29 = sshll.u32 %s2606_s28, 4  ;;  %s208_s29 = int_to_ptr.vmem [resolvable:$true] %s2672_s29 }
   0xb   : > { %s2463_s7 = scalar_lea.hbm %s3018_s2, 16 }
   0xc   : > { %p2666_p5 = pnand %p3022_p2, %p2416_p4  ;;  %p2464_p6 = scmp.ne.s32.totalorder %s3018_s2, %s2463_s7 }
   0xd   : > { %p2470_p10 = scmp.lt.u32.totalorder %s2463_s7, %s3018_s2 }
   0xe   : > { %p2682_p7 = pneg %p2666_p5 }
  0x10   : > { %p2466_p8 = pnand %p2682_p7, %p2464_p6 }
  0x12   : > { %p2467_p9 = pneg %p2466_p8 }
  0x14   : > { %p2472_p11 = pnand %p2470_p10, %p2467_p9 }
  0x16   : > { %2475 = shalt.err (!%p2472_p11)
}
  0x17   : > { %s2476_s13 = scalar_lea.vmem %s2654_s20, 16  ;;  %s2483_s14 = scalar_lea.vmem %s2654_s20, 32 }
  0x18   : > { %p2477_p12 = scmp.ne.s32.totalorder %s2654_s20, %s2476_s13  ;;  %p2484_p1 = scmp.lt.s32.totalorder %s2654_s20, %s2654_s20 }
  0x19   : > { %p2485_p4 = scmp.lt.s32.totalorder %s2483_s14, %s2476_s13 }
  0x1a   : > { %p2479_p13 = pnand %p2477_p12, %p2682_p7 }
  0x1b   : > { %p2486_p6 = por %p2485_p4, %p2484_p1 }
  0x1c   : > { %p2480_p0 = pneg %p2479_p13 }
  0x1e   : > { %p2487_p8 = pnand %p2486_p6, %p2480_p0 }
  0x20   : > { %2490 = shalt.err (!%p2487_p8)
}
  0x21   : > { %2422 = dma.hbm_to_vmem [thread:$0]  (!%p2666_p5), %s3018_s2, 16, %s2654_s20, [#allocation5]  }
  0x22   : > { %s2491_s23 = scalar_lea.hbm %s3017_s1, 576 }
  0x23   : > { %p2492_p9 = scmp.ne.s32.totalorder %s3017_s1, %s2491_s23  ;;  %p2498_p12 = scmp.lt.u32.totalorder %s2491_s23, %s3017_s1 }
  0x25   : > { %p2494_p10 = pnand %p2492_p9, %p2682_p7 }
  0x27   : > { %p2495_p11 = pneg %p2494_p10 }
  0x29   : > { %p2500_p13 = pnand %p2498_p12, %p2495_p11 }
  0x2b   : > { %2503 = shalt.err (!%p2500_p13)
}
  0x2c   : > { %s2504_s20 = scalar_lea.vmem %s2662_s24, 576  ;;  %p2512_p6 = scmp.lt.s32.totalorder %s2662_s24, %s2662_s24 }
  0x2d   : > { %p2505_p0 = scmp.ne.s32.totalorder %s2662_s24, %s2504_s20  ;;  %p2513_p8 = scmp.lt.s32.totalorder %s2504_s20, %s2504_s20 }
  0x2f   : > { %p2507_p1 = pnand %p2505_p0, %p2682_p7  ;;  %p2514_p9 = por %p2513_p8, %p2512_p6 }
  0x31   : > { %p2508_p4 = pneg %p2507_p1 }
  0x33   : > { %p2515_p10 = pnand %p2514_p9, %p2508_p4 }
  0x35   : > { %2518 = shalt.err (!%p2515_p10)
}
  0x36   : > { %s2607_s7 = smov 64   ;;  %s2608_s8 = smov 4  }
  0x37   : > { %2419 = dma.hbm_to_vmem [thread:$0]  (!%p2666_p5), %s3017_s1, 576, %s2662_s24, [#allocation3], %s2607_s7, %s2607_s7, %s2608_s8  }
  0x38   : > { %s2519_s14 = scalar_lea.hbm %s3019_s3, 128 }
  0x39   : > { %p2520_p11 = scmp.ne.s32.totalorder %s3019_s3, %s2519_s14  ;;  %p2526_p0 = scmp.lt.u32.totalorder %s2519_s14, %s3019_s3 }
  0x3b   : > { %p2522_p12 = pnand %p2520_p11, %p2682_p7 }
  0x3d   : > { %p2523_p13 = pneg %p2522_p12 }
  0x3f   : > { %p2528_p1 = pnand %p2526_p0, %p2523_p13 }
  0x41   : > { %2531 = shalt.err (!%p2528_p1)
}
  0x42   : > { %s2532_s24 = scalar_lea.vmem %s2670_s27, 128  ;;  %p2540_p9 = scmp.lt.s32.totalorder %s2670_s27, %s2670_s27 }
  0x43   : > { %p2533_p4 = scmp.ne.s32.totalorder %s2670_s27, %s2532_s24  ;;  %p2541_p10 = scmp.lt.s32.totalorder %s2532_s24, %s2532_s24 }
  0x45   : > { %p2535_p6 = pnand %p2533_p4, %p2682_p7  ;;  %p2542_p11 = por %p2541_p10, %p2540_p9 }
  0x47   : > { %p2536_p8 = pneg %p2535_p6 }
  0x49   : > { %p2543_p12 = pnand %p2542_p11, %p2536_p8 }
  0x4b   : > { %2546 = shalt.err (!%p2543_p12)
}
  0x4c   : > { %2425 = dma.hbm_to_vmem [thread:$0]  (!%p2666_p5), %s3019_s3, 128, %s2670_s27, [#allocation5]  }
  0x4d   : > { %s2547_s6 = scalar_lea.hbm %s3020_s4, 128 }
  0x4e   : > { %p2548_p13 = scmp.ne.s32.totalorder %s3020_s4, %s2547_s6  ;;  %p2554_p4 = scmp.lt.u32.totalorder %s2547_s6, %s3020_s4 }
  0x50   : > { %p2550_p0 = pnand %p2548_p13, %p2682_p7 }
  0x52   : > { %p2551_p1 = pneg %p2550_p0 }
  0x54   : > { %p2556_p6 = pnand %p2554_p4, %p2551_p1 }
  0x56   : > { %2559 = shalt.err (!%p2556_p6)
}
  0x57   : > { %s2560_s11 = scalar_lea.vmem %s208_s29, 128  ;;  %p2568_p11 = scmp.lt.s32.totalorder %s208_s29, %s208_s29 }
  0x58   : > { %p2561_p8 = scmp.ne.s32.totalorder %s208_s29, %s2560_s11  ;;  %p2569_p12 = scmp.lt.s32.totalorder %s2560_s11, %s2560_s11 }
  0x5a   : > { %p2563_p9 = pnand %p2561_p8, %p2682_p7  ;;  %p2570_p2 = por %p2569_p12, %p2568_p11 }
  0x5c   : > { %p2564_p10 = pneg %p2563_p9 }
  0x5e   : > { %p2571_p3 = pnand %p2570_p2, %p2564_p10 }
  0x60   : > { %2574 = shalt.err (!%p2571_p3)
}
  0x61   : > { %2428 = dma.hbm_to_vmem [thread:$0]  (!%p2666_p5), %s3020_s4, 128, %s208_s29, [#allocation8]  }
  0x62   : > { %p3027_p13 = scmp.ne.s32.totalorder %s3024_s22, 0 }
  0x63   : > { %p3028_p0 = scmp.eq.s32.totalorder (!%p3027_p13), %s2649_s21, 0 }
  0x64   : > { %228 = sbr.rel (%p3027_p13) target bundleno = 643 (0x283), region = 40 }
  0x6b   : > { %2584 = dma.done.wait (%p3028_p0), [#allocation3], 576   ;;  %p3029_p7 = pmov %p3028_p0 }
  0x6c   : > { %p3030_p1 = pmov %p3028_p0 }
  0x6d   : > { %2586 = vsyncadd (%p3029_p7), [#allocation3], 4294966720 }
  0x6e   : > { %2588 = dma.done.wait (%p3030_p1), [#allocation5], 144   ;;  %p3031_p2 = pmov %p3028_p0 }
  0x6f   : > { %p3032_p3 = pmov %p3028_p0 }
  0x70   : > { %2590 = vsyncadd (%p3031_p2), [#allocation5], 4294967152 }
  0x71   : > { %2592 = dma.done.wait (%p3032_p3), [#allocation8], 128   ;;  %p3033_p5 = pmov %p3028_p0 }
  0x72   : > { %p268_p4 = scmp.lt.s32.totalorder %s2649_s21, 1  ;;  %vm298_vm0 = vcmask 523264   ;;  %vm300_vm1 = vcmask 517120   ;;  %v2790_v0 = vld [vmem:[#allocation4] ss:$0 sm:$0xff]  ;;  %v2792_v1 = vld [vmem:[#allocation6] sm:$0xff] }
  0x73   : > { %2594 = vsyncadd (%p3033_p5), [#allocation8], 4294967168  ;;  %v2794_v2 = vld [vmem:[#allocation7] sm:$0xff]  ;;  %v2801_v3 = vld [vmem:[#allocation2] sm:$0x7]  ;;  %v2609_v6 = vmov 0.0  }
  0x74   : > { %s3035_s21 = smov (!%p268_p4, %s2649_s21), 1  ;;  %v2803_v4 = vld [vmem:[#allocation2 + $0x4] sm:$0x7]  ;;  %v2805_v5 = vld [vmem:[#allocation2 + $0x8] sm:$0x7] }
  0x75   : > { %s2398_s22 = smul.u32 432, %s3035_s21  ;;  %v2847_v7 = vld [vmem:[#allocation2 + $0xc] sm:$0x7]  ;;  %v2849_v8 = vld [vmem:[#allocation2 + $0x10] sm:$0x7] }
  0x76   : > { %s2399_s25 = smul.u32 160, %s3035_s21  ;;  %v2851_v9 = vld [vmem:[#allocation2 + $0x14] sm:$0x7]  ;;  %v2853_v10 = vld [vmem:[#allocation2 + $0x18] sm:$0x7]  ;;  %s2859_s21 = smov 0  }
  0x77   : > { %s2788_s13 = scalar_lea.vmem %s3016_s0, %s2398_s22  ;;  %v2855_v11 = vld [vmem:[#allocation2 + $0x1c] sm:$0x7]  ;;  %v2857_v12 = vld [vmem:[#allocation2 + $0x20] sm:$0x7] }
  0x78   : > { %s2799_s16 = scalar_lea.vmem %s3021_s5, %s2399_s25 }
  0x79   : > { %299 = vst.msk [vmem:[%s2799_s16] sm:$0xff] %vm298_vm0, %v2609_v6  ;;  %302 = vst.msk [vmem:[%s2799_s16 + $0x10] sm:$0xff] %vm298_vm0, %v2609_v6 }
  0x7a   : > { %304 = vst.msk [vmem:[%s2799_s16 + $0x20] sm:$0xff] %vm298_vm0, %v2609_v6  ;;  %306 = vst.msk [vmem:[%s2799_s16 + $0x30] sm:$0xff] %vm298_vm0, %v2609_v6 }
  0x7b   : > { %308 = vst.msk [vmem:[%s2799_s16 + $0x40] sm:$0xff] %vm298_vm0, %v2609_v6  ;;  %310 = vst.msk [vmem:[%s2799_s16 + $0x50] sm:$0xff] %vm298_vm0, %v2609_v6 }
  0x7c   : > { %312 = vst.msk [vmem:[%s2799_s16 + $0x60] sm:$0xff] %vm298_vm0, %v2609_v6  ;;  %314 = vst.msk [vmem:[%s2799_s16 + $0x70] sm:$0xff] %vm298_vm0, %v2609_v6 }
  0x7d   : > { %316 = vst.msk [vmem:[%s2799_s16 + $0x80] sm:$0xff] %vm298_vm0, %v2609_v6  ;;  %318 = vst.msk [vmem:[%s2799_s16 + $0x90] sm:$0xff] %vm298_vm0, %v2609_v6 }
  0x7e   : > { %301 = vst.msk [vmem:[%s2799_s16 + $0x8] sm:$0x3] %vm300_vm1, %v2609_v6  ;;  %303 = vst.msk [vmem:[%s2799_s16 + $0x18] sm:$0x3] %vm300_vm1, %v2609_v6 }
  0x7f   : > { %305 = vst.msk [vmem:[%s2799_s16 + $0x28] sm:$0x3] %vm300_vm1, %v2609_v6  ;;  %307 = vst.msk [vmem:[%s2799_s16 + $0x38] sm:$0x3] %vm300_vm1, %v2609_v6 }
  0x80   : > { %309 = vst.msk [vmem:[%s2799_s16 + $0x48] sm:$0x3] %vm300_vm1, %v2609_v6  ;;  %311 = vst.msk [vmem:[%s2799_s16 + $0x58] sm:$0x3] %vm300_vm1, %v2609_v6 }
  0x81   : > { %313 = vst.msk [vmem:[%s2799_s16 + $0x68] sm:$0x3] %vm300_vm1, %v2609_v6  ;;  %315 = vst.msk [vmem:[%s2799_s16 + $0x78] sm:$0x3] %vm300_vm1, %v2609_v6 }
  0x82   : > { %317 = vst.msk [vmem:[%s2799_s16 + $0x88] sm:$0x3] %vm300_vm1, %v2609_v6  ;;  %319 = vst.msk [vmem:[%s2799_s16 + $0x98] sm:$0x3] %vm300_vm1, %v2609_v6 }
  0x83 LB: >> { %vm355_vm2 = vcmask 1042432   ;;  %s2134_s17 = smul.u32 48, %s2601_s21  ;;  %vm344_vm3 = vcmask 1046528   ;;  %vm350_vm4 = vcmask 23552   ;;  %vm682_vm5 = vcmask 1045504   ;;  %s2192_s24 = sshll.u32 %s2601_s21, 4  ;;  %s2601_s21 = sphi %s2859_s21, %s325_s21  }
  0x84   : >> { %2256 = vmatprep.subr.msk.mxu0 %vm355_vm2, %v2803_v4  ;;  %2266 = vmatprep.subr.msk.mxu1 %vm355_vm2, %v2803_v4  ;;  %vm2611_vm6 = vmmov 0   ;;  %vm1852_vm7 = vcmask 130048   ;;  %s2051_s23 = scalar_lea.vmem %s2799_s16, %s2192_s24  ;;  %s325_s21 = sadd.s32 1, %s2601_s21  }
  0x85   : >> { %2257 = vmatpush3.msk.msra.mxu0 %vm355_vm2, %v2803_v4  ;;  %2267 = vmatpush3.msk.msra.mxu1 %vm355_vm2, %v2803_v4  ;;  %s2878_s19 = scalar_lea.vmem %s2788_s13, %s2134_s17  ;;  %p322_p6 = scmp.ge.s32.totalorder %s325_s21, 8  }
  0x86   : >> { %2261 = vmatprep.subr.msk.mxu0 %vm355_vm2, %v2801_v3  ;;  %2271 = vmatprep.subr.msk.mxu1 %vm355_vm2, %v2801_v3  ;;  %v329_v13 = vld [vmem:[%s2878_s19] sm:$0xff]  ;;  %v330_v14 = vld [vmem:[%s2878_s19 + $0x8] sm:$0xff]  ;;  %v332_v15 = vld [vmem:[%s2878_s19 + $0x18] sm:$0xff] }
  0x87   : >> { %v345_v16 = vrot.slane %v329_v13, 1  ;;  %v346_v17 = vrot.slane %v330_v14, 1  ;;  %v333_v18 = vld [vmem:[%s2878_s19 + $0x20] sm:$0xff]  ;;  %v519_v19 = vrot.slane %v332_v15, 1  ;;  %v331_v20 = vld [vmem:[%s2878_s19 + $0x10] sm:$0x3] }
  0x88   : >> { %v520_v21 = vrot.slane %v333_v18, 1  ;;  %v348_v22 = vrot.slane %v331_v20, 1  ;;  %v334_v23 = vld [vmem:[%s2878_s19 + $0x28] sm:$0x3]  ;;  %v683_v29 = vrot.slane %v329_v13, 2  ;;  %v684_v30 = vrot.slane %v330_v14, 2 }
  0x89   : >> { %v347_v24 = vsel %vm344_vm3, %v345_v16, %v346_v17  ;;  %v522_v25 = vrot.slane %v334_v23, 1  ;;  %v772_v31 = vrot.slane %v332_v15, 2  ;;  %v773_v32 = vrot.slane %v333_v18, 2  ;;  %v335_v39 = vld [vmem:[%s2878_s19 + $0x30] sm:$0xff]  ;;  %v336_v40 = vld [vmem:[%s2878_s19 + $0x38] sm:$0xff]  ;;  %v338_v52 = vld [vmem:[%s2878_s19 + $0x48] sm:$0xff] }
  0x8a   : >> { %2258 = vmatprep.mubr.msk.f32.mxu0 %vm350_vm4, %v347_v24  ;;  %v521_v26 = vsel %vm344_vm3, %v519_v19, %v520_v21  ;;  %v349_v27 = vsel %vm344_vm3, %v346_v17, %v348_v22  ;;  %v685_v33 = vsel %vm682_vm5, %v683_v29, %v684_v30  ;;  %v686_v35 = vrot.slane %v331_v20, 2  ;;  %v337_v43 = vld [vmem:[%s2878_s19 + $0x40] sm:$0x3]  ;;  %v339_v53 = vld [vmem:[%s2878_s19 + $0x50] sm:$0xff]  ;;  %v340_v56 = vld [vmem:[%s2878_s19 + $0x58] sm:$0x3] }
  0x8b   : >> { %2268 = vmatprep.mubr.msk.f32.mxu1 %vm350_vm4, %v521_v26  ;;  %2259 = vmatmul.mubr.msk.f32.vlgmr.msra.gmra.mrb[0].mxu0 %vm350_vm4, %v349_v27  ;;  %v523_v28 = vsel %vm344_vm3, %v520_v21, %v522_v25  ;;  %v774_v34 = vsel %vm682_vm5, %v772_v31, %v773_v32  ;;  %v775_v36 = vrot.slane %v334_v23, 2  ;;  %v1102_v41 = vrot.slane %v335_v39, 1 }
  0x8c   : >> { %2269 = vmatmul.mubr.msk.f32.vlgmr.msra.gmra.mrb[0].mxu1 %vm350_vm4, %v523_v28  ;;  %2262 = vmatpush3.msk.msra.mxu0 %vm355_vm2, %v2801_v3  ;;  %v687_v37 = vsel %vm682_vm5, %v684_v30, %v686_v35  ;;  %v1103_v42 = vrot.slane %v336_v40, 1  ;;  %v1105_v45 = vrot.slane %v337_v43, 1  ;;  %v1268_v46 = vrot.slane %v335_v39, 2 }
  0x8d   : >> { %2272 = vmatpush3.msk.msra.mxu1 %vm355_vm2, %v2801_v3  ;;  %2263 = vmatprep.mubr.msk.f32.mxu0 %vm350_vm4, %v329_v13  ;;  %v776_v38 = vsel %vm682_vm5, %v773_v32, %v775_v36  ;;  %v1269_v47 = vrot.slane %v336_v40, 2  ;;  %v1271_v50 = vrot.slane %v337_v43, 2  ;;  %v1598_v54 = vrot.slane %v338_v52, 1 }
  0x8e   : >> { %2273 = vmatprep.mubr.msk.f32.mxu1 %vm350_vm4, %v332_v15  ;;  %2276 = vmatprep.subr.msk.mxu0 %vm355_vm2, %v2805_v5  ;;  %v1104_v44 = vsel %vm344_vm3, %v1102_v41, %v1103_v42  ;;  %v1106_v48 = vsel %vm344_vm3, %v1103_v42, %v1105_v45  ;;  %v1599_v55 = vrot.slane %v339_v53, 1  ;;  %v1601_v58 = vrot.slane %v340_v56, 1 }
  0x8f   : >> { %2281 = vmatprep.subr.msk.mxu1 %vm355_vm2, %v2805_v5  ;;  %v1270_v49 = vsel %vm682_vm5, %v1268_v46, %v1269_v47  ;;  %v1272_v51 = vsel %vm682_vm5, %v1269_v47, %v1271_v50  ;;  %v1764_v59 = vrot.slane %v338_v52, 2  ;;  %v1765_v60 = vrot.slane %v339_v53, 2 }
  0x90   : >> { %v1600_v57 = vsel %vm344_vm3, %v1598_v54, %v1599_v55  ;;  %v1602_v61 = vsel %vm344_vm3, %v1599_v55, %v1601_v58  ;;  %v1767_v63 = vrot.slane %v340_v56, 2  ;;  %v2610_v13 = vmov 0.0|0.0  }
  0x91   : >> { %v1766_v62 = vsel %vm682_vm5, %v1764_v59, %v1765_v60 }
  0x92   : >> { %v1768_v6 = vsel %vm682_vm5, %v1765_v60, %v1767_v63 }
  0x93   : >> { %2264 = vmatmul.mubr.msk.f32.vlgmr.msra.gmra.mrb[0].mxu0 %vm350_vm4, %v330_v14  ;;  %v2612_v14 = vmov 0.0  }
  0x94   : >> { %2274 = vmatmul.mubr.msk.f32.vlgmr.msra.gmra.mrb[0].mxu1 %vm350_vm4, %v333_v18  ;;  %2277 = vmatpush3.msk.msra.mxu0 %vm355_vm2, %v2805_v5 }
  0x95   : >> { %2282 = vmatpush3.msk.msra.mxu1 %vm355_vm2, %v2805_v5  ;;  %2278 = vmatprep.mubr.msk.f32.mxu0 %vm350_vm4, %v685_v33 }
  0x96   : >> { %2283 = vmatprep.mubr.msk.f32.mxu1 %vm350_vm4, %v774_v34  ;;  %2286 = vmatprep.subr.msk.mxu0 %vm355_vm2, %v2847_v7 }
  0x97   : >> { %2291 = vmatprep.subr.msk.mxu1 %vm355_vm2, %v2847_v7 }
  0x9b   : >> { %2279 = vmatmul.mubr.msk.f32.vlgmr.msra.gmra.mrb[0].mxu0 %vm350_vm4, %v687_v37 }
  0x9c   : >> { %2284 = vmatmul.mubr.msk.f32.vlgmr.msra.gmra.mrb[0].mxu1 %vm350_vm4, %v776_v38  ;;  %2287 = vmatpush3.msk.msra.mxu0 %vm355_vm2, %v2847_v7 }
  0x9d   : >> { %2292 = vmatpush3.msk.msra.mxu1 %vm355_vm2, %v2847_v7  ;;  %2288 = vmatprep.mubr.msk.f32.mxu0 %vm350_vm4, %v332_v15 }
  0x9e   : >> { %2293 = vmatprep.mubr.msk.f32.mxu1 %vm350_vm4, %v335_v39  ;;  %2296 = vmatprep.subr.msk.mxu0 %vm355_vm2, %v2849_v8 }
  0x9f   : >> { %2301 = vmatprep.subr.msk.mxu1 %vm355_vm2, %v2849_v8 }
  0xa3   : >> { %2289 = vmatmul.mubr.msk.f32.vlgmr.msra.gmra.mrb[0].mxu0 %vm350_vm4, %v333_v18 }
  0xa4   : >> { %2294 = vmatmul.mubr.msk.f32.vlgmr.msra.gmra.mrb[0].mxu1 %vm350_vm4, %v336_v40  ;;  %2297 = vmatpush3.msk.msra.mxu0 %vm355_vm2, %v2849_v8 }
  0xa5   : >> { %2302 = vmatpush3.msk.msra.mxu1 %vm355_vm2, %v2849_v8  ;;  %2298 = vmatprep.mubr.msk.f32.mxu0 %vm350_vm4, %v521_v26 }
  0xa6   : >> { %2303 = vmatprep.mubr.msk.f32.mxu1 %vm350_vm4, %v1104_v44  ;;  %2306 = vmatprep.subr.msk.mxu0 %vm355_vm2, %v2851_v9 }
  0xa7   : >> { %2311 = vmatprep.subr.msk.mxu1 %vm355_vm2, %v2851_v9 }
  0xab   : >> { %2299 = vmatmul.mubr.msk.f32.vlgmr.msra.gmra.mrb[0].mxu0 %vm350_vm4, %v523_v28 }
  0xac   : >> { %2304 = vmatmul.mubr.msk.f32.vlgmr.msra.gmra.mrb[0].mxu1 %vm350_vm4, %v1106_v48  ;;  %2307 = vmatpush3.msk.msra.mxu0 %vm355_vm2, %v2851_v9 }
  0xad   : >> { %2312 = vmatpush3.msk.msra.mxu1 %vm355_vm2, %v2851_v9  ;;  %2308 = vmatprep.mubr.msk.f32.mxu0 %vm350_vm4, %v774_v34 }
  0xae   : >> { %2313 = vmatprep.mubr.msk.f32.mxu1 %vm350_vm4, %v1270_v49  ;;  %2316 = vmatprep.subr.msk.mxu0 %vm355_vm2, %v2853_v10 }
  0xaf   : >> { %2321 = vmatprep.subr.msk.mxu1 %vm355_vm2, %v2853_v10 }
  0xb3   : >> { %2309 = vmatmul.mubr.msk.f32.vlgmr.msra.gmra.mrb[0].mxu0 %vm350_vm4, %v776_v38 }
  0xb4   : >> { %2314 = vmatmul.mubr.msk.f32.vlgmr.msra.gmra.mrb[0].mxu1 %vm350_vm4, %v1272_v51  ;;  %2317 = vmatpush3.msk.msra.mxu0 %vm355_vm2, %v2853_v10 }
  0xb5   : >> { %2322 = vmatpush3.msk.msra.mxu1 %vm355_vm2, %v2853_v10  ;;  %2318 = vmatprep.mubr.msk.f32.mxu0 %vm350_vm4, %v335_v39 }
  0xb6   : >> { %2323 = vmatprep.mubr.msk.f32.mxu1 %vm350_vm4, %v338_v52  ;;  %2326 = vmatprep.subr.msk.mxu0 %vm355_vm2, %v2855_v11 }
  0xb7   : >> { %2331 = vmatprep.subr.msk.mxu1 %vm355_vm2, %v2855_v11 }
  0xbb   : >> { %2319 = vmatmul.mubr.msk.f32.vlgmr.msra.gmra.mrb[0].mxu0 %vm350_vm4, %v336_v40 }
  0xbc   : >> { %2324 = vmatmul.mubr.msk.f32.vlgmr.msra.gmra.mrb[0].mxu1 %vm350_vm4, %v339_v53  ;;  %2327 = vmatpush3.msk.msra.mxu0 %vm355_vm2, %v2855_v11 }
  0xbd   : >> { %2332 = vmatpush3.msk.msra.mxu1 %vm355_vm2, %v2855_v11  ;;  %2328 = vmatprep.mubr.msk.f32.mxu0 %vm350_vm4, %v1104_v44 }
  0xbe   : >> { %2333 = vmatprep.mubr.msk.f32.mxu1 %vm350_vm4, %v1600_v57  ;;  %2336 = vmatprep.subr.msk.mxu0 %vm355_vm2, %v2857_v12 }
  0xbf   : >> { %2341 = vmatprep.subr.msk.mxu1 %vm355_vm2, %v2857_v12 }
  0xc3   : >> { %2329 = vmatmul.mubr.msk.f32.vlgmr.msra.gmra.mrb[0].mxu0 %vm350_vm4, %v1106_v48 }
  0xc4   : >> { %2334 = vmatmul.mubr.msk.f32.vlgmr.msra.gmra.mrb[0].mxu1 %vm350_vm4, %v1602_v61  ;;  %2337 = vmatpush3.msk.msra.mxu0 %vm355_vm2, %v2857_v12 }
  0xc5   : >> { %2342 = vmatpush3.msk.msra.mxu1 %vm355_vm2, %v2857_v12  ;;  %2338 = vmatprep.mubr.msk.f32.mxu0 %vm350_vm4, %v1270_v49 }
  0xc6   : >> { %2343 = vmatprep.mubr.msk.f32.mxu1 %vm350_vm4, %v1766_v62  ;;  %2360 = vmatprep.subr.bf16.mxu0 %v2610_v13 }
  0xc7   : >> { %2363 = vmatprep.subr.bf16.mxu1 %v2610_v13 }
  0xcb   : >> { %2339 = vmatmul.mubr.msk.f32.vlgmr.msra.gmra.mrb[0].mxu0 %vm350_vm4, %v1272_v51 }
  0xcc   : >> { %2344 = vmatmul.mubr.msk.f32.vlgmr.msra.gmra.mrb[0].mxu1 %vm350_vm4, %v1768_v6  ;;  %2350 = vmatprep.mubr.msk.f32.mxu0 %vm2611_vm6, %v2612_v14 }
  0xcd   : >> { %2357 = vmatprep.mubr.msk.f32.mxu1 %vm2611_vm6, %v2612_v14 }
 0x19e   : >> { %v2340_v15 = vpop.f32.mrb[0].mxu0 }
 0x19f   : >> { %v2345_v16 = vpop.f32.mrb[0].mxu1  ;;  %v1753_v17 = vpop.f32.mrb[1].mxu0 }
 0x1a0   : >> { %v1851_v18 = vmax.f32 %v2340_v15, %v2345_v16  ;;  %v1839_v19 = vpop.f32.mrb[1].mxu1 }
 0x1a1   : >> { %v1850_v20 = vmax.f32 %v1753_v17, %v1839_v19 }
 0x1a3   : >> { %v2361_v21 = vpack.c.bf16 %v1851_v18, %v1850_v20 }
 0x1a5   : >> { %2362 = vmatpush3.bf16.msra.mxu0 %v2361_v21  ;;  %2365 = vmatpush3.bf16.msra.mxu1 %v2361_v21 }
 0x1a8   : >> { %2351 = vmatmul.mubr.msk.f32.vlgmr.msra.gmra.mrb[2].mxu0 %vm1852_vm7, %v2792_v1  ;;  %2358 = vmatmul.mubr.msk.f32.vlgmr.msra.gmra.mrb[2].mxu1 %vm1852_vm7, %v2794_v2 }
 0x27b   : >> { %v1922_v22 = vpop.f32.mrb[2].mxu0  ;;  %v1995_v23 = vpop.f32.mrb[2].mxu1 }
 0x27c   : >> { %v1999_v24 = vmax.f32 %v1922_v22, %v1995_v23  ;;  %v2352_v25 = vpop.f32.mrb[3].mxu0  ;;  %v2359_v26 = vpop.f32.mrb[3].mxu1  ;;  %324 = sbr.rel (!%p322_p6) target bundleno = 131 (0x83), region = 104 }
 0x27e   : >> { %v2006_v27 = vadd.f32 %v2790_v0, %v1999_v24 }
 0x280   : >> { %v2007_v28 = vmax.f32 %v2006_v27, 0.0 }
 0x282   : >> { %2193 = vst.msk [vmem:[%s2051_s23 + $0x11] sm:$0xff] %vm298_vm0, %v2007_v28 }
 0x283 PF: > { %s18_s18 = sadd.s32 1, %s2597_s18  }
 0x284   : > { %p15_p8 = scmp.ge.s32.totalorder %s18_s18, 4  }
 0x286   :  { %17 = sbr.rel (!%p15_p8) target bundleno = 3 (0x3), region = 115 }
 0x28d   :  { %2033 = vsyncpa [#allocation3], 1 }
 0x28e   :  { %2035 = vsyncpa [#allocation3 + $0x1], 1 }
 0x28f   :  { %2036 = vsyncpa [#allocation5], 1 }
 0x290   :  { %2037 = vsyncpa [#allocation8], 1 }

// kernel: vgg_forward.9
= control target key start
LH: loop header
LB: loop body
LE: loop exit
PB: predicated region body
PF: predicated region fallthrough
CT: control target
= control target key end

     0   :  { %vm19_vm0 = vcmask 74752   ;;  %v244_v3 = vmov 0.0|0.0   ;;  %v245_v6 = vmov 0.0   ;;  %vm246_vm1 = vmmov 0   ;;  %s337_s0 = inlined_call_operand.vmem [shape: f32[2,128], index: 0, kind: input, shape index: {}]   ;;  %s338_s1 = inlined_call_operand.vmem [shape: f32[128,10], index: 1, kind: input, shape index: {}]   ;;  %s339_s2 = inlined_call_operand.vmem [shape: f32[1,10], index: 2, kind: input, shape index: {}]   ;;  %s340_s3 = inlined_call_operand.hbm [shape: f32[2,10], index: 3, kind: output, shape index: {}]  }
   0x1   :  { %v23_v0 = vld [vmem:[%s338_s1] sm:$0xff]  ;;  %v24_v1 = vld [vmem:[%s338_s1 + $0x8] sm:$0xff]  ;;  %v25_v2 = vld [vmem:[%s338_s1 + $0x10] sm:$0xff]  ;;  %192 = vmatprep.subr.bf16.mxu0 %v244_v3  ;;  %20 = vst.msk [vmem:[#allocation2] sm:$0x3] %vm19_vm0, %v245_v6  ;;  %189 = vmatprep.mubr.msk.f32.mxu0 %vm246_vm1, %v245_v6 }
   0x2   :  { %v193_v4 = vpack.c.bf16 %v24_v1, %v23_v0  ;;  %v26_v5 = vld [vmem:[%s338_s1 + $0x18] sm:$0xff]  ;;  %v27_v8 = vld [vmem:[%s338_s1 + $0x20] sm:$0xff]  ;;  %v28_v9 = vld [vmem:[%s338_s1 + $0x28] sm:$0xff] }
   0x3   :  { %v196_v7 = vpack.c.bf16 %v26_v5, %v25_v2 }
   0x4   :  { %194 = vmatpush3.bf16.msra.mxu0 %v193_v4 }
   0x5   :  { %195 = vmatprep.subr.bf16.mxu0 %v244_v3 }
   0x6   :  { %8 = vsyncpa [#allocation4], 0  ;;  %v199_v10 = vpack.c.bf16 %v28_v9, %v27_v8  ;;  %v29_v11 = vld [vmem:[%s338_s1 + $0x30] sm:$0xff]  ;;  %v30_v12 = vld [vmem:[%s338_s1 + $0x38] sm:$0xff] }
   0x7   :  { %v202_v13 = vpack.c.bf16 %v30_v12, %v29_v11  ;;  %v31_v14 = vld [vmem:[%s338_s1 + $0x40] sm:$0xff]  ;;  %v32_v15 = vld [vmem:[%s338_s1 + $0x48] sm:$0xff]  ;;  %v33_v17 = vld [vmem:[%s338_s1 + $0x50] sm:$0xff] }
   0x8   :  { %197 = vmatpush3.bf16.msra.mxu0 %v196_v7  ;;  %v205_v16 = vpack.c.bf16 %v32_v15, %v31_v14  ;;  %v34_v18 = vld [vmem:[%s338_s1 + $0x58] sm:$0xff]  ;;  %v35_v20 = vld [vmem:[%s338_s1 + $0x60] sm:$0xff]  ;;  %v36_v21 = vld [vmem:[%s338_s1 + $0x68] sm:$0xff] }
   0x9   :  { %198 = vmatprep.subr.bf16.mxu0 %v244_v3  ;;  %v208_v19 = vpack.c.bf16 %v34_v18, %v33_v17  ;;  %v211_v22 = vpack.c.bf16 %v36_v21, %v35_v20  ;;  %v37_v23 = vld [vmem:[%s338_s1 + $0x70] sm:$0xff]  ;;  %v38_v24 = vld [vmem:[%s338_s1 + $0x78] sm:$0xff]  ;;  %v22_v26 = vld [vmem:[%s337_s0] sm:$0x3]  ;;  %s247_s1 = smov [#allocation3]  }
   0xa   :  { %v214_v25 = vpack.c.bf16 %v38_v24, %v37_v23  ;;  %v21_v27 = vld [vmem:[#allocation2] sm:$0x3]  ;;  %s131_s21 = sshll.u32 %s247_s1, 4  ;;  %s132_s21 = int_to_ptr.vmem [resolvable:$true] %s131_s21 }
   0xb   :  { %v139_v31 = vld [vmem:[%s339_s2] ss:$0 sm:$0xff]  ;;  %s220_s22 = scalar_lea.vmem %s132_s21, 32  ;;  %p225_p1 = scmp.lt.s32.totalorder %s132_s21, %s132_s21 }
   0xc   :  { %200 = vmatpush3.bf16.msra.mxu0 %v199_v10  ;;  %p221_p0 = scmp.ne.s32.totalorder %s132_s21, %s220_s22  ;;  %p226_p2 = scmp.lt.s32.totalorder %s220_s22, %s220_s22 }
   0xd   :  { %201 = vmatprep.subr.bf16.mxu0 %v244_v3 }
   0xe   :  { %p227_p3 = por %p226_p2, %p225_p1 }
  0x10   :  { %203 = vmatpush3.bf16.msra.mxu0 %v202_v13  ;;  %p228_p4 = pnand %p227_p3, %p221_p0 }
  0x11   :  { %204 = vmatprep.subr.bf16.mxu0 %v244_v3 }
  0x14   :  { %206 = vmatpush3.bf16.msra.mxu0 %v205_v16 }
  0x15   :  { %207 = vmatprep.subr.bf16.mxu0 %v244_v3 }
  0x18   :  { %209 = vmatpush3.bf16.msra.mxu0 %v208_v19 }
  0x19   :  { %210 = vmatprep.subr.bf16.mxu0 %v244_v3 }
  0x1c   :  { %212 = vmatpush3.bf16.msra.mxu0 %v211_v22 }
  0x1d   :  { %213 = vmatprep.subr.bf16.mxu0 %v244_v3 }
  0x20   :  { %215 = vmatpush3.bf16.msra.mxu0 %v214_v25 }
  0x23   :  { %190 = vmatmul.mubr.f32.vlgmr.msra.gmra.mrb[0].mxu0 %v22_v26 }
  0xf6   :  { %v105_v28 = vpop.f32.mrb[0].mxu0 }
  0xf7   :  { %v109_v29 = vadd.f32 %v105_v28, %v21_v27  ;;  %v191_v30 = vpop.f32.mrb[1].mxu0 }
  0xf9   :  { %111 = vst.msk [vmem:[#allocation2] sm:$0x3] %vm19_vm0, %v109_v29 }
 0x100   :  { %v115_v32 = vld [vmem:[#allocation2] sm:$0x3] }
 0x101   :  { %v123_v33 = vadd.f32 %v139_v31, %v115_v32 }
 0x103   :  { %124 = vst.msk [vmem:[#allocation3] sm:$0x3] %vm19_vm0, %v123_v33 }
 0x104   :  { %231 = shalt.err (!%p228_p4)
}
 0x105   :  { %s232_s24 = scalar_lea.hbm %s340_s3, 32 }
 0x106   :  { %p233_p5 = scmp.ne.s32.totalorder %s340_s3, %s232_s24  ;;  %p236_p6 = scmp.lt.u32.totalorder %s232_s24, %s340_s3 }
 0x108   :  { %p238_p7 = pnand %p236_p6, %p233_p5 }
 0x10a   :  { %241 = shalt.err (!%p238_p7)
}
 0x10b   :  { %134 = dma.vmem_to_hbm [thread:$0]  %s132_s21, 32, %s340_s3, [#allocation4]  }
 0x10c   :  { %242 = dma.done.wait [#allocation4], 32  }
 0x10d   :  { %243 = vsyncadd [#allocation4], 4294967264 }
 0x10e   :  { %138 = vsyncpa [#allocation4], 1 }

// kernel: vgg_forward.8
= control target key start
LH: loop header
LB: loop body
LE: loop exit
PB: predicated region body
PF: predicated region fallthrough
CT: control target
= control target key end

     0   :  { %v988_v22 = vmov 1983009808   ;;  %v29_v24 = vlaneseq  ;;  %s1226_s1 = inlined_call_operand.vmem [shape: bf16[1024,128], index: 1, kind: input, shape index: {}]   ;;  %s1227_s0 = inlined_call_operand.vmem [shape: f32[2,1024], index: 0, kind: input, shape index: {}]   ;;  %s1228_s2 = inlined_call_operand.vmem [shape: f32[1,128], index: 2, kind: input, shape index: {}]   ;;  %s1229_s3 = inlined_call_operand.vmem [shape: f32[2,128], index: 3, kind: output, shape index: {}]  }
   0x1   :  { %v922_v0 = vld [vmem:[%s1226_s1 + $0x40] sm:$0xff]   ;;  %v926_v4 = vld [vmem:[%s1226_s1 + $0x48] sm:$0xff]   ;;  %v930_v8 = vld [vmem:[%s1226_s1 + $0x50] sm:$0xff]   ;;  %v27_v23 = vunpack.c.l.s4 %v988_v22 }
   0x2   :  { %v923_v1 = vld [vmem:[%s1226_s1 + $0xc0] sm:$0xff]   ;;  %832 = vmatprep.subr.bf16.mxu0 %v922_v0  ;;  %v927_v5 = vld [vmem:[%s1226_s1 + $0xc8] sm:$0xff]   ;;  %v931_v9 = vld [vmem:[%s1226_s1 + $0xd0] sm:$0xff]   ;;  %v30_v30 = vshrl.u32 %v29_v24, 7 }
   0x3   :  { %v924_v2 = vld [vmem:[%s1226_s1] sm:$0xff]   ;;  %854 = vmatprep.subr.bf16.mxu1 %v923_v1  ;;  %v928_v6 = vld [vmem:[%s1226_s1 + $0x8] sm:$0xff]   ;;  %v932_v10 = vld [vmem:[%s1226_s1 + $0x10] sm:$0xff]   ;;  %v28_v29 = vunpack.c.0.s8 %v27_v23 }
   0x4   :  { %v925_v3 = vld [vmem:[%s1226_s1 + $0x80] sm:$0xff]   ;;  %833 = vmatpush3.bf16.msra.mxu0 %v924_v2  ;;  %v929_v7 = vld [vmem:[%s1226_s1 + $0x88] sm:$0xff]   ;;  %v933_v11 = vld [vmem:[%s1226_s1 + $0x90] sm:$0xff]  }
   0x5   :  { %855 = vmatpush3.bf16.msra.mxu1 %v925_v3  ;;  %834 = vmatprep.subr.bf16.mxu0 %v926_v4  ;;  %v934_v12 = vld [vmem:[%s1226_s1 + $0x58] sm:$0xff]   ;;  %v938_v16 = vld [vmem:[%s1226_s1 + $0x60] sm:$0xff]   ;;  %v942_v20 = vld [vmem:[%s1226_s1 + $0x68] sm:$0xff]   ;;  %v31_v35 = vsub.s32 %v28_v29, %v30_v30 }
   0x6   :  { %856 = vmatprep.subr.bf16.mxu1 %v927_v5  ;;  %v935_v13 = vld [vmem:[%s1226_s1 + $0xd8] sm:$0xff]   ;;  %v939_v17 = vld [vmem:[%s1226_s1 + $0xe0] sm:$0xff]   ;;  %v943_v21 = vld [vmem:[%s1226_s1 + $0xe8] sm:$0xff]  }
   0x7   :  { %v936_v14 = vld [vmem:[%s1226_s1 + $0x18] sm:$0xff]   ;;  %v940_v18 = vld [vmem:[%s1226_s1 + $0x20] sm:$0xff]   ;;  %v944_v25 = vld [vmem:[%s1226_s1 + $0x28] sm:$0xff]  }
   0x8   :  { %835 = vmatpush3.bf16.msra.mxu0 %v928_v6  ;;  %v937_v15 = vld [vmem:[%s1226_s1 + $0x98] sm:$0xff]   ;;  %v941_v19 = vld [vmem:[%s1226_s1 + $0xa0] sm:$0xff]   ;;  %v945_v26 = vld [vmem:[%s1226_s1 + $0xa8] sm:$0xff]  }
   0x9   :  { %857 = vmatpush3.bf16.msra.mxu1 %v929_v7  ;;  %836 = vmatprep.subr.bf16.mxu0 %v930_v8  ;;  %v946_v27 = vld [vmem:[%s1226_s1 + $0x70] sm:$0xff]   ;;  %v950_v33 = vld [vmem:[%s1226_s1 + $0x78] sm:$0xff]   ;;  %v21_v38 = vld [vmem:[%s1227_s0] sm:$0xff] }
   0xa   :  { %858 = vmatprep.subr.bf16.mxu1 %v931_v9  ;;  %v947_v28 = vld [vmem:[%s1226_s1 + $0xf0] sm:$0xff]   ;;  %v951_v34 = vld [vmem:[%s1226_s1 + $0xf8] sm:$0xff]   ;;  %v22_v39 = vld [vmem:[%s1227_s0 + $0x8] sm:$0xff]  ;;  %v32_v40 = vrot.slane %v21_v38, %v31_v35  ;;  %v25_v42 = vcombine.high %v21_v38, %v21_v38 }
   0xb   :  { %v948_v31 = vld [vmem:[%s1226_s1 + $0x30] sm:$0xff]   ;;  %v952_v36 = vld [vmem:[%s1226_s1 + $0x38] sm:$0xff]   ;;  %v42_v41 = vcombine.high %v22_v39, %v22_v39  ;;  %v956_v43 = vld [vmem:[%s1226_s1 + $0x140] sm:$0xff]   ;;  %v1115_v44 = vrot.slane %v22_v39, %v31_v35 }
   0xc   :  { %837 = vmatpush3.bf16.msra.mxu0 %v932_v10  ;;  %v949_v32 = vld [vmem:[%s1226_s1 + $0xb0] sm:$0xff]   ;;  %v953_v37 = vld [vmem:[%s1226_s1 + $0xb8] sm:$0xff]   ;;  %v957_v45 = vld [vmem:[%s1226_s1 + $0x1c0] sm:$0xff]   ;;  %v40_v46 = vcombine.high %v32_v40, %v32_v40  ;;  %v39_v47 = vrot.slane %v25_v42, %v31_v35  ;;  %v67_v49 = vpack.c.bf16 %v32_v40, %v32_v40 }
   0xd   :  { %859 = vmatpush3.bf16.msra.mxu1 %v933_v11  ;;  %838 = vmatprep.subr.bf16.mxu0 %v934_v12  ;;  %v57_v48 = vcombine.high %v1115_v44, %v1115_v44  ;;  %v1122_v50 = vrot.slane %v42_v41, %v31_v35  ;;  %v958_v53 = vld [vmem:[%s1226_s1 + $0x100] sm:$0xff]   ;;  %v960_v55 = vld [vmem:[%s1226_s1 + $0x148] sm:$0xff]   ;;  %v964_v63 = vld [vmem:[%s1226_s1 + $0x150] sm:$0xff]   ;;  %v71_v24 = vpack.c.bf16 %v1115_v44, %v1115_v44 }
   0xe   :  { %860 = vmatprep.subr.bf16.mxu1 %v935_v13  ;;  %v68_v51 = vpack.c.bf16 %v40_v46, %v40_v46  ;;  %v41_v52 = vcombine.high %v39_v47, %v39_v47  ;;  %v69_v54 = vpack.c.bf16 %v39_v47, %v39_v47  ;;  %v959_v58 = vld [vmem:[%s1226_s1 + $0x180] sm:$0xff]   ;;  %v961_v60 = vld [vmem:[%s1226_s1 + $0x1c8] sm:$0xff]   ;;  %v965_v1 = vld [vmem:[%s1226_s1 + $0x1d0] sm:$0xff]  }
   0xf   :  { %v58_v56 = vcombine.high %v1122_v50, %v1122_v50  ;;  %v72_v59 = vpack.c.bf16 %v57_v48, %v57_v48  ;;  %v962_v62 = vld [vmem:[%s1226_s1 + $0x108] sm:$0xff]   ;;  %v966_v2 = vld [vmem:[%s1226_s1 + $0x110] sm:$0xff]   ;;  %v968_v3 = vld [vmem:[%s1226_s1 + $0x158] sm:$0xff]  }
  0x10   :  { %839 = vmatpush3.bf16.msra.mxu0 %v936_v14  ;;  %619 = vmatprep.mubr.bf16.mxu0 %v68_v51  ;;  %v70_v57 = vpack.c.bf16 %v41_v52, %v41_v52  ;;  %v963_v0 = vld [vmem:[%s1226_s1 + $0x188] sm:$0xff]   ;;  %v967_v4 = vld [vmem:[%s1226_s1 + $0x190] sm:$0xff]   ;;  %v969_v5 = vld [vmem:[%s1226_s1 + $0x1d8] sm:$0xff]  }
  0x11   :  { %861 = vmatpush3.bf16.msra.mxu1 %v937_v15  ;;  %840 = vmatprep.subr.bf16.mxu0 %v938_v16  ;;  %v74_v61 = vpack.c.bf16 %v58_v56, %v58_v56  ;;  %v970_v6 = vld [vmem:[%s1226_s1 + $0x118] sm:$0xff]   ;;  %v972_v7 = vld [vmem:[%s1226_s1 + $0x160] sm:$0xff]   ;;  %v976_v11 = vld [vmem:[%s1226_s1 + $0x168] sm:$0xff]  }
  0x12   :  { %862 = vmatprep.subr.bf16.mxu1 %v939_v17  ;;  %659 = vmatprep.mubr.bf16.mxu1 %v70_v57  ;;  %v971_v8 = vld [vmem:[%s1226_s1 + $0x198] sm:$0xff]   ;;  %v973_v9 = vld [vmem:[%s1226_s1 + $0x1e0] sm:$0xff]   ;;  %v977_v13 = vld [vmem:[%s1226_s1 + $0x1e8] sm:$0xff]  }
  0x13   :  { %v974_v10 = vld [vmem:[%s1226_s1 + $0x120] sm:$0xff]   ;;  %v978_v14 = vld [vmem:[%s1226_s1 + $0x128] sm:$0xff]   ;;  %v980_v15 = vld [vmem:[%s1226_s1 + $0x170] sm:$0xff]  }
  0x14   :  { %841 = vmatpush3.bf16.msra.mxu0 %v940_v18  ;;  %v975_v12 = vld [vmem:[%s1226_s1 + $0x1a0] sm:$0xff]   ;;  %v979_v16 = vld [vmem:[%s1226_s1 + $0x1a8] sm:$0xff]   ;;  %v981_v17 = vld [vmem:[%s1226_s1 + $0x1f0] sm:$0xff]  }
  0x15   :  { %863 = vmatpush3.bf16.msra.mxu1 %v941_v19  ;;  %842 = vmatprep.subr.bf16.mxu0 %v942_v20  ;;  %v982_v18 = vld [vmem:[%s1226_s1 + $0x130] sm:$0xff]   ;;  %v984_v19 = vld [vmem:[%s1226_s1 + $0x178] sm:$0xff]   ;;  %v831_v52 = vld [vmem:[%s1228_s2] ss:$0 sm:$0xff] }
  0x16   :  { %864 = vmatprep.subr.bf16.mxu1 %v943_v21  ;;  %v983_v20 = vld [vmem:[%s1226_s1 + $0x1b0] sm:$0xff]   ;;  %v985_v21 = vld [vmem:[%s1226_s1 + $0x1f8] sm:$0xff]  }
  0x17   :  { %v986_v22 = vld [vmem:[%s1226_s1 + $0x138] sm:$0xff]  }
  0x18   :  { %843 = vmatpush3.bf16.msra.mxu0 %v944_v25  ;;  %v987_v23 = vld [vmem:[%s1226_s1 + $0x1b8] sm:$0xff]   ;;  %v73_v25 = vpack.c.bf16 %v1122_v50, %v1122_v50 }
  0x19   :  { %865 = vmatpush3.bf16.msra.mxu1 %v945_v26  ;;  %844 = vmatprep.subr.bf16.mxu0 %v946_v27  ;;  %v989_v26 = vmov 0.0  }
  0x1a   :  { %866 = vmatprep.subr.bf16.mxu1 %v947_v28  ;;  %19 = vst [vmem:[#allocation2] sm:$0x3] %v989_v26 }
  0x1c   :  { %845 = vmatpush3.bf16.msra.mxu0 %v948_v31 }
  0x1d   :  { %867 = vmatpush3.bf16.msra.mxu1 %v949_v32  ;;  %846 = vmatprep.subr.bf16.mxu0 %v950_v33 }
  0x1e   :  { %868 = vmatprep.subr.bf16.mxu1 %v951_v34 }
  0x20   :  { %847 = vmatpush3.bf16.msra.mxu0 %v952_v36 }
  0x21   :  { %869 = vmatpush3.bf16.msra.mxu1 %v953_v37  ;;  %876 = vmatprep.subr.bf16.mxu0 %v956_v43  ;;  %v20_v48 = vld [vmem:[#allocation2] sm:$0x3] }
  0x22   :  { %898 = vmatprep.subr.bf16.mxu1 %v957_v45 }
  0x23   :  { %620 = vmatmul.mubr.bf16.vlgmr.msra.gmra.mrb[0].mxu0 %v67_v49 }
  0x24   :  { %877 = vmatpush3.bf16.msra.mxu0 %v958_v53  ;;  %660 = vmatmul.mubr.bf16.vlgmr.msra.gmra.mrb[0].mxu1 %v69_v54 }
  0x25   :  { %878 = vmatprep.subr.bf16.mxu0 %v960_v55  ;;  %899 = vmatpush3.bf16.msra.mxu1 %v959_v58 }
  0x26   :  { %699 = vmatprep.mubr.bf16.mxu0 %v72_v59  ;;  %900 = vmatprep.subr.bf16.mxu1 %v961_v60 }
  0x27   :  { %739 = vmatprep.mubr.bf16.mxu1 %v74_v61 }
  0x28   :  { %879 = vmatpush3.bf16.msra.mxu0 %v962_v62 }
  0x29   :  { %880 = vmatprep.subr.bf16.mxu0 %v964_v63  ;;  %901 = vmatpush3.bf16.msra.mxu1 %v963_v0 }
  0x2a   :  { %902 = vmatprep.subr.bf16.mxu1 %v965_v1 }
  0x2c   :  { %881 = vmatpush3.bf16.msra.mxu0 %v966_v2 }
  0x2d   :  { %882 = vmatprep.subr.bf16.mxu0 %v968_v3  ;;  %903 = vmatpush3.bf16.msra.mxu1 %v967_v4 }
  0x2e   :  { %904 = vmatprep.subr.bf16.mxu1 %v969_v5 }
  0x30   :  { %883 = vmatpush3.bf16.msra.mxu0 %v970_v6 }
  0x31   :  { %884 = vmatprep.subr.bf16.mxu0 %v972_v7  ;;  %905 = vmatpush3.bf16.msra.mxu1 %v971_v8 }
  0x32   :  { %906 = vmatprep.subr.bf16.mxu1 %v973_v9 }
  0x34   :  { %885 = vmatpush3.bf16.msra.mxu0 %v974_v10 }
  0x35   :  { %886 = vmatprep.subr.bf16.mxu0 %v976_v11  ;;  %907 = vmatpush3.bf16.msra.mxu1 %v975_v12 }
  0x36   :  { %908 = vmatprep.subr.bf16.mxu1 %v977_v13 }
  0x38   :  { %887 = vmatpush3.bf16.msra.mxu0 %v978_v14 }
  0x39   :  { %888 = vmatprep.subr.bf16.mxu0 %v980_v15  ;;  %909 = vmatpush3.bf16.msra.mxu1 %v979_v16 }
  0x3a   :  { %910 = vmatprep.subr.bf16.mxu1 %v981_v17 }
  0x3c   :  { %889 = vmatpush3.bf16.msra.mxu0 %v982_v18 }
  0x3d   :  { %890 = vmatprep.subr.bf16.mxu0 %v984_v19  ;;  %911 = vmatpush3.bf16.msra.mxu1 %v983_v20 }
  0x3e   :  { %912 = vmatprep.subr.bf16.mxu1 %v985_v21 }
  0x40   :  { %891 = vmatpush3.bf16.msra.mxu0 %v986_v22 }
  0x41   :  { %913 = vmatpush3.bf16.msra.mxu1 %v987_v23 }
  0x43   :  { %700 = vmatmul.mubr.bf16.vlgmr.msra.gmra.mrb[4].mxu0 %v71_v24 }
  0x44   :  { %740 = vmatmul.mubr.bf16.vlgmr.msra.gmra.mrb[4].mxu1 %v73_v25 }
  0xf6   :  { %v848_v27 = vpop.f32.mrb[0].mxu0 }
  0xf7   :  { %v849_v28 = vpop.f32.mrb[1].mxu0  ;;  %v870_v29 = vpop.f32.mrb[0].mxu1 }
  0xf8   :  { %v850_v30 = vadd.f32 %v849_v28, %v848_v27  ;;  %v851_v31 = vpop.f32.mrb[2].mxu0  ;;  %v871_v32 = vpop.f32.mrb[1].mxu1 }
  0xf9   :  { %v852_v33 = vpop.f32.mrb[3].mxu0  ;;  %v872_v34 = vadd.f32 %v871_v32, %v870_v29  ;;  %v873_v35 = vpop.f32.mrb[2].mxu1 }
  0xfa   :  { %v874_v36 = vpop.f32.mrb[3].mxu1 }
  0xfb   :  { %v662_v37 = vadd.f32 %v872_v34, %v850_v30 }
 0x116   :  { %v892_v38 = vpop.f32.mrb[4].mxu0 }
 0x117   :  { %v893_v39 = vpop.f32.mrb[5].mxu0  ;;  %v914_v40 = vpop.f32.mrb[4].mxu1 }
 0x118   :  { %v894_v41 = vadd.f32 %v893_v39, %v892_v38  ;;  %v895_v42 = vpop.f32.mrb[6].mxu0  ;;  %v915_v43 = vpop.f32.mrb[5].mxu1 }
 0x119   :  { %v896_v44 = vpop.f32.mrb[7].mxu0  ;;  %v916_v46 = vadd.f32 %v915_v43, %v914_v40  ;;  %v917_v47 = vpop.f32.mrb[6].mxu1 }
 0x11a   :  { %v702_v45 = vadd.f32 %v894_v41, %v662_v37  ;;  %v918_v49 = vpop.f32.mrb[7].mxu1 }
 0x11c   :  { %v742_v50 = vadd.f32 %v916_v46, %v702_v45 }
 0x11e   :  { %v747_v51 = vadd.f32 %v742_v50, %v20_v48 }
 0x120   :  { %748 = vst [vmem:[#allocation2] sm:$0x3] %v747_v51 }
 0x127   :  { %v752_v53 = vld [vmem:[#allocation2] sm:$0x3] }
 0x128   :  { %v760_v54 = vadd.f32 %v831_v52, %v752_v53 }
 0x12a   :  { %v761_v55 = vmax.f32 %v760_v54, 0.0 }
 0x12c   :  { %762 = vst [vmem:[%s1229_s3] sm:$0x3] %v761_v55 }

// kernel: vgg_forward.6
= control target key start
LH: loop header
LB: loop body
LE: loop exit
PB: predicated region body
PF: predicated region fallthrough
CT: control target
= control target key end

     0   :  { %9 = vsyncpa [#allocation4], 0  ;;  %s5704_s0 = inlined_call_operand.vmem [shape: f32[2,10,10,64], index: 0, kind: input, shape index: {}]   ;;  %s5705_s1 = inlined_call_operand.hbm [shape: f32[9,64,512], index: 1, kind: input, shape index: {}]   ;;  %s5706_s2 = inlined_call_operand.hbm [shape: f32[1,512], index: 2, kind: input, shape index: {}]   ;;  %s5707_s3 = inlined_call_operand.hbm [shape: f32[49,64], index: 3, kind: input, shape index: {}]   ;;  %s5708_s4 = inlined_call_operand.vmem [shape: f32[2,49,512], index: 4, kind: output, shape index: {}]  }
   0x1   :  { %10 = vsyncpa [#allocation6], 0  ;;  %s4811_s15 = smov 0   ;;  %s4813_s16 = smov 0  }
   0x2   :  { %s4815_s17 = smov 0  }
   0x3 LB: > { %s4778_s18 = smov [#allocation5]   ;;  %s3819_s20 = sadd.s32 4294967295, %s4776_s17   ;;  %s4776_s17 = sphi %s4815_s17, %s16_s17   ;;  %s4772_s16 = sphi %s4813_s16, %s5721_s16   ;;  %s4768_s15 = sphi %s4811_s15, %s5720_s15  }
   0x4   : > { %s179_s19 = sshll.u32 %s4778_s18, 4  ;;  %p3821_p0 = scmp.ge.s32.totalorder %s4776_s17, 1  ;;  %s180_s19 = int_to_ptr.vmem [resolvable:$true] %s179_s19 }
   0x5   : > { %p153_p1 = scmp.lt.s32.totalorder %s4776_s17, 3  ;;  %p4829_p2 = scmp.eq.s32.totalorder %s3819_s20, 0 }
   0x6   : > { %s28_s23 = sadd.s32 1, %s4772_s16  ;;  %s4779_s26 = smov [#allocation3]  }
   0x7   : > { %s5712_s21 = scalar_select %p4829_p2, 1, 0 }
   0x8   : > { %p4833_p3 = pnand %p3821_p0, %p153_p1  ;;  %p4846_p6 = scmp.ge.s32.totalorder %s28_s23, 2 }
   0x9   : > { %s165_s27 = sshll.u32 %s4779_s26, 4  ;;  %s4662_s30 = scalar_lea.hbm %s5706_s2, 64  ;;  %s4850_s27 = int_to_ptr.vmem [resolvable:$true] %s165_s27 }
   0xa   : > { %s5713_s22 = scalar_select %p4833_p3, 1, 0 }
   0xb   : > { %p4614_p4 = pneg %p4833_p3  ;;  %p4663_p7 = scmp.ne.s32.totalorder %s5706_s2, %s4662_s30 }
   0xc   : > { %s5715_s25 = scalar_select %p4846_p6, 1, 0 }
   0xd   : > { %p4842_p5 = pnand %p4829_p2, %p4614_p4  ;;  %p4669_p11 = scmp.lt.u32.totalorder %s4662_s30, %s5706_s2 }
   0xf   : > { %p4860_p8 = pneg %p4842_p5 }
  0x11   : > { %p4665_p9 = pnand %p4860_p8, %p4663_p7 }
  0x13   : > { %p4666_p10 = pneg %p4665_p9 }
  0x15   : > { %p4671_p12 = pnand %p4669_p11, %p4666_p10 }
  0x17   : > { %4674 = shalt.err (!%p4671_p12)
}
  0x18   : > { %s4675_s10 = scalar_lea.vmem %s180_s19, 64  ;;  %p4683_p4 = scmp.lt.s32.totalorder %s180_s19, %s180_s19 }
  0x19   : > { %p4676_p13 = scmp.ne.s32.totalorder %s180_s19, %s4675_s10  ;;  %p4684_p2 = scmp.lt.s32.totalorder %s4675_s10, %s4675_s10 }
  0x1b   : > { %p4678_p0 = pnand %p4676_p13, %p4860_p8  ;;  %p4685_p3 = por %p4684_p2, %p4683_p4 }
  0x1d   : > { %p4679_p1 = pneg %p4678_p0 }
  0x1f   : > { %p4686_p6 = pnand %p4685_p3, %p4679_p1 }
  0x21   : > { %4689 = shalt.err (!%p4686_p6)
}
  0x22   : > { %4620 = dma.hbm_to_vmem [thread:$0]  (!%p4842_p5), %s5706_s2, 64, %s180_s19, [#allocation6]  }
  0x23   : > { %p5717_p7 = scmp.ne.s32.totalorder %s5715_s25, 0  ;;  %s4690_s18 = scalar_lea.hbm %s5705_s1, 36864 }
  0x24   : > { %p4691_p2 = scmp.ne.s32.totalorder %s5705_s1, %s4690_s18  ;;  %p4697_p9 = scmp.lt.u32.totalorder %s4690_s18, %s5705_s1 }
  0x25   : > { %s5723_s23 = smov (%p5717_p7, %s28_s23), 0 }
  0x26   : > { %p4693_p3 = pnand %p4691_p2, %p4860_p8 }
  0x28   : > { %p4694_p6 = pneg %p4693_p3 }
  0x2a   : > { %p4699_p10 = pnand %p4697_p9, %p4694_p6 }
  0x2c   : > { %4702 = shalt.err (!%p4699_p10)
}
  0x2d   : > { %s4703_s19 = scalar_lea.vmem %s4850_s27, 36864  ;;  %p4711_p0 = scmp.lt.s32.totalorder %s4850_s27, %s4850_s27 }
  0x2e   : > { %p4704_p11 = scmp.ne.s32.totalorder %s4850_s27, %s4703_s19  ;;  %p4712_p1 = scmp.lt.s32.totalorder %s4703_s19, %s4703_s19 }
  0x30   : > { %p4706_p12 = pnand %p4704_p11, %p4860_p8  ;;  %p4713_p4 = por %p4712_p1, %p4711_p0 }
  0x32   : > { %p4707_p13 = pneg %p4706_p12 }
  0x34   : > { %p4714_p7 = pnand %p4713_p4, %p4707_p13 }
  0x36   : > { %4717 = shalt.err (!%p4714_p7)
}
  0x37   : > { %s4780_s25 = smov 512   ;;  %s4781_s30 = smov 32  }
  0x38   : > { %4617 = dma.hbm_to_vmem [thread:$0]  (!%p4842_p5), %s5705_s1, 36864, %s4850_s27, [#allocation4], %s4780_s25, %s4780_s25, %s4781_s30  }
  0x39   : > { %s4782_s8 = smov [#allocation7]   ;;  %s4718_s12 = scalar_lea.hbm %s5707_s3, 896 }
  0x3a   : > { %s191_s9 = sshll.u32 %s4782_s8, 4  ;;  %p4719_p2 = scmp.ne.s32.totalorder %s5707_s3, %s4718_s12  ;;  %s192_s9 = int_to_ptr.vmem [resolvable:$true] %s191_s9 }
  0x3b   : > { %p4725_p9 = scmp.lt.u32.totalorder %s4718_s12, %s5707_s3 }
  0x3c   : > { %p4721_p3 = pnand %p4719_p2, %p4860_p8 }
  0x3e   : > { %p4722_p6 = pneg %p4721_p3 }
  0x40   : > { %p4727_p10 = pnand %p4725_p9, %p4722_p6 }
  0x42   : > { %4730 = shalt.err (!%p4727_p10)
}
  0x43   : > { %s4731_s27 = scalar_lea.vmem %s192_s9, 896  ;;  %p4739_p0 = scmp.lt.s32.totalorder %s192_s9, %s192_s9 }
  0x44   : > { %p4732_p11 = scmp.ne.s32.totalorder %s192_s9, %s4731_s27  ;;  %p4740_p1 = scmp.lt.s32.totalorder %s4731_s27, %s4731_s27 }
  0x46   : > { %p4734_p12 = pnand %p4732_p11, %p4860_p8  ;;  %p4741_p4 = por %p4740_p1, %p4739_p0 }
  0x48   : > { %p4735_p13 = pneg %p4734_p12 }
  0x4a   : > { %p4742_p7 = pnand %p4741_p4, %p4735_p13 }
  0x4c   : > { %4745 = shalt.err (!%p4742_p7)
}
  0x4d   : > { %s4783_s26 = smov 128   ;;  %s4784_s28 = smov 8  }
  0x4e   : > { %4623 = dma.hbm_to_vmem [thread:$0]  (!%p4842_p5), %s5707_s3, 896, %s192_s9, [#allocation6], %s4783_s26, %s4783_s26, %s4784_s28  }
  0x4f   : > { %p5718_p2 = scmp.ne.s32.totalorder %s5713_s22, 0 }
  0x50   : > { %p5719_p3 = scmp.ne.s32.totalorder (!%p5718_p2), %s5712_s21, 0 }
  0x51   : > { %215 = sbr.rel (%p5718_p2) target bundleno = 868 (0x364), region = 36 }
  0x58   : > { %4759 = dma.done.wait (%p5719_p3), [#allocation4], 36864  }
  0x59   : > { %4761 = vsyncadd (%p5719_p3), [#allocation4], 4294930432 }
  0x5a   : > { %4763 = dma.done.wait (%p5719_p3), [#allocation6], 960  }
  0x5b   : > { %4765 = vsyncadd (%p5719_p3), [#allocation6], 4294966336  ;;  %v4785_v0 = vmov 0.0   ;;  %p249_p5 = scmp.lt.s32.totalorder %s4768_s15, 1  ;;  %v385_v1 = vld [vmem:[#allocation3 + $0x108] sm:$0xff]  ;;  %v387_v3 = vld [vmem:[#allocation3 + $0x118] sm:$0xff] }
  0x5c   : > { %497 = vmatprep.mubr.f32.mxu0 %v4785_v0  ;;  %287 = vst [vmem:[#allocation2 + $0xc0] sm:$0x1] %v4785_v0  ;;  %288 = vst [vmem:[#allocation2 + $0xc8] sm:$0x1] %v4785_v0  ;;  %610 = vmatprep.mubr.f32.mxu1 %v4785_v0  ;;  %v389_v2 = vld [vmem:[#allocation3 + $0x128] sm:$0xff]  ;;  %v391_v5 = vld [vmem:[#allocation3 + $0x138] sm:$0xff] }
  0x5d   : > { %289 = vst [vmem:[#allocation2 + $0xd0] sm:$0x1] %v4785_v0  ;;  %290 = vst [vmem:[#allocation2 + $0xd8] sm:$0x1] %v4785_v0  ;;  %s5725_s15 = smov (!%p249_p5, %s4768_s15), 1  ;;  %v4024_v4 = vpack.c.bf16 %v389_v2, %v385_v1  ;;  %v384_v6 = vld [vmem:[#allocation3 + $0x100] sm:$0xff]  ;;  %v4040_v8 = vpack.c.bf16 %v391_v5, %v387_v3 }
  0x5e   : > { %v388_v7 = vld [vmem:[#allocation3 + $0x120] sm:$0xff]  ;;  %v386_v10 = vld [vmem:[#allocation3 + $0x110] sm:$0xff]  ;;  %v393_v12 = vld [vmem:[#allocation3 + $0x148] sm:$0xff]  ;;  %s4600_s21 = smul.u32 160, %s5725_s15  ;;  %vm901_vm0 = vcmask 1045504   ;;  %vm358_vm1 = vcmask 1046528  }
  0x5f   : > { %v4026_v9 = vpack.c.bf16 %v388_v7, %v384_v6  ;;  %v390_v11 = vld [vmem:[#allocation3 + $0x130] sm:$0xff]  ;;  %4025 = vmatprep.subr.bf16.mxu0 %v4024_v4  ;;  %v397_v14 = vld [vmem:[#allocation3 + $0x168] sm:$0xff]  ;;  %v395_v15 = vld [vmem:[#allocation3 + $0x158] sm:$0xff]  ;;  %4041 = vmatprep.subr.bf16.mxu1 %v4040_v8  ;;  %vm416_vm2 = vcmask 523264   ;;  %s4601_s25 = smul.u32 224, %s5725_s15 }
  0x60   : > { %v4042_v13 = vpack.c.bf16 %v390_v11, %v386_v10  ;;  %v399_v16 = vld [vmem:[#allocation3 + $0x178] sm:$0xff]  ;;  %v4028_v17 = vpack.c.bf16 %v397_v14, %v393_v12  ;;  %v392_v19 = vld [vmem:[#allocation3 + $0x140] sm:$0xff]  ;;  %v394_v21 = vld [vmem:[#allocation3 + $0x150] sm:$0xff]  ;;  %s4945_s7 = scalar_lea.vmem %s5704_s0, %s4600_s21 }
  0x61   : > { %4027 = vmatpush1.bf16.msra.mxu0 %v4026_v9  ;;  %v4044_v18 = vpack.c.bf16 %v399_v16, %v395_v15  ;;  %v396_v20 = vld [vmem:[#allocation3 + $0x160] sm:$0xff]  ;;  %v398_v23 = vld [vmem:[#allocation3 + $0x170] sm:$0xff]  ;;  %v401_v24 = vld [vmem:[#allocation3 + $0x188] sm:$0xff]  ;;  %s5665_s6 = scalar_lea.vmem %s5708_s4, %s4601_s25 }
  0x62   : > { %4043 = vmatpush1.bf16.msra.mxu1 %v4042_v13  ;;  %v4030_v22 = vpack.c.bf16 %v396_v20, %v392_v19  ;;  %v405_v25 = vld [vmem:[#allocation3 + $0x1a8] sm:$0xff]  ;;  %4029 = vmatprep.subr.bf16.mxu0 %v4028_v17  ;;  %v4046_v26 = vpack.c.bf16 %v398_v23, %v394_v21  ;;  %v403_v28 = vld [vmem:[#allocation3 + $0x198] sm:$0xff]  ;;  %v400_v30 = vld [vmem:[#allocation3 + $0x180] sm:$0xff] }
  0x63   : > { %4045 = vmatprep.subr.bf16.mxu1 %v4044_v18  ;;  %v4032_v27 = vpack.c.bf16 %v405_v25, %v401_v24  ;;  %v407_v29 = vld [vmem:[#allocation3 + $0x1b8] sm:$0xff]  ;;  %v404_v32 = vld [vmem:[#allocation3 + $0x1a0] sm:$0xff]  ;;  %v402_v33 = vld [vmem:[#allocation3 + $0x190] sm:$0xff] }
  0x64   : > { %v4048_v31 = vpack.c.bf16 %v407_v29, %v403_v28  ;;  %v406_v34 = vld [vmem:[#allocation3 + $0x1b0] sm:$0xff]  ;;  %v4034_v35 = vpack.c.bf16 %v404_v32, %v400_v30  ;;  %v409_v36 = vld [vmem:[#allocation3 + $0x1c8] sm:$0xff]  ;;  %v411_v38 = vld [vmem:[#allocation3 + $0x1d8] sm:$0xff] }
  0x65   : > { %4031 = vmatpush1.bf16.msra.mxu0 %v4030_v22  ;;  %v413_v37 = vld [vmem:[#allocation3 + $0x1e8] sm:$0xff]  ;;  %v4050_v39 = vpack.c.bf16 %v406_v34, %v402_v33  ;;  %v415_v41 = vld [vmem:[#allocation3 + $0x1f8] sm:$0xff]  ;;  %v408_v42 = vld [vmem:[#allocation3 + $0x1c0] sm:$0xff] }
  0x66   : > { %4047 = vmatpush1.bf16.msra.mxu1 %v4046_v26  ;;  %4033 = vmatprep.subr.bf16.mxu0 %v4032_v27  ;;  %v4036_v40 = vpack.c.bf16 %v413_v37, %v409_v36  ;;  %v412_v43 = vld [vmem:[#allocation3 + $0x1e0] sm:$0xff]  ;;  %v4052_v44 = vpack.c.bf16 %v415_v41, %v411_v38  ;;  %v410_v45 = vld [vmem:[#allocation3 + $0x1d0] sm:$0xff]  ;;  %v295_v48 = vld [vmem:[%s4945_s7 + $0x8] sm:$0x3] }
  0x67   : > { %4049 = vmatprep.subr.bf16.mxu1 %v4048_v31  ;;  %v414_v46 = vld [vmem:[#allocation3 + $0x1f0] sm:$0xff]  ;;  %v4948_v47 = vld [vmem:[%s4945_s7] sm:$0xff]  ;;  %v4038_v49 = vpack.c.bf16 %v412_v43, %v408_v42  ;;  %v360_v51 = vrot.slane %v295_v48, 1  ;;  %v903_v52 = vrot.slane %v295_v48, 2  ;;  %v311_v54 = vld [vmem:[#allocation3 + $0x8] sm:$0xff] }
  0x68   : > { %v359_v50 = vrot.slane %v4948_v47, 1  ;;  %v4953_v53 = vld [vmem:[%s4945_s7 + $0x10] sm:$0xff]  ;;  %v315_v55 = vld [vmem:[#allocation3 + $0x28] sm:$0xff]  ;;  %v4054_v56 = vpack.c.bf16 %v414_v46, %v410_v45  ;;  %v4956_v57 = vld [vmem:[%s4945_s7 + $0x18] sm:$0x3]  ;;  %v902_v61 = vrot.slane %v4948_v47, 2 }
  0x69   : > { %4035 = vmatpush1.bf16.msra.mxu0 %v4034_v35  ;;  %v4056_v58 = vpack.c.bf16 %v315_v55, %v311_v54  ;;  %v313_v59 = vld [vmem:[#allocation3 + $0x18] sm:$0xff]  ;;  %v310_v63 = vld [vmem:[#allocation3] sm:$0xff]  ;;  %v312_v2 = vld [vmem:[#allocation3 + $0x10] sm:$0xff]  ;;  %v362_v6 = vrot.slane %v4953_v53, 1  ;;  %v363_v7 = vrot.slane %v4956_v57, 1 }
  0x6a   : > { %4051 = vmatpush1.bf16.msra.mxu1 %v4050_v39  ;;  %4037 = vmatprep.subr.bf16.mxu0 %v4036_v40  ;;  %v317_v60 = vld [vmem:[#allocation3 + $0x38] sm:$0xff]  ;;  %v314_v1 = vld [vmem:[#allocation3 + $0x20] sm:$0xff]  ;;  %v316_v3 = vld [vmem:[#allocation3 + $0x30] sm:$0xff]  ;;  %v4960_v4 = vsel %vm901_vm0, %v902_v61, %v903_v52  ;;  %v361_v5 = vsel %vm358_vm1, %v359_v50, %v360_v51 }
  0x6b   : > { %4053 = vmatprep.subr.bf16.mxu1 %v4052_v44  ;;  %v4072_v62 = vpack.c.bf16 %v317_v60, %v313_v59  ;;  %v4966_v8 = vld [vmem:[%s4945_s7 + $0x20] sm:$0xff]  ;;  %v4969_v9 = vld [vmem:[%s4945_s7 + $0x28] sm:$0x3]  ;;  %v4058_v11 = vpack.c.bf16 %v314_v1, %v310_v63  ;;  %v321_v13 = vld [vmem:[#allocation3 + $0x58] sm:$0xff]  ;;  %v4074_v15 = vpack.c.bf16 %v316_v3, %v312_v2  ;;  %v364_v22 = vsel %vm358_vm1, %v362_v6, %v363_v7 }
  0x6c   : > { %v319_v10 = vld [vmem:[#allocation3 + $0x48] sm:$0xff]  ;;  %v325_v14 = vld [vmem:[#allocation3 + $0x78] sm:$0xff]  ;;  %v318_v17 = vld [vmem:[#allocation3 + $0x40] sm:$0xff]  ;;  %v365_v23 = vrot.slane %v4966_v8, 1  ;;  %v366_v24 = vrot.slane %v4969_v9, 1 }
  0x6d   : > { %4039 = vmatpush1.bf16.msra.mxu0 %v4038_v49  ;;  %v323_v12 = vld [vmem:[#allocation3 + $0x68] sm:$0xff]  ;;  %v322_v18 = vld [vmem:[#allocation3 + $0x60] sm:$0xff]  ;;  %v4076_v19 = vpack.c.bf16 %v325_v14, %v321_v13  ;;  %v320_v20 = vld [vmem:[#allocation3 + $0x50] sm:$0xff] }
  0x6e   : > { %4055 = vmatpush1.bf16.msra.mxu1 %v4054_v56  ;;  %4057 = vmatprep.subr.bf16.mxu0 %v4056_v58  ;;  %v4060_v16 = vpack.c.bf16 %v323_v12, %v319_v10  ;;  %v324_v21 = vld [vmem:[#allocation3 + $0x70] sm:$0xff]  ;;  %v4983_v26 = vld [vmem:[%s4945_s7 + $0x38] sm:$0x3]  ;;  %v327_v27 = vld [vmem:[#allocation3 + $0x88] sm:$0xff]  ;;  %v4062_v28 = vpack.c.bf16 %v322_v18, %v318_v17  ;;  %v367_v39 = vsel %vm358_vm1, %v365_v23, %v366_v24 }
  0x6f   : > { %4073 = vmatprep.subr.bf16.mxu1 %v4072_v62  ;;  %v4980_v25 = vld [vmem:[%s4945_s7 + $0x30] sm:$0xff]  ;;  %v331_v29 = vld [vmem:[#allocation3 + $0xa8] sm:$0xff]  ;;  %v329_v30 = vld [vmem:[#allocation3 + $0x98] sm:$0xff]  ;;  %v4078_v32 = vpack.c.bf16 %v324_v21, %v320_v20  ;;  %v369_v41 = vrot.slane %v4983_v26, 1 }
  0x70   : > { %3832 = vmatmul.mubr.msk.f32.vlgmr.msra.gmra.mrb[0].mxu0 %vm416_vm2, %v361_v5  ;;  %v333_v31 = vld [vmem:[#allocation3 + $0xb8] sm:$0xff]  ;;  %v4064_v33 = vpack.c.bf16 %v331_v29, %v327_v27  ;;  %v326_v34 = vld [vmem:[#allocation3 + $0x80] sm:$0xff]  ;;  %v328_v37 = vld [vmem:[#allocation3 + $0x90] sm:$0xff]  ;;  %v368_v40 = vrot.slane %v4980_v25, 1 }
  0x71   : > { %3840 = vmatmul.mubr.msk.f32.vlgmr.msra.gmra.mrb[0].mxu1 %vm416_vm2, %v361_v5  ;;  %503 = vmatprep.mubr.f32.mxu0 %v4785_v0  ;;  %v330_v35 = vld [vmem:[#allocation3 + $0xa0] sm:$0xff]  ;;  %v4080_v36 = vpack.c.bf16 %v333_v31, %v329_v30  ;;  %v332_v38 = vld [vmem:[#allocation3 + $0xb0] sm:$0xff]  ;;  %v4998_v43 = vld [vmem:[%s4945_s7 + $0x48] sm:$0x3] }
  0x72   : > { %616 = vmatprep.mubr.f32.mxu1 %v4785_v0  ;;  %4059 = vmatpush1.bf16.msra.mxu0 %v4058_v11  ;;  %v4995_v42 = vld [vmem:[%s4945_s7 + $0x40] sm:$0xff]  ;;  %v335_v44 = vld [vmem:[#allocation3 + $0xc8] sm:$0xff]  ;;  %v4066_v45 = vpack.c.bf16 %v330_v35, %v326_v34  ;;  %v337_v48 = vld [vmem:[#allocation3 + $0xd8] sm:$0xff]  ;;  %v4082_v50 = vpack.c.bf16 %v332_v38, %v328_v37  ;;  %v370_v61 = vsel %vm358_vm1, %v368_v40, %v369_v41  ;;  %v372_v63 = vrot.slane %v4998_v43, 1 }
  0x73   : > { %4075 = vmatpush1.bf16.msra.mxu1 %v4074_v15  ;;  %4061 = vmatprep.subr.bf16.mxu0 %v4060_v16  ;;  %v339_v46 = vld [vmem:[#allocation3 + $0xe8] sm:$0xff]  ;;  %v341_v49 = vld [vmem:[#allocation3 + $0xf8] sm:$0xff]  ;;  %v334_v52 = vld [vmem:[#allocation3 + $0xc0] sm:$0xff]  ;;  %v371_v62 = vrot.slane %v4995_v42, 1 }
  0x74   : > { %3833 = vmatmul.mubr.msk.f32.gmra.mrb[2].mxu0 %vm416_vm2, %v364_v22  ;;  %4077 = vmatprep.subr.bf16.mxu1 %v4076_v19  ;;  %v4068_v51 = vpack.c.bf16 %v339_v46, %v335_v44  ;;  %v338_v54 = vld [vmem:[#allocation3 + $0xe0] sm:$0xff]  ;;  %v336_v55 = vld [vmem:[#allocation3 + $0xd0] sm:$0xff]  ;;  %v4084_v56 = vpack.c.bf16 %v341_v49, %v337_v48  ;;  %v928_v59 = vld [vmem:[#allocation3 + $0x208] sm:$0xff] }
  0x75   : > { %3841 = vmatmul.mubr.msk.f32.gmra.mrb[2].mxu1 %vm416_vm2, %v364_v22  ;;  %509 = vmatprep.mubr.f32.mxu0 %v4785_v0  ;;  %v340_v58 = vld [vmem:[#allocation3 + $0xf0] sm:$0xff]  ;;  %v932_v60 = vld [vmem:[#allocation3 + $0x228] sm:$0xff]  ;;  %v930_v1 = vld [vmem:[#allocation3 + $0x218] sm:$0xff]  ;;  %v4070_v7 = vpack.c.bf16 %v338_v54, %v334_v52  ;;  %v373_v13 = vsel %vm358_vm1, %v371_v62, %v372_v63 }
  0x76   : > { %622 = vmatprep.mubr.f32.mxu1 %v4785_v0  ;;  %4063 = vmatpush1.bf16.msra.mxu0 %v4062_v28  ;;  %v934_v2 = vld [vmem:[#allocation3 + $0x238] sm:$0xff]  ;;  %v5011_v3 = vld [vmem:[%s4945_s7 + $0x50] sm:$0xff]  ;;  %v4086_v10 = vpack.c.bf16 %v340_v58, %v336_v55  ;;  %v4088_v11 = vpack.c.bf16 %v932_v60, %v928_v59  ;;  %v5026_v16 = vld [vmem:[%s4945_s7 + $0x60] sm:$0xff] }
  0x77   : > { %4079 = vmatpush1.bf16.msra.mxu1 %v4078_v32  ;;  %4065 = vmatprep.subr.bf16.mxu0 %v4064_v33  ;;  %v5014_v5 = vld [vmem:[%s4945_s7 + $0x58] sm:$0x3]  ;;  %v4104_v12 = vpack.c.bf16 %v934_v2, %v930_v1  ;;  %v374_v14 = vrot.slane %v5011_v3, 1  ;;  %v5029_v17 = vld [vmem:[%s4945_s7 + $0x68] sm:$0x3]  ;;  %v377_v19 = vrot.slane %v5026_v16, 1 }
  0x78   : > { %3834 = vmatmul.mubr.msk.f32.gmra.mrb[4].mxu0 %vm416_vm2, %v367_v39  ;;  %4081 = vmatprep.subr.bf16.mxu1 %v4080_v36  ;;  %v375_v15 = vrot.slane %v5014_v5, 1  ;;  %v378_v20 = vrot.slane %v5029_v17, 1  ;;  %v5041_v21 = vld [vmem:[%s4945_s7 + $0x70] sm:$0xff]  ;;  %v5044_v22 = vld [vmem:[%s4945_s7 + $0x78] sm:$0x3]  ;;  %v927_v30 = vld [vmem:[#allocation3 + $0x200] sm:$0xff] }
  0x79   : > { %3842 = vmatmul.mubr.msk.f32.gmra.mrb[4].mxu1 %vm416_vm2, %v367_v39  ;;  %515 = vmatprep.mubr.f32.mxu0 %v4785_v0  ;;  %v380_v27 = vrot.slane %v5041_v21, 1  ;;  %v381_v28 = vrot.slane %v5044_v22, 1  ;;  %v931_v31 = vld [vmem:[#allocation3 + $0x220] sm:$0xff]  ;;  %v929_v32 = vld [vmem:[#allocation3 + $0x210] sm:$0xff]  ;;  %v936_v34 = vld [vmem:[#allocation3 + $0x248] sm:$0xff] }
  0x7a   : > { %628 = vmatprep.mubr.f32.mxu1 %v4785_v0  ;;  %4067 = vmatpush1.bf16.msra.mxu0 %v4066_v45  ;;  %v376_v18 = vsel %vm358_vm1, %v374_v14, %v375_v15  ;;  %v379_v24 = vsel %vm358_vm1, %v377_v19, %v378_v20  ;;  %v933_v33 = vld [vmem:[#allocation3 + $0x230] sm:$0xff]  ;;  %v940_v35 = vld [vmem:[#allocation3 + $0x268] sm:$0xff]  ;;  %v938_v36 = vld [vmem:[#allocation3 + $0x258] sm:$0xff]  ;;  %v4090_v38 = vpack.c.bf16 %v931_v31, %v927_v30 }
  0x7b   : > { %4083 = vmatpush1.bf16.msra.mxu1 %v4082_v50  ;;  %4069 = vmatprep.subr.bf16.mxu0 %v4068_v51  ;;  %v382_v29 = vsel %vm358_vm1, %v380_v27, %v381_v28  ;;  %v942_v37 = vld [vmem:[#allocation3 + $0x278] sm:$0xff]  ;;  %v4106_v39 = vpack.c.bf16 %v933_v33, %v929_v32  ;;  %v4092_v41 = vpack.c.bf16 %v940_v35, %v936_v34  ;;  %v935_v44 = vld [vmem:[#allocation3 + $0x240] sm:$0xff]  ;;  %v937_v46 = vld [vmem:[#allocation3 + $0x250] sm:$0xff] }
  0x7c   : > { %3835 = vmatmul.mubr.msk.f32.gmra.mrb[6].mxu0 %vm416_vm2, %v370_v61  ;;  %4085 = vmatprep.subr.bf16.mxu1 %v4084_v56  ;;  %v939_v45 = vld [vmem:[#allocation3 + $0x260] sm:$0xff]  ;;  %v4108_v48 = vpack.c.bf16 %v942_v37, %v938_v36  ;;  %v941_v49 = vld [vmem:[#allocation3 + $0x270] sm:$0xff]  ;;  %v944_v50 = vld [vmem:[#allocation3 + $0x288] sm:$0xff] }
  0x7d   : > { %3843 = vmatmul.mubr.msk.f32.gmra.mrb[6].mxu1 %vm416_vm2, %v370_v61  ;;  %521 = vmatprep.mubr.f32.mxu0 %v4785_v0  ;;  %v948_v51 = vld [vmem:[#allocation3 + $0x2a8] sm:$0xff]  ;;  %v946_v52 = vld [vmem:[#allocation3 + $0x298] sm:$0xff]  ;;  %v4094_v55 = vpack.c.bf16 %v939_v45, %v935_v44  ;;  %v4110_v56 = vpack.c.bf16 %v941_v49, %v937_v46  ;;  %v943_v59 = vld [vmem:[#allocation3 + $0x280] sm:$0xff]  ;;  %v905_v46 = vrot.slane %v4953_v53, 2 }
  0x7e   : > { %634 = vmatprep.mubr.f32.mxu1 %v4785_v0  ;;  %4071 = vmatpush1.bf16.msra.mxu0 %v4070_v7  ;;  %v950_v54 = vld [vmem:[#allocation3 + $0x2b8] sm:$0xff]  ;;  %v4096_v58 = vpack.c.bf16 %v948_v51, %v944_v50  ;;  %v947_v60 = vld [vmem:[#allocation3 + $0x2a0] sm:$0xff]  ;;  %v945_v61 = vld [vmem:[#allocation3 + $0x290] sm:$0xff] }
  0x7f   : > { %4087 = vmatpush1.bf16.msra.mxu1 %v4086_v10  ;;  %4089 = vmatprep.subr.bf16.mxu0 %v4088_v11  ;;  %v949_v63 = vld [vmem:[#allocation3 + $0x2b0] sm:$0xff]  ;;  %v952_v1 = vld [vmem:[#allocation3 + $0x2c8] sm:$0xff]  ;;  %v954_v7 = vld [vmem:[#allocation3 + $0x2d8] sm:$0xff]  ;;  %v4098_v11 = vpack.c.bf16 %v947_v60, %v943_v59 }
  0x80   : > { %3836 = vmatmul.mubr.msk.f32.gmra.mrb[8].mxu0 %vm416_vm2, %v373_v13  ;;  %4105 = vmatprep.subr.bf16.mxu1 %v4104_v12  ;;  %v956_v2 = vld [vmem:[#allocation3 + $0x2e8] sm:$0xff]  ;;  %v958_v10 = vld [vmem:[#allocation3 + $0x2f8] sm:$0xff]  ;;  %v4114_v12 = vpack.c.bf16 %v949_v63, %v945_v61  ;;  %v951_v15 = vld [vmem:[#allocation3 + $0x2c0] sm:$0xff]  ;;  %v908_v63 = vrot.slane %v4966_v8, 2 }
  0x81   : > { %3844 = vmatmul.mubr.msk.f32.gmra.mrb[8].mxu1 %vm416_vm2, %v373_v13  ;;  %527 = vmatprep.mubr.f32.mxu0 %v4785_v0  ;;  %v4100_v13 = vpack.c.bf16 %v956_v2, %v952_v1  ;;  %v953_v20 = vld [vmem:[#allocation3 + $0x2d0] sm:$0xff]  ;;  %v1258_v30 = vld [vmem:[#allocation3 + $0x328] sm:$0xff]  ;;  %v1256_v31 = vld [vmem:[#allocation3 + $0x318] sm:$0xff]  ;;  %v909_v1 = vrot.slane %v4969_v9, 2 }
  0x82   : > { %640 = vmatprep.mubr.f32.mxu1 %v4785_v0  ;;  %v957_v28 = vld [vmem:[#allocation3 + $0x2f0] sm:$0xff]  ;;  %v1260_v32 = vld [vmem:[#allocation3 + $0x338] sm:$0xff]  ;;  %v1253_v37 = vld [vmem:[#allocation3 + $0x300] sm:$0xff] }
  0x83   : > { %v4118_v34 = vpack.c.bf16 %v957_v28, %v953_v20  ;;  %v4136_v36 = vpack.c.bf16 %v1260_v32, %v1256_v31  ;;  %v1262_v44 = vld [vmem:[#allocation3 + $0x348] sm:$0xff]  ;;  %v1264_v49 = vld [vmem:[#allocation3 + $0x358] sm:$0xff]  ;;  %v1267_v60 = vld [vmem:[#allocation3 + $0x370] sm:$0xff]  ;;  %v910_v28 = vsel %vm901_vm0, %v908_v63, %v909_v1  ;;  %v924_v1 = vrot.slane %v5044_v22, 2 }
  0x84   : > { %3837 = vmatmul.mubr.msk.f32.gmra.mrb[10].mxu0 %vm416_vm2, %v376_v18  ;;  %v1266_v45 = vld [vmem:[#allocation3 + $0x368] sm:$0xff]  ;;  %v1268_v50 = vld [vmem:[#allocation3 + $0x378] sm:$0xff]  ;;  %v1275_v20 = vld [vmem:[#allocation3 + $0x3b0] sm:$0xff] }
  0x85   : > { %3845 = vmatmul.mubr.msk.f32.gmra.mrb[10].mxu1 %vm416_vm2, %v376_v18  ;;  %533 = vmatprep.mubr.f32.mxu0 %v4785_v0  ;;  %v955_v18 = vld [vmem:[#allocation3 + $0x2e0] sm:$0xff]  ;;  %v4140_v59 = vpack.c.bf16 %v1268_v50, %v1264_v49  ;;  %v1270_v61 = vld [vmem:[#allocation3 + $0x388] sm:$0xff]  ;;  %v1272_v2 = vld [vmem:[#allocation3 + $0x398] sm:$0xff]  ;;  %v915_v49 = vrot.slane %v4998_v43, 2 }
  0x86   : > { %646 = vmatprep.mubr.f32.mxu1 %v4785_v0  ;;  %v4102_v33 = vpack.c.bf16 %v955_v18, %v951_v15  ;;  %v1271_v15 = vld [vmem:[#allocation3 + $0x390] sm:$0xff]  ;;  %v1282_v9 = vld [vmem:[#allocation3 + $0x3e8] sm:$0xff]  ;;  %v1280_v31 = vld [vmem:[#allocation3 + $0x3d8] sm:$0xff] }
  0x87   : > { %v1284_v32 = vld [vmem:[#allocation3 + $0x3f8] sm:$0xff]  ;;  %v1606_v22 = vld [vmem:[#allocation3 + $0x430] sm:$0xff] }
  0x88   : > { %3838 = vmatmul.mubr.msk.f32.gmra.mrb[12].mxu0 %vm416_vm2, %v379_v24  ;;  %v1603_v50 = vld [vmem:[#allocation3 + $0x418] sm:$0xff] }
  0x89   : > { %3846 = vmatmul.mubr.msk.f32.gmra.mrb[12].mxu1 %vm416_vm2, %v379_v24  ;;  %539 = vmatprep.mubr.f32.mxu0 %v4785_v0  ;;  %v4116_v24 = vpack.c.bf16 %v958_v10, %v954_v7  ;;  %v1276_v7 = vld [vmem:[#allocation3 + $0x3b8] sm:$0xff] }
  0x8a   : > { %652 = vmatprep.mubr.f32.mxu1 %v4785_v0  ;;  %v4144_v18 = vpack.c.bf16 %v1276_v7, %v1272_v2  ;;  %v1600_v2 = vld [vmem:[#allocation3 + $0x400] sm:$0xff] }
  0x8b   : > { %v1604_v7 = vld [vmem:[#allocation3 + $0x420] sm:$0xff] }
  0x8c   : > { %3839 = vmatmul.mubr.msk.f32.gmra.mrb[14].mxu0 %vm416_vm2, %v382_v29 }
  0x8d   : > { %3847 = vmatmul.mubr.msk.f32.gmra.mrb[14].mxu1 %vm416_vm2, %v382_v29  ;;  %739 = vmatprep.mubr.f32.mxu0 %v4785_v0  ;;  %v1254_v29 = vld [vmem:[#allocation3 + $0x308] sm:$0xff] }
  0x8e   : > { %852 = vmatprep.mubr.f32.mxu1 %v4785_v0  ;;  %v4120_v35 = vpack.c.bf16 %v1258_v30, %v1254_v29  ;;  %v911_v29 = vrot.slane %v4980_v25, 2  ;;  %v912_v30 = vrot.slane %v4983_v26, 2  ;;  %v1605_v26 = vld [vmem:[#allocation3 + $0x428] sm:$0xff] }
  0x90   : > { %3848 = vmatmul.mubr.msk.f32.vlgmr.msra.gmra.mrb[0].mxu0 %vm416_vm2, %v4948_v47 }
  0x91   : > { %3856 = vmatmul.mubr.msk.f32.vlgmr.msra.gmra.mrb[0].mxu1 %vm416_vm2, %v4948_v47  ;;  %745 = vmatprep.mubr.f32.mxu0 %v4785_v0  ;;  %v4112_v47 = vpack.c.bf16 %v950_v54, %v946_v52  ;;  %v4124_v54 = vpack.c.bf16 %v1266_v45, %v1262_v44  ;;  %v1601_v44 = vld [vmem:[#allocation3 + $0x408] sm:$0xff]  ;;  %v913_v45 = vsel %vm901_vm0, %v911_v29, %v912_v30 }
  0x92   : > { %858 = vmatprep.mubr.f32.mxu1 %v4785_v0  ;;  %4091 = vmatpush1.bf16.msra.mxu0 %v4090_v38  ;;  %v1257_v38 = vld [vmem:[#allocation3 + $0x320] sm:$0xff] }
  0x93   : > { %4107 = vmatpush1.bf16.msra.mxu1 %v4106_v39  ;;  %4093 = vmatprep.subr.bf16.mxu0 %v4092_v41  ;;  %v1255_v39 = vld [vmem:[#allocation3 + $0x310] sm:$0xff]  ;;  %v4122_v51 = vpack.c.bf16 %v1257_v38, %v1253_v37  ;;  %v1281_v37 = vld [vmem:[#allocation3 + $0x3e0] sm:$0xff] }
  0x94   : > { %3849 = vmatmul.mubr.msk.f32.gmra.mrb[2].mxu0 %vm416_vm2, %v4953_v53  ;;  %4109 = vmatprep.subr.bf16.mxu1 %v4108_v48  ;;  %v1259_v41 = vld [vmem:[#allocation3 + $0x330] sm:$0xff]  ;;  %v906_v48 = vrot.slane %v4956_v57, 2 }
  0x95   : > { %3857 = vmatmul.mubr.msk.f32.gmra.mrb[2].mxu1 %vm416_vm2, %v4953_v53  ;;  %751 = vmatprep.mubr.f32.mxu0 %v4785_v0  ;;  %v4138_v52 = vpack.c.bf16 %v1259_v41, %v1255_v39  ;;  %v1279_v38 = vld [vmem:[#allocation3 + $0x3d0] sm:$0xff]  ;;  %v4148_v39 = vpack.c.bf16 %v1284_v32, %v1280_v31  ;;  %v1617_v32 = vld [vmem:[#allocation3 + $0x488] sm:$0xff] }
  0x96   : > { %864 = vmatprep.mubr.f32.mxu1 %v4785_v0  ;;  %4095 = vmatpush1.bf16.msra.mxu0 %v4094_v55  ;;  %v1261_v55 = vld [vmem:[#allocation3 + $0x340] sm:$0xff]  ;;  %v907_v57 = vsel %vm901_vm0, %v905_v46, %v906_v48  ;;  %v1283_v41 = vld [vmem:[#allocation3 + $0x3f0] sm:$0xff]  ;;  %v914_v48 = vrot.slane %v4995_v42, 2 }
  0x97   : > { %4111 = vmatpush1.bf16.msra.mxu1 %v4110_v56  ;;  %4097 = vmatprep.subr.bf16.mxu0 %v4096_v58  ;;  %v1265_v56 = vld [vmem:[#allocation3 + $0x360] sm:$0xff]  ;;  %v1263_v58 = vld [vmem:[#allocation3 + $0x350] sm:$0xff] }
  0x98   : > { %3850 = vmatmul.mubr.msk.f32.gmra.mrb[4].mxu0 %vm416_vm2, %v4966_v8  ;;  %4113 = vmatprep.subr.bf16.mxu1 %v4112_v47  ;;  %v1274_v47 = vld [vmem:[#allocation3 + $0x3a8] sm:$0xff]  ;;  %v4126_v10 = vpack.c.bf16 %v1265_v56, %v1261_v55  ;;  %v4152_v55 = vpack.c.bf16 %v1605_v26, %v1601_v44  ;;  %v916_v43 = vsel %vm901_vm0, %v914_v48, %v915_v49  ;;  %v1614_v31 = vld [vmem:[#allocation3 + $0x470] sm:$0xff] }
  0x99   : > { %3858 = vmatmul.mubr.msk.f32.gmra.mrb[4].mxu1 %vm416_vm2, %v4966_v8  ;;  %757 = vmatprep.mubr.f32.mxu0 %v4785_v0  ;;  %v1618_v44 = vld [vmem:[#allocation3 + $0x490] sm:$0xff]  ;;  %v1625_v49 = vld [vmem:[#allocation3 + $0x4c8] sm:$0xff] }
  0x9a   : > { %870 = vmatprep.mubr.f32.mxu1 %v4785_v0  ;;  %4099 = vmatpush1.bf16.msra.mxu0 %v4098_v11  ;;  %v4142_v11 = vpack.c.bf16 %v1267_v60, %v1263_v58  ;;  %v917_v58 = vrot.slane %v5011_v3, 2 }
  0x9b   : > { %4115 = vmatpush1.bf16.msra.mxu1 %v4114_v12  ;;  %4101 = vmatprep.subr.bf16.mxu0 %v4100_v13  ;;  %v1269_v12 = vld [vmem:[#allocation3 + $0x380] sm:$0xff] }
  0x9c   : > { %3851 = vmatmul.mubr.msk.f32.gmra.mrb[6].mxu0 %vm416_vm2, %v4980_v25  ;;  %4117 = vmatprep.subr.bf16.mxu1 %v4116_v24  ;;  %v1273_v13 = vld [vmem:[#allocation3 + $0x3a0] sm:$0xff]  ;;  %v1278_v24 = vld [vmem:[#allocation3 + $0x3c8] sm:$0xff] }
  0x9d   : > { %3859 = vmatmul.mubr.msk.f32.gmra.mrb[6].mxu1 %vm416_vm2, %v4980_v25  ;;  %763 = vmatprep.mubr.f32.mxu0 %v4785_v0 }
  0x9e   : > { %876 = vmatprep.mubr.f32.mxu1 %v4785_v0  ;;  %4103 = vmatpush1.bf16.msra.mxu0 %v4102_v33  ;;  %v4130_v33 = vpack.c.bf16 %v1273_v13, %v1269_v12  ;;  %v1611_v12 = vld [vmem:[#allocation3 + $0x458] sm:$0xff] }
  0x9f   : > { %4119 = vmatpush1.bf16.msra.mxu1 %v4118_v34  ;;  %4121 = vmatprep.subr.bf16.mxu0 %v4120_v35  ;;  %v4146_v34 = vpack.c.bf16 %v1275_v20, %v1271_v15  ;;  %v4132_v35 = vpack.c.bf16 %v1282_v9, %v1278_v24  ;;  %v1615_v13 = vld [vmem:[#allocation3 + $0x478] sm:$0xff]  ;;  %v4154_v15 = vpack.c.bf16 %v1604_v7, %v1600_v2  ;;  %v1608_v24 = vld [vmem:[#allocation3 + $0x440] sm:$0xff] }
  0xa0   : > { %3852 = vmatmul.mubr.msk.f32.gmra.mrb[8].mxu0 %vm416_vm2, %v4995_v42  ;;  %4137 = vmatprep.subr.bf16.mxu1 %v4136_v36  ;;  %v1277_v36 = vld [vmem:[#allocation3 + $0x3c0] sm:$0xff]  ;;  %v4172_v30 = vpack.c.bf16 %v1615_v13, %v1611_v12  ;;  %v1934_v2 = vld [vmem:[#allocation3 + $0x518] sm:$0xff] }
  0xa1   : > { %3860 = vmatmul.mubr.msk.f32.gmra.mrb[8].mxu1 %vm416_vm2, %v4995_v42  ;;  %769 = vmatprep.mubr.f32.mxu0 %v4785_v0  ;;  %v1612_v9 = vld [vmem:[#allocation3 + $0x460] sm:$0xff]  ;;  %v1938_v7 = vld [vmem:[#allocation3 + $0x538] sm:$0xff] }
  0xa2   : > { %882 = vmatprep.mubr.f32.mxu1 %v4785_v0  ;;  %v5220_v12 = vld [vmem:[%s4945_s7 + $0x18] sm:$0x3]  ;;  %v5228_v13 = vld [vmem:[%s4945_s7 + $0x80] sm:$0xff] }
  0xa4   : > { %3853 = vmatmul.mubr.msk.f32.gmra.mrb[10].mxu0 %vm416_vm2, %v5011_v3 }
  0xa5   : > { %3861 = vmatmul.mubr.msk.f32.gmra.mrb[10].mxu1 %vm416_vm2, %v5011_v3  ;;  %775 = vmatprep.mubr.f32.mxu0 %v4785_v0 }
  0xa6   : > { %888 = vmatprep.mubr.f32.mxu1 %v4785_v0 }
  0xa8   : > { %3854 = vmatmul.mubr.msk.f32.gmra.mrb[12].mxu0 %vm416_vm2, %v5026_v16 }
  0xa9   : > { %3862 = vmatmul.mubr.msk.f32.gmra.mrb[12].mxu1 %vm416_vm2, %v5026_v16  ;;  %781 = vmatprep.mubr.f32.mxu0 %v4785_v0 }
  0xaa   : > { %894 = vmatprep.mubr.f32.mxu1 %v4785_v0 }
  0xac   : > { %3855 = vmatmul.mubr.msk.f32.gmra.mrb[14].mxu0 %vm416_vm2, %v5041_v21 }
  0xad   : > { %3863 = vmatmul.mubr.msk.f32.gmra.mrb[14].mxu1 %vm416_vm2, %v5041_v21  ;;  %1039 = vmatprep.mubr.f32.mxu0 %v4785_v0 }
  0xae   : > { %1152 = vmatprep.mubr.f32.mxu1 %v4785_v0 }
  0xb0   : > { %3864 = vmatmul.mubr.msk.f32.vlgmr.msra.gmra.mrb[0].mxu0 %vm416_vm2, %v4960_v4 }
  0xb1   : > { %3872 = vmatmul.mubr.msk.f32.vlgmr.msra.gmra.mrb[0].mxu1 %vm416_vm2, %v4960_v4  ;;  %1045 = vmatprep.mubr.f32.mxu0 %v4785_v0  ;;  %v4128_v4 = vpack.c.bf16 %v1274_v47, %v1270_v61  ;;  %v920_v61 = vrot.slane %v5026_v16, 2 }
  0xb2   : > { %1158 = vmatprep.mubr.f32.mxu1 %v4785_v0  ;;  %4123 = vmatpush1.bf16.msra.mxu0 %v4122_v51  ;;  %v1607_v51 = vld [vmem:[#allocation3 + $0x438] sm:$0xff] }
  0xb3   : > { %4139 = vmatpush1.bf16.msra.mxu1 %v4138_v52  ;;  %4125 = vmatprep.subr.bf16.mxu0 %v4124_v54  ;;  %v4134_v52 = vpack.c.bf16 %v1281_v37, %v1277_v36  ;;  %v4150_v54 = vpack.c.bf16 %v1283_v41, %v1279_v38  ;;  %v4168_v56 = vpack.c.bf16 %v1607_v51, %v1603_v50  ;;  %v1620_v41 = vld [vmem:[#allocation3 + $0x4a0] sm:$0xff]  ;;  %v1629_v50 = vld [vmem:[#allocation3 + $0x4e8] sm:$0xff]  ;;  %v1627_v51 = vld [vmem:[#allocation3 + $0x4d8] sm:$0xff] }
  0xb4   : > { %3865 = vmatmul.mubr.msk.f32.gmra.mrb[2].mxu0 %vm416_vm2, %v907_v57  ;;  %4141 = vmatprep.subr.bf16.mxu1 %v4140_v59  ;;  %v918_v59 = vrot.slane %v5014_v5, 2  ;;  %v921_v5 = vrot.slane %v5029_v17, 2  ;;  %v4158_v36 = vpack.c.bf16 %v1612_v9, %v1608_v24  ;;  %v1935_v24 = vld [vmem:[#allocation3 + $0x520] sm:$0xff]  ;;  %v1933_v9 = vld [vmem:[#allocation3 + $0x510] sm:$0xff] }
  0xb5   : > { %3873 = vmatmul.mubr.msk.f32.gmra.mrb[2].mxu1 %vm416_vm2, %v907_v57  ;;  %1051 = vmatprep.mubr.f32.mxu0 %v4785_v0  ;;  %v923_v57 = vrot.slane %v5041_v21, 2 }
  0xb6   : > { %1164 = vmatprep.mubr.f32.mxu1 %v4785_v0  ;;  %4127 = vmatpush1.bf16.msra.mxu0 %v4126_v10  ;;  %v919_v60 = vsel %vm901_vm0, %v917_v58, %v918_v59  ;;  %v922_v47 = vsel %vm901_vm0, %v920_v61, %v921_v5  ;;  %v1602_v10 = vld [vmem:[#allocation3 + $0x410] sm:$0xff]  ;;  %v1628_v59 = vld [vmem:[#allocation3 + $0x4e0] sm:$0xff] }
  0xb7   : > { %4143 = vmatpush1.bf16.msra.mxu1 %v4142_v11  ;;  %4129 = vmatprep.subr.bf16.mxu0 %v4128_v4  ;;  %v925_v17 = vsel %vm901_vm0, %v923_v57, %v924_v1  ;;  %v1609_v11 = vld [vmem:[#allocation3 + $0x448] sm:$0xff] }
  0xb8   : > { %3866 = vmatmul.mubr.msk.f32.gmra.mrb[4].mxu0 %vm416_vm2, %v910_v28  ;;  %4145 = vmatprep.subr.bf16.mxu1 %v4144_v18  ;;  %v1613_v4 = vld [vmem:[#allocation3 + $0x468] sm:$0xff]  ;;  %v4170_v18 = vpack.c.bf16 %v1606_v22, %v1602_v10 }
  0xb9   : > { %3874 = vmatmul.mubr.msk.f32.gmra.mrb[4].mxu1 %vm416_vm2, %v910_v28  ;;  %1057 = vmatprep.mubr.f32.mxu0 %v4785_v0  ;;  %v4156_v20 = vpack.c.bf16 %v1613_v4, %v1609_v11  ;;  %v1610_v28 = vld [vmem:[#allocation3 + $0x450] sm:$0xff]  ;;  %v1932_v1 = vld [vmem:[#allocation3 + $0x508] sm:$0xff]  ;;  %v4200_v4 = vpack.c.bf16 %v1938_v7, %v1934_v2 }
  0xba   : > { %1170 = vmatprep.mubr.f32.mxu1 %v4785_v0  ;;  %4131 = vmatpush1.bf16.msra.mxu0 %v4130_v33  ;;  %v1621_v33 = vld [vmem:[#allocation3 + $0x4a8] sm:$0xff]  ;;  %v4174_v37 = vpack.c.bf16 %v1614_v31, %v1610_v28  ;;  %v1937_v28 = vld [vmem:[#allocation3 + $0x530] sm:$0xff] }
  0xbb   : > { %4147 = vmatpush1.bf16.msra.mxu1 %v4146_v34  ;;  %4133 = vmatprep.subr.bf16.mxu0 %v4132_v35  ;;  %v1619_v34 = vld [vmem:[#allocation3 + $0x498] sm:$0xff]  ;;  %v4160_v38 = vpack.c.bf16 %v1621_v33, %v1617_v32  ;;  %v1944_v31 = vld [vmem:[#allocation3 + $0x568] sm:$0xff] }
  0xbc   : > { %3867 = vmatmul.mubr.msk.f32.gmra.mrb[6].mxu0 %vm416_vm2, %v913_v45  ;;  %4149 = vmatprep.subr.bf16.mxu1 %v4148_v39  ;;  %v1623_v35 = vld [vmem:[#allocation3 + $0x4b8] sm:$0xff]  ;;  %v1616_v39 = vld [vmem:[#allocation3 + $0x480] sm:$0xff]  ;;  %v1956_v2 = vld [vmem:[#allocation3 + $0x5c8] sm:$0xff] }
  0xbd   : > { %3875 = vmatmul.mubr.msk.f32.gmra.mrb[6].mxu1 %vm416_vm2, %v913_v45  ;;  %1063 = vmatprep.mubr.f32.mxu0 %v4785_v0  ;;  %v4176_v26 = vpack.c.bf16 %v1623_v35, %v1619_v34  ;;  %v1622_v45 = vld [vmem:[#allocation3 + $0x4b0] sm:$0xff]  ;;  %v1942_v34 = vld [vmem:[#allocation3 + $0x558] sm:$0xff]  ;;  %v1960_v7 = vld [vmem:[#allocation3 + $0x5e8] sm:$0xff] }
  0xbe   : > { %1176 = vmatprep.mubr.f32.mxu1 %v4785_v0  ;;  %4135 = vmatpush1.bf16.msra.mxu0 %v4134_v52  ;;  %v1631_v52 = vld [vmem:[#allocation3 + $0x4f8] sm:$0xff] }
  0xbf   : > { %4151 = vmatpush1.bf16.msra.mxu1 %v4150_v54  ;;  %4153 = vmatprep.subr.bf16.mxu0 %v4152_v55  ;;  %v4162_v54 = vpack.c.bf16 %v1620_v41, %v1616_v39  ;;  %v4178_v55 = vpack.c.bf16 %v1622_v45, %v1618_v44  ;;  %v4180_v5 = vpack.c.bf16 %v1631_v52, %v1627_v51  ;;  %v1946_v35 = vld [vmem:[#allocation3 + $0x578] sm:$0xff]  ;;  %v1939_v41 = vld [vmem:[#allocation3 + $0x540] sm:$0xff] }
  0xc0   : > { %3868 = vmatmul.mubr.msk.f32.gmra.mrb[8].mxu0 %vm416_vm2, %v916_v43  ;;  %4169 = vmatprep.subr.bf16.mxu1 %v4168_v56  ;;  %v4164_v56 = vpack.c.bf16 %v1629_v50, %v1625_v49  ;;  %v1943_v44 = vld [vmem:[#allocation3 + $0x560] sm:$0xff]  ;;  %v4204_v45 = vpack.c.bf16 %v1946_v35, %v1942_v34  ;;  %v1945_v49 = vld [vmem:[#allocation3 + $0x570] sm:$0xff]  ;;  %v1952_v50 = vld [vmem:[#allocation3 + $0x5a8] sm:$0xff] }
  0xc1   : > { %3876 = vmatmul.mubr.msk.f32.gmra.mrb[8].mxu1 %vm416_vm2, %v916_v43  ;;  %1069 = vmatprep.mubr.f32.mxu0 %v4785_v0  ;;  %v1624_v43 = vld [vmem:[#allocation3 + $0x4c0] sm:$0xff]  ;;  %v2262_v34 = vld [vmem:[#allocation3 + $0x628] sm:$0xff] }
  0xc2   : > { %1182 = vmatprep.mubr.f32.mxu1 %v4785_v0  ;;  %v4166_v10 = vpack.c.bf16 %v1628_v59, %v1624_v43  ;;  %v4190_v43 = vpack.c.bf16 %v1943_v44, %v1939_v41  ;;  %v5279_v41 = vld [vmem:[%s4945_s7 + $0x68] sm:$0x3] }
  0xc4   : > { %3869 = vmatmul.mubr.msk.f32.gmra.mrb[10].mxu0 %vm416_vm2, %v919_v60 }
  0xc5   : > { %3877 = vmatmul.mubr.msk.f32.gmra.mrb[10].mxu1 %vm416_vm2, %v919_v60  ;;  %1075 = vmatprep.mubr.f32.mxu0 %v4785_v0  ;;  %v1626_v60 = vld [vmem:[#allocation3 + $0x4d0] sm:$0xff] }
  0xc6   : > { %1188 = vmatprep.mubr.f32.mxu1 %v4785_v0 }
  0xc8   : > { %3870 = vmatmul.mubr.msk.f32.gmra.mrb[12].mxu0 %vm416_vm2, %v922_v47 }
  0xc9   : > { %3878 = vmatmul.mubr.msk.f32.gmra.mrb[12].mxu1 %vm416_vm2, %v922_v47  ;;  %1081 = vmatprep.mubr.f32.mxu0 %v4785_v0  ;;  %v1630_v47 = vld [vmem:[#allocation3 + $0x4f0] sm:$0xff] }
  0xca   : > { %1194 = vmatprep.mubr.f32.mxu1 %v4785_v0  ;;  %v4182_v22 = vpack.c.bf16 %v1630_v47, %v1626_v60  ;;  %v1951_v47 = vld [vmem:[#allocation3 + $0x5a0] sm:$0xff] }
  0xcc   : > { %3871 = vmatmul.mubr.msk.f32.gmra.mrb[14].mxu0 %vm416_vm2, %v925_v17 }
  0xcd   : > { %3879 = vmatmul.mubr.msk.f32.gmra.mrb[14].mxu1 %vm416_vm2, %v925_v17  ;;  %1373 = vmatprep.mubr.f32.mxu0 %v4785_v0  ;;  %v1936_v17 = vld [vmem:[#allocation3 + $0x528] sm:$0xff] }
  0xce   : > { %1486 = vmatprep.mubr.f32.mxu1 %v4785_v0  ;;  %v4184_v11 = vpack.c.bf16 %v1936_v17, %v1932_v1  ;;  %v1949_v1 = vld [vmem:[#allocation3 + $0x590] sm:$0xff] }
  0xcf   : > { %v1953_v17 = vld [vmem:[#allocation3 + $0x5b0] sm:$0xff] }
  0xd0   : > { %3896 = vmatmul.mubr.msk.f32.vlgmr.msra.gmra.mrb[0].mxu0 %vm416_vm2, %v4953_v53 }
  0xd1   : > { %3904 = vmatmul.mubr.msk.f32.vlgmr.msra.gmra.mrb[0].mxu1 %vm416_vm2, %v4953_v53  ;;  %1379 = vmatprep.mubr.f32.mxu0 %v4785_v0  ;;  %v2278_v53 = vld [vmem:[#allocation3 + $0x6a8] sm:$0xff] }
  0xd2   : > { %1492 = vmatprep.mubr.f32.mxu1 %v4785_v0  ;;  %4155 = vmatpush1.bf16.msra.mxu0 %v4154_v15  ;;  %v1576_v15 = vrot.slane %v5220_v12, 1 }
  0xd3   : > { %4171 = vmatpush1.bf16.msra.mxu1 %v4170_v18  ;;  %4157 = vmatprep.subr.bf16.mxu0 %v4156_v20  ;;  %v5233_v18 = vld [vmem:[%s4945_s7 + $0x28] sm:$0x3]  ;;  %v1931_v20 = vld [vmem:[#allocation3 + $0x500] sm:$0xff] }
  0xd4   : > { %3897 = vmatmul.mubr.msk.f32.gmra.mrb[2].mxu0 %vm416_vm2, %v4966_v8  ;;  %4173 = vmatprep.subr.bf16.mxu1 %v4172_v30  ;;  %v1940_v30 = vld [vmem:[#allocation3 + $0x548] sm:$0xff]  ;;  %v1577_v32 = vsel %vm358_vm1, %v362_v6, %v1576_v15  ;;  %v1579_v33 = vrot.slane %v5233_v18, 1  ;;  %v5268_v15 = vld [vmem:[%s4945_s7 + $0x58] sm:$0x3] }
  0xd5   : > { %3905 = vmatmul.mubr.msk.f32.gmra.mrb[2].mxu1 %vm416_vm2, %v4966_v8  ;;  %1385 = vmatprep.mubr.f32.mxu0 %v4785_v0  ;;  %v4188_v39 = vpack.c.bf16 %v1944_v31, %v1940_v30  ;;  %v1948_v6 = vld [vmem:[#allocation3 + $0x588] sm:$0xff]  ;;  %v1959_v30 = vld [vmem:[#allocation3 + $0x5e0] sm:$0xff]  ;;  %v1957_v31 = vld [vmem:[#allocation3 + $0x5d0] sm:$0xff] }
  0xd6   : > { %1498 = vmatprep.mubr.f32.mxu1 %v4785_v0  ;;  %4159 = vmatpush1.bf16.msra.mxu0 %v4158_v36  ;;  %v4186_v36 = vpack.c.bf16 %v1935_v24, %v1931_v20  ;;  %v1580_v51 = vsel %vm358_vm1, %v365_v23, %v1579_v33  ;;  %v4192_v60 = vpack.c.bf16 %v1952_v50, %v1948_v6  ;;  %v2258_v33 = vld [vmem:[#allocation3 + $0x608] sm:$0xff]  ;;  %v1591_v6 = vrot.slane %v5279_v41, 1  ;;  %v5290_v50 = vld [vmem:[%s4945_s7 + $0x78] sm:$0x3] }
  0xd7   : > { %4175 = vmatpush1.bf16.msra.mxu1 %v4174_v37  ;;  %4161 = vmatprep.subr.bf16.mxu0 %v4160_v38  ;;  %v5246_v37 = vld [vmem:[%s4945_s7 + $0x38] sm:$0x3]  ;;  %v4202_v38 = vpack.c.bf16 %v1937_v28, %v1933_v9  ;;  %v4210_v24 = vpack.c.bf16 %v1953_v17, %v1949_v1  ;;  %v4196_v9 = vpack.c.bf16 %v1960_v7, %v1956_v2  ;;  %v1955_v28 = vld [vmem:[#allocation3 + $0x5c0] sm:$0xff]  ;;  %v2266_v1 = vld [vmem:[#allocation3 + $0x648] sm:$0xff] }
  0xd8   : > { %3898 = vmatmul.mubr.msk.f32.gmra.mrb[4].mxu0 %vm416_vm2, %v4980_v25  ;;  %4177 = vmatprep.subr.bf16.mxu1 %v4176_v26  ;;  %v1941_v26 = vld [vmem:[#allocation3 + $0x550] sm:$0xff]  ;;  %v1582_v52 = vrot.slane %v5246_v37, 1  ;;  %v4198_v44 = vpack.c.bf16 %v1959_v30, %v1955_v28  ;;  %v2268_v2 = vld [vmem:[#allocation3 + $0x658] sm:$0xff]  ;;  %v2274_v30 = vld [vmem:[#allocation3 + $0x688] sm:$0xff] }
  0xd9   : > { %3906 = vmatmul.mubr.msk.f32.gmra.mrb[4].mxu1 %vm416_vm2, %v4980_v25  ;;  %1391 = vmatprep.mubr.f32.mxu0 %v4785_v0  ;;  %v4206_v59 = vpack.c.bf16 %v1945_v49, %v1941_v26  ;;  %v2272_v7 = vld [vmem:[#allocation3 + $0x678] sm:$0xff]  ;;  %v2271_v28 = vld [vmem:[#allocation3 + $0x670] sm:$0xff] }
  0xda   : > { %1504 = vmatprep.mubr.f32.mxu1 %v4785_v0  ;;  %4163 = vmatpush1.bf16.msra.mxu0 %v4162_v54  ;;  %v1950_v54 = vld [vmem:[#allocation3 + $0x598] sm:$0xff] }
  0xdb   : > { %4179 = vmatpush1.bf16.msra.mxu1 %v4178_v55  ;;  %4165 = vmatprep.subr.bf16.mxu0 %v4164_v56  ;;  %v1954_v55 = vld [vmem:[#allocation3 + $0x5b8] sm:$0xff]  ;;  %v5257_v56 = vld [vmem:[%s4945_s7 + $0x48] sm:$0x3] }
  0xdc   : > { %3899 = vmatmul.mubr.msk.f32.gmra.mrb[6].mxu0 %vm416_vm2, %v4995_v42  ;;  %4181 = vmatprep.subr.bf16.mxu1 %v4180_v5  ;;  %v1947_v5 = vld [vmem:[#allocation3 + $0x580] sm:$0xff]  ;;  %v4208_v23 = vpack.c.bf16 %v1954_v55, %v1950_v54  ;;  %v1596_v54 = vrot.slane %v5228_v13, 1 }
  0xdd   : > { %3907 = vmatmul.mubr.msk.f32.gmra.mrb[6].mxu1 %vm416_vm2, %v4995_v42  ;;  %1397 = vmatprep.mubr.f32.mxu0 %v4785_v0  ;;  %v4194_v20 = vpack.c.bf16 %v1951_v47, %v1947_v5  ;;  %v2259_v5 = vld [vmem:[#allocation3 + $0x610] sm:$0xff] }
  0xde   : > { %1510 = vmatprep.mubr.f32.mxu1 %v4785_v0  ;;  %4167 = vmatpush1.bf16.msra.mxu0 %v4166_v10  ;;  %v1583_v10 = vsel %vm358_vm1, %v368_v40, %v1582_v52  ;;  %v5301_v52 = vld [vmem:[%s4945_s7 + $0x88] sm:$0x3]  ;;  %v2263_v47 = vld [vmem:[#allocation3 + $0x630] sm:$0xff] }
  0xdf   : > { %4183 = vmatpush1.bf16.msra.mxu1 %v4182_v22  ;;  %4185 = vmatprep.subr.bf16.mxu0 %v4184_v11  ;;  %v1585_v22 = vrot.slane %v5257_v56, 1  ;;  %v1958_v11 = vld [vmem:[#allocation3 + $0x5d8] sm:$0xff] }
  0xe0   : > { %3900 = vmatmul.mubr.msk.f32.gmra.mrb[8].mxu0 %vm416_vm2, %v5011_v3  ;;  %4201 = vmatprep.subr.bf16.mxu1 %v4200_v4  ;;  %v1962_v4 = vld [vmem:[#allocation3 + $0x5f8] sm:$0xff] }
  0xe1   : > { %3908 = vmatmul.mubr.msk.f32.gmra.mrb[8].mxu1 %vm416_vm2, %v5011_v3  ;;  %1403 = vmatprep.mubr.f32.mxu0 %v4785_v0  ;;  %v4212_v40 = vpack.c.bf16 %v1962_v4, %v1958_v11  ;;  %v1586_v35 = vsel %vm358_vm1, %v371_v62, %v1585_v22  ;;  %v4234_v22 = vpack.c.bf16 %v2263_v47, %v2259_v5  ;;  %v2265_v4 = vld [vmem:[#allocation3 + $0x640] sm:$0xff]  ;;  %v2611_v5 = vld [vmem:[#allocation3 + $0x738] sm:$0xff] }
  0xe2   : > { %1516 = vmatprep.mubr.f32.mxu1 %v4785_v0 }
  0xe4   : > { %3901 = vmatmul.mubr.msk.f32.gmra.mrb[10].mxu0 %vm416_vm2, %v5026_v16 }
  0xe5   : > { %3909 = vmatmul.mubr.msk.f32.gmra.mrb[10].mxu1 %vm416_vm2, %v5026_v16  ;;  %1409 = vmatprep.mubr.f32.mxu0 %v4785_v0  ;;  %v1928_v16 = vrot.slane %v5301_v52, 2 }
  0xe6   : > { %1522 = vmatprep.mubr.f32.mxu1 %v4785_v0 }
  0xe8   : > { %3902 = vmatmul.mubr.msk.f32.gmra.mrb[12].mxu0 %vm416_vm2, %v5041_v21 }
  0xe9   : > { %3910 = vmatmul.mubr.msk.f32.gmra.mrb[12].mxu1 %vm416_vm2, %v5041_v21  ;;  %1415 = vmatprep.mubr.f32.mxu0 %v4785_v0  ;;  %v2604_v21 = vld [vmem:[#allocation3 + $0x700] sm:$0xff] }
  0xea   : > { %1528 = vmatprep.mubr.f32.mxu1 %v4785_v0 }
  0xec   : > { %3903 = vmatmul.mubr.msk.f32.gmra.mrb[14].mxu0 %vm416_vm2, %v5228_v13 }
  0xed   : > { %3911 = vmatmul.mubr.msk.f32.gmra.mrb[14].mxu1 %vm416_vm2, %v5228_v13  ;;  %1712 = vmatprep.mubr.f32.mxu0 %v4785_v0 }
  0xee   : > { %1825 = vmatprep.mubr.f32.mxu1 %v4785_v0 }
  0xf0   : > { %3912 = vmatmul.mubr.msk.f32.vlgmr.msra.gmra.mrb[0].mxu0 %vm416_vm2, %v1577_v32 }
  0xf1   : > { %3920 = vmatmul.mubr.msk.f32.vlgmr.msra.gmra.mrb[0].mxu1 %vm416_vm2, %v1577_v32  ;;  %1718 = vmatprep.mubr.f32.mxu0 %v4785_v0  ;;  %v1961_v32 = vld [vmem:[#allocation3 + $0x5f0] sm:$0xff] }
  0xf2   : > { %1831 = vmatprep.mubr.f32.mxu1 %v4785_v0  ;;  %4187 = vmatpush1.bf16.msra.mxu0 %v4186_v36  ;;  %v1588_v36 = vrot.slane %v5268_v15, 1  ;;  %v4214_v26 = vpack.c.bf16 %v1961_v32, %v1957_v31  ;;  %v2276_v31 = vld [vmem:[#allocation3 + $0x698] sm:$0xff] }
  0xf3   : > { %4203 = vmatpush1.bf16.msra.mxu1 %v4202_v38  ;;  %4189 = vmatprep.subr.bf16.mxu0 %v4188_v39  ;;  %v2260_v38 = vld [vmem:[#allocation3 + $0x618] sm:$0xff] }
  0xf4   : > { %3913 = vmatmul.mubr.msk.f32.gmra.mrb[2].mxu0 %vm416_vm2, %v1580_v51  ;;  %4205 = vmatprep.subr.bf16.mxu1 %v4204_v45  ;;  %v2264_v39 = vld [vmem:[#allocation3 + $0x638] sm:$0xff]  ;;  %v4216_v45 = vpack.c.bf16 %v2262_v34, %v2258_v33  ;;  %v1589_v62 = vsel %vm358_vm1, %v374_v14, %v1588_v36  ;;  %v1592_v14 = vsel %vm358_vm1, %v377_v19, %v1591_v6  ;;  %v1597_v19 = vrot.slane %v5301_v52, 1  ;;  %v2277_v36 = vld [vmem:[#allocation3 + $0x6a0] sm:$0xff]  ;;  %v2610_v52 = vld [vmem:[#allocation3 + $0x730] sm:$0xff] }
  0xf5   : > { %3921 = vmatmul.mubr.msk.f32.gmra.mrb[2].mxu1 %vm416_vm2, %v1580_v51  ;;  %1724 = vmatprep.mubr.f32.mxu0 %v4785_v0  ;;  %v4232_v49 = vpack.c.bf16 %v2264_v39, %v2260_v38  ;;  %v1594_v51 = vrot.slane %v5290_v50, 1  ;;  %v4224_v34 = vpack.c.bf16 %v2278_v53, %v2274_v30  ;;  %v2275_v38 = vld [vmem:[#allocation3 + $0x690] sm:$0xff]  ;;  %v2282_v39 = vld [vmem:[#allocation3 + $0x6c8] sm:$0xff] }
  0xf6   : > { %1837 = vmatprep.mubr.f32.mxu1 %v4785_v0  ;;  %4191 = vmatpush1.bf16.msra.mxu0 %v4190_v43  ;;  %v1598_v43 = vsel %vm358_vm1, %v1596_v54, %v1597_v19  ;;  %v2283_v19 = vld [vmem:[#allocation3 + $0x6d0] sm:$0xff] }
  0xf7   : > { %4207 = vmatpush1.bf16.msra.mxu1 %v4206_v59  ;;  %4193 = vmatprep.subr.bf16.mxu0 %v4192_v60  ;;  %v1595_v55 = vsel %vm358_vm1, %v380_v27, %v1594_v51  ;;  %v1907_v59 = vrot.slane %v5220_v12, 2  ;;  %v2257_v60 = vld [vmem:[#allocation3 + $0x600] sm:$0xff]  ;;  %v1910_v12 = vrot.slane %v5233_v18, 2  ;;  %v1913_v18 = vrot.slane %v5246_v37, 2  ;;  %v2286_v37 = vld [vmem:[#allocation3 + $0x6e8] sm:$0xff]  ;;  %v2618_v53 = vld [vmem:[#allocation3 + $0x770] sm:$0xff] }
  0xf8   : > { %3914 = vmatmul.mubr.msk.f32.gmra.mrb[4].mxu0 %vm416_vm2, %v1583_v10  ;;  %4209 = vmatprep.subr.bf16.mxu1 %v4208_v23  ;;  %v2261_v27 = vld [vmem:[#allocation3 + $0x620] sm:$0xff]  ;;  %v2270_v23 = vld [vmem:[#allocation3 + $0x668] sm:$0xff] }
  0xf9   : > { %3922 = vmatmul.mubr.msk.f32.gmra.mrb[4].mxu1 %vm416_vm2, %v1583_v10  ;;  %1730 = vmatprep.mubr.f32.mxu0 %v4785_v0  ;;  %v1908_v17 = vsel %vm901_vm0, %v905_v46, %v1907_v59  ;;  %v4218_v10 = vpack.c.bf16 %v2261_v27, %v2257_v60  ;;  %v4220_v11 = vpack.c.bf16 %v2270_v23, %v2266_v1  ;;  %v2281_v51 = vld [vmem:[#allocation3 + $0x6c0] sm:$0xff]  ;;  %v1919_v60 = vrot.slane %v5268_v15, 2  ;;  %v2607_v27 = vld [vmem:[#allocation3 + $0x718] sm:$0xff] }
  0xfa   : > { %1843 = vmatprep.mubr.f32.mxu1 %v4785_v0  ;;  %4195 = vmatpush1.bf16.msra.mxu0 %v4194_v20  ;;  %v2269_v20 = vld [vmem:[#allocation3 + $0x660] sm:$0xff]  ;;  %v1911_v46 = vsel %vm901_vm0, %v908_v63, %v1910_v12  ;;  %v2279_v63 = vld [vmem:[#allocation3 + $0x6b0] sm:$0xff]  ;;  %v1927_v15 = vrot.slane %v5228_v13, 2  ;;  %v2613_v12 = vld [vmem:[#allocation3 + $0x748] sm:$0xff] }
  0xfb   : > { %4211 = vmatpush1.bf16.msra.mxu1 %v4210_v24  ;;  %4197 = vmatprep.subr.bf16.mxu0 %v4196_v9  ;;  %v2267_v24 = vld [vmem:[#allocation3 + $0x650] sm:$0xff]  ;;  %v4236_v9 = vpack.c.bf16 %v2272_v7, %v2268_v2  ;;  %v4222_v32 = vpack.c.bf16 %v2269_v20, %v2265_v4  ;;  %v4242_v6 = vpack.c.bf16 %v2279_v63, %v2275_v38  ;;  %v2617_v2 = vld [vmem:[#allocation3 + $0x768] sm:$0xff]  ;;  %v5388_v7 = vld [vmem:[%s4945_s7 + $0x20] sm:$0xff] }
  0xfc   : > { %3915 = vmatmul.mubr.msk.f32.gmra.mrb[6].mxu0 %vm416_vm2, %v1586_v35  ;;  %4213 = vmatprep.subr.bf16.mxu1 %v4212_v40  ;;  %v2280_v40 = vld [vmem:[#allocation3 + $0x6b8] sm:$0xff]  ;;  %v4238_v33 = vpack.c.bf16 %v2271_v28, %v2267_v24  ;;  %v1920_v42 = vsel %vm901_vm0, %v917_v58, %v1919_v60  ;;  %v1925_v58 = vrot.slane %v5290_v50, 2  ;;  %v2608_v50 = vld [vmem:[#allocation3 + $0x720] sm:$0xff]  ;;  %v4252_v20 = vpack.c.bf16 %v2617_v2, %v2613_v12  ;;  %v2614_v28 = vld [vmem:[#allocation3 + $0x750] sm:$0xff] }
  0xfd   : > { %3923 = vmatmul.mubr.msk.f32.gmra.mrb[6].mxu1 %vm416_vm2, %v1586_v35  ;;  %1736 = vmatprep.mubr.f32.mxu0 %v4785_v0  ;;  %v2273_v35 = vld [vmem:[#allocation3 + $0x680] sm:$0xff]  ;;  %v4240_v8 = vpack.c.bf16 %v2280_v40, %v2276_v31  ;;  %v5397_v31 = vld [vmem:[%s4945_s7 + $0x30] sm:$0xff]  ;;  %v2623_v40 = vld [vmem:[#allocation3 + $0x798] sm:$0xff] }
  0xfe   : > { %1849 = vmatprep.mubr.f32.mxu1 %v4785_v0  ;;  %4199 = vmatpush1.bf16.msra.mxu0 %v4198_v44  ;;  %v1914_v44 = vsel %vm901_vm0, %v911_v29, %v1913_v18  ;;  %v2287_v29 = vld [vmem:[#allocation3 + $0x6f0] sm:$0xff]  ;;  %v2612_v24 = vld [vmem:[#allocation3 + $0x740] sm:$0xff]  ;;  %v2625_v18 = vld [vmem:[#allocation3 + $0x7a8] sm:$0xff]  ;;  %v2582_v2 = vrot.slane %v5397_v31, 1 }
  0xff   : > { %4215 = vmatpush1.bf16.msra.mxu1 %v4214_v26  ;;  %4217 = vmatprep.subr.bf16.mxu0 %v4216_v45  ;;  %v1916_v26 = vrot.slane %v5257_v56, 2  ;;  %v2284_v45 = vld [vmem:[#allocation3 + $0x6d8] sm:$0xff]  ;;  %v2609_v56 = vld [vmem:[#allocation3 + $0x728] sm:$0xff]  ;;  %v4246_v1 = vpack.c.bf16 %v2287_v29, %v2283_v19  ;;  %v2624_v38 = vld [vmem:[#allocation3 + $0x7a0] sm:$0xff] }
 0x100   : > { %3916 = vmatmul.mubr.msk.f32.gmra.mrb[8].mxu0 %vm416_vm2, %v1589_v62  ;;  %4233 = vmatprep.subr.bf16.mxu1 %v4232_v49  ;;  %v2288_v49 = vld [vmem:[#allocation3 + $0x6f8] sm:$0xff]  ;;  %v2630_v19 = vld [vmem:[#allocation3 + $0x7d0] sm:$0xff]  ;;  %v2948_v12 = vld [vmem:[#allocation3 + $0x868] sm:$0xff] }
 0x101   : > { %3924 = vmatmul.mubr.msk.f32.gmra.mrb[8].mxu1 %vm416_vm2, %v1589_v62  ;;  %1742 = vmatprep.mubr.f32.mxu0 %v4785_v0  ;;  %v4226_v62 = vpack.c.bf16 %v2277_v36, %v2273_v35  ;;  %v4244_v25 = vpack.c.bf16 %v2288_v49, %v2284_v45  ;;  %v1917_v59 = vsel %vm901_vm0, %v914_v48, %v1916_v26  ;;  %v1922_v48 = vrot.slane %v5279_v41, 2  ;;  %v2620_v36 = vld [vmem:[#allocation3 + $0x780] sm:$0xff]  ;;  %v2631_v45 = vld [vmem:[#allocation3 + $0x7d8] sm:$0xff]  ;;  %v2634_v29 = vld [vmem:[#allocation3 + $0x7f0] sm:$0xff] }
 0x102   : > { %1855 = vmatprep.mubr.f32.mxu1 %v4785_v0  ;;  %v1926_v41 = vsel %vm901_vm0, %v923_v57, %v1925_v58  ;;  %v2606_v57 = vld [vmem:[#allocation3 + $0x710] sm:$0xff]  ;;  %v5406_v26 = vld [vmem:[%s4945_s7 + $0x40] sm:$0xff]  ;;  %v2635_v49 = vld [vmem:[#allocation3 + $0x7f8] sm:$0xff] }
 0x103   : > { %v1923_v3 = vsel %vm901_vm0, %v920_v61, %v1922_v48  ;;  %v1929_v61 = vsel %vm901_vm0, %v1927_v15, %v1928_v16  ;;  %v4266_v4 = vpack.c.bf16 %v2610_v52, %v2606_v57  ;;  %v2938_v60 = vld [vmem:[#allocation3 + $0x818] sm:$0xff]  ;;  %v5443_v48 = vld [vmem:[%s4945_s7 + $0x28] sm:$0x3]  ;;  %v5452_v58 = vld [vmem:[%s4945_s7 + $0x90] sm:$0xff] }
 0x104   : > { %3917 = vmatmul.mubr.msk.f32.gmra.mrb[10].mxu0 %vm416_vm2, %v1592_v14  ;;  %v5457_v16 = vld [vmem:[%s4945_s7 + $0x38] sm:$0x3]  ;;  %v2941_v57 = vld [vmem:[#allocation3 + $0x830] sm:$0xff]  ;;  %v2944_v52 = vld [vmem:[#allocation3 + $0x848] sm:$0xff] }
 0x105   : > { %3925 = vmatmul.mubr.msk.f32.gmra.mrb[10].mxu1 %vm416_vm2, %v1592_v14  ;;  %1748 = vmatprep.mubr.f32.mxu0 %v4785_v0  ;;  %v4228_v14 = vpack.c.bf16 %v2286_v37, %v2282_v39  ;;  %v2626_v39 = vld [vmem:[#allocation3 + $0x7b0] sm:$0xff]  ;;  %v2629_v37 = vld [vmem:[#allocation3 + $0x7c8] sm:$0xff] }
 0x106   : > { %1861 = vmatprep.mubr.f32.mxu1 %v4785_v0 }
 0x108   : > { %3918 = vmatmul.mubr.msk.f32.gmra.mrb[12].mxu0 %vm416_vm2, %v1595_v55 }
 0x109   : > { %3926 = vmatmul.mubr.msk.f32.gmra.mrb[12].mxu1 %vm416_vm2, %v1595_v55  ;;  %1754 = vmatprep.mubr.f32.mxu0 %v4785_v0  ;;  %v2285_v55 = vld [vmem:[#allocation3 + $0x6e0] sm:$0xff] }
 0x10a   : > { %1867 = vmatprep.mubr.f32.mxu1 %v4785_v0  ;;  %v4230_v47 = vpack.c.bf16 %v2285_v55, %v2281_v51  ;;  %v2628_v51 = vld [vmem:[#allocation3 + $0x7c0] sm:$0xff] }
 0x10b   : > { %v2632_v55 = vld [vmem:[#allocation3 + $0x7e0] sm:$0xff] }
 0x10c   : > { %3919 = vmatmul.mubr.msk.f32.gmra.mrb[14].mxu0 %vm416_vm2, %v1598_v43 }
 0x10d   : > { %3927 = vmatmul.mubr.msk.f32.gmra.mrb[14].mxu1 %vm416_vm2, %v1598_v43  ;;  %2043 = vmatprep.mubr.f32.mxu0 %v4785_v0  ;;  %v2605_v43 = vld [vmem:[#allocation3 + $0x708] sm:$0xff] }
 0x10e   : > { %2156 = vmatprep.mubr.f32.mxu1 %v4785_v0  ;;  %v4248_v23 = vpack.c.bf16 %v2609_v56, %v2605_v43  ;;  %v2936_v43 = vld [vmem:[#allocation3 + $0x808] sm:$0xff] }
 0x10f   : > { %v2940_v56 = vld [vmem:[#allocation3 + $0x828] sm:$0xff] }
 0x110   : > { %3928 = vmatmul.mubr.msk.f32.vlgmr.msra.gmra.mrb[0].mxu0 %vm416_vm2, %v1908_v17 }
 0x111   : > { %3936 = vmatmul.mubr.msk.f32.vlgmr.msra.gmra.mrb[0].mxu1 %vm416_vm2, %v1908_v17  ;;  %2049 = vmatprep.mubr.f32.mxu0 %v4785_v0  ;;  %v4264_v17 = vpack.c.bf16 %v2611_v5, %v2607_v27  ;;  %v2942_v27 = vld [vmem:[#allocation3 + $0x838] sm:$0xff]  ;;  %v4262_v5 = vpack.c.bf16 %v2632_v55, %v2628_v51  ;;  %v2960_v51 = vld [vmem:[#allocation3 + $0x8c8] sm:$0xff] }
 0x112   : > { %2162 = vmatprep.mubr.f32.mxu1 %v4785_v0  ;;  %4219 = vmatpush1.bf16.msra.mxu0 %v4218_v10  ;;  %v2615_v10 = vld [vmem:[#allocation3 + $0x758] sm:$0xff]  ;;  %v2964_v55 = vld [vmem:[#allocation3 + $0x8e8] sm:$0xff] }
 0x113   : > { %4235 = vmatpush1.bf16.msra.mxu1 %v4234_v22  ;;  %4221 = vmatprep.subr.bf16.mxu0 %v4220_v11  ;;  %v2619_v22 = vld [vmem:[#allocation3 + $0x778] sm:$0xff]  ;;  %v4250_v11 = vpack.c.bf16 %v2608_v50, %v2604_v21  ;;  %v2939_v21 = vld [vmem:[#allocation3 + $0x820] sm:$0xff]  ;;  %v2937_v50 = vld [vmem:[#allocation3 + $0x810] sm:$0xff] }
 0x114   : > { %3929 = vmatmul.mubr.msk.f32.gmra.mrb[2].mxu0 %vm416_vm2, %v1911_v46  ;;  %4237 = vmatprep.subr.bf16.mxu1 %v4236_v9  ;;  %v2616_v9 = vld [vmem:[#allocation3 + $0x760] sm:$0xff]  ;;  %v4268_v30 = vpack.c.bf16 %v2619_v22, %v2615_v10  ;;  %v2583_v22 = vrot.slane %v5457_v16, 1 }
 0x115   : > { %3937 = vmatmul.mubr.msk.f32.gmra.mrb[2].mxu1 %vm416_vm2, %v1911_v46  ;;  %2055 = vmatprep.mubr.f32.mxu0 %v4785_v0  ;;  %v2621_v46 = vld [vmem:[#allocation3 + $0x788] sm:$0xff] }
 0x116   : > { %2168 = vmatprep.mubr.f32.mxu1 %v4785_v0  ;;  %4223 = vmatpush1.bf16.msra.mxu0 %v4222_v32  ;;  %v2627_v32 = vld [vmem:[#allocation3 + $0x7b8] sm:$0xff]  ;;  %v4256_v35 = vpack.c.bf16 %v2625_v18, %v2621_v46  ;;  %v2945_v46 = vld [vmem:[#allocation3 + $0x850] sm:$0xff] }
 0x117   : > { %4239 = vmatpush1.bf16.msra.mxu1 %v4238_v33  ;;  %4225 = vmatprep.subr.bf16.mxu0 %v4224_v34  ;;  %v4254_v33 = vpack.c.bf16 %v2616_v9, %v2612_v24  ;;  %v4270_v34 = vpack.c.bf16 %v2618_v53, %v2614_v28  ;;  %v4272_v63 = vpack.c.bf16 %v2627_v32, %v2623_v40  ;;  %v5469_v24 = vld [vmem:[%s4945_s7 + $0x48] sm:$0x3]  ;;  %v2947_v53 = vld [vmem:[#allocation3 + $0x860] sm:$0xff]  ;;  %v2949_v40 = vld [vmem:[#allocation3 + $0x870] sm:$0xff] }
 0x118   : > { %3930 = vmatmul.mubr.msk.f32.gmra.mrb[4].mxu0 %vm416_vm2, %v1914_v44  ;;  %4241 = vmatprep.subr.bf16.mxu1 %v4240_v8  ;;  %v2622_v8 = vld [vmem:[#allocation3 + $0x790] sm:$0xff]  ;;  %v4298_v9 = vpack.c.bf16 %v2941_v57, %v2937_v50  ;;  %v4284_v28 = vpack.c.bf16 %v2948_v12, %v2944_v52  ;;  %v2952_v32 = vld [vmem:[#allocation3 + $0x888] sm:$0xff]  ;;  %v5499_v52 = vld [vmem:[%s4945_s7 + $0x78] sm:$0x3] }
 0x119   : > { %3938 = vmatmul.mubr.msk.f32.gmra.mrb[4].mxu1 %vm416_vm2, %v1914_v44  ;;  %2061 = vmatprep.mubr.f32.mxu0 %v4785_v0  ;;  %v2633_v44 = vld [vmem:[#allocation3 + $0x7e8] sm:$0xff] }
 0x11a   : > { %2174 = vmatprep.mubr.f32.mxu1 %v4785_v0  ;;  %4227 = vmatpush1.bf16.msra.mxu0 %v4226_v62  ;;  %v4258_v62 = vpack.c.bf16 %v2624_v38, %v2620_v36  ;;  %v2586_v36 = vrot.slane %v5469_v24, 1  ;;  %v2954_v38 = vld [vmem:[#allocation3 + $0x898] sm:$0xff] }
 0x11b   : > { %4243 = vmatpush1.bf16.msra.mxu1 %v4242_v6  ;;  %4229 = vmatprep.subr.bf16.mxu0 %v4228_v14  ;;  %v4274_v6 = vpack.c.bf16 %v2626_v39, %v2622_v8  ;;  %v4260_v14 = vpack.c.bf16 %v2633_v44, %v2629_v37  ;;  %v2958_v8 = vld [vmem:[#allocation3 + $0x8b8] sm:$0xff]  ;;  %v4302_v37 = vpack.c.bf16 %v2949_v40, %v2945_v46 }
 0x11c   : > { %3931 = vmatmul.mubr.msk.f32.gmra.mrb[6].mxu0 %vm416_vm2, %v1917_v59  ;;  %4245 = vmatprep.subr.bf16.mxu1 %v4244_v25  ;;  %v4276_v25 = vpack.c.bf16 %v2635_v49, %v2631_v45  ;;  %v2951_v45 = vld [vmem:[#allocation3 + $0x880] sm:$0xff] }
 0x11d   : > { %3939 = vmatmul.mubr.msk.f32.gmra.mrb[6].mxu1 %vm416_vm2, %v1917_v59  ;;  %2067 = vmatprep.mubr.f32.mxu0 %v4785_v0  ;;  %v5415_v59 = vld [vmem:[%s4945_s7 + $0x50] sm:$0xff]  ;;  %v2955_v49 = vld [vmem:[#allocation3 + $0x8a0] sm:$0xff] }
 0x11e   : > { %2180 = vmatprep.mubr.f32.mxu1 %v4785_v0  ;;  %4231 = vmatpush1.bf16.msra.mxu0 %v4230_v47  ;;  %v4278_v47 = vpack.c.bf16 %v2634_v29, %v2630_v19  ;;  %v2588_v19 = vrot.slane %v5415_v59, 1 }
 0x11f   : > { %4247 = vmatpush1.bf16.msra.mxu1 %v4246_v1  ;;  %4249 = vmatprep.subr.bf16.mxu0 %v4248_v23  ;;  %v4280_v1 = vpack.c.bf16 %v2940_v56, %v2936_v43  ;;  %v4296_v23 = vpack.c.bf16 %v2942_v27, %v2938_v60  ;;  %v2962_v43 = vld [vmem:[#allocation3 + $0x8d8] sm:$0xff]  ;;  %v5489_v60 = vld [vmem:[%s4945_s7 + $0x68] sm:$0x3]  ;;  %v4290_v27 = vpack.c.bf16 %v2955_v49, %v2951_v45  ;;  %v3241_v49 = vld [vmem:[#allocation5] sm:$0xf] }
 0x120   : > { %3932 = vmatmul.mubr.msk.f32.gmra.mrb[8].mxu0 %vm416_vm2, %v1920_v42  ;;  %4265 = vmatprep.subr.bf16.mxu1 %v4264_v17  ;;  %v5424_v17 = vld [vmem:[%s4945_s7 + $0x60] sm:$0xff]  ;;  %v2966_v56 = vld [vmem:[#allocation3 + $0x8f8] sm:$0xff]  ;;  %v2592_v57 = vrot.slane %v5489_v60, 1 }
 0x121   : > { %3940 = vmatmul.mubr.msk.f32.gmra.mrb[8].mxu1 %vm416_vm2, %v1920_v42  ;;  %2073 = vmatprep.mubr.f32.mxu0 %v4785_v0  ;;  %v5433_v42 = vld [vmem:[%s4945_s7 + $0x70] sm:$0xff] }
 0x122   : > { %2186 = vmatprep.mubr.f32.mxu1 %v4785_v0 }
 0x124   : > { %3933 = vmatmul.mubr.msk.f32.gmra.mrb[10].mxu0 %vm416_vm2, %v1923_v3 }
 0x125   : > { %3941 = vmatmul.mubr.msk.f32.gmra.mrb[10].mxu1 %vm416_vm2, %v1923_v3  ;;  %2079 = vmatprep.mubr.f32.mxu0 %v4785_v0  ;;  %v2579_v3 = vrot.slane %v5388_v7, 1 }
 0x126   : > { %2192 = vmatprep.mubr.f32.mxu1 %v4785_v0 }
 0x128   : > { %3934 = vmatmul.mubr.msk.f32.gmra.mrb[12].mxu0 %vm416_vm2, %v1926_v41 }
 0x129   : > { %3942 = vmatmul.mubr.msk.f32.gmra.mrb[12].mxu1 %vm416_vm2, %v1926_v41  ;;  %2085 = vmatprep.mubr.f32.mxu0 %v4785_v0  ;;  %v2580_v41 = vrot.slane %v5443_v48, 1 }
 0x12a   : > { %2198 = vmatprep.mubr.f32.mxu1 %v4785_v0 }
 0x12b   : > { %v2581_v10 = vsel %vm358_vm1, %v2579_v3, %v2580_v41  ;;  %v4308_v3 = vpack.c.bf16 %v2966_v56, %v2962_v43  ;;  %v2961_v41 = vld [vmem:[#allocation3 + $0x8d0] sm:$0xff] }
 0x12c   : > { %3935 = vmatmul.mubr.msk.f32.gmra.mrb[14].mxu0 %vm416_vm2, %v1929_v61 }
 0x12d   : > { %3943 = vmatmul.mubr.msk.f32.gmra.mrb[14].mxu1 %vm416_vm2, %v1929_v61  ;;  %2377 = vmatprep.mubr.f32.mxu0 %v4785_v0  ;;  %v2935_v61 = vld [vmem:[#allocation3 + $0x800] sm:$0xff] }
 0x12e   : > { %2490 = vmatprep.mubr.f32.mxu1 %v4785_v0 }
 0x130   : > { %3960 = vmatmul.mubr.msk.f32.vlgmr.msra.gmra.mrb[0].mxu0 %vm416_vm2, %v5388_v7 }
 0x131   : > { %3968 = vmatmul.mubr.msk.f32.vlgmr.msra.gmra.mrb[0].mxu1 %vm416_vm2, %v5388_v7  ;;  %2383 = vmatprep.mubr.f32.mxu0 %v4785_v0 }
 0x132   : > { %2496 = vmatprep.mubr.f32.mxu1 %v4785_v0  ;;  %4251 = vmatpush1.bf16.msra.mxu0 %v4250_v11  ;;  %v2946_v11 = vld [vmem:[#allocation3 + $0x858] sm:$0xff] }
 0x133   : > { %4267 = vmatpush1.bf16.msra.mxu1 %v4266_v4  ;;  %4253 = vmatprep.subr.bf16.mxu0 %v4252_v20  ;;  %v2950_v4 = vld [vmem:[#allocation3 + $0x878] sm:$0xff]  ;;  %v4282_v20 = vpack.c.bf16 %v2939_v21, %v2935_v61  ;;  %v2965_v61 = vld [vmem:[#allocation3 + $0x8f0] sm:$0xff]  ;;  %v2591_v21 = vrot.slane %v5424_v17, 1 }
 0x134   : > { %3961 = vmatmul.mubr.msk.f32.gmra.mrb[2].mxu0 %vm416_vm2, %v5397_v31  ;;  %4269 = vmatprep.subr.bf16.mxu1 %v4268_v30  ;;  %v2943_v30 = vld [vmem:[#allocation3 + $0x840] sm:$0xff]  ;;  %v4300_v18 = vpack.c.bf16 %v2950_v4, %v2946_v11  ;;  %v2595_v11 = vrot.slane %v5499_v52, 1  ;;  %v5509_v4 = vld [vmem:[%s4945_s7 + $0x88] sm:$0x3] }
 0x135   : > { %3969 = vmatmul.mubr.msk.f32.gmra.mrb[2].mxu1 %vm416_vm2, %v5397_v31  ;;  %2389 = vmatprep.mubr.f32.mxu0 %v4785_v0  ;;  %v4286_v39 = vpack.c.bf16 %v2947_v53, %v2943_v30  ;;  %v2600_v30 = vrot.slane %v5452_v58, 1 }
 0x136   : > { %2502 = vmatprep.mubr.f32.mxu1 %v4785_v0  ;;  %4255 = vmatpush1.bf16.msra.mxu0 %v4254_v33  ;;  %v2956_v33 = vld [vmem:[#allocation3 + $0x8a8] sm:$0xff] }
 0x137   : > { %4271 = vmatpush1.bf16.msra.mxu1 %v4270_v34  ;;  %4257 = vmatprep.subr.bf16.mxu0 %v4256_v35  ;;  %v2585_v34 = vrot.slane %v5406_v26, 1  ;;  %v2584_v35 = vsel %vm358_vm1, %v2582_v2, %v2583_v22  ;;  %v4288_v44 = vpack.c.bf16 %v2956_v33, %v2952_v32  ;;  %v4310_v2 = vpack.c.bf16 %v2965_v61, %v2961_v41 }
 0x138   : > { %3962 = vmatmul.mubr.msk.f32.gmra.mrb[4].mxu0 %vm416_vm2, %v5406_v26  ;;  %4273 = vmatprep.subr.bf16.mxu1 %v4272_v63  ;;  %v5479_v63 = vld [vmem:[%s4945_s7 + $0x58] sm:$0x3]  ;;  %v2593_v22 = vsel %vm358_vm1, %v2591_v21, %v2592_v57  ;;  %v2911_v32 = vrot.slane %v5443_v48, 2  ;;  %v2914_v33 = vrot.slane %v5457_v16, 2  ;;  %v2916_v48 = vrot.slane %v5406_v26, 2 }
 0x139   : > { %3970 = vmatmul.mubr.msk.f32.gmra.mrb[4].mxu1 %vm416_vm2, %v5406_v26  ;;  %2395 = vmatprep.mubr.f32.mxu0 %v4785_v0  ;;  %v2589_v29 = vrot.slane %v5479_v63, 1  ;;  %v2919_v16 = vrot.slane %v5415_v59, 2 }
 0x13a   : > { %2508 = vmatprep.mubr.f32.mxu1 %v4785_v0  ;;  %4259 = vmatpush1.bf16.msra.mxu0 %v4258_v62  ;;  %v2953_v62 = vld [vmem:[#allocation3 + $0x890] sm:$0xff] }
 0x13b   : > { %4275 = vmatpush1.bf16.msra.mxu1 %v4274_v6  ;;  %4261 = vmatprep.subr.bf16.mxu0 %v4260_v14  ;;  %v4304_v6 = vpack.c.bf16 %v2958_v8, %v2954_v38  ;;  %v2957_v14 = vld [vmem:[#allocation3 + $0x8b0] sm:$0xff]  ;;  %v2590_v50 = vsel %vm358_vm1, %v2588_v19, %v2589_v29  ;;  %v2925_v38 = vrot.slane %v5433_v42, 2  ;;  %v2926_v8 = vrot.slane %v5499_v52, 2 }
 0x13c   : > { %3963 = vmatmul.mubr.msk.f32.gmra.mrb[6].mxu0 %vm416_vm2, %v5415_v59  ;;  %4277 = vmatprep.subr.bf16.mxu1 %v4276_v25  ;;  %v2587_v25 = vsel %vm358_vm1, %v2585_v34, %v2586_v36  ;;  %v2917_v34 = vrot.slane %v5469_v24, 2  ;;  %v2922_v24 = vrot.slane %v5424_v17, 2  ;;  %v2923_v36 = vrot.slane %v5489_v60, 2 }
 0x13d   : > { %3971 = vmatmul.mubr.msk.f32.gmra.mrb[6].mxu1 %vm416_vm2, %v5415_v59  ;;  %2401 = vmatprep.mubr.f32.mxu0 %v4785_v0 }
 0x13e   : > { %2514 = vmatprep.mubr.f32.mxu1 %v4785_v0  ;;  %4263 = vmatpush1.bf16.msra.mxu0 %v4262_v5  ;;  %v4306_v5 = vpack.c.bf16 %v2957_v14, %v2953_v62  ;;  %v2918_v26 = vsel %vm901_vm0, %v2916_v48, %v2917_v34 }
 0x13f   : > { %4279 = vmatpush1.bf16.msra.mxu1 %v4278_v47  ;;  %4281 = vmatprep.subr.bf16.mxu0 %v4280_v1  ;;  %v4292_v47 = vpack.c.bf16 %v2964_v55, %v2960_v51  ;;  %v2959_v1 = vld [vmem:[#allocation3 + $0x8c0] sm:$0xff] }
 0x140   : > { %3964 = vmatmul.mubr.msk.f32.gmra.mrb[8].mxu0 %vm416_vm2, %v5424_v17  ;;  %4297 = vmatprep.subr.bf16.mxu1 %v4296_v23  ;;  %v2963_v23 = vld [vmem:[#allocation3 + $0x8e0] sm:$0xff] }
 0x141   : > { %3972 = vmatmul.mubr.msk.f32.gmra.mrb[8].mxu1 %vm416_vm2, %v5424_v17  ;;  %2407 = vmatprep.mubr.f32.mxu0 %v4785_v0  ;;  %v4294_v12 = vpack.c.bf16 %v2963_v23, %v2959_v1  ;;  %v2924_v17 = vsel %vm901_vm0, %v2922_v24, %v2923_v36 }
 0x142   : > { %2520 = vmatprep.mubr.f32.mxu1 %v4785_v0 }
 0x144   : > { %3965 = vmatmul.mubr.msk.f32.gmra.mrb[10].mxu0 %vm416_vm2, %v5433_v42 }
 0x145   : > { %3973 = vmatmul.mubr.msk.f32.gmra.mrb[10].mxu1 %vm416_vm2, %v5433_v42  ;;  %2413 = vmatprep.mubr.f32.mxu0 %v4785_v0 }
 0x146   : > { %2526 = vmatprep.mubr.f32.mxu1 %v4785_v0 }
 0x148   : > { %3966 = vmatmul.mubr.msk.f32.gmra.mrb[12].mxu0 %vm416_vm2, %v5228_v13 }
 0x149   : > { %3974 = vmatmul.mubr.msk.f32.gmra.mrb[12].mxu1 %vm416_vm2, %v5228_v13  ;;  %2419 = vmatprep.mubr.f32.mxu0 %v4785_v0  ;;  %v3243_v13 = vlaneseq }
 0x14a   : > { %2532 = vmatprep.mubr.f32.mxu1 %v4785_v0 }
 0x14c   : > { %3967 = vmatmul.mubr.msk.f32.gmra.mrb[14].mxu0 %vm416_vm2, %v5452_v58 }
 0x14d   : > { %3975 = vmatmul.mubr.msk.f32.gmra.mrb[14].mxu1 %vm416_vm2, %v5452_v58  ;;  %2716 = vmatprep.mubr.f32.mxu0 %v4785_v0 }
 0x14e   : > { %2829 = vmatprep.mubr.f32.mxu1 %v4785_v0 }
 0x150   : > { %3976 = vmatmul.mubr.msk.f32.vlgmr.msra.gmra.mrb[0].mxu0 %vm416_vm2, %v2581_v10 }
 0x151   : > { %3984 = vmatmul.mubr.msk.f32.vlgmr.msra.gmra.mrb[0].mxu1 %vm416_vm2, %v2581_v10  ;;  %2722 = vmatprep.mubr.f32.mxu0 %v4785_v0  ;;  %v2594_v10 = vrot.slane %v5433_v42, 1  ;;  %v2929_v42 = vrot.slane %v5509_v4, 2 }
 0x152   : > { %2835 = vmatprep.mubr.f32.mxu1 %v4785_v0  ;;  %4283 = vmatpush1.bf16.msra.mxu0 %v4282_v20 }
 0x153   : > { %4299 = vmatpush1.bf16.msra.mxu1 %v4298_v9  ;;  %4285 = vmatprep.subr.bf16.mxu0 %v4284_v28  ;;  %v2596_v20 = vsel %vm358_vm1, %v2594_v10, %v2595_v11  ;;  %v2598_v9 = vrot.slane %v5509_v4, 1  ;;  %v5518_v28 = vld [vmem:[%s4945_s7 + $0x98] sm:$0x3] }
 0x154   : > { %3977 = vmatmul.mubr.msk.f32.gmra.mrb[2].mxu0 %vm416_vm2, %v2584_v35  ;;  %4301 = vmatprep.subr.bf16.mxu1 %v4300_v18  ;;  %v2601_v46 = vrot.slane %v5518_v28, 1  ;;  %v2910_v18 = vrot.slane %v5388_v7, 2 }
 0x155   : > { %3985 = vmatmul.mubr.msk.f32.gmra.mrb[2].mxu1 %vm416_vm2, %v2584_v35  ;;  %2728 = vmatprep.mubr.f32.mxu0 %v4785_v0  ;;  %v2599_v53 = vsel %vm358_vm1, %v1596_v54, %v2598_v9  ;;  %v2913_v54 = vrot.slane %v5397_v31, 2  ;;  %v2920_v35 = vrot.slane %v5479_v63, 2  ;;  %v2927_v63 = vsel %vm901_vm0, %v2925_v38, %v2926_v8 }
 0x156   : > { %2841 = vmatprep.mubr.f32.mxu1 %v4785_v0  ;;  %4287 = vmatpush1.bf16.msra.mxu0 %v4286_v39  ;;  %v2602_v40 = vsel %vm358_vm1, %v2600_v30, %v2601_v46  ;;  %v2912_v7 = vsel %vm901_vm0, %v2910_v18, %v2911_v32  ;;  %v2931_v39 = vrot.slane %v5452_v58, 2 }
 0x157   : > { %4303 = vmatpush1.bf16.msra.mxu1 %v4302_v37  ;;  %4289 = vmatprep.subr.bf16.mxu0 %v4288_v44  ;;  %v2915_v31 = vsel %vm901_vm0, %v2913_v54, %v2914_v33  ;;  %v2921_v59 = vsel %vm901_vm0, %v2919_v16, %v2920_v35  ;;  %v2930_v37 = vsel %vm901_vm0, %v1927_v15, %v2929_v42  ;;  %v2932_v44 = vrot.slane %v5518_v28, 2 }
 0x158   : > { %3978 = vmatmul.mubr.msk.f32.gmra.mrb[4].mxu0 %vm416_vm2, %v2587_v25  ;;  %4305 = vmatprep.subr.bf16.mxu1 %v4304_v6  ;;  %v3244_v15 = vshrl.u32 %v3243_v13, 7 }
 0x159   : > { %3986 = vmatmul.mubr.msk.f32.gmra.mrb[4].mxu1 %vm416_vm2, %v2587_v25  ;;  %2734 = vmatprep.mubr.f32.mxu0 %v4785_v0  ;;  %v2933_v58 = vsel %vm901_vm0, %v2931_v39, %v2932_v44 }
 0x15a   : > { %2847 = vmatprep.mubr.f32.mxu1 %v4785_v0  ;;  %4291 = vmatpush1.bf16.msra.mxu0 %v4290_v27  ;;  %v3245_v45 = vsub.s32 0, %v3244_v15  ;;  %v3253_v62 = vsub.s32 2, %v3244_v15  ;;  %v3249_v6 = vsub.s32 1, %v3244_v15  ;;  %v3257_v14 = vsub.s32 3, %v3244_v15 }
 0x15b   : > { %4307 = vmatpush1.bf16.msra.mxu1 %v4306_v5  ;;  %4293 = vmatprep.subr.bf16.mxu0 %v4292_v47 }
 0x15c   : > { %3979 = vmatmul.mubr.msk.f32.gmra.mrb[6].mxu0 %vm416_vm2, %v2590_v50  ;;  %4309 = vmatprep.subr.bf16.mxu1 %v4308_v3  ;;  %v5595_v51 = vrot.slane %v3241_v49, %v3245_v45  ;;  %v5597_v19 = vrot.slane %v3241_v49, %v3253_v62  ;;  %v5599_v25 = vrot.slane %v3241_v49, %v3249_v6 }
 0x15d   : > { %3987 = vmatmul.mubr.msk.f32.gmra.mrb[6].mxu1 %vm416_vm2, %v2590_v50  ;;  %2740 = vmatprep.mubr.f32.mxu0 %v4785_v0  ;;  %v5601_v56 = vrot.slane %v3241_v49, %v3257_v14 }
 0x15e   : > { %2853 = vmatprep.mubr.f32.mxu1 %v4785_v0  ;;  %4295 = vmatpush1.bf16.msra.mxu0 %v4294_v12 }
 0x15f   : > { %4311 = vmatpush1.bf16.msra.mxu1 %v4310_v2 }
 0x160   : > { %3980 = vmatmul.mubr.msk.f32.gmra.mrb[8].mxu0 %vm416_vm2, %v2593_v22 }
 0x161   : > { %3988 = vmatmul.mubr.msk.f32.gmra.mrb[8].mxu1 %vm416_vm2, %v2593_v22  ;;  %2746 = vmatprep.mubr.f32.mxu0 %v4785_v0 }
 0x162   : > { %2859 = vmatprep.mubr.f32.mxu1 %v4785_v0 }
 0x164   : > { %3981 = vmatmul.mubr.msk.f32.gmra.mrb[10].mxu0 %vm416_vm2, %v2596_v20 }
 0x165   : > { %3989 = vmatmul.mubr.msk.f32.gmra.mrb[10].mxu1 %vm416_vm2, %v2596_v20  ;;  %2752 = vmatprep.mubr.f32.mxu0 %v4785_v0 }
 0x166   : > { %2865 = vmatprep.mubr.f32.mxu1 %v4785_v0 }
 0x168   : > { %3982 = vmatmul.mubr.msk.f32.gmra.mrb[12].mxu0 %vm416_vm2, %v2599_v53 }
 0x169   : > { %3990 = vmatmul.mubr.msk.f32.gmra.mrb[12].mxu1 %vm416_vm2, %v2599_v53  ;;  %2758 = vmatprep.mubr.f32.mxu0 %v4785_v0 }
 0x16a   : > { %2871 = vmatprep.mubr.f32.mxu1 %v4785_v0 }
 0x16c   : > { %3983 = vmatmul.mubr.msk.f32.gmra.mrb[14].mxu0 %vm416_vm2, %v2602_v40 }
 0x16d   : > { %3991 = vmatmul.mubr.msk.f32.gmra.mrb[14].mxu1 %vm416_vm2, %v2602_v40  ;;  %3047 = vmatprep.mubr.f32.mxu0 %v4785_v0 }
 0x16e   : > { %3160 = vmatprep.mubr.f32.mxu1 %v4785_v0 }
 0x170   : > { %3992 = vmatmul.mubr.msk.f32.vlgmr.msra.gmra.mrb[0].mxu0 %vm416_vm2, %v2912_v7 }
 0x171   : > { %4000 = vmatmul.mubr.msk.f32.vlgmr.msra.gmra.mrb[0].mxu1 %vm416_vm2, %v2912_v7  ;;  %3053 = vmatprep.mubr.f32.mxu0 %v4785_v0 }
 0x172   : > { %3166 = vmatprep.mubr.f32.mxu1 %v4785_v0 }
 0x174   : > { %3993 = vmatmul.mubr.msk.f32.gmra.mrb[2].mxu0 %vm416_vm2, %v2915_v31 }
 0x175   : > { %4001 = vmatmul.mubr.msk.f32.gmra.mrb[2].mxu1 %vm416_vm2, %v2915_v31  ;;  %3059 = vmatprep.mubr.f32.mxu0 %v4785_v0 }
 0x176   : > { %3172 = vmatprep.mubr.f32.mxu1 %v4785_v0 }
 0x178   : > { %3994 = vmatmul.mubr.msk.f32.gmra.mrb[4].mxu0 %vm416_vm2, %v2918_v26 }
 0x179   : > { %4002 = vmatmul.mubr.msk.f32.gmra.mrb[4].mxu1 %vm416_vm2, %v2918_v26  ;;  %3065 = vmatprep.mubr.f32.mxu0 %v4785_v0 }
 0x17a   : > { %3178 = vmatprep.mubr.f32.mxu1 %v4785_v0 }
 0x17c   : > { %3995 = vmatmul.mubr.msk.f32.gmra.mrb[6].mxu0 %vm416_vm2, %v2921_v59 }
 0x17d   : > { %4003 = vmatmul.mubr.msk.f32.gmra.mrb[6].mxu1 %vm416_vm2, %v2921_v59  ;;  %3071 = vmatprep.mubr.f32.mxu0 %v4785_v0 }
 0x17e   : > { %3184 = vmatprep.mubr.f32.mxu1 %v4785_v0 }
 0x180   : > { %3996 = vmatmul.mubr.msk.f32.gmra.mrb[8].mxu0 %vm416_vm2, %v2924_v17 }
 0x181   : > { %4004 = vmatmul.mubr.msk.f32.gmra.mrb[8].mxu1 %vm416_vm2, %v2924_v17  ;;  %3077 = vmatprep.mubr.f32.mxu0 %v4785_v0 }
 0x182   : > { %3190 = vmatprep.mubr.f32.mxu1 %v4785_v0 }
 0x184   : > { %3997 = vmatmul.mubr.msk.f32.gmra.mrb[10].mxu0 %vm416_vm2, %v2927_v63 }
 0x185   : > { %4005 = vmatmul.mubr.msk.f32.gmra.mrb[10].mxu1 %vm416_vm2, %v2927_v63  ;;  %3083 = vmatprep.mubr.f32.mxu0 %v4785_v0 }
 0x186   : > { %3196 = vmatprep.mubr.f32.mxu1 %v4785_v0 }
 0x188   : > { %3998 = vmatmul.mubr.msk.f32.gmra.mrb[12].mxu0 %vm416_vm2, %v2930_v37 }
 0x189   : > { %4006 = vmatmul.mubr.msk.f32.gmra.mrb[12].mxu1 %vm416_vm2, %v2930_v37  ;;  %3089 = vmatprep.mubr.f32.mxu0 %v4785_v0 }
 0x18a   : > { %3202 = vmatprep.mubr.f32.mxu1 %v4785_v0 }
 0x18c   : > { %3999 = vmatmul.mubr.msk.f32.gmra.mrb[14].mxu0 %vm416_vm2, %v2933_v58 }
 0x18d   : > { %4007 = vmatmul.mubr.msk.f32.gmra.mrb[14].mxu1 %vm416_vm2, %v2933_v58  ;;  %3447 = vmatprep.mubr.f32.mxu0 %v4785_v0 }
 0x18e   : > { %3554 = vmatprep.mubr.f32.mxu1 %v4785_v0 }
 0x243   : > { %v3049_v55 = vpop.f32.mrb[0].mxu0 }
 0x244   : > { %v3162_v29 = vpop.f32.mrb[0].mxu1  ;;  %v3051_v43 = vpop.f32.mrb[1].mxu0  ;;  %v3263_v27 = vadd.f32 %v5595_v51, %v3049_v55 }
 0x245   : > { %v3164_v60 = vpop.f32.mrb[1].mxu1  ;;  %v3265_v5 = vadd.f32 %v5597_v19, %v3162_v29  ;;  %v3264_v47 = vadd.f32 %v5599_v25, %v3051_v43 }
 0x246   : > { %v3266_v23 = vadd.f32 %v5601_v56, %v3164_v60  ;;  %v3295_v52 = vmax.f32 %v3263_v27, 0.0 }
 0x247   : > { %v3055_v1 = vpop.f32.mrb[2].mxu0  ;;  %v3297_v10 = vmax.f32 %v3265_v5, 0.0  ;;  %v3296_v22 = vmax.f32 %v3264_v47, 0.0 }
 0x248   : > { %v3267_v3 = vadd.f32 %v5595_v51, %v3055_v1  ;;  %v3168_v41 = vpop.f32.mrb[2].mxu1  ;;  %v3057_v61 = vpop.f32.mrb[3].mxu0  ;;  %v3298_v9 = vmax.f32 %v3266_v23, 0.0 }
 0x249   : > { %v3269_v21 = vadd.f32 %v5597_v19, %v3168_v41  ;;  %v3268_v50 = vadd.f32 %v5599_v25, %v3057_v61  ;;  %v3170_v57 = vpop.f32.mrb[3].mxu1 }
 0x24a   : > { %v3299_v12 = vmax.f32 %v3267_v3, 0.0  ;;  %v3270_v2 = vadd.f32 %v5601_v56, %v3170_v57 }
 0x24b   : > { %v3301_v11 = vmax.f32 %v3269_v21, 0.0  ;;  %v3300_v4 = vmax.f32 %v3268_v50, 0.0  ;;  %v3061_v20 = vpop.f32.mrb[4].mxu0 }
 0x24c   : > { %v4314_v28 = vpack.c.bf16 %v3299_v12, %v3295_v52  ;;  %v3302_v30 = vmax.f32 %v3270_v2, 0.0  ;;  %v3174_v53 = vpop.f32.mrb[4].mxu1  ;;  %v3063_v46 = vpop.f32.mrb[5].mxu0  ;;  %v3271_v7 = vadd.f32 %v5595_v51, %v3061_v20 }
 0x24d   : > { %v4330_v18 = vpack.c.bf16 %v3301_v11, %v3297_v10  ;;  %v4312_v40 = vpack.c.bf16 %v3300_v4, %v3296_v22  ;;  %v3176_v32 = vpop.f32.mrb[5].mxu1  ;;  %v3273_v33 = vadd.f32 %v5597_v19, %v3174_v53  ;;  %v3272_v48 = vadd.f32 %v5599_v25, %v3063_v46 }
 0x24e   : > { %v4328_v54 = vpack.c.bf16 %v3302_v30, %v3298_v9  ;;  %v3274_v34 = vadd.f32 %v5601_v56, %v3176_v32  ;;  %v3303_v38 = vmax.f32 %v3271_v7, 0.0 }
 0x24f   : > { %v3067_v31 = vpop.f32.mrb[6].mxu0  ;;  %4313 = vmatprep.subr.bf16.mxu0 %v4312_v40  ;;  %v3305_v63 = vmax.f32 %v3273_v33, 0.0  ;;  %v3304_v42 = vmax.f32 %v3272_v48, 0.0 }
 0x250   : > { %v3275_v16 = vadd.f32 %v5595_v51, %v3067_v31  ;;  %v3180_v26 = vpop.f32.mrb[6].mxu1  ;;  %4329 = vmatprep.subr.bf16.mxu1 %v4328_v54  ;;  %v3069_v35 = vpop.f32.mrb[7].mxu0  ;;  %4315 = vmatpush1.bf16.msra.mxu0 %v4314_v28  ;;  %v3306_v58 = vmax.f32 %v3274_v34, 0.0 }
 0x251   : > { %v3277_v24 = vadd.f32 %v5597_v19, %v3180_v26  ;;  %v3276_v59 = vadd.f32 %v5599_v25, %v3069_v35  ;;  %v3182_v36 = vpop.f32.mrb[7].mxu1  ;;  %4331 = vmatpush1.bf16.msra.mxu1 %v4330_v18 }
 0x252   : > { %v3307_v17 = vmax.f32 %v3275_v16, 0.0  ;;  %v3278_v8 = vadd.f32 %v5601_v56, %v3182_v36 }
 0x253   : > { %v3309_v39 = vmax.f32 %v3277_v24, 0.0  ;;  %v3308_v37 = vmax.f32 %v3276_v59, 0.0  ;;  %v3073_v44 = vpop.f32.mrb[8].mxu0 }
 0x254   : > { %v4318_v13 = vpack.c.bf16 %v3307_v17, %v3303_v38  ;;  %v3310_v15 = vmax.f32 %v3278_v8, 0.0  ;;  %v3186_v45 = vpop.f32.mrb[8].mxu1  ;;  %v3075_v49 = vpop.f32.mrb[9].mxu0  ;;  %v3279_v29 = vadd.f32 %v5595_v51, %v3073_v44 }
 0x255   : > { %v4334_v62 = vpack.c.bf16 %v3309_v39, %v3305_v63  ;;  %v4316_v6 = vpack.c.bf16 %v3308_v37, %v3304_v42  ;;  %v3188_v14 = vpop.f32.mrb[9].mxu1  ;;  %v3281_v43 = vadd.f32 %v5597_v19, %v3186_v45  ;;  %v3280_v60 = vadd.f32 %v5599_v25, %v3075_v49  ;;  %v3360_v45 = vld [vmem:[#allocation7 + $0x28] sm:$0xff]  ;;  %v3361_v49 = vld [vmem:[#allocation7 + $0x30] sm:$0x1] }
 0x256   : > { %v4332_v55 = vpack.c.bf16 %v3310_v15, %v3306_v58  ;;  %v3282_v5 = vadd.f32 %v5601_v56, %v3188_v14  ;;  %v3311_v21 = vmax.f32 %v3279_v29, 0.0  ;;  %v3359_v15 = vld [vmem:[#allocation7 + $0x20] sm:$0xff] }
 0x257   : > { %v3079_v27 = vpop.f32.mrb[10].mxu0  ;;  %4317 = vmatprep.subr.bf16.mxu0 %v4316_v6  ;;  %v3313_v52 = vmax.f32 %v3281_v43, 0.0  ;;  %v3312_v12 = vmax.f32 %v3280_v60, 0.0 }
 0x258   : > { %v3283_v47 = vadd.f32 %v5595_v51, %v3079_v27  ;;  %v3192_v1 = vpop.f32.mrb[10].mxu1  ;;  %4333 = vmatprep.subr.bf16.mxu1 %v4332_v55  ;;  %v3081_v23 = vpop.f32.mrb[11].mxu0  ;;  %4319 = vmatpush1.bf16.msra.mxu0 %v4318_v13  ;;  %v3314_v11 = vmax.f32 %v3282_v5, 0.0  ;;  %v3358_v13 = vld [vmem:[#allocation7 + $0x18] sm:$0xff] }
 0x259   : > { %v3285_v3 = vadd.f32 %v5597_v19, %v3192_v1  ;;  %v3284_v41 = vadd.f32 %v5599_v25, %v3081_v23  ;;  %v3194_v61 = vpop.f32.mrb[11].mxu1  ;;  %4335 = vmatpush1.bf16.msra.mxu1 %v4334_v62 }
 0x25a   : > { %v3315_v50 = vmax.f32 %v3283_v47, 0.0  ;;  %v3286_v57 = vadd.f32 %v5601_v56, %v3194_v61 }
 0x25b   : > { %v3317_v2 = vmax.f32 %v3285_v3, 0.0  ;;  %v3316_v10 = vmax.f32 %v3284_v41, 0.0  ;;  %v3085_v22 = vpop.f32.mrb[12].mxu0 }
 0x25c   : > { %v4322_v4 = vpack.c.bf16 %v3315_v50, %v3311_v21  ;;  %v3318_v20 = vmax.f32 %v3286_v57, 0.0  ;;  %v3198_v9 = vpop.f32.mrb[12].mxu1  ;;  %v3087_v28 = vpop.f32.mrb[13].mxu0  ;;  %v3287_v40 = vadd.f32 %v5595_v51, %v3085_v22 }
 0x25d   : > { %v4338_v30 = vpack.c.bf16 %v3317_v2, %v3313_v52  ;;  %v4320_v53 = vpack.c.bf16 %v3316_v10, %v3312_v12  ;;  %v3200_v46 = vpop.f32.mrb[13].mxu1  ;;  %v3289_v32 = vadd.f32 %v5597_v19, %v3198_v9  ;;  %v3288_v54 = vadd.f32 %v5599_v25, %v3087_v28  ;;  %v3354_v28 = vld [vmem:[#allocation2 + $0xd8] sm:$0x1] }
 0x25e   : > { %v4336_v18 = vpack.c.bf16 %v3318_v20, %v3314_v11  ;;  %v3290_v33 = vadd.f32 %v5601_v56, %v3200_v46  ;;  %v3319_v24 = vmax.f32 %v3287_v40, 0.0  ;;  %v3351_v11 = vld [vmem:[#allocation2 + $0xc0] sm:$0x1]  ;;  %v3352_v20 = vld [vmem:[#allocation2 + $0xc8] sm:$0x1] }
 0x25f   : > { %v3091_v7 = vpop.f32.mrb[14].mxu0  ;;  %4321 = vmatprep.subr.bf16.mxu0 %v4320_v53  ;;  %v3321_v38 = vmax.f32 %v3289_v32, 0.0  ;;  %v3320_v17 = vmax.f32 %v3288_v54, 0.0 }
 0x260   : > { %v3291_v48 = vadd.f32 %v5595_v51, %v3091_v7  ;;  %v3204_v31 = vpop.f32.mrb[14].mxu1  ;;  %4337 = vmatprep.subr.bf16.mxu1 %v4336_v18  ;;  %v3093_v34 = vpop.f32.mrb[15].mxu0  ;;  %4323 = vmatpush1.bf16.msra.mxu0 %v4322_v4  ;;  %v3322_v42 = vmax.f32 %v3290_v33, 0.0  ;;  %v3353_v4 = vld [vmem:[#allocation2 + $0xd0] sm:$0x1] }
 0x261   : > { %v3293_v16 = vadd.f32 %v5597_v19, %v3204_v31  ;;  %v3292_v26 = vadd.f32 %v5599_v25, %v3093_v34  ;;  %v3206_v35 = vpop.f32.mrb[15].mxu1  ;;  %4339 = vmatpush1.bf16.msra.mxu1 %v4338_v30  ;;  %v3355_v19 = vld [vmem:[#allocation7] sm:$0xff]  ;;  %v3356_v25 = vld [vmem:[#allocation7 + $0x8] sm:$0xff] }
 0x262   : > { %v3323_v59 = vmax.f32 %v3291_v48, 0.0  ;;  %v3294_v36 = vadd.f32 %v5601_v56, %v3206_v35  ;;  %v3357_v56 = vld [vmem:[#allocation7 + $0x10] sm:$0xff] }
 0x263   : > { %v3325_v8 = vmax.f32 %v3293_v16, 0.0  ;;  %v3324_v63 = vmax.f32 %v3292_v26, 0.0 }
 0x264   : > { %v4326_v51 = vpack.c.bf16 %v3323_v59, %v3319_v24  ;;  %v3326_v39 = vmax.f32 %v3294_v36, 0.0 }
 0x265   : > { %v4342_v37 = vpack.c.bf16 %v3325_v8, %v3321_v38  ;;  %v4324_v44 = vpack.c.bf16 %v3324_v63, %v3320_v17 }
 0x266   : > { %v4340_v58 = vpack.c.bf16 %v3326_v39, %v3322_v42 }
 0x267   : > { %4325 = vmatprep.subr.bf16.mxu0 %v4324_v44 }
 0x268   : > { %4341 = vmatprep.subr.bf16.mxu1 %v4340_v58  ;;  %4327 = vmatpush1.bf16.msra.mxu0 %v4326_v51 }
 0x269   : > { %4343 = vmatpush1.bf16.msra.mxu1 %v4342_v37 }
 0x26b   : > { %4008 = vmatmul.mubr.msk.f32.vlgmr.msra.gmra.mrb[16].mxu0 %vm416_vm2, %v3355_v19 }
 0x26c   : > { %4015 = vmatmul.mubr.msk.f32.vlgmr.msra.gmra.mrb[16].mxu1 %vm416_vm2, %v3355_v19  ;;  %3453 = vmatprep.mubr.f32.mxu0 %v4785_v0 }
 0x26d   : > { %3560 = vmatprep.mubr.f32.mxu1 %v4785_v0 }
 0x26f   : > { %4009 = vmatmul.mubr.msk.f32.gmra.mrb[18].mxu0 %vm416_vm2, %v3356_v25 }
 0x270   : > { %4016 = vmatmul.mubr.msk.f32.gmra.mrb[18].mxu1 %vm416_vm2, %v3356_v25  ;;  %3459 = vmatprep.mubr.f32.mxu0 %v4785_v0 }
 0x271   : > { %3566 = vmatprep.mubr.f32.mxu1 %v4785_v0 }
 0x273   : > { %4010 = vmatmul.mubr.msk.f32.gmra.mrb[20].mxu0 %vm416_vm2, %v3357_v56 }
 0x274   : > { %4017 = vmatmul.mubr.msk.f32.gmra.mrb[20].mxu1 %vm416_vm2, %v3357_v56  ;;  %3465 = vmatprep.mubr.f32.mxu0 %v4785_v0 }
 0x275   : > { %3572 = vmatprep.mubr.f32.mxu1 %v4785_v0 }
 0x277   : > { %4011 = vmatmul.mubr.msk.f32.gmra.mrb[22].mxu0 %vm416_vm2, %v3358_v13 }
 0x278   : > { %4018 = vmatmul.mubr.msk.f32.gmra.mrb[22].mxu1 %vm416_vm2, %v3358_v13  ;;  %3471 = vmatprep.mubr.f32.mxu0 %v4785_v0 }
 0x279   : > { %3578 = vmatprep.mubr.f32.mxu1 %v4785_v0 }
 0x27b   : > { %4012 = vmatmul.mubr.msk.f32.gmra.mrb[24].mxu0 %vm416_vm2, %v3359_v15 }
 0x27c   : > { %4019 = vmatmul.mubr.msk.f32.gmra.mrb[24].mxu1 %vm416_vm2, %v3359_v15  ;;  %3477 = vmatprep.mubr.f32.mxu0 %v4785_v0 }
 0x27d   : > { %3584 = vmatprep.mubr.f32.mxu1 %v4785_v0 }
 0x27f   : > { %4013 = vmatmul.mubr.msk.f32.gmra.mrb[26].mxu0 %vm416_vm2, %v3360_v45 }
 0x280   : > { %4020 = vmatmul.mubr.msk.f32.gmra.mrb[26].mxu1 %vm416_vm2, %v3360_v45  ;;  %3483 = vmatprep.mubr.f32.mxu0 %v4785_v0 }
 0x281   : > { %3590 = vmatprep.mubr.f32.mxu1 %v4785_v0 }
 0x283   : > { %4014 = vmatmul.mubr.msk.f32.gmra.mrb[28].mxu0 %vm416_vm2, %v3361_v49 }
 0x284   : > { %4021 = vmatmul.mubr.msk.f32.gmra.mrb[28].mxu1 %vm416_vm2, %v3361_v49 }
 0x33e   : > { %v3449_v62 = vpop.f32.mrb[16].mxu0 }
 0x33f   : > { %v3556_v0 = vpop.f32.mrb[16].mxu1  ;;  %v3451_v6 = vpop.f32.mrb[17].mxu0  ;;  %3684 = vst [vmem:[%s5665_s6] sm:$0xff] %v3449_v62 }
 0x340   : > { %v3558_v14 = vpop.f32.mrb[17].mxu1  ;;  %3686 = vst [vmem:[%s5665_s6 + $0x10] sm:$0xff] %v3556_v0  ;;  %3685 = vst [vmem:[%s5665_s6 + $0x8] sm:$0xff] %v3451_v6 }
 0x341   : > { %3687 = vst [vmem:[%s5665_s6 + $0x18] sm:$0xff] %v3558_v14 }
 0x342   : > { %v3455_v55 = vpop.f32.mrb[18].mxu0 }
 0x343   : > { %v3562_v29 = vpop.f32.mrb[18].mxu1  ;;  %v3457_v43 = vpop.f32.mrb[19].mxu0  ;;  %3688 = vst [vmem:[%s5665_s6 + $0x20] sm:$0xff] %v3455_v55 }
 0x344   : > { %v3564_v60 = vpop.f32.mrb[19].mxu1  ;;  %3690 = vst [vmem:[%s5665_s6 + $0x30] sm:$0xff] %v3562_v29  ;;  %3689 = vst [vmem:[%s5665_s6 + $0x28] sm:$0xff] %v3457_v43 }
 0x345   : > { %3691 = vst [vmem:[%s5665_s6 + $0x38] sm:$0xff] %v3564_v60 }
 0x346   : > { %v3461_v27 = vpop.f32.mrb[20].mxu0 }
 0x347   : > { %v3568_v5 = vpop.f32.mrb[20].mxu1  ;;  %v3463_v47 = vpop.f32.mrb[21].mxu0  ;;  %3692 = vst [vmem:[%s5665_s6 + $0x40] sm:$0xff] %v3461_v27 }
 0x348   : > { %v3570_v1 = vpop.f32.mrb[21].mxu1  ;;  %3694 = vst [vmem:[%s5665_s6 + $0x50] sm:$0xff] %v3568_v5  ;;  %3693 = vst [vmem:[%s5665_s6 + $0x48] sm:$0xff] %v3463_v47 }
 0x349   : > { %3695 = vst [vmem:[%s5665_s6 + $0x58] sm:$0xff] %v3570_v1 }
 0x34a   : > { %v3467_v23 = vpop.f32.mrb[22].mxu0 }
 0x34b   : > { %v3574_v3 = vpop.f32.mrb[22].mxu1  ;;  %v3469_v41 = vpop.f32.mrb[23].mxu0  ;;  %3696 = vst [vmem:[%s5665_s6 + $0x60] sm:$0xff] %v3467_v23 }
 0x34c   : > { %v3576_v61 = vpop.f32.mrb[23].mxu1  ;;  %3698 = vst [vmem:[%s5665_s6 + $0x70] sm:$0xff] %v3574_v3  ;;  %3697 = vst [vmem:[%s5665_s6 + $0x68] sm:$0xff] %v3469_v41 }
 0x34d   : > { %3699 = vst [vmem:[%s5665_s6 + $0x78] sm:$0xff] %v3576_v61 }
 0x34e   : > { %v3473_v21 = vpop.f32.mrb[24].mxu0 }
 0x34f   : > { %v3580_v50 = vpop.f32.mrb[24].mxu1  ;;  %v3475_v57 = vpop.f32.mrb[25].mxu0  ;;  %3700 = vst [vmem:[%s5665_s6 + $0x80] sm:$0xff] %v3473_v21 }
 0x350   : > { %v3582_v52 = vpop.f32.mrb[25].mxu1  ;;  %3702 = vst [vmem:[%s5665_s6 + $0x90] sm:$0xff] %v3580_v50  ;;  %3701 = vst [vmem:[%s5665_s6 + $0x88] sm:$0xff] %v3475_v57 }
 0x351   : > { %3703 = vst [vmem:[%s5665_s6 + $0x98] sm:$0xff] %v3582_v52 }
 0x352   : > { %v3479_v12 = vpop.f32.mrb[26].mxu0 }
 0x353   : > { %v3586_v2 = vpop.f32.mrb[26].mxu1  ;;  %v3481_v10 = vpop.f32.mrb[27].mxu0  ;;  %3704 = vst [vmem:[%s5665_s6 + $0xa0] sm:$0xff] %v3479_v12 }
 0x354   : > { %v3588_v22 = vpop.f32.mrb[27].mxu1  ;;  %3706 = vst [vmem:[%s5665_s6 + $0xb0] sm:$0xff] %v3586_v2  ;;  %3705 = vst [vmem:[%s5665_s6 + $0xa8] sm:$0xff] %v3481_v10 }
 0x355   : > { %3707 = vst [vmem:[%s5665_s6 + $0xb8] sm:$0xff] %v3588_v22 }
 0x356   : > { %v3485_v9 = vpop.f32.mrb[28].mxu0 }
 0x357   : > { %v3621_v30 = vadd.f32 %v3485_v9, %v3351_v11  ;;  %v3592_v53 = vpop.f32.mrb[28].mxu1  ;;  %v3487_v46 = vpop.f32.mrb[29].mxu0 }
 0x358   : > { %v3623_v18 = vadd.f32 %v3592_v53, %v3353_v4  ;;  %v3622_v40 = vadd.f32 %v3487_v46, %v3352_v20  ;;  %v3594_v32 = vpop.f32.mrb[29].mxu1 }
 0x359   : > { %3649 = vst [vmem:[#allocation2 + $0xc0] sm:$0x1] %v3621_v30  ;;  %v3624_v54 = vadd.f32 %v3594_v32, %v3354_v28 }
 0x35a   : > { %3651 = vst [vmem:[#allocation2 + $0xd0] sm:$0x1] %v3623_v18  ;;  %3650 = vst [vmem:[#allocation2 + $0xc8] sm:$0x1] %v3622_v40 }
 0x35b   : > { %3652 = vst [vmem:[#allocation2 + $0xd8] sm:$0x1] %v3624_v54 }
 0x360   : > { %v3680_v7 = vld [vmem:[#allocation2 + $0xc0] sm:$0x1] }
 0x361   : > { %3708 = vst [vmem:[%s5665_s6 + $0xc0] sm:$0x1] %v3680_v7  ;;  %v3682_v33 = vld [vmem:[#allocation2 + $0xd0] sm:$0x1]  ;;  %v3681_v48 = vld [vmem:[#allocation2 + $0xc8] sm:$0x1] }
 0x362   : > { %3710 = vst [vmem:[%s5665_s6 + $0xd0] sm:$0x1] %v3682_v33  ;;  %3709 = vst [vmem:[%s5665_s6 + $0xc8] sm:$0x1] %v3681_v48  ;;  %v3683_v31 = vld [vmem:[#allocation2 + $0xd8] sm:$0x1] }
 0x363   : > { %3711 = vst [vmem:[%s5665_s6 + $0xd8] sm:$0x1] %v3683_v31 }
 0x364 PF: > { %s16_s17 = sadd.s32 1, %s4776_s17   ;;  %s5720_s15 = smov %s4772_s16 }
 0x365   : > { %p13_p8 = scmp.ge.s32.totalorder %s16_s17, 4   ;;  %s5721_s16 = smov %s5723_s23 }
 0x367   :  { %15 = sbr.rel (!%p13_p8) target bundleno = 3 (0x3), region = 99 }
 0x36e   :  { %3733 = vsyncpa [#allocation4], 1 }
 0x36f   :  { %3735 = vsyncpa [#allocation4 + $0x1], 1 }
 0x370   :  { %3736 = vsyncpa [#allocation6], 1 }

// kernel: vgg_forward.7
= control target key start
LH: loop header
LB: loop body
LE: loop exit
PB: predicated region body
PF: predicated region fallthrough
CT: control target
= control target key end

     0   :  { %s18789_s0 = inlined_call_operand.vmem [shape: f32[2,25088], index: 0, kind: input, shape index: {}]   ;;  %s18790_s1 = inlined_call_operand.hbm [shape: bf16[25088,1024], index: 1, kind: input, shape index: {}]   ;;  %s18791_s2 = inlined_call_operand.hbm [shape: f32[1,1024], index: 2, kind: input, shape index: {}]   ;;  %s18792_s3 = inlined_call_operand.vmem [shape: f32[2,1024], index: 3, kind: output, shape index: {}]  }
   0x1   :  { %18798 = sst [smem:[#allocation10_spill]] %s18790_s1 }
   0x2   :  { %8 = vsyncpa [#allocation4], 0 }
   0x3   :  { %10 = vsyncpa [#allocation4 + $0x1], 0 }
   0x4   :  { %11 = vsyncpa [#allocation6], 0 }
   0x5   :  { %13 = vsyncpa [#allocation6 + $0x1], 0  ;;  %s16695_s12 = smov 0   ;;  %s16697_s13 = smov 0  }
   0x6   :  { %s16699_s14 = smov 0   ;;  %s16701_s15 = smov 0  }
   0x7   :  { %s16703_s16 = smov 0   ;;  %s16705_s17 = smov 0  }
   0x8   :  { %s16707_s18 = smov 0   ;;  %s16709_s19 = smov 0  }
   0x9   :  { %s16711_s20 = smov 0   ;;  %s16713_s21 = smov 0  }
   0xa   :  { %s16715_s22 = smov 0  }
   0xb LB: > { %s28_s23 = sadd.s32 1, %s16657_s20  ;;  %p73_p1 = scmp.ne.s32.totalorder %s16645_s17, %s16641_s16  ;;  %s16665_s22 = sphi %s16715_s22, %s19_s22   ;;  %s16661_s21 = sphi %s16713_s21, %s18826_s21   ;;  %s16657_s20 = sphi %s16711_s20, %s18825_s20   ;;  %s16653_s19 = sphi %s16709_s19, %s18824_s19   ;;  %s16649_s18 = sphi %s16707_s18, %s18823_s18   ;;  %s16645_s17 = sphi %s16705_s17, %s18822_s17   ;;  %s16641_s16 = sphi %s16703_s16, %s18821_s16   ;;  %s16637_s15 = sphi %s16701_s15, %s18820_s15   ;;  %s16633_s14 = sphi %s16699_s14, %s18819_s14   ;;  %s16629_s13 = sphi %s16697_s13, %s18818_s13   ;;  %s16625_s12 = sphi %s16695_s12, %s18817_s12  }
   0xc   : > { %p16752_p0 = scmp.ge.s32.totalorder %s28_s23, 4  ;;  %p18794_p2 = scmp.eq.s32.totalorder %s16665_s22, 0 }
   0xd   : > { %p18793_p4 = scmp.lt.s32.totalorder %s16665_s22, 8  ;;  %s164_s27 = sand.u32 1, %s16645_s17  }
   0xe   : > { %s18828_s23 = smov (%p16752_p0, %s28_s23), 0  ;;  %p75_p3 = por %p18794_p2, %p73_p1 }
   0xf   : > { %s14039_s28 = smul.u32 12544, %s164_s27  ;;  %s12261_s29 = sshll.u32 %s16661_s21, 2 }
  0x10   : > { %s13845_s30 = smul.u32 6272, %s16657_s20  ;;  %p16773_p5 = pnand %p18793_p4, %p75_p3 }
  0x11   : > { %s168_s6 = scalar_lea.vmem [#allocation3], %s14039_s28  ;;  %s18801_s1 = sld [smem:[#allocation10_spill]] }
  0x12   : > { %s175_s5 = sadd.s32 %s13845_s30, %s12261_s29  ;;  %s178_s7 = sshll.u32 %s168_s6, 4  ;;  %s16777_s7 = int_to_ptr.vmem [resolvable:$true] %s178_s7 }
  0x13   : > { %s12263_s8 = sshll.u32 %s175_s5, 6  ;;  %s16785_s24 = scalar_lea.sflag [#allocation4], %s164_s27 }
  0x14   : > { %p16513_p8 = pneg %p16773_p5 }
  0x17   : > { %s16782_s11 = scalar_lea.hbm %s18801_s1, %s12263_s8  ;;  %s16516_s30 = scalar_lea.hbm %s18801_s1, 1605632 }
  0x18   : > { %s16511_s26 = scalar_lea.hbm %s16782_s11, 200704  ;;  %p16517_p11 = scmp.lt.u32.totalorder %s16782_s11, %s18801_s1 }
  0x19   : > { %p16512_p7 = scmp.ne.s32.totalorder %s16782_s11, %s16511_s26  ;;  %p16518_p12 = scmp.lt.u32.totalorder %s16516_s30, %s16511_s26 }
  0x1a   : > { %p16520_p1 = scmp.lt.u32.totalorder %s16511_s26, %s16782_s11 }
  0x1b   : > { %p16514_p9 = pnand %p16513_p8, %p16512_p7  ;;  %p16519_p13 = por %p16518_p12, %p16517_p11 }
  0x1d   : > { %p16515_p10 = pneg %p16514_p9  ;;  %p16521_p3 = por %p16520_p1, %p16519_p13 }
  0x1f   : > { %p16522_p4 = pnand %p16521_p3, %p16515_p10 }
  0x21   : > { %16525 = shalt.err (!%p16522_p4)
}
  0x22   : > { %s16526_s27 = scalar_lea.vmem %s16777_s7, 200704  ;;  %s16667_s8 = smov [#allocation3]  }
  0x23   : > { %p16527_p7 = scmp.ne.s32.totalorder %s16777_s7, %s16526_s27  ;;  %s16531_s9 = sshll.u32 %s16667_s8, 4  ;;  %s16532_s9 = int_to_ptr.vmem [resolvable:$false] %s16531_s9 }
  0x24   : > { %s16533_s10 = scalar_lea.vmem %s16532_s9, 401408  ;;  %p16534_p6 = scmp.lt.s32.totalorder %s16777_s7, %s16532_s9 }
  0x25   : > { %p16529_p9 = pnand %p16527_p7, %p16513_p8  ;;  %p16535_p11 = scmp.lt.s32.totalorder %s16533_s10, %s16526_s27 }
  0x27   : > { %p16530_p2 = pneg %p16529_p9  ;;  %p16536_p12 = por %p16535_p11, %p16534_p6 }
  0x29   : > { %p16537_p13 = pnand %p16536_p12, %p16530_p2 }
  0x2b   : > { %16540 = shalt.err (!%p16537_p13)
}
  0x2c   : > { %s16668_s26 = smov 512   ;;  %s16669_s28 = smov 256  }
  0x2d   : > { %s16670_s29 = smov 16   ;;  %p205_p2 = scmp.lt.s32.totalorder %s16665_s22, 9 }
  0x2e   : > { %14048 = dma.hbm_to_vmem [thread:$0]  (!%p16773_p5), %s16782_s11, 200704, %s16777_s7, %s16785_s24, %s16668_s26, %s16669_s28, %s16670_s29  }
  0x2f   : > { %p18802_p4 = scmp.ge.s32.totalorder %s16665_s22, 1  ;;  %s12257_s5 = sadd.s32 4294967295, %s16665_s22  }
  0x30   : > { %s31_s6 = sadd.s32 1, %s16661_s21  ;;  %p79_p8 = scmp.ne.s32.totalorder %s16641_s16, %s16637_s15 }
  0x31   : > { %p16816_p6 = pnand %p18802_p4, %p205_p2  ;;  %s18830_s6 = smov (!%p16752_p0, %s31_s6), %s16661_s21 }
  0x32   : > { %p16827_p10 = scmp.eq.s32.totalorder %s12257_s5, 0  ;;  %p33_p5 = scmp.ge.s32.totalorder %s18830_s6, 2 }
  0x33   : > { %s92_s24 = sadd.s32 1, %s16633_s14  ;;  %p99_p3 = scmp.ne.s32.totalorder %s16633_s14, %s16629_s13 }
  0x34   : > { %p16834_p1 = por %p16827_p10, %p79_p8  ;;  %s18832_s6 = smov (%p33_p5, %s18830_s6), 0 }
  0x35   : > { %18806 = sst [smem:[#allocation9_spill]] %s18832_s6  ;;  %p18807_p0 = scmp.eq.s32.totalorder %s16665_s22, 0 }
  0x36   : > { %s18805_s7 = scalar_select %p16834_p1, 1, 0 }
  0x37   : > { %p16844_p7 = por %p99_p3, %p18807_p0  ;;  %p105_p9 = scmp.ne.s32.totalorder %s16629_s13, %s16625_s12 }
  0x38   : > { %s62_s25 = ssub.s32 %s16661_s21, %s18832_s6  ;;  %s188_s11 = sand.u32 1, %s16633_s14  }
  0x39   : > { %s18809_s27 = ssub.s32 %s16657_s20, %s18828_s23  ;;  %p90_p11 = scmp.eq.s32.totalorder %s62_s25, 0 }
  0x3a   : > { %s63_s8 = sor.u32 %s62_s25, %s18809_s27  ;;  %p16858_p13 = por %p105_p9, %p16827_p10 }
  0x3b   : > { %p64_p12 = scmp.eq.s32.totalorder %s63_s8, 0  ;;  %s18811_s26 = sadd.s32 1, %s16645_s17 }
  0x3c   : > { %s18810_s9 = scalar_select %p16858_p13, 1, 0 }
  0x3d   : > { %s16863_s10 = scalar_select %p90_p11, %s16633_s14, %s92_s24  }
  0x3e   : > { %s16868_s28 = scalar_select %p64_p12, %s16645_s17, %s18811_s26  }
  0x3f   : > { %s12264_s29 = sshll.u32 %s188_s11, 2  ;;  %s13846_s5 = sshll.u32 %s16661_s21, 6 }
  0x40   : > { %s16874_s6 = scalar_lea.hbm %s18791_s2, %s13846_s5  ;;  %s192_s4 = scalar_lea.vmem [#allocation5], %s12264_s29 }
  0x41   : > { %s200_s25 = sshll.u32 %s192_s4, 4  ;;  %p18812_p2 = scmp.lt.s32.totalorder %s16665_s22, 8  ;;  %s16876_s25 = int_to_ptr.vmem [resolvable:$true] %s200_s25 }
  0x42   : > { %s189_s27 = scalar_lea.sflag [#allocation6], %s188_s11  ;;  %s16541_s1 = scalar_lea.hbm %s16874_s6, 64 }
  0x43   : > { %p16882_p4 = pnand %p18812_p2, %p16844_p7  ;;  %p16542_p8 = scmp.ne.s32.totalorder %s16874_s6, %s16541_s1 }
  0x44   : > { %s16546_s15 = scalar_lea.hbm %s18791_s2, 128  ;;  %p16547_p0 = scmp.lt.u32.totalorder %s16874_s6, %s18791_s2 }
  0x45   : > { %p16543_p10 = pneg %p16882_p4  ;;  %p16548_p7 = scmp.lt.u32.totalorder %s16546_s15, %s16541_s1 }
  0x46   : > { %p16550_p11 = scmp.lt.u32.totalorder %s16541_s1, %s16874_s6 }
  0x47   : > { %p16544_p5 = pnand %p16543_p10, %p16542_p8  ;;  %p16549_p9 = por %p16548_p7, %p16547_p0 }
  0x49   : > { %p16545_p3 = pneg %p16544_p5  ;;  %p16551_p12 = por %p16550_p11, %p16549_p9 }
  0x4b   : > { %p16552_p2 = pnand %p16551_p12, %p16545_p3 }
  0x4d   : > { %16555 = shalt.err (!%p16552_p2)
}
  0x4e   : > { %s16556_s11 = scalar_lea.vmem %s16876_s25, 64  ;;  %s16671_s12 = smov [#allocation5]  }
  0x4f   : > { %p16557_p8 = scmp.ne.s32.totalorder %s16876_s25, %s16556_s11  ;;  %s16561_s4 = sshll.u32 %s16671_s12, 4  ;;  %s16562_s4 = int_to_ptr.vmem [resolvable:$false] %s16561_s4 }
  0x50   : > { %s16563_s8 = scalar_lea.vmem %s16562_s4, 128  ;;  %p16564_p1 = scmp.lt.s32.totalorder %s16876_s25, %s16562_s4 }
  0x51   : > { %p16559_p5 = pnand %p16557_p8, %p16543_p10  ;;  %p16565_p0 = scmp.lt.s32.totalorder %s16563_s8, %s16556_s11 }
  0x53   : > { %p16560_p13 = pneg %p16559_p5  ;;  %p16566_p7 = por %p16565_p0, %p16564_p1 }
  0x55   : > { %p16567_p9 = pnand %p16566_p7, %p16560_p13 }
  0x57   : > { %16570 = shalt.err (!%p16567_p9)
}
  0x58   : > { %14051 = dma.hbm_to_vmem [thread:$0]  (!%p16882_p4), %s16874_s6, 64, %s16876_s25, %s189_s27  }
  0x59   : > { %209 = sbr.rel (%p16816_p6) target bundleno = 1914 (0x77a), region = 32  ;;  %s211_s1 = sand.u32 (!%p16816_p6), 1, %s16641_s16  }
  0x5a   : > { %s14040_s26 = smul.u32 (!%p16816_p6), 12544, %s211_s1  ;;  %s212_s15 = scalar_lea.sflag (!%p16816_p6), [#allocation4], %s211_s1 }
  0x5b   : > { %p18814_p10 = scmp.ne.s32.totalorder (!%p16816_p6), %s18805_s7, 0 }
  0x5c   : > { %s16914_s29 = scalar_lea.vmem (!%p16816_p6), [#allocation3], %s14040_s26 }
  0x60   : > { %16616 = dma.done.wait (%p18814_p10), %s212_s15, 200704  }
  0x61   : > { %16618 = vsyncadd (%p18814_p10), %s212_s15, 4294766592  ;;  %s220_s24 = sand.u32 1, %s16629_s13   ;;  %p18815_p6 = scmp.ne.s32.totalorder %s18810_s9, 0 }
  0x62   : > { %s16921_s5 = sshll.u32 %s220_s24, 2  ;;  %s221_s30 = scalar_lea.sflag [#allocation6], %s220_s24 }
  0x63   : > { %s224_s6 = scalar_lea.vmem [#allocation5], %s16921_s5 }
  0x64   : > { %16620 = dma.done.wait (%p18815_p6), %s221_s30, 64  }
  0x65   : > { %16622 = vsyncadd (%p18815_p6), %s221_s30, 4294967232  ;;  %s257_s25 = smul.u32 49, %s16649_s18  ;;  %s12270_s27 = sshll.u32 %s16653_s19, 2 }
  0x66   : > { %p267_p1 = scmp.lt.s32.totalorder %s12270_s27, 7  ;;  %p12272_p4 = scmp.ne.s32.totalorder %s16649_s18, 0 }
  0x67   : > { %p258_p13 = scmp.lt.s32.totalorder %s257_s25, 195  ;;  %v16672_v0 = vmov (!%p12272_p4), 0.0  }
  0x68   : > { %s18834_s27 = smov (!%p267_p1, %s12270_s27), 7  ;;  %276 = sbr.rel (%p12272_p4) target bundleno = 111 (0x6f), region = 44 }
  0x69   : > { %s18836_s25 = smov (!%p258_p13, %s257_s25), 195  ;;  %s12271_s7 = sshll.u32 %s18834_s27, 1  ;;  %277 = vst [vmem:[#allocation2] sm:$0xff] (!%p12272_p4), %v16672_v0 }
  0x6a   : > { %s12269_s11 = sshll.u32 %s18836_s25, 1  ;;  %s16933_s8 = scalar_lea.vmem %s18792_s3, %s12271_s7 }
  0x6b   : > { %s16938_s9 = scalar_lea.vmem %s18789_s0, %s12269_s11 }
  0x6f PF: > { %v14147_v1 = vld [vmem:[%s16914_s29 + $0x4] ss:$16 sps:$4 sm:$0xff]   ;;  %v14149_v2 = vld [vmem:[%s16914_s29 + $0xc] ss:$16 sps:$4 sm:$0xff]   ;;  %v14151_v3 = vld [vmem:[%s16914_s29] ss:$16 sps:$4 sm:$0xff]   ;;  %v309_v39 = vlaneseq }
  0x70   : > { %10022 = vmatprep.subr.bf16.mxu0 %v14147_v1  ;;  %v14152_v4 = vld [vmem:[%s16914_s29 + $0x8] ss:$16 sps:$4 sm:$0xff]   ;;  %11047 = vmatprep.subr.bf16.mxu1 %v14149_v2  ;;  %v14153_v5 = vld [vmem:[%s16914_s29 + $0x24] ss:$16 sps:$4 sm:$0xff]   ;;  %v14155_v6 = vld [vmem:[%s16914_s29 + $0x2c] ss:$16 sps:$4 sm:$0xff]  }
  0x71   : > { %10023 = vmatpush1.bf16.msra.mxu0 %v14151_v3  ;;  %11048 = vmatpush1.bf16.msra.mxu1 %v14152_v4  ;;  %v14157_v7 = vld [vmem:[%s16914_s29 + $0x20] ss:$16 sps:$4 sm:$0xff]   ;;  %v14158_v8 = vld [vmem:[%s16914_s29 + $0x28] ss:$16 sps:$4 sm:$0xff]   ;;  %v14159_v9 = vld [vmem:[%s16914_s29 + $0x44] ss:$16 sps:$4 sm:$0xff]  }
  0x72   : > { %10024 = vmatprep.subr.bf16.mxu0 %v14153_v5  ;;  %11049 = vmatprep.subr.bf16.mxu1 %v14155_v6  ;;  %v14161_v10 = vld [vmem:[%s16914_s29 + $0x4c] ss:$16 sps:$4 sm:$0xff]   ;;  %v14163_v11 = vld [vmem:[%s16914_s29 + $0x40] ss:$16 sps:$4 sm:$0xff]   ;;  %v14164_v12 = vld [vmem:[%s16914_s29 + $0x48] ss:$16 sps:$4 sm:$0xff]  }
  0x73   : > { %v14165_v13 = vld [vmem:[%s16914_s29 + $0x64] ss:$16 sps:$4 sm:$0xff]   ;;  %v14167_v14 = vld [vmem:[%s16914_s29 + $0x6c] ss:$16 sps:$4 sm:$0xff]   ;;  %v14169_v15 = vld [vmem:[%s16914_s29 + $0x60] ss:$16 sps:$4 sm:$0xff]  }
  0x74   : > { %v14170_v16 = vld [vmem:[%s16914_s29 + $0x68] ss:$16 sps:$4 sm:$0xff]   ;;  %v14171_v17 = vld [vmem:[%s16914_s29 + $0x84] ss:$16 sps:$4 sm:$0xff]   ;;  %v14173_v18 = vld [vmem:[%s16914_s29 + $0x8c] ss:$16 sps:$4 sm:$0xff]  }
  0x75   : > { %10025 = vmatpush1.bf16.msra.mxu0 %v14157_v7  ;;  %11050 = vmatpush1.bf16.msra.mxu1 %v14158_v8  ;;  %v14175_v19 = vld [vmem:[%s16914_s29 + $0x80] ss:$16 sps:$4 sm:$0xff]   ;;  %v14176_v20 = vld [vmem:[%s16914_s29 + $0x88] ss:$16 sps:$4 sm:$0xff]   ;;  %v14177_v21 = vld [vmem:[%s16914_s29 + $0xa4] ss:$16 sps:$4 sm:$0xff]  }
  0x76   : > { %10026 = vmatprep.subr.bf16.mxu0 %v14159_v9  ;;  %11051 = vmatprep.subr.bf16.mxu1 %v14161_v10  ;;  %v14179_v22 = vld [vmem:[%s16914_s29 + $0xac] ss:$16 sps:$4 sm:$0xff]   ;;  %v14181_v23 = vld [vmem:[%s16914_s29 + $0xa0] ss:$16 sps:$4 sm:$0xff]   ;;  %v14182_v24 = vld [vmem:[%s16914_s29 + $0xa8] ss:$16 sps:$4 sm:$0xff]  }
  0x77   : > { %v14183_v25 = vld [vmem:[%s16914_s29 + $0xc4] ss:$16 sps:$4 sm:$0xff]   ;;  %v14185_v26 = vld [vmem:[%s16914_s29 + $0xcc] ss:$16 sps:$4 sm:$0xff]   ;;  %v14187_v27 = vld [vmem:[%s16914_s29 + $0xc0] ss:$16 sps:$4 sm:$0xff]  }
  0x78   : > { %v14188_v28 = vld [vmem:[%s16914_s29 + $0xc8] ss:$16 sps:$4 sm:$0xff]   ;;  %v14189_v29 = vld [vmem:[%s16914_s29 + $0xe4] ss:$16 sps:$4 sm:$0xff]   ;;  %v14191_v30 = vld [vmem:[%s16914_s29 + $0xec] ss:$16 sps:$4 sm:$0xff]  }
  0x79   : > { %10027 = vmatpush1.bf16.msra.mxu0 %v14163_v11  ;;  %11052 = vmatpush1.bf16.msra.mxu1 %v14164_v12  ;;  %v14193_v31 = vld [vmem:[%s16914_s29 + $0xe0] ss:$16 sps:$4 sm:$0xff]   ;;  %v14194_v32 = vld [vmem:[%s16914_s29 + $0xe8] ss:$16 sps:$4 sm:$0xff]   ;;  %v14195_v33 = vld [vmem:[%s16914_s29 + $0x104] ss:$16 sps:$4 sm:$0xff]  }
  0x7a   : > { %10028 = vmatprep.subr.bf16.mxu0 %v14165_v13  ;;  %11053 = vmatprep.subr.bf16.mxu1 %v14167_v14  ;;  %v14197_v34 = vld [vmem:[%s16914_s29 + $0x10c] ss:$16 sps:$4 sm:$0xff]   ;;  %v14199_v35 = vld [vmem:[%s16914_s29 + $0x100] ss:$16 sps:$4 sm:$0xff]   ;;  %v14200_v36 = vld [vmem:[%s16914_s29 + $0x108] ss:$16 sps:$4 sm:$0xff]  }
  0x7b   : > { %v16673_v37 = vmov 1983009808   ;;  %v14201_v40 = vld [vmem:[%s16914_s29 + $0x124] ss:$16 sps:$4 sm:$0xff]   ;;  %v14203_v41 = vld [vmem:[%s16914_s29 + $0x12c] ss:$16 sps:$4 sm:$0xff]  }
  0x7c   : > { %v307_v38 = vunpack.c.l.s4 %v16673_v37  ;;  %v14205_v42 = vld [vmem:[%s16914_s29 + $0x120] ss:$16 sps:$4 sm:$0xff]   ;;  %v16980_v44 = vshrl.u32 %v309_v39, 7  ;;  %v14206_v45 = vld [vmem:[%s16914_s29 + $0x128] ss:$16 sps:$4 sm:$0xff]   ;;  %p13842_p3 = scmp.ne.s32.totalorder %s16649_s18, 3 }
  0x7d   : > { %10029 = vmatpush1.bf16.msra.mxu0 %v14169_v15  ;;  %11054 = vmatpush1.bf16.msra.mxu1 %v14170_v16  ;;  %v14207_v46 = vld [vmem:[%s16914_s29 + $0x144] ss:$16 sps:$4 sm:$0xff]   ;;  %v14209_v47 = vld [vmem:[%s16914_s29 + $0x14c] ss:$16 sps:$4 sm:$0xff]   ;;  %v14211_v48 = vld [vmem:[%s16914_s29 + $0x140] ss:$16 sps:$4 sm:$0xff]  }
  0x7e   : > { %10030 = vmatprep.subr.bf16.mxu0 %v14171_v17  ;;  %11055 = vmatprep.subr.bf16.mxu1 %v14173_v18  ;;  %v308_v43 = vunpack.c.0.s8 %v307_v38  ;;  %v14212_v49 = vld [vmem:[%s16914_s29 + $0x148] ss:$16 sps:$4 sm:$0xff]   ;;  %v14213_v51 = vld [vmem:[%s16914_s29 + $0x164] ss:$16 sps:$4 sm:$0xff]   ;;  %v14215_v52 = vld [vmem:[%s16914_s29 + $0x16c] ss:$16 sps:$4 sm:$0xff]  }
  0x7f   : > { %v279_v53 = vld [vmem:[%s16938_s9] sm:$0xff]  ;;  %v14217_v54 = vld [vmem:[%s16914_s29 + $0x160] ss:$16 sps:$4 sm:$0xff]   ;;  %v14219_v57 = vld [vmem:[%s16914_s29 + $0x184] ss:$16 sps:$4 sm:$0xff]  }
  0x80   : > { %v16988_v50 = vsub.s32 %v308_v43, %v16980_v44  ;;  %v14218_v56 = vld [vmem:[%s16914_s29 + $0x168] ss:$16 sps:$4 sm:$0xff]   ;;  %v14221_v58 = vld [vmem:[%s16914_s29 + $0x18c] ss:$16 sps:$4 sm:$0xff]   ;;  %v14223_v60 = vld [vmem:[%s16914_s29 + $0x180] ss:$16 sps:$4 sm:$0xff]   ;;  %v305_v5 = vcombine.high %v279_v53, %v279_v53 }
  0x81   : > { %10031 = vmatpush1.bf16.msra.mxu0 %v14175_v19  ;;  %11056 = vmatpush1.bf16.msra.mxu1 %v14176_v20  ;;  %v14224_v62 = vld [vmem:[%s16914_s29 + $0x188] ss:$16 sps:$4 sm:$0xff]   ;;  %v14225_v63 = vld [vmem:[%s16914_s29 + $0x1a4] ss:$16 sps:$4 sm:$0xff]   ;;  %v14227_v0 = vld [vmem:[%s16914_s29 + $0x1ac] ss:$16 sps:$4 sm:$0xff]  }
  0x82   : > { %10032 = vmatprep.subr.bf16.mxu0 %v14177_v21  ;;  %11057 = vmatprep.subr.bf16.mxu1 %v14179_v22  ;;  %v312_v55 = vrot.slane %v279_v53, %v16988_v50  ;;  %v14229_v1 = vld [vmem:[%s16914_s29 + $0x1a0] ss:$16 sps:$4 sm:$0xff]   ;;  %v14230_v2 = vld [vmem:[%s16914_s29 + $0x1a8] ss:$16 sps:$4 sm:$0xff]   ;;  %v14231_v3 = vld [vmem:[%s16914_s29 + $0x1c4] ss:$16 sps:$4 sm:$0xff]   ;;  %v17011_v10 = vrot.slane %v305_v5, %v16988_v50 }
  0x83   : > { %v14233_v4 = vld [vmem:[%s16914_s29 + $0x1cc] ss:$16 sps:$4 sm:$0xff]   ;;  %v14235_v6 = vld [vmem:[%s16914_s29 + $0x1c0] ss:$16 sps:$4 sm:$0xff]   ;;  %v14236_v7 = vld [vmem:[%s16914_s29 + $0x1c8] ss:$16 sps:$4 sm:$0xff]  }
  0x84   : > { %v320_v59 = vcombine.high %v312_v55, %v312_v55  ;;  %v14237_v8 = vld [vmem:[%s16914_s29 + $0x1e4] ss:$16 sps:$4 sm:$0xff]   ;;  %v14239_v9 = vld [vmem:[%s16914_s29 + $0x1ec] ss:$16 sps:$4 sm:$0xff]   ;;  %v14241_v11 = vld [vmem:[%s16914_s29 + $0x1e0] ss:$16 sps:$4 sm:$0xff]   ;;  %v321_v15 = vcombine.high %v17011_v10, %v17011_v10  ;;  %v565_v17 = vpack.c.bf16 %v312_v55, %v312_v55 }
  0x85   : > { %10033 = vmatpush1.bf16.msra.mxu0 %v14181_v23  ;;  %11058 = vmatpush1.bf16.msra.mxu1 %v14182_v24  ;;  %v14242_v12 = vld [vmem:[%s16914_s29 + $0x1e8] ss:$16 sps:$4 sm:$0xff]   ;;  %v14246_v13 = vld [vmem:[%s16914_s29 + $0x204] ss:$16 sps:$4 sm:$0xff]   ;;  %v14249_v14 = vld [vmem:[%s16914_s29 + $0x20c] ss:$16 sps:$4 sm:$0xff]  }
  0x86   : > { %10034 = vmatprep.subr.bf16.mxu0 %v14183_v25  ;;  %11059 = vmatprep.subr.bf16.mxu1 %v14185_v26  ;;  %v566_v61 = vpack.c.bf16 %v320_v59, %v320_v59  ;;  %v14244_v16 = vld [vmem:[%s16914_s29 + $0x200] ss:$16 sps:$4 sm:$0xff]   ;;  %v14247_v18 = vld [vmem:[%s16914_s29 + $0x208] ss:$16 sps:$4 sm:$0xff]   ;;  %v14252_v19 = vld [vmem:[%s16914_s29 + $0x224] ss:$16 sps:$4 sm:$0xff]   ;;  %v568_v21 = vpack.c.bf16 %v321_v15, %v321_v15 }
  0x87   : > { %v14255_v20 = vld [vmem:[%s16914_s29 + $0x22c] ss:$16 sps:$4 sm:$0xff]   ;;  %v14250_v22 = vld [vmem:[%s16914_s29 + $0x220] ss:$16 sps:$4 sm:$0xff]   ;;  %v14253_v23 = vld [vmem:[%s16914_s29 + $0x228] ss:$16 sps:$4 sm:$0xff]  }
  0x88   : > { %10054 = vmatprep.mubr.bf16.mxu0 %v566_v61  ;;  %11079 = vmatprep.mubr.bf16.mxu1 %v566_v61  ;;  %v14258_v24 = vld [vmem:[%s16914_s29 + $0x244] ss:$16 sps:$4 sm:$0xff]   ;;  %v14261_v25 = vld [vmem:[%s16914_s29 + $0x24c] ss:$16 sps:$4 sm:$0xff]   ;;  %v14256_v26 = vld [vmem:[%s16914_s29 + $0x240] ss:$16 sps:$4 sm:$0xff]  }
  0x89   : > { %10035 = vmatpush1.bf16.msra.mxu0 %v14187_v27  ;;  %11060 = vmatpush1.bf16.msra.mxu1 %v14188_v28  ;;  %v14259_v27 = vld [vmem:[%s16914_s29 + $0x248] ss:$16 sps:$4 sm:$0xff]   ;;  %v14264_v28 = vld [vmem:[%s16914_s29 + $0x264] ss:$16 sps:$4 sm:$0xff]   ;;  %v14279_v37 = vld [vmem:[%s16914_s29 + $0x2ac] ss:$16 sps:$4 sm:$0xff]  }
  0x8a   : > { %10036 = vmatprep.subr.bf16.mxu0 %v14189_v29  ;;  %11061 = vmatprep.subr.bf16.mxu1 %v14191_v30  ;;  %v14267_v29 = vld [vmem:[%s16914_s29 + $0x26c] ss:$16 sps:$4 sm:$0xff]   ;;  %v14262_v30 = vld [vmem:[%s16914_s29 + $0x260] ss:$16 sps:$4 sm:$0xff]   ;;  %v14277_v39 = vld [vmem:[%s16914_s29 + $0x2a8] ss:$16 sps:$4 sm:$0xff]  }
  0x8b   : > { %v14274_v38 = vld [vmem:[%s16914_s29 + $0x2a0] ss:$16 sps:$4 sm:$0xff]   ;;  %v14283_v43 = vld [vmem:[%s16914_s29 + $0x2c8] ss:$16 sps:$4 sm:$0xff]   ;;  %v14303_v55 = vld [vmem:[%s16914_s29 + $0x32c] ss:$16 sps:$4 sm:$0xff]  }
  0x8c   : > { %v14295_v53 = vld [vmem:[%s16914_s29 + $0x308] ss:$16 sps:$4 sm:$0xff]   ;;  %v14309_v59 = vld [vmem:[%s16914_s29 + $0x34c] ss:$16 sps:$4 sm:$0xff]   ;;  %v14336_v15 = vld [vmem:[%s16914_s29 + $0x3e4] ss:$16 sps:$4 sm:$0xff]  }
  0x8d   : > { %10037 = vmatpush1.bf16.msra.mxu0 %v14193_v31  ;;  %11062 = vmatpush1.bf16.msra.mxu1 %v14194_v32  ;;  %v14265_v31 = vld [vmem:[%s16914_s29 + $0x268] ss:$16 sps:$4 sm:$0xff]   ;;  %v14270_v32 = vld [vmem:[%s16914_s29 + $0x284] ss:$16 sps:$4 sm:$0xff]  }
  0x8e   : > { %10038 = vmatprep.subr.bf16.mxu0 %v14195_v33  ;;  %11063 = vmatprep.subr.bf16.mxu1 %v14197_v34  ;;  %v14273_v33 = vld [vmem:[%s16914_s29 + $0x28c] ss:$16 sps:$4 sm:$0xff]   ;;  %v14268_v34 = vld [vmem:[%s16914_s29 + $0x280] ss:$16 sps:$4 sm:$0xff]   ;;  %v14307_v61 = vld [vmem:[%s16914_s29 + $0x348] ss:$16 sps:$4 sm:$0xff]  }
  0x8f   : > { %v14319_v5 = vld [vmem:[%s16914_s29 + $0x388] ss:$16 sps:$4 sm:$0xff]  }
  0x91   : > { %10039 = vmatpush1.bf16.msra.mxu0 %v14199_v35  ;;  %11064 = vmatpush1.bf16.msra.mxu1 %v14200_v36  ;;  %v14271_v35 = vld [vmem:[%s16914_s29 + $0x288] ss:$16 sps:$4 sm:$0xff]   ;;  %v14276_v36 = vld [vmem:[%s16914_s29 + $0x2a4] ss:$16 sps:$4 sm:$0xff]  }
  0x92   : > { %10040 = vmatprep.subr.bf16.mxu0 %v14201_v40  ;;  %11065 = vmatprep.subr.bf16.mxu1 %v14203_v41  ;;  %v14282_v40 = vld [vmem:[%s16914_s29 + $0x2c4] ss:$16 sps:$4 sm:$0xff]   ;;  %v14285_v41 = vld [vmem:[%s16914_s29 + $0x2cc] ss:$16 sps:$4 sm:$0xff]  }
  0x95   : > { %10041 = vmatpush1.bf16.msra.mxu0 %v14205_v42  ;;  %11066 = vmatpush1.bf16.msra.mxu1 %v14206_v45  ;;  %v14280_v42 = vld [vmem:[%s16914_s29 + $0x2c0] ss:$16 sps:$4 sm:$0xff]   ;;  %v14288_v45 = vld [vmem:[%s16914_s29 + $0x2e4] ss:$16 sps:$4 sm:$0xff]  }
  0x96   : > { %10042 = vmatprep.subr.bf16.mxu0 %v14207_v46  ;;  %11067 = vmatprep.subr.bf16.mxu1 %v14209_v47  ;;  %v14291_v46 = vld [vmem:[%s16914_s29 + $0x2ec] ss:$16 sps:$4 sm:$0xff]   ;;  %v14286_v47 = vld [vmem:[%s16914_s29 + $0x2e0] ss:$16 sps:$4 sm:$0xff]  }
  0x99   : > { %10043 = vmatpush1.bf16.msra.mxu0 %v14211_v48  ;;  %11068 = vmatpush1.bf16.msra.mxu1 %v14212_v49  ;;  %v14289_v48 = vld [vmem:[%s16914_s29 + $0x2e8] ss:$16 sps:$4 sm:$0xff]   ;;  %v14294_v49 = vld [vmem:[%s16914_s29 + $0x304] ss:$16 sps:$4 sm:$0xff]  }
  0x9a   : > { %10044 = vmatprep.subr.bf16.mxu0 %v14213_v51  ;;  %11069 = vmatprep.subr.bf16.mxu1 %v14215_v52  ;;  %v14297_v51 = vld [vmem:[%s16914_s29 + $0x30c] ss:$16 sps:$4 sm:$0xff]   ;;  %v14292_v52 = vld [vmem:[%s16914_s29 + $0x300] ss:$16 sps:$4 sm:$0xff]  }
  0x9d   : > { %10045 = vmatpush1.bf16.msra.mxu0 %v14217_v54  ;;  %11070 = vmatpush1.bf16.msra.mxu1 %v14218_v56  ;;  %v14300_v54 = vld [vmem:[%s16914_s29 + $0x324] ss:$16 sps:$4 sm:$0xff]   ;;  %v14298_v56 = vld [vmem:[%s16914_s29 + $0x320] ss:$16 sps:$4 sm:$0xff]  }
  0x9e   : > { %10046 = vmatprep.subr.bf16.mxu0 %v14219_v57  ;;  %11071 = vmatprep.subr.bf16.mxu1 %v14221_v58  ;;  %v14301_v57 = vld [vmem:[%s16914_s29 + $0x328] ss:$16 sps:$4 sm:$0xff]   ;;  %v14306_v58 = vld [vmem:[%s16914_s29 + $0x344] ss:$16 sps:$4 sm:$0xff]  }
  0xa1   : > { %10047 = vmatpush1.bf16.msra.mxu0 %v14223_v60  ;;  %11072 = vmatpush1.bf16.msra.mxu1 %v14224_v62  ;;  %v14304_v60 = vld [vmem:[%s16914_s29 + $0x340] ss:$16 sps:$4 sm:$0xff]   ;;  %v14312_v62 = vld [vmem:[%s16914_s29 + $0x364] ss:$16 sps:$4 sm:$0xff]  }
  0xa2   : > { %10048 = vmatprep.subr.bf16.mxu0 %v14225_v63  ;;  %11073 = vmatprep.subr.bf16.mxu1 %v14227_v0  ;;  %v14315_v63 = vld [vmem:[%s16914_s29 + $0x36c] ss:$16 sps:$4 sm:$0xff]   ;;  %v14310_v0 = vld [vmem:[%s16914_s29 + $0x360] ss:$16 sps:$4 sm:$0xff]  }
  0xa5   : > { %10049 = vmatpush1.bf16.msra.mxu0 %v14229_v1  ;;  %11074 = vmatpush1.bf16.msra.mxu1 %v14230_v2  ;;  %v14313_v1 = vld [vmem:[%s16914_s29 + $0x368] ss:$16 sps:$4 sm:$0xff]   ;;  %v14318_v2 = vld [vmem:[%s16914_s29 + $0x384] ss:$16 sps:$4 sm:$0xff]  }
  0xa6   : > { %10050 = vmatprep.subr.bf16.mxu0 %v14231_v3  ;;  %11075 = vmatprep.subr.bf16.mxu1 %v14233_v4  ;;  %v14321_v3 = vld [vmem:[%s16914_s29 + $0x38c] ss:$16 sps:$4 sm:$0xff]   ;;  %v14316_v4 = vld [vmem:[%s16914_s29 + $0x380] ss:$16 sps:$4 sm:$0xff]  }
  0xa9   : > { %10051 = vmatpush1.bf16.msra.mxu0 %v14235_v6  ;;  %11076 = vmatpush1.bf16.msra.mxu1 %v14236_v7  ;;  %v14324_v6 = vld [vmem:[%s16914_s29 + $0x3a4] ss:$16 sps:$4 sm:$0xff]   ;;  %v14327_v7 = vld [vmem:[%s16914_s29 + $0x3ac] ss:$16 sps:$4 sm:$0xff]  }
  0xaa   : > { %10052 = vmatprep.subr.bf16.mxu0 %v14237_v8  ;;  %11077 = vmatprep.subr.bf16.mxu1 %v14239_v9  ;;  %v14322_v8 = vld [vmem:[%s16914_s29 + $0x3a0] ss:$16 sps:$4 sm:$0xff]   ;;  %v14325_v9 = vld [vmem:[%s16914_s29 + $0x3a8] ss:$16 sps:$4 sm:$0xff]  }
  0xad   : > { %10053 = vmatpush1.bf16.msra.mxu0 %v14241_v11  ;;  %11078 = vmatpush1.bf16.msra.mxu1 %v14242_v12  ;;  %v14330_v11 = vld [vmem:[%s16914_s29 + $0x3c4] ss:$16 sps:$4 sm:$0xff]   ;;  %v14333_v12 = vld [vmem:[%s16914_s29 + $0x3cc] ss:$16 sps:$4 sm:$0xff]  }
  0xae   : > { %10063 = vmatprep.subr.bf16.mxu0 %v14246_v13  ;;  %11088 = vmatprep.subr.bf16.mxu1 %v14249_v14  ;;  %v14328_v13 = vld [vmem:[%s16914_s29 + $0x3c0] ss:$16 sps:$4 sm:$0xff]   ;;  %v14331_v14 = vld [vmem:[%s16914_s29 + $0x3c8] ss:$16 sps:$4 sm:$0xff]  }
  0xb0   : > { %10055 = vmatmul.mubr.bf16.vlgmr.msra.gmra.mrb[0].mxu0 %v565_v17  ;;  %11080 = vmatmul.mubr.bf16.vlgmr.msra.gmra.mrb[0].mxu1 %v565_v17  ;;  %v14334_v17 = vld [vmem:[%s16914_s29 + $0x3e0] ss:$16 sps:$4 sm:$0xff]  }
  0xb1   : > { %10064 = vmatpush1.bf16.msra.mxu0 %v14244_v16  ;;  %11089 = vmatpush1.bf16.msra.mxu1 %v14247_v18  ;;  %v14339_v16 = vld [vmem:[%s16914_s29 + $0x3ec] ss:$16 sps:$4 sm:$0xff]   ;;  %v14337_v18 = vld [vmem:[%s16914_s29 + $0x3e8] ss:$16 sps:$4 sm:$0xff]  }
  0xb2   : > { %10065 = vmatprep.subr.bf16.mxu0 %v14252_v19  ;;  %11090 = vmatprep.subr.bf16.mxu1 %v14255_v20  ;;  %v14342_v19 = vld [vmem:[%s16914_s29 + $0x404] ss:$16 sps:$4 sm:$0xff]   ;;  %v14345_v20 = vld [vmem:[%s16914_s29 + $0x40c] ss:$16 sps:$4 sm:$0xff]  }
  0xb3   : > { %10095 = vmatprep.mubr.bf16.mxu0 %v568_v21  ;;  %11120 = vmatprep.mubr.bf16.mxu1 %v568_v21  ;;  %v14340_v21 = vld [vmem:[%s16914_s29 + $0x400] ss:$16 sps:$4 sm:$0xff]  }
  0xb5   : > { %10066 = vmatpush1.bf16.msra.mxu0 %v14250_v22  ;;  %11091 = vmatpush1.bf16.msra.mxu1 %v14253_v23  ;;  %v567_v22 = vpack.c.bf16 %v17011_v10, %v17011_v10  ;;  %v14343_v23 = vld [vmem:[%s16914_s29 + $0x408] ss:$16 sps:$4 sm:$0xff]  }
  0xb6   : > { %10067 = vmatprep.subr.bf16.mxu0 %v14258_v24  ;;  %11092 = vmatprep.subr.bf16.mxu1 %v14261_v25  ;;  %v17088_v24 = vld [vmem:[%s16938_s9 + $0x8] sm:$0xff] }
  0xb7   : > { %v14348_v25 = vld [vmem:[%s16914_s29 + $0x424] ss:$16 sps:$4 sm:$0xff]  }
  0xb9   : > { %10068 = vmatpush1.bf16.msra.mxu0 %v14256_v26  ;;  %11093 = vmatpush1.bf16.msra.mxu1 %v14259_v27  ;;  %v14351_v26 = vld [vmem:[%s16914_s29 + $0x42c] ss:$16 sps:$4 sm:$0xff]   ;;  %v17094_v27 = vrot.slane %v17088_v24, %v16988_v50 }
  0xba   : > { %10069 = vmatprep.subr.bf16.mxu0 %v14264_v28  ;;  %11094 = vmatprep.subr.bf16.mxu1 %v14267_v29  ;;  %v14346_v28 = vld [vmem:[%s16914_s29 + $0x420] ss:$16 sps:$4 sm:$0xff]   ;;  %v14349_v29 = vld [vmem:[%s16914_s29 + $0x428] ss:$16 sps:$4 sm:$0xff]  }
  0xbb   : > { %v337_v10 = vcombine.high %v17094_v27, %v17094_v27 }
  0xbd   : > { %10070 = vmatpush1.bf16.msra.mxu0 %v14262_v30  ;;  %11095 = vmatpush1.bf16.msra.mxu1 %v14265_v31  ;;  %v14354_v30 = vld [vmem:[%s16914_s29 + $0x444] ss:$16 sps:$4 sm:$0xff]   ;;  %v14357_v31 = vld [vmem:[%s16914_s29 + $0x44c] ss:$16 sps:$4 sm:$0xff]  }
  0xbe   : > { %10071 = vmatprep.subr.bf16.mxu0 %v14270_v32  ;;  %11096 = vmatprep.subr.bf16.mxu1 %v14273_v33  ;;  %v570_v32 = vpack.c.bf16 %v337_v10, %v337_v10  ;;  %v14352_v33 = vld [vmem:[%s16914_s29 + $0x440] ss:$16 sps:$4 sm:$0xff]   ;;  %v14433_v10 = vld [vmem:[%s16914_s29 + $0x5e8] ss:$16 sps:$4 sm:$0xff]  }
  0xc1   : > { %10072 = vmatpush1.bf16.msra.mxu0 %v14268_v34  ;;  %11097 = vmatpush1.bf16.msra.mxu1 %v14271_v35  ;;  %v14355_v34 = vld [vmem:[%s16914_s29 + $0x448] ss:$16 sps:$4 sm:$0xff]   ;;  %v14360_v35 = vld [vmem:[%s16914_s29 + $0x464] ss:$16 sps:$4 sm:$0xff]  }
  0xc2   : > { %10073 = vmatprep.subr.bf16.mxu0 %v14276_v36  ;;  %11098 = vmatprep.subr.bf16.mxu1 %v14279_v37  ;;  %v14363_v36 = vld [vmem:[%s16914_s29 + $0x46c] ss:$16 sps:$4 sm:$0xff]   ;;  %v14358_v37 = vld [vmem:[%s16914_s29 + $0x460] ss:$16 sps:$4 sm:$0xff]  }
  0xc5   : > { %10074 = vmatpush1.bf16.msra.mxu0 %v14274_v38  ;;  %11099 = vmatpush1.bf16.msra.mxu1 %v14277_v39  ;;  %v14361_v38 = vld [vmem:[%s16914_s29 + $0x468] ss:$16 sps:$4 sm:$0xff]   ;;  %v14366_v39 = vld [vmem:[%s16914_s29 + $0x484] ss:$16 sps:$4 sm:$0xff]  }
  0xc6   : > { %10075 = vmatprep.subr.bf16.mxu0 %v14282_v40  ;;  %11100 = vmatprep.subr.bf16.mxu1 %v14285_v41  ;;  %v14369_v40 = vld [vmem:[%s16914_s29 + $0x48c] ss:$16 sps:$4 sm:$0xff]   ;;  %v14364_v41 = vld [vmem:[%s16914_s29 + $0x480] ss:$16 sps:$4 sm:$0xff]  }
  0xc9   : > { %10076 = vmatpush1.bf16.msra.mxu0 %v14280_v42  ;;  %11101 = vmatpush1.bf16.msra.mxu1 %v14283_v43  ;;  %v14367_v42 = vld [vmem:[%s16914_s29 + $0x488] ss:$16 sps:$4 sm:$0xff]   ;;  %v14372_v43 = vld [vmem:[%s16914_s29 + $0x4a4] ss:$16 sps:$4 sm:$0xff]  }
  0xca   : > { %10077 = vmatprep.subr.bf16.mxu0 %v14288_v45  ;;  %11102 = vmatprep.subr.bf16.mxu1 %v14291_v46  ;;  %v14375_v45 = vld [vmem:[%s16914_s29 + $0x4ac] ss:$16 sps:$4 sm:$0xff]   ;;  %v14370_v46 = vld [vmem:[%s16914_s29 + $0x4a0] ss:$16 sps:$4 sm:$0xff]  }
  0xcd   : > { %10078 = vmatpush1.bf16.msra.mxu0 %v14286_v47  ;;  %11103 = vmatpush1.bf16.msra.mxu1 %v14289_v48  ;;  %v14373_v47 = vld [vmem:[%s16914_s29 + $0x4a8] ss:$16 sps:$4 sm:$0xff]   ;;  %v14378_v48 = vld [vmem:[%s16914_s29 + $0x4c4] ss:$16 sps:$4 sm:$0xff]  }
  0xce   : > { %10079 = vmatprep.subr.bf16.mxu0 %v14294_v49  ;;  %11104 = vmatprep.subr.bf16.mxu1 %v14297_v51  ;;  %v14381_v49 = vld [vmem:[%s16914_s29 + $0x4cc] ss:$16 sps:$4 sm:$0xff]   ;;  %v14376_v51 = vld [vmem:[%s16914_s29 + $0x4c0] ss:$16 sps:$4 sm:$0xff]  }
  0xd1   : > { %10080 = vmatpush1.bf16.msra.mxu0 %v14292_v52  ;;  %11105 = vmatpush1.bf16.msra.mxu1 %v14295_v53  ;;  %v14379_v52 = vld [vmem:[%s16914_s29 + $0x4c8] ss:$16 sps:$4 sm:$0xff]   ;;  %v14384_v53 = vld [vmem:[%s16914_s29 + $0x4e4] ss:$16 sps:$4 sm:$0xff]  }
  0xd2   : > { %10081 = vmatprep.subr.bf16.mxu0 %v14300_v54  ;;  %11106 = vmatprep.subr.bf16.mxu1 %v14303_v55  ;;  %v14387_v54 = vld [vmem:[%s16914_s29 + $0x4ec] ss:$16 sps:$4 sm:$0xff]   ;;  %v14382_v55 = vld [vmem:[%s16914_s29 + $0x4e0] ss:$16 sps:$4 sm:$0xff]  }
  0xd5   : > { %10082 = vmatpush1.bf16.msra.mxu0 %v14298_v56  ;;  %11107 = vmatpush1.bf16.msra.mxu1 %v14301_v57  ;;  %v14385_v56 = vld [vmem:[%s16914_s29 + $0x4e8] ss:$16 sps:$4 sm:$0xff]   ;;  %v14390_v57 = vld [vmem:[%s16914_s29 + $0x504] ss:$16 sps:$4 sm:$0xff]  }
  0xd6   : > { %10083 = vmatprep.subr.bf16.mxu0 %v14306_v58  ;;  %11108 = vmatprep.subr.bf16.mxu1 %v14309_v59  ;;  %v14393_v58 = vld [vmem:[%s16914_s29 + $0x50c] ss:$16 sps:$4 sm:$0xff]   ;;  %v14388_v59 = vld [vmem:[%s16914_s29 + $0x500] ss:$16 sps:$4 sm:$0xff]  }
  0xd9   : > { %10084 = vmatpush1.bf16.msra.mxu0 %v14304_v60  ;;  %11109 = vmatpush1.bf16.msra.mxu1 %v14307_v61  ;;  %v14391_v60 = vld [vmem:[%s16914_s29 + $0x508] ss:$16 sps:$4 sm:$0xff]   ;;  %v14396_v61 = vld [vmem:[%s16914_s29 + $0x524] ss:$16 sps:$4 sm:$0xff]  }
  0xda   : > { %10085 = vmatprep.subr.bf16.mxu0 %v14312_v62  ;;  %11110 = vmatprep.subr.bf16.mxu1 %v14315_v63  ;;  %v14399_v62 = vld [vmem:[%s16914_s29 + $0x52c] ss:$16 sps:$4 sm:$0xff]   ;;  %v14394_v63 = vld [vmem:[%s16914_s29 + $0x520] ss:$16 sps:$4 sm:$0xff]  }
  0xdd   : > { %10086 = vmatpush1.bf16.msra.mxu0 %v14310_v0  ;;  %11111 = vmatpush1.bf16.msra.mxu1 %v14313_v1  ;;  %v14397_v0 = vld [vmem:[%s16914_s29 + $0x528] ss:$16 sps:$4 sm:$0xff]   ;;  %v14402_v1 = vld [vmem:[%s16914_s29 + $0x544] ss:$16 sps:$4 sm:$0xff]  }
  0xde   : > { %10087 = vmatprep.subr.bf16.mxu0 %v14318_v2  ;;  %11112 = vmatprep.subr.bf16.mxu1 %v14321_v3  ;;  %v14405_v2 = vld [vmem:[%s16914_s29 + $0x54c] ss:$16 sps:$4 sm:$0xff]   ;;  %v14400_v3 = vld [vmem:[%s16914_s29 + $0x540] ss:$16 sps:$4 sm:$0xff]  }
  0xe1   : > { %10088 = vmatpush1.bf16.msra.mxu0 %v14316_v4  ;;  %11113 = vmatpush1.bf16.msra.mxu1 %v14319_v5  ;;  %v14403_v4 = vld [vmem:[%s16914_s29 + $0x548] ss:$16 sps:$4 sm:$0xff]   ;;  %v14408_v5 = vld [vmem:[%s16914_s29 + $0x564] ss:$16 sps:$4 sm:$0xff]  }
  0xe2   : > { %10089 = vmatprep.subr.bf16.mxu0 %v14324_v6  ;;  %11114 = vmatprep.subr.bf16.mxu1 %v14327_v7  ;;  %v14411_v6 = vld [vmem:[%s16914_s29 + $0x56c] ss:$16 sps:$4 sm:$0xff]   ;;  %v14406_v7 = vld [vmem:[%s16914_s29 + $0x560] ss:$16 sps:$4 sm:$0xff]  }
  0xe5   : > { %10090 = vmatpush1.bf16.msra.mxu0 %v14322_v8  ;;  %11115 = vmatpush1.bf16.msra.mxu1 %v14325_v9  ;;  %v14409_v8 = vld [vmem:[%s16914_s29 + $0x568] ss:$16 sps:$4 sm:$0xff]   ;;  %v14414_v9 = vld [vmem:[%s16914_s29 + $0x584] ss:$16 sps:$4 sm:$0xff]  }
  0xe6   : > { %10091 = vmatprep.subr.bf16.mxu0 %v14330_v11  ;;  %11116 = vmatprep.subr.bf16.mxu1 %v14333_v12  ;;  %v14417_v11 = vld [vmem:[%s16914_s29 + $0x58c] ss:$16 sps:$4 sm:$0xff]   ;;  %v14412_v12 = vld [vmem:[%s16914_s29 + $0x580] ss:$16 sps:$4 sm:$0xff]  }
  0xe9   : > { %10092 = vmatpush1.bf16.msra.mxu0 %v14328_v13  ;;  %11117 = vmatpush1.bf16.msra.mxu1 %v14331_v14  ;;  %v14415_v13 = vld [vmem:[%s16914_s29 + $0x588] ss:$16 sps:$4 sm:$0xff]   ;;  %v14420_v14 = vld [vmem:[%s16914_s29 + $0x5a4] ss:$16 sps:$4 sm:$0xff]  }
  0xea   : > { %10093 = vmatprep.subr.bf16.mxu0 %v14336_v15  ;;  %11118 = vmatprep.subr.bf16.mxu1 %v14339_v16  ;;  %v14423_v15 = vld [vmem:[%s16914_s29 + $0x5ac] ss:$16 sps:$4 sm:$0xff]   ;;  %v14418_v16 = vld [vmem:[%s16914_s29 + $0x5a0] ss:$16 sps:$4 sm:$0xff]  }
  0xed   : > { %10094 = vmatpush1.bf16.msra.mxu0 %v14334_v17  ;;  %11119 = vmatpush1.bf16.msra.mxu1 %v14337_v18  ;;  %v14421_v17 = vld [vmem:[%s16914_s29 + $0x5a8] ss:$16 sps:$4 sm:$0xff]   ;;  %v14426_v18 = vld [vmem:[%s16914_s29 + $0x5c4] ss:$16 sps:$4 sm:$0xff]  }
  0xee   : > { %10104 = vmatprep.subr.bf16.mxu0 %v14342_v19  ;;  %11129 = vmatprep.subr.bf16.mxu1 %v14345_v20  ;;  %v14429_v19 = vld [vmem:[%s16914_s29 + $0x5cc] ss:$16 sps:$4 sm:$0xff]   ;;  %v322_v20 = vcombine.high %v17088_v24, %v17088_v24  ;;  %v14430_v24 = vld [vmem:[%s16914_s29 + $0x5e0] ss:$16 sps:$4 sm:$0xff]  }
  0xf0   : > { %10096 = vmatmul.mubr.bf16.vlgmr.msra.gmra.mrb[0].mxu0 %v567_v22  ;;  %11121 = vmatmul.mubr.bf16.vlgmr.msra.gmra.mrb[0].mxu1 %v567_v22  ;;  %v14427_v22 = vld [vmem:[%s16914_s29 + $0x5c8] ss:$16 sps:$4 sm:$0xff]  }
  0xf1   : > { %10105 = vmatpush1.bf16.msra.mxu0 %v14340_v21  ;;  %11130 = vmatpush1.bf16.msra.mxu1 %v14343_v23  ;;  %v14424_v21 = vld [vmem:[%s16914_s29 + $0x5c0] ss:$16 sps:$4 sm:$0xff]   ;;  %v14432_v23 = vld [vmem:[%s16914_s29 + $0x5e4] ss:$16 sps:$4 sm:$0xff]  }
  0xf2   : > { %10106 = vmatprep.subr.bf16.mxu0 %v14348_v25  ;;  %11131 = vmatprep.subr.bf16.mxu1 %v14351_v26  ;;  %v14435_v25 = vld [vmem:[%s16914_s29 + $0x5ec] ss:$16 sps:$4 sm:$0xff]   ;;  %v17157_v26 = vrot.slane %v322_v20, %v16988_v50  ;;  %v14511_v20 = vld [vmem:[%s16914_s29 + $0x788] ss:$16 sps:$4 sm:$0xff]  }
  0xf3   : > { %10136 = vmatprep.mubr.bf16.mxu0 %v570_v32  ;;  %11161 = vmatprep.mubr.bf16.mxu1 %v570_v32  ;;  %v14436_v32 = vld [vmem:[%s16914_s29 + $0x600] ss:$16 sps:$4 sm:$0xff]  }
  0xf5   : > { %10107 = vmatpush1.bf16.msra.mxu0 %v14346_v28  ;;  %11132 = vmatpush1.bf16.msra.mxu1 %v14349_v29  ;;  %v14438_v28 = vld [vmem:[%s16914_s29 + $0x604] ss:$16 sps:$4 sm:$0xff]   ;;  %v14441_v29 = vld [vmem:[%s16914_s29 + $0x60c] ss:$16 sps:$4 sm:$0xff]  }
  0xf6   : > { %10108 = vmatprep.subr.bf16.mxu0 %v14354_v30  ;;  %11133 = vmatprep.subr.bf16.mxu1 %v14357_v31  ;;  %v338_v30 = vcombine.high %v17157_v26, %v17157_v26  ;;  %v569_v31 = vpack.c.bf16 %v17094_v27, %v17094_v27  ;;  %v14442_v27 = vld [vmem:[%s16914_s29 + $0x620] ss:$16 sps:$4 sm:$0xff]  }
  0xf9   : > { %10109 = vmatpush1.bf16.msra.mxu0 %v14352_v33  ;;  %11134 = vmatpush1.bf16.msra.mxu1 %v14355_v34  ;;  %v14439_v33 = vld [vmem:[%s16914_s29 + $0x608] ss:$16 sps:$4 sm:$0xff]   ;;  %v14444_v34 = vld [vmem:[%s16914_s29 + $0x624] ss:$16 sps:$4 sm:$0xff]  }
  0xfa   : > { %10110 = vmatprep.subr.bf16.mxu0 %v14360_v35  ;;  %11135 = vmatprep.subr.bf16.mxu1 %v14363_v36  ;;  %v14447_v35 = vld [vmem:[%s16914_s29 + $0x62c] ss:$16 sps:$4 sm:$0xff]   ;;  %v572_v36 = vpack.c.bf16 %v338_v30, %v338_v30  ;;  %v14523_v30 = vld [vmem:[%s16914_s29 + $0x7c8] ss:$16 sps:$4 sm:$0xff]  }
  0xfd   : > { %10111 = vmatpush1.bf16.msra.mxu0 %v14358_v37  ;;  %11136 = vmatpush1.bf16.msra.mxu1 %v14361_v38  ;;  %v14445_v37 = vld [vmem:[%s16914_s29 + $0x628] ss:$16 sps:$4 sm:$0xff]   ;;  %v14450_v38 = vld [vmem:[%s16914_s29 + $0x644] ss:$16 sps:$4 sm:$0xff]  }
  0xfe   : > { %10112 = vmatprep.subr.bf16.mxu0 %v14366_v39  ;;  %11137 = vmatprep.subr.bf16.mxu1 %v14369_v40  ;;  %v14453_v39 = vld [vmem:[%s16914_s29 + $0x64c] ss:$16 sps:$4 sm:$0xff]   ;;  %v14448_v40 = vld [vmem:[%s16914_s29 + $0x640] ss:$16 sps:$4 sm:$0xff]  }
 0x101   : > { %10113 = vmatpush1.bf16.msra.mxu0 %v14364_v41  ;;  %11138 = vmatpush1.bf16.msra.mxu1 %v14367_v42  ;;  %v14451_v41 = vld [vmem:[%s16914_s29 + $0x648] ss:$16 sps:$4 sm:$0xff]   ;;  %v14456_v42 = vld [vmem:[%s16914_s29 + $0x664] ss:$16 sps:$4 sm:$0xff]  }
 0x102   : > { %10114 = vmatprep.subr.bf16.mxu0 %v14372_v43  ;;  %11139 = vmatprep.subr.bf16.mxu1 %v14375_v45  ;;  %v14459_v43 = vld [vmem:[%s16914_s29 + $0x66c] ss:$16 sps:$4 sm:$0xff]   ;;  %v14454_v45 = vld [vmem:[%s16914_s29 + $0x660] ss:$16 sps:$4 sm:$0xff]  }
 0x105   : > { %10115 = vmatpush1.bf16.msra.mxu0 %v14370_v46  ;;  %11140 = vmatpush1.bf16.msra.mxu1 %v14373_v47  ;;  %v14457_v46 = vld [vmem:[%s16914_s29 + $0x668] ss:$16 sps:$4 sm:$0xff]   ;;  %v14462_v47 = vld [vmem:[%s16914_s29 + $0x684] ss:$16 sps:$4 sm:$0xff]  }
 0x106   : > { %10116 = vmatprep.subr.bf16.mxu0 %v14378_v48  ;;  %11141 = vmatprep.subr.bf16.mxu1 %v14381_v49  ;;  %v14465_v48 = vld [vmem:[%s16914_s29 + $0x68c] ss:$16 sps:$4 sm:$0xff]   ;;  %v14460_v49 = vld [vmem:[%s16914_s29 + $0x680] ss:$16 sps:$4 sm:$0xff]  }
 0x109   : > { %10117 = vmatpush1.bf16.msra.mxu0 %v14376_v51  ;;  %11142 = vmatpush1.bf16.msra.mxu1 %v14379_v52  ;;  %v14463_v51 = vld [vmem:[%s16914_s29 + $0x688] ss:$16 sps:$4 sm:$0xff]   ;;  %v14468_v52 = vld [vmem:[%s16914_s29 + $0x6a4] ss:$16 sps:$4 sm:$0xff]  }
 0x10a   : > { %10118 = vmatprep.subr.bf16.mxu0 %v14384_v53  ;;  %11143 = vmatprep.subr.bf16.mxu1 %v14387_v54  ;;  %v14471_v53 = vld [vmem:[%s16914_s29 + $0x6ac] ss:$16 sps:$4 sm:$0xff]   ;;  %v14466_v54 = vld [vmem:[%s16914_s29 + $0x6a0] ss:$16 sps:$4 sm:$0xff]  }
 0x10d   : > { %10119 = vmatpush1.bf16.msra.mxu0 %v14382_v55  ;;  %11144 = vmatpush1.bf16.msra.mxu1 %v14385_v56  ;;  %v14469_v55 = vld [vmem:[%s16914_s29 + $0x6a8] ss:$16 sps:$4 sm:$0xff]   ;;  %v14474_v56 = vld [vmem:[%s16914_s29 + $0x6c4] ss:$16 sps:$4 sm:$0xff]  }
 0x10e   : > { %10120 = vmatprep.subr.bf16.mxu0 %v14390_v57  ;;  %11145 = vmatprep.subr.bf16.mxu1 %v14393_v58  ;;  %v14477_v57 = vld [vmem:[%s16914_s29 + $0x6cc] ss:$16 sps:$4 sm:$0xff]   ;;  %v14472_v58 = vld [vmem:[%s16914_s29 + $0x6c0] ss:$16 sps:$4 sm:$0xff]  }
 0x111   : > { %10121 = vmatpush1.bf16.msra.mxu0 %v14388_v59  ;;  %11146 = vmatpush1.bf16.msra.mxu1 %v14391_v60  ;;  %v14475_v59 = vld [vmem:[%s16914_s29 + $0x6c8] ss:$16 sps:$4 sm:$0xff]   ;;  %v14480_v60 = vld [vmem:[%s16914_s29 + $0x6e4] ss:$16 sps:$4 sm:$0xff]  }
 0x112   : > { %10122 = vmatprep.subr.bf16.mxu0 %v14396_v61  ;;  %11147 = vmatprep.subr.bf16.mxu1 %v14399_v62  ;;  %v14483_v61 = vld [vmem:[%s16914_s29 + $0x6ec] ss:$16 sps:$4 sm:$0xff]   ;;  %v14478_v62 = vld [vmem:[%s16914_s29 + $0x6e0] ss:$16 sps:$4 sm:$0xff]  }
 0x115   : > { %10123 = vmatpush1.bf16.msra.mxu0 %v14394_v63  ;;  %11148 = vmatpush1.bf16.msra.mxu1 %v14397_v0  ;;  %v14481_v63 = vld [vmem:[%s16914_s29 + $0x6e8] ss:$16 sps:$4 sm:$0xff]   ;;  %v14486_v0 = vld [vmem:[%s16914_s29 + $0x704] ss:$16 sps:$4 sm:$0xff]  }
 0x116   : > { %10124 = vmatprep.subr.bf16.mxu0 %v14402_v1  ;;  %11149 = vmatprep.subr.bf16.mxu1 %v14405_v2  ;;  %v14489_v1 = vld [vmem:[%s16914_s29 + $0x70c] ss:$16 sps:$4 sm:$0xff]   ;;  %v14484_v2 = vld [vmem:[%s16914_s29 + $0x700] ss:$16 sps:$4 sm:$0xff]  }
 0x119   : > { %10125 = vmatpush1.bf16.msra.mxu0 %v14400_v3  ;;  %11150 = vmatpush1.bf16.msra.mxu1 %v14403_v4  ;;  %v14487_v3 = vld [vmem:[%s16914_s29 + $0x708] ss:$16 sps:$4 sm:$0xff]   ;;  %v14492_v4 = vld [vmem:[%s16914_s29 + $0x724] ss:$16 sps:$4 sm:$0xff]  }
 0x11a   : > { %10126 = vmatprep.subr.bf16.mxu0 %v14408_v5  ;;  %11151 = vmatprep.subr.bf16.mxu1 %v14411_v6  ;;  %v14495_v5 = vld [vmem:[%s16914_s29 + $0x72c] ss:$16 sps:$4 sm:$0xff]   ;;  %v14490_v6 = vld [vmem:[%s16914_s29 + $0x720] ss:$16 sps:$4 sm:$0xff]  }
 0x11d   : > { %10127 = vmatpush1.bf16.msra.mxu0 %v14406_v7  ;;  %11152 = vmatpush1.bf16.msra.mxu1 %v14409_v8  ;;  %v14493_v7 = vld [vmem:[%s16914_s29 + $0x728] ss:$16 sps:$4 sm:$0xff]   ;;  %v14498_v8 = vld [vmem:[%s16914_s29 + $0x744] ss:$16 sps:$4 sm:$0xff]  }
 0x11e   : > { %10128 = vmatprep.subr.bf16.mxu0 %v14414_v9  ;;  %11153 = vmatprep.subr.bf16.mxu1 %v14417_v11  ;;  %v14501_v9 = vld [vmem:[%s16914_s29 + $0x74c] ss:$16 sps:$4 sm:$0xff]   ;;  %v14496_v11 = vld [vmem:[%s16914_s29 + $0x740] ss:$16 sps:$4 sm:$0xff]  }
 0x121   : > { %10129 = vmatpush1.bf16.msra.mxu0 %v14412_v12  ;;  %11154 = vmatpush1.bf16.msra.mxu1 %v14415_v13  ;;  %v14499_v12 = vld [vmem:[%s16914_s29 + $0x748] ss:$16 sps:$4 sm:$0xff]   ;;  %v14504_v13 = vld [vmem:[%s16914_s29 + $0x764] ss:$16 sps:$4 sm:$0xff]  }
 0x122   : > { %10130 = vmatprep.subr.bf16.mxu0 %v14420_v14  ;;  %11155 = vmatprep.subr.bf16.mxu1 %v14423_v15  ;;  %v14507_v14 = vld [vmem:[%s16914_s29 + $0x76c] ss:$16 sps:$4 sm:$0xff]   ;;  %v14502_v15 = vld [vmem:[%s16914_s29 + $0x760] ss:$16 sps:$4 sm:$0xff]  }
 0x125   : > { %10131 = vmatpush1.bf16.msra.mxu0 %v14418_v16  ;;  %11156 = vmatpush1.bf16.msra.mxu1 %v14421_v17  ;;  %v14505_v16 = vld [vmem:[%s16914_s29 + $0x768] ss:$16 sps:$4 sm:$0xff]   ;;  %v14510_v17 = vld [vmem:[%s16914_s29 + $0x784] ss:$16 sps:$4 sm:$0xff]  }
 0x126   : > { %10132 = vmatprep.subr.bf16.mxu0 %v14426_v18  ;;  %11157 = vmatprep.subr.bf16.mxu1 %v14429_v19  ;;  %v14513_v18 = vld [vmem:[%s16914_s29 + $0x78c] ss:$16 sps:$4 sm:$0xff]   ;;  %v14508_v19 = vld [vmem:[%s16914_s29 + $0x780] ss:$16 sps:$4 sm:$0xff]  }
 0x129   : > { %10133 = vmatpush1.bf16.msra.mxu0 %v14424_v21  ;;  %11158 = vmatpush1.bf16.msra.mxu1 %v14427_v22  ;;  %v14516_v21 = vld [vmem:[%s16914_s29 + $0x7a4] ss:$16 sps:$4 sm:$0xff]   ;;  %v14519_v22 = vld [vmem:[%s16914_s29 + $0x7ac] ss:$16 sps:$4 sm:$0xff]  }
 0x12a   : > { %10134 = vmatprep.subr.bf16.mxu0 %v14432_v23  ;;  %11159 = vmatprep.subr.bf16.mxu1 %v14435_v25  ;;  %v14514_v23 = vld [vmem:[%s16914_s29 + $0x7a0] ss:$16 sps:$4 sm:$0xff]   ;;  %v14517_v25 = vld [vmem:[%s16914_s29 + $0x7a8] ss:$16 sps:$4 sm:$0xff]  }
 0x12d   : > { %10135 = vmatpush1.bf16.msra.mxu0 %v14430_v24  ;;  %11160 = vmatpush1.bf16.msra.mxu1 %v14433_v10  ;;  %v14522_v24 = vld [vmem:[%s16914_s29 + $0x7c4] ss:$16 sps:$4 sm:$0xff]   ;;  %v14525_v10 = vld [vmem:[%s16914_s29 + $0x7cc] ss:$16 sps:$4 sm:$0xff]  }
 0x12e   : > { %10145 = vmatprep.subr.bf16.mxu0 %v14438_v28  ;;  %11170 = vmatprep.subr.bf16.mxu1 %v14441_v29  ;;  %v14520_v28 = vld [vmem:[%s16914_s29 + $0x7c0] ss:$16 sps:$4 sm:$0xff]   ;;  %v17225_v29 = vld [vmem:[%s16938_s9 + $0x10] sm:$0xff] }
 0x130   : > { %10137 = vmatmul.mubr.bf16.vlgmr.msra.gmra.mrb[0].mxu0 %v569_v31  ;;  %11162 = vmatmul.mubr.bf16.vlgmr.msra.gmra.mrb[0].mxu1 %v569_v31  ;;  %v14528_v31 = vld [vmem:[%s16914_s29 + $0x7e4] ss:$16 sps:$4 sm:$0xff]  }
 0x131   : > { %10146 = vmatpush1.bf16.msra.mxu0 %v14436_v32  ;;  %11171 = vmatpush1.bf16.msra.mxu1 %v14439_v33  ;;  %v14531_v32 = vld [vmem:[%s16914_s29 + $0x7ec] ss:$16 sps:$4 sm:$0xff]   ;;  %v17232_v33 = vrot.slane %v17225_v29, %v16988_v50 }
 0x132   : > { %10147 = vmatprep.subr.bf16.mxu0 %v14444_v34  ;;  %11172 = vmatprep.subr.bf16.mxu1 %v14447_v35  ;;  %v14526_v34 = vld [vmem:[%s16914_s29 + $0x7e0] ss:$16 sps:$4 sm:$0xff]   ;;  %v14529_v35 = vld [vmem:[%s16914_s29 + $0x7e8] ss:$16 sps:$4 sm:$0xff]  }
 0x133   : > { %10177 = vmatprep.mubr.bf16.mxu0 %v572_v36  ;;  %11202 = vmatprep.mubr.bf16.mxu1 %v572_v36  ;;  %v14535_v36 = vld [vmem:[%s16914_s29 + $0x804] ss:$16 sps:$4 sm:$0xff]  }
 0x135   : > { %10148 = vmatpush1.bf16.msra.mxu0 %v14442_v27  ;;  %11173 = vmatpush1.bf16.msra.mxu1 %v14445_v37  ;;  %v14538_v27 = vld [vmem:[%s16914_s29 + $0x80c] ss:$16 sps:$4 sm:$0xff]   ;;  %v354_v37 = vcombine.high %v17232_v33, %v17232_v33 }
 0x136   : > { %10149 = vmatprep.subr.bf16.mxu0 %v14450_v38  ;;  %11174 = vmatprep.subr.bf16.mxu1 %v14453_v39  ;;  %v14533_v38 = vld [vmem:[%s16914_s29 + $0x800] ss:$16 sps:$4 sm:$0xff]   ;;  %v571_v39 = vpack.c.bf16 %v17157_v26, %v17157_v26  ;;  %v14547_v26 = vld [vmem:[%s16914_s29 + $0x844] ss:$16 sps:$4 sm:$0xff]  }
 0x139   : > { %10150 = vmatpush1.bf16.msra.mxu0 %v14448_v40  ;;  %11175 = vmatpush1.bf16.msra.mxu1 %v14451_v41  ;;  %v14536_v40 = vld [vmem:[%s16914_s29 + $0x808] ss:$16 sps:$4 sm:$0xff]   ;;  %v14541_v41 = vld [vmem:[%s16914_s29 + $0x824] ss:$16 sps:$4 sm:$0xff]  }
 0x13a   : > { %10151 = vmatprep.subr.bf16.mxu0 %v14456_v42  ;;  %11176 = vmatprep.subr.bf16.mxu1 %v14459_v43  ;;  %v14544_v42 = vld [vmem:[%s16914_s29 + $0x82c] ss:$16 sps:$4 sm:$0xff]   ;;  %v574_v43 = vpack.c.bf16 %v354_v37, %v354_v37  ;;  %v14617_v37 = vld [vmem:[%s16914_s29 + $0x9c0] ss:$16 sps:$4 sm:$0xff]  }
 0x13d   : > { %10152 = vmatpush1.bf16.msra.mxu0 %v14454_v45  ;;  %11177 = vmatpush1.bf16.msra.mxu1 %v14457_v46  ;;  %v14539_v45 = vld [vmem:[%s16914_s29 + $0x820] ss:$16 sps:$4 sm:$0xff]   ;;  %v14542_v46 = vld [vmem:[%s16914_s29 + $0x828] ss:$16 sps:$4 sm:$0xff]  }
 0x13e   : > { %10153 = vmatprep.subr.bf16.mxu0 %v14462_v47  ;;  %11178 = vmatprep.subr.bf16.mxu1 %v14465_v48  ;;  %v14550_v47 = vld [vmem:[%s16914_s29 + $0x84c] ss:$16 sps:$4 sm:$0xff]   ;;  %v14545_v48 = vld [vmem:[%s16914_s29 + $0x840] ss:$16 sps:$4 sm:$0xff]  }
 0x141   : > { %10154 = vmatpush1.bf16.msra.mxu0 %v14460_v49  ;;  %11179 = vmatpush1.bf16.msra.mxu1 %v14463_v51  ;;  %v14548_v49 = vld [vmem:[%s16914_s29 + $0x848] ss:$16 sps:$4 sm:$0xff]   ;;  %v14553_v51 = vld [vmem:[%s16914_s29 + $0x864] ss:$16 sps:$4 sm:$0xff]  }
 0x142   : > { %10155 = vmatprep.subr.bf16.mxu0 %v14468_v52  ;;  %11180 = vmatprep.subr.bf16.mxu1 %v14471_v53  ;;  %v14556_v52 = vld [vmem:[%s16914_s29 + $0x86c] ss:$16 sps:$4 sm:$0xff]   ;;  %v14551_v53 = vld [vmem:[%s16914_s29 + $0x860] ss:$16 sps:$4 sm:$0xff]  }
 0x145   : > { %10156 = vmatpush1.bf16.msra.mxu0 %v14466_v54  ;;  %11181 = vmatpush1.bf16.msra.mxu1 %v14469_v55  ;;  %v14554_v54 = vld [vmem:[%s16914_s29 + $0x868] ss:$16 sps:$4 sm:$0xff]   ;;  %v14559_v55 = vld [vmem:[%s16914_s29 + $0x884] ss:$16 sps:$4 sm:$0xff]  }
 0x146   : > { %10157 = vmatprep.subr.bf16.mxu0 %v14474_v56  ;;  %11182 = vmatprep.subr.bf16.mxu1 %v14477_v57  ;;  %v14562_v56 = vld [vmem:[%s16914_s29 + $0x88c] ss:$16 sps:$4 sm:$0xff]   ;;  %v14557_v57 = vld [vmem:[%s16914_s29 + $0x880] ss:$16 sps:$4 sm:$0xff]  }
 0x149   : > { %10158 = vmatpush1.bf16.msra.mxu0 %v14472_v58  ;;  %11183 = vmatpush1.bf16.msra.mxu1 %v14475_v59  ;;  %v14560_v58 = vld [vmem:[%s16914_s29 + $0x888] ss:$16 sps:$4 sm:$0xff]   ;;  %v14565_v59 = vld [vmem:[%s16914_s29 + $0x8a4] ss:$16 sps:$4 sm:$0xff]  }
 0x14a   : > { %10159 = vmatprep.subr.bf16.mxu0 %v14480_v60  ;;  %11184 = vmatprep.subr.bf16.mxu1 %v14483_v61  ;;  %v14568_v60 = vld [vmem:[%s16914_s29 + $0x8ac] ss:$16 sps:$4 sm:$0xff]   ;;  %v14563_v61 = vld [vmem:[%s16914_s29 + $0x8a0] ss:$16 sps:$4 sm:$0xff]  }
 0x14d   : > { %10160 = vmatpush1.bf16.msra.mxu0 %v14478_v62  ;;  %11185 = vmatpush1.bf16.msra.mxu1 %v14481_v63  ;;  %v14566_v62 = vld [vmem:[%s16914_s29 + $0x8a8] ss:$16 sps:$4 sm:$0xff]   ;;  %v14571_v63 = vld [vmem:[%s16914_s29 + $0x8c4] ss:$16 sps:$4 sm:$0xff]  }
 0x14e   : > { %10161 = vmatprep.subr.bf16.mxu0 %v14486_v0  ;;  %11186 = vmatprep.subr.bf16.mxu1 %v14489_v1  ;;  %v14574_v0 = vld [vmem:[%s16914_s29 + $0x8cc] ss:$16 sps:$4 sm:$0xff]   ;;  %v14569_v1 = vld [vmem:[%s16914_s29 + $0x8c0] ss:$16 sps:$4 sm:$0xff]  }
 0x151   : > { %10162 = vmatpush1.bf16.msra.mxu0 %v14484_v2  ;;  %11187 = vmatpush1.bf16.msra.mxu1 %v14487_v3  ;;  %v14572_v2 = vld [vmem:[%s16914_s29 + $0x8c8] ss:$16 sps:$4 sm:$0xff]   ;;  %v14577_v3 = vld [vmem:[%s16914_s29 + $0x8e4] ss:$16 sps:$4 sm:$0xff]  }
 0x152   : > { %10163 = vmatprep.subr.bf16.mxu0 %v14492_v4  ;;  %11188 = vmatprep.subr.bf16.mxu1 %v14495_v5  ;;  %v14580_v4 = vld [vmem:[%s16914_s29 + $0x8ec] ss:$16 sps:$4 sm:$0xff]   ;;  %v14575_v5 = vld [vmem:[%s16914_s29 + $0x8e0] ss:$16 sps:$4 sm:$0xff]  }
 0x155   : > { %10164 = vmatpush1.bf16.msra.mxu0 %v14490_v6  ;;  %11189 = vmatpush1.bf16.msra.mxu1 %v14493_v7  ;;  %v14578_v6 = vld [vmem:[%s16914_s29 + $0x8e8] ss:$16 sps:$4 sm:$0xff]   ;;  %v14583_v7 = vld [vmem:[%s16914_s29 + $0x904] ss:$16 sps:$4 sm:$0xff]  }
 0x156   : > { %10165 = vmatprep.subr.bf16.mxu0 %v14498_v8  ;;  %11190 = vmatprep.subr.bf16.mxu1 %v14501_v9  ;;  %v14586_v8 = vld [vmem:[%s16914_s29 + $0x90c] ss:$16 sps:$4 sm:$0xff]   ;;  %v14581_v9 = vld [vmem:[%s16914_s29 + $0x900] ss:$16 sps:$4 sm:$0xff]  }
 0x159   : > { %10166 = vmatpush1.bf16.msra.mxu0 %v14496_v11  ;;  %11191 = vmatpush1.bf16.msra.mxu1 %v14499_v12  ;;  %v14584_v11 = vld [vmem:[%s16914_s29 + $0x908] ss:$16 sps:$4 sm:$0xff]   ;;  %v14589_v12 = vld [vmem:[%s16914_s29 + $0x924] ss:$16 sps:$4 sm:$0xff]  }
 0x15a   : > { %10167 = vmatprep.subr.bf16.mxu0 %v14504_v13  ;;  %11192 = vmatprep.subr.bf16.mxu1 %v14507_v14  ;;  %v14592_v13 = vld [vmem:[%s16914_s29 + $0x92c] ss:$16 sps:$4 sm:$0xff]   ;;  %v14587_v14 = vld [vmem:[%s16914_s29 + $0x920] ss:$16 sps:$4 sm:$0xff]  }
 0x15d   : > { %10168 = vmatpush1.bf16.msra.mxu0 %v14502_v15  ;;  %11193 = vmatpush1.bf16.msra.mxu1 %v14505_v16  ;;  %v14590_v15 = vld [vmem:[%s16914_s29 + $0x928] ss:$16 sps:$4 sm:$0xff]   ;;  %v14595_v16 = vld [vmem:[%s16914_s29 + $0x944] ss:$16 sps:$4 sm:$0xff]  }
 0x15e   : > { %10169 = vmatprep.subr.bf16.mxu0 %v14510_v17  ;;  %11194 = vmatprep.subr.bf16.mxu1 %v14513_v18  ;;  %v14598_v17 = vld [vmem:[%s16914_s29 + $0x94c] ss:$16 sps:$4 sm:$0xff]   ;;  %v14593_v18 = vld [vmem:[%s16914_s29 + $0x940] ss:$16 sps:$4 sm:$0xff]  }
 0x161   : > { %10170 = vmatpush1.bf16.msra.mxu0 %v14508_v19  ;;  %11195 = vmatpush1.bf16.msra.mxu1 %v14511_v20  ;;  %v14596_v19 = vld [vmem:[%s16914_s29 + $0x948] ss:$16 sps:$4 sm:$0xff]   ;;  %v14601_v20 = vld [vmem:[%s16914_s29 + $0x964] ss:$16 sps:$4 sm:$0xff]  }
 0x162   : > { %10171 = vmatprep.subr.bf16.mxu0 %v14516_v21  ;;  %11196 = vmatprep.subr.bf16.mxu1 %v14519_v22  ;;  %v14604_v21 = vld [vmem:[%s16914_s29 + $0x96c] ss:$16 sps:$4 sm:$0xff]   ;;  %v14599_v22 = vld [vmem:[%s16914_s29 + $0x960] ss:$16 sps:$4 sm:$0xff]  }
 0x165   : > { %10172 = vmatpush1.bf16.msra.mxu0 %v14514_v23  ;;  %11197 = vmatpush1.bf16.msra.mxu1 %v14517_v25  ;;  %v14602_v23 = vld [vmem:[%s16914_s29 + $0x968] ss:$16 sps:$4 sm:$0xff]   ;;  %v14607_v25 = vld [vmem:[%s16914_s29 + $0x984] ss:$16 sps:$4 sm:$0xff]  }
 0x166   : > { %10173 = vmatprep.subr.bf16.mxu0 %v14522_v24  ;;  %11198 = vmatprep.subr.bf16.mxu1 %v14525_v10  ;;  %v14610_v24 = vld [vmem:[%s16914_s29 + $0x98c] ss:$16 sps:$4 sm:$0xff]   ;;  %v14605_v10 = vld [vmem:[%s16914_s29 + $0x980] ss:$16 sps:$4 sm:$0xff]  }
 0x169   : > { %10174 = vmatpush1.bf16.msra.mxu0 %v14520_v28  ;;  %11199 = vmatpush1.bf16.msra.mxu1 %v14523_v30  ;;  %v14608_v28 = vld [vmem:[%s16914_s29 + $0x988] ss:$16 sps:$4 sm:$0xff]   ;;  %v14613_v30 = vld [vmem:[%s16914_s29 + $0x9a4] ss:$16 sps:$4 sm:$0xff]  }
 0x16a   : > { %10175 = vmatprep.subr.bf16.mxu0 %v14528_v31  ;;  %11200 = vmatprep.subr.bf16.mxu1 %v14531_v32  ;;  %v14616_v31 = vld [vmem:[%s16914_s29 + $0x9ac] ss:$16 sps:$4 sm:$0xff]   ;;  %v14611_v32 = vld [vmem:[%s16914_s29 + $0x9a0] ss:$16 sps:$4 sm:$0xff]  }
 0x16d   : > { %10176 = vmatpush1.bf16.msra.mxu0 %v14526_v34  ;;  %11201 = vmatpush1.bf16.msra.mxu1 %v14529_v35  ;;  %v14614_v34 = vld [vmem:[%s16914_s29 + $0x9a8] ss:$16 sps:$4 sm:$0xff]   ;;  %v14619_v35 = vld [vmem:[%s16914_s29 + $0x9c4] ss:$16 sps:$4 sm:$0xff]  }
 0x16e   : > { %10186 = vmatprep.subr.bf16.mxu0 %v14535_v36  ;;  %11211 = vmatprep.subr.bf16.mxu1 %v14538_v27  ;;  %v14622_v36 = vld [vmem:[%s16914_s29 + $0x9cc] ss:$16 sps:$4 sm:$0xff]   ;;  %v339_v27 = vcombine.high %v17225_v29, %v17225_v29  ;;  %v14623_v29 = vld [vmem:[%s16914_s29 + $0x9e0] ss:$16 sps:$4 sm:$0xff]  }
 0x170   : > { %10178 = vmatmul.mubr.bf16.vlgmr.msra.gmra.mrb[0].mxu0 %v571_v39  ;;  %11203 = vmatmul.mubr.bf16.vlgmr.msra.gmra.mrb[0].mxu1 %v571_v39  ;;  %v14625_v39 = vld [vmem:[%s16914_s29 + $0x9e4] ss:$16 sps:$4 sm:$0xff]  }
 0x171   : > { %10187 = vmatpush1.bf16.msra.mxu0 %v14533_v38  ;;  %11212 = vmatpush1.bf16.msra.mxu1 %v14536_v40  ;;  %v14620_v38 = vld [vmem:[%s16914_s29 + $0x9c8] ss:$16 sps:$4 sm:$0xff]   ;;  %v14628_v40 = vld [vmem:[%s16914_s29 + $0x9ec] ss:$16 sps:$4 sm:$0xff]  }
 0x172   : > { %10188 = vmatprep.subr.bf16.mxu0 %v14541_v41  ;;  %11213 = vmatprep.subr.bf16.mxu1 %v14544_v42  ;;  %v17305_v41 = vrot.slane %v339_v27, %v16988_v50  ;;  %v14626_v42 = vld [vmem:[%s16914_s29 + $0x9e8] ss:$16 sps:$4 sm:$0xff]  }
 0x173   : > { %10218 = vmatprep.mubr.bf16.mxu0 %v574_v43  ;;  %11243 = vmatprep.mubr.bf16.mxu1 %v574_v43  ;;  %v14631_v43 = vld [vmem:[%s16914_s29 + $0xa04] ss:$16 sps:$4 sm:$0xff]   ;;  %v14704_v27 = vld [vmem:[%s16914_s29 + $0xb88] ss:$16 sps:$4 sm:$0xff]  }
 0x175   : > { %10189 = vmatpush1.bf16.msra.mxu0 %v14539_v45  ;;  %11214 = vmatpush1.bf16.msra.mxu1 %v14542_v46  ;;  %v14634_v45 = vld [vmem:[%s16914_s29 + $0xa0c] ss:$16 sps:$4 sm:$0xff]   ;;  %v355_v46 = vcombine.high %v17305_v41, %v17305_v41 }
 0x176   : > { %10190 = vmatprep.subr.bf16.mxu0 %v14547_v26  ;;  %11215 = vmatprep.subr.bf16.mxu1 %v14550_v47  ;;  %v573_v26 = vpack.c.bf16 %v17232_v33, %v17232_v33  ;;  %v14629_v47 = vld [vmem:[%s16914_s29 + $0xa00] ss:$16 sps:$4 sm:$0xff]  }
 0x177   : > { %v14635_v33 = vld [vmem:[%s16914_s29 + $0xa20] ss:$16 sps:$4 sm:$0xff]  }
 0x179   : > { %10191 = vmatpush1.bf16.msra.mxu0 %v14545_v48  ;;  %11216 = vmatpush1.bf16.msra.mxu1 %v14548_v49  ;;  %v14632_v48 = vld [vmem:[%s16914_s29 + $0xa08] ss:$16 sps:$4 sm:$0xff]   ;;  %v14637_v49 = vld [vmem:[%s16914_s29 + $0xa24] ss:$16 sps:$4 sm:$0xff]  }
 0x17a   : > { %10192 = vmatprep.subr.bf16.mxu0 %v14553_v51  ;;  %11217 = vmatprep.subr.bf16.mxu1 %v14556_v52  ;;  %v14640_v51 = vld [vmem:[%s16914_s29 + $0xa2c] ss:$16 sps:$4 sm:$0xff]   ;;  %v576_v52 = vpack.c.bf16 %v355_v46, %v355_v46  ;;  %v14716_v46 = vld [vmem:[%s16914_s29 + $0xbc8] ss:$16 sps:$4 sm:$0xff]  }
 0x17d   : > { %10193 = vmatpush1.bf16.msra.mxu0 %v14551_v53  ;;  %11218 = vmatpush1.bf16.msra.mxu1 %v14554_v54  ;;  %v14638_v53 = vld [vmem:[%s16914_s29 + $0xa28] ss:$16 sps:$4 sm:$0xff]   ;;  %v14643_v54 = vld [vmem:[%s16914_s29 + $0xa44] ss:$16 sps:$4 sm:$0xff]  }
 0x17e   : > { %10194 = vmatprep.subr.bf16.mxu0 %v14559_v55  ;;  %11219 = vmatprep.subr.bf16.mxu1 %v14562_v56  ;;  %v14646_v55 = vld [vmem:[%s16914_s29 + $0xa4c] ss:$16 sps:$4 sm:$0xff]   ;;  %v14641_v56 = vld [vmem:[%s16914_s29 + $0xa40] ss:$16 sps:$4 sm:$0xff]  }
 0x181   : > { %10195 = vmatpush1.bf16.msra.mxu0 %v14557_v57  ;;  %11220 = vmatpush1.bf16.msra.mxu1 %v14560_v58  ;;  %v14644_v57 = vld [vmem:[%s16914_s29 + $0xa48] ss:$16 sps:$4 sm:$0xff]   ;;  %v14649_v58 = vld [vmem:[%s16914_s29 + $0xa64] ss:$16 sps:$4 sm:$0xff]  }
 0x182   : > { %10196 = vmatprep.subr.bf16.mxu0 %v14565_v59  ;;  %11221 = vmatprep.subr.bf16.mxu1 %v14568_v60  ;;  %v14652_v59 = vld [vmem:[%s16914_s29 + $0xa6c] ss:$16 sps:$4 sm:$0xff]   ;;  %v14647_v60 = vld [vmem:[%s16914_s29 + $0xa60] ss:$16 sps:$4 sm:$0xff]  }
 0x185   : > { %10197 = vmatpush1.bf16.msra.mxu0 %v14563_v61  ;;  %11222 = vmatpush1.bf16.msra.mxu1 %v14566_v62  ;;  %v14650_v61 = vld [vmem:[%s16914_s29 + $0xa68] ss:$16 sps:$4 sm:$0xff]   ;;  %v14655_v62 = vld [vmem:[%s16914_s29 + $0xa84] ss:$16 sps:$4 sm:$0xff]  }
 0x186   : > { %10198 = vmatprep.subr.bf16.mxu0 %v14571_v63  ;;  %11223 = vmatprep.subr.bf16.mxu1 %v14574_v0  ;;  %v14658_v63 = vld [vmem:[%s16914_s29 + $0xa8c] ss:$16 sps:$4 sm:$0xff]   ;;  %v14653_v0 = vld [vmem:[%s16914_s29 + $0xa80] ss:$16 sps:$4 sm:$0xff]  }
 0x189   : > { %10199 = vmatpush1.bf16.msra.mxu0 %v14569_v1  ;;  %11224 = vmatpush1.bf16.msra.mxu1 %v14572_v2  ;;  %v14656_v1 = vld [vmem:[%s16914_s29 + $0xa88] ss:$16 sps:$4 sm:$0xff]   ;;  %v14661_v2 = vld [vmem:[%s16914_s29 + $0xaa4] ss:$16 sps:$4 sm:$0xff]  }
 0x18a   : > { %10200 = vmatprep.subr.bf16.mxu0 %v14577_v3  ;;  %11225 = vmatprep.subr.bf16.mxu1 %v14580_v4  ;;  %v14664_v3 = vld [vmem:[%s16914_s29 + $0xaac] ss:$16 sps:$4 sm:$0xff]   ;;  %v14659_v4 = vld [vmem:[%s16914_s29 + $0xaa0] ss:$16 sps:$4 sm:$0xff]  }
 0x18d   : > { %10201 = vmatpush1.bf16.msra.mxu0 %v14575_v5  ;;  %11226 = vmatpush1.bf16.msra.mxu1 %v14578_v6  ;;  %v14662_v5 = vld [vmem:[%s16914_s29 + $0xaa8] ss:$16 sps:$4 sm:$0xff]   ;;  %v14667_v6 = vld [vmem:[%s16914_s29 + $0xac4] ss:$16 sps:$4 sm:$0xff]  }
 0x18e   : > { %10202 = vmatprep.subr.bf16.mxu0 %v14583_v7  ;;  %11227 = vmatprep.subr.bf16.mxu1 %v14586_v8  ;;  %v14670_v7 = vld [vmem:[%s16914_s29 + $0xacc] ss:$16 sps:$4 sm:$0xff]   ;;  %v14665_v8 = vld [vmem:[%s16914_s29 + $0xac0] ss:$16 sps:$4 sm:$0xff]  }
 0x191   : > { %10203 = vmatpush1.bf16.msra.mxu0 %v14581_v9  ;;  %11228 = vmatpush1.bf16.msra.mxu1 %v14584_v11  ;;  %v14668_v9 = vld [vmem:[%s16914_s29 + $0xac8] ss:$16 sps:$4 sm:$0xff]   ;;  %v14673_v11 = vld [vmem:[%s16914_s29 + $0xae4] ss:$16 sps:$4 sm:$0xff]  }
 0x192   : > { %10204 = vmatprep.subr.bf16.mxu0 %v14589_v12  ;;  %11229 = vmatprep.subr.bf16.mxu1 %v14592_v13  ;;  %v14676_v12 = vld [vmem:[%s16914_s29 + $0xaec] ss:$16 sps:$4 sm:$0xff]   ;;  %v14671_v13 = vld [vmem:[%s16914_s29 + $0xae0] ss:$16 sps:$4 sm:$0xff]  }
 0x195   : > { %10205 = vmatpush1.bf16.msra.mxu0 %v14587_v14  ;;  %11230 = vmatpush1.bf16.msra.mxu1 %v14590_v15  ;;  %v14674_v14 = vld [vmem:[%s16914_s29 + $0xae8] ss:$16 sps:$4 sm:$0xff]   ;;  %v14679_v15 = vld [vmem:[%s16914_s29 + $0xb04] ss:$16 sps:$4 sm:$0xff]  }
 0x196   : > { %10206 = vmatprep.subr.bf16.mxu0 %v14595_v16  ;;  %11231 = vmatprep.subr.bf16.mxu1 %v14598_v17  ;;  %v14682_v16 = vld [vmem:[%s16914_s29 + $0xb0c] ss:$16 sps:$4 sm:$0xff]   ;;  %v14677_v17 = vld [vmem:[%s16914_s29 + $0xb00] ss:$16 sps:$4 sm:$0xff]  }
 0x199   : > { %10207 = vmatpush1.bf16.msra.mxu0 %v14593_v18  ;;  %11232 = vmatpush1.bf16.msra.mxu1 %v14596_v19  ;;  %v14680_v18 = vld [vmem:[%s16914_s29 + $0xb08] ss:$16 sps:$4 sm:$0xff]   ;;  %v14685_v19 = vld [vmem:[%s16914_s29 + $0xb24] ss:$16 sps:$4 sm:$0xff]  }
 0x19a   : > { %10208 = vmatprep.subr.bf16.mxu0 %v14601_v20  ;;  %11233 = vmatprep.subr.bf16.mxu1 %v14604_v21  ;;  %v14688_v20 = vld [vmem:[%s16914_s29 + $0xb2c] ss:$16 sps:$4 sm:$0xff]   ;;  %v14683_v21 = vld [vmem:[%s16914_s29 + $0xb20] ss:$16 sps:$4 sm:$0xff]  }
 0x19d   : > { %10209 = vmatpush1.bf16.msra.mxu0 %v14599_v22  ;;  %11234 = vmatpush1.bf16.msra.mxu1 %v14602_v23  ;;  %v14686_v22 = vld [vmem:[%s16914_s29 + $0xb28] ss:$16 sps:$4 sm:$0xff]   ;;  %v14691_v23 = vld [vmem:[%s16914_s29 + $0xb44] ss:$16 sps:$4 sm:$0xff]  }
 0x19e   : > { %10210 = vmatprep.subr.bf16.mxu0 %v14607_v25  ;;  %11235 = vmatprep.subr.bf16.mxu1 %v14610_v24  ;;  %v14694_v25 = vld [vmem:[%s16914_s29 + $0xb4c] ss:$16 sps:$4 sm:$0xff]   ;;  %v14689_v24 = vld [vmem:[%s16914_s29 + $0xb40] ss:$16 sps:$4 sm:$0xff]  }
 0x1a1   : > { %10211 = vmatpush1.bf16.msra.mxu0 %v14605_v10  ;;  %11236 = vmatpush1.bf16.msra.mxu1 %v14608_v28  ;;  %v14692_v10 = vld [vmem:[%s16914_s29 + $0xb48] ss:$16 sps:$4 sm:$0xff]   ;;  %v14697_v28 = vld [vmem:[%s16914_s29 + $0xb64] ss:$16 sps:$4 sm:$0xff]  }
 0x1a2   : > { %10212 = vmatprep.subr.bf16.mxu0 %v14613_v30  ;;  %11237 = vmatprep.subr.bf16.mxu1 %v14616_v31  ;;  %v14700_v30 = vld [vmem:[%s16914_s29 + $0xb6c] ss:$16 sps:$4 sm:$0xff]   ;;  %v14695_v31 = vld [vmem:[%s16914_s29 + $0xb60] ss:$16 sps:$4 sm:$0xff]  }
 0x1a5   : > { %10213 = vmatpush1.bf16.msra.mxu0 %v14611_v32  ;;  %11238 = vmatpush1.bf16.msra.mxu1 %v14614_v34  ;;  %v14698_v32 = vld [vmem:[%s16914_s29 + $0xb68] ss:$16 sps:$4 sm:$0xff]   ;;  %v14703_v34 = vld [vmem:[%s16914_s29 + $0xb84] ss:$16 sps:$4 sm:$0xff]  }
 0x1a6   : > { %10214 = vmatprep.subr.bf16.mxu0 %v14619_v35  ;;  %11239 = vmatprep.subr.bf16.mxu1 %v14622_v36  ;;  %v14706_v35 = vld [vmem:[%s16914_s29 + $0xb8c] ss:$16 sps:$4 sm:$0xff]   ;;  %v14701_v36 = vld [vmem:[%s16914_s29 + $0xb80] ss:$16 sps:$4 sm:$0xff]  }
 0x1a9   : > { %10215 = vmatpush1.bf16.msra.mxu0 %v14617_v37  ;;  %11240 = vmatpush1.bf16.msra.mxu1 %v14620_v38  ;;  %v14709_v37 = vld [vmem:[%s16914_s29 + $0xba4] ss:$16 sps:$4 sm:$0xff]   ;;  %v14712_v38 = vld [vmem:[%s16914_s29 + $0xbac] ss:$16 sps:$4 sm:$0xff]  }
 0x1aa   : > { %10216 = vmatprep.subr.bf16.mxu0 %v14625_v39  ;;  %11241 = vmatprep.subr.bf16.mxu1 %v14628_v40  ;;  %v14707_v39 = vld [vmem:[%s16914_s29 + $0xba0] ss:$16 sps:$4 sm:$0xff]   ;;  %v14710_v40 = vld [vmem:[%s16914_s29 + $0xba8] ss:$16 sps:$4 sm:$0xff]  }
 0x1ad   : > { %10217 = vmatpush1.bf16.msra.mxu0 %v14623_v29  ;;  %11242 = vmatpush1.bf16.msra.mxu1 %v14626_v42  ;;  %v14715_v29 = vld [vmem:[%s16914_s29 + $0xbc4] ss:$16 sps:$4 sm:$0xff]   ;;  %v14718_v42 = vld [vmem:[%s16914_s29 + $0xbcc] ss:$16 sps:$4 sm:$0xff]  }
 0x1ae   : > { %10227 = vmatprep.subr.bf16.mxu0 %v14631_v43  ;;  %11252 = vmatprep.subr.bf16.mxu1 %v14634_v45  ;;  %v17372_v43 = vld [vmem:[%s16938_s9 + $0x18] sm:$0xff] }
 0x1af   : > { %v14713_v45 = vld [vmem:[%s16914_s29 + $0xbc0] ss:$16 sps:$4 sm:$0xff]  }
 0x1b0   : > { %10219 = vmatmul.mubr.bf16.vlgmr.msra.gmra.mrb[0].mxu0 %v573_v26  ;;  %11244 = vmatmul.mubr.bf16.vlgmr.msra.gmra.mrb[0].mxu1 %v573_v26  ;;  %v14721_v26 = vld [vmem:[%s16914_s29 + $0xbe4] ss:$16 sps:$4 sm:$0xff]  }
 0x1b1   : > { %10228 = vmatpush1.bf16.msra.mxu0 %v14629_v47  ;;  %11253 = vmatpush1.bf16.msra.mxu1 %v14632_v48  ;;  %v14724_v47 = vld [vmem:[%s16914_s29 + $0xbec] ss:$16 sps:$4 sm:$0xff]   ;;  %v17380_v48 = vrot.slane %v17372_v43, %v16988_v50 }
 0x1b2   : > { %10229 = vmatprep.subr.bf16.mxu0 %v14637_v49  ;;  %11254 = vmatprep.subr.bf16.mxu1 %v14640_v51  ;;  %v14719_v49 = vld [vmem:[%s16914_s29 + $0xbe0] ss:$16 sps:$4 sm:$0xff]   ;;  %v14722_v51 = vld [vmem:[%s16914_s29 + $0xbe8] ss:$16 sps:$4 sm:$0xff]  }
 0x1b3   : > { %10259 = vmatprep.mubr.bf16.mxu0 %v576_v52  ;;  %11284 = vmatprep.mubr.bf16.mxu1 %v576_v52  ;;  %v14728_v52 = vld [vmem:[%s16914_s29 + $0xc04] ss:$16 sps:$4 sm:$0xff]  }
 0x1b5   : > { %10230 = vmatpush1.bf16.msra.mxu0 %v14635_v33  ;;  %11255 = vmatpush1.bf16.msra.mxu1 %v14638_v53  ;;  %v14731_v33 = vld [vmem:[%s16914_s29 + $0xc0c] ss:$16 sps:$4 sm:$0xff]   ;;  %v371_v53 = vcombine.high %v17380_v48, %v17380_v48 }
 0x1b6   : > { %10231 = vmatprep.subr.bf16.mxu0 %v14643_v54  ;;  %11256 = vmatprep.subr.bf16.mxu1 %v14646_v55  ;;  %v575_v54 = vpack.c.bf16 %v17305_v41, %v17305_v41  ;;  %v14726_v55 = vld [vmem:[%s16914_s29 + $0xc00] ss:$16 sps:$4 sm:$0xff]  }
 0x1b7   : > { %v14732_v41 = vld [vmem:[%s16914_s29 + $0xc20] ss:$16 sps:$4 sm:$0xff]  }
 0x1b9   : > { %10232 = vmatpush1.bf16.msra.mxu0 %v14641_v56  ;;  %11257 = vmatpush1.bf16.msra.mxu1 %v14644_v57  ;;  %v14729_v56 = vld [vmem:[%s16914_s29 + $0xc08] ss:$16 sps:$4 sm:$0xff]   ;;  %v14734_v57 = vld [vmem:[%s16914_s29 + $0xc24] ss:$16 sps:$4 sm:$0xff]  }
 0x1ba   : > { %10233 = vmatprep.subr.bf16.mxu0 %v14649_v58  ;;  %11258 = vmatprep.subr.bf16.mxu1 %v14652_v59  ;;  %v14737_v58 = vld [vmem:[%s16914_s29 + $0xc2c] ss:$16 sps:$4 sm:$0xff]   ;;  %v578_v59 = vpack.c.bf16 %v371_v53, %v371_v53  ;;  %v14810_v53 = vld [vmem:[%s16914_s29 + $0xdc0] ss:$16 sps:$4 sm:$0xff]  }
 0x1bd   : > { %10234 = vmatpush1.bf16.msra.mxu0 %v14647_v60  ;;  %11259 = vmatpush1.bf16.msra.mxu1 %v14650_v61  ;;  %v14735_v60 = vld [vmem:[%s16914_s29 + $0xc28] ss:$16 sps:$4 sm:$0xff]   ;;  %v14740_v61 = vld [vmem:[%s16914_s29 + $0xc44] ss:$16 sps:$4 sm:$0xff]  }
 0x1be   : > { %10235 = vmatprep.subr.bf16.mxu0 %v14655_v62  ;;  %11260 = vmatprep.subr.bf16.mxu1 %v14658_v63  ;;  %v14743_v62 = vld [vmem:[%s16914_s29 + $0xc4c] ss:$16 sps:$4 sm:$0xff]   ;;  %v14738_v63 = vld [vmem:[%s16914_s29 + $0xc40] ss:$16 sps:$4 sm:$0xff]  }
 0x1c1   : > { %10236 = vmatpush1.bf16.msra.mxu0 %v14653_v0  ;;  %11261 = vmatpush1.bf16.msra.mxu1 %v14656_v1  ;;  %v14741_v0 = vld [vmem:[%s16914_s29 + $0xc48] ss:$16 sps:$4 sm:$0xff]   ;;  %v14746_v1 = vld [vmem:[%s16914_s29 + $0xc64] ss:$16 sps:$4 sm:$0xff]  }
 0x1c2   : > { %10237 = vmatprep.subr.bf16.mxu0 %v14661_v2  ;;  %11262 = vmatprep.subr.bf16.mxu1 %v14664_v3  ;;  %v14749_v2 = vld [vmem:[%s16914_s29 + $0xc6c] ss:$16 sps:$4 sm:$0xff]   ;;  %v14744_v3 = vld [vmem:[%s16914_s29 + $0xc60] ss:$16 sps:$4 sm:$0xff]  }
 0x1c5   : > { %10238 = vmatpush1.bf16.msra.mxu0 %v14659_v4  ;;  %11263 = vmatpush1.bf16.msra.mxu1 %v14662_v5  ;;  %v14747_v4 = vld [vmem:[%s16914_s29 + $0xc68] ss:$16 sps:$4 sm:$0xff]   ;;  %v14752_v5 = vld [vmem:[%s16914_s29 + $0xc84] ss:$16 sps:$4 sm:$0xff]  }
 0x1c6   : > { %10239 = vmatprep.subr.bf16.mxu0 %v14667_v6  ;;  %11264 = vmatprep.subr.bf16.mxu1 %v14670_v7  ;;  %v14755_v6 = vld [vmem:[%s16914_s29 + $0xc8c] ss:$16 sps:$4 sm:$0xff]   ;;  %v14750_v7 = vld [vmem:[%s16914_s29 + $0xc80] ss:$16 sps:$4 sm:$0xff]  }
 0x1c9   : > { %10240 = vmatpush1.bf16.msra.mxu0 %v14665_v8  ;;  %11265 = vmatpush1.bf16.msra.mxu1 %v14668_v9  ;;  %v14753_v8 = vld [vmem:[%s16914_s29 + $0xc88] ss:$16 sps:$4 sm:$0xff]   ;;  %v14758_v9 = vld [vmem:[%s16914_s29 + $0xca4] ss:$16 sps:$4 sm:$0xff]  }
 0x1ca   : > { %10241 = vmatprep.subr.bf16.mxu0 %v14673_v11  ;;  %11266 = vmatprep.subr.bf16.mxu1 %v14676_v12  ;;  %v14761_v11 = vld [vmem:[%s16914_s29 + $0xcac] ss:$16 sps:$4 sm:$0xff]   ;;  %v14756_v12 = vld [vmem:[%s16914_s29 + $0xca0] ss:$16 sps:$4 sm:$0xff]  }
 0x1cd   : > { %10242 = vmatpush1.bf16.msra.mxu0 %v14671_v13  ;;  %11267 = vmatpush1.bf16.msra.mxu1 %v14674_v14  ;;  %v14759_v13 = vld [vmem:[%s16914_s29 + $0xca8] ss:$16 sps:$4 sm:$0xff]   ;;  %v14764_v14 = vld [vmem:[%s16914_s29 + $0xcc4] ss:$16 sps:$4 sm:$0xff]  }
 0x1ce   : > { %10243 = vmatprep.subr.bf16.mxu0 %v14679_v15  ;;  %11268 = vmatprep.subr.bf16.mxu1 %v14682_v16  ;;  %v14767_v15 = vld [vmem:[%s16914_s29 + $0xccc] ss:$16 sps:$4 sm:$0xff]   ;;  %v14762_v16 = vld [vmem:[%s16914_s29 + $0xcc0] ss:$16 sps:$4 sm:$0xff]  }
 0x1d1   : > { %10244 = vmatpush1.bf16.msra.mxu0 %v14677_v17  ;;  %11269 = vmatpush1.bf16.msra.mxu1 %v14680_v18  ;;  %v14765_v17 = vld [vmem:[%s16914_s29 + $0xcc8] ss:$16 sps:$4 sm:$0xff]   ;;  %v14770_v18 = vld [vmem:[%s16914_s29 + $0xce4] ss:$16 sps:$4 sm:$0xff]  }
 0x1d2   : > { %10245 = vmatprep.subr.bf16.mxu0 %v14685_v19  ;;  %11270 = vmatprep.subr.bf16.mxu1 %v14688_v20  ;;  %v14773_v19 = vld [vmem:[%s16914_s29 + $0xcec] ss:$16 sps:$4 sm:$0xff]   ;;  %v14768_v20 = vld [vmem:[%s16914_s29 + $0xce0] ss:$16 sps:$4 sm:$0xff]  }
 0x1d5   : > { %10246 = vmatpush1.bf16.msra.mxu0 %v14683_v21  ;;  %11271 = vmatpush1.bf16.msra.mxu1 %v14686_v22  ;;  %v14771_v21 = vld [vmem:[%s16914_s29 + $0xce8] ss:$16 sps:$4 sm:$0xff]   ;;  %v14776_v22 = vld [vmem:[%s16914_s29 + $0xd04] ss:$16 sps:$4 sm:$0xff]  }
 0x1d6   : > { %10247 = vmatprep.subr.bf16.mxu0 %v14691_v23  ;;  %11272 = vmatprep.subr.bf16.mxu1 %v14694_v25  ;;  %v14779_v23 = vld [vmem:[%s16914_s29 + $0xd0c] ss:$16 sps:$4 sm:$0xff]   ;;  %v14774_v25 = vld [vmem:[%s16914_s29 + $0xd00] ss:$16 sps:$4 sm:$0xff]  }
 0x1d9   : > { %10248 = vmatpush1.bf16.msra.mxu0 %v14689_v24  ;;  %11273 = vmatpush1.bf16.msra.mxu1 %v14692_v10  ;;  %v14777_v24 = vld [vmem:[%s16914_s29 + $0xd08] ss:$16 sps:$4 sm:$0xff]   ;;  %v14782_v10 = vld [vmem:[%s16914_s29 + $0xd24] ss:$16 sps:$4 sm:$0xff]  }
 0x1da   : > { %10249 = vmatprep.subr.bf16.mxu0 %v14697_v28  ;;  %11274 = vmatprep.subr.bf16.mxu1 %v14700_v30  ;;  %v14785_v28 = vld [vmem:[%s16914_s29 + $0xd2c] ss:$16 sps:$4 sm:$0xff]   ;;  %v14780_v30 = vld [vmem:[%s16914_s29 + $0xd20] ss:$16 sps:$4 sm:$0xff]  }
 0x1dd   : > { %10250 = vmatpush1.bf16.msra.mxu0 %v14695_v31  ;;  %11275 = vmatpush1.bf16.msra.mxu1 %v14698_v32  ;;  %v14783_v31 = vld [vmem:[%s16914_s29 + $0xd28] ss:$16 sps:$4 sm:$0xff]   ;;  %v14788_v32 = vld [vmem:[%s16914_s29 + $0xd44] ss:$16 sps:$4 sm:$0xff]  }
 0x1de   : > { %10251 = vmatprep.subr.bf16.mxu0 %v14703_v34  ;;  %11276 = vmatprep.subr.bf16.mxu1 %v14706_v35  ;;  %v14791_v34 = vld [vmem:[%s16914_s29 + $0xd4c] ss:$16 sps:$4 sm:$0xff]   ;;  %v14786_v35 = vld [vmem:[%s16914_s29 + $0xd40] ss:$16 sps:$4 sm:$0xff]  }
 0x1e1   : > { %10252 = vmatpush1.bf16.msra.mxu0 %v14701_v36  ;;  %11277 = vmatpush1.bf16.msra.mxu1 %v14704_v27  ;;  %v14789_v36 = vld [vmem:[%s16914_s29 + $0xd48] ss:$16 sps:$4 sm:$0xff]   ;;  %v14794_v27 = vld [vmem:[%s16914_s29 + $0xd64] ss:$16 sps:$4 sm:$0xff]  }
 0x1e2   : > { %10253 = vmatprep.subr.bf16.mxu0 %v14709_v37  ;;  %11278 = vmatprep.subr.bf16.mxu1 %v14712_v38  ;;  %v14797_v37 = vld [vmem:[%s16914_s29 + $0xd6c] ss:$16 sps:$4 sm:$0xff]   ;;  %v14792_v38 = vld [vmem:[%s16914_s29 + $0xd60] ss:$16 sps:$4 sm:$0xff]  }
 0x1e5   : > { %10254 = vmatpush1.bf16.msra.mxu0 %v14707_v39  ;;  %11279 = vmatpush1.bf16.msra.mxu1 %v14710_v40  ;;  %v14795_v39 = vld [vmem:[%s16914_s29 + $0xd68] ss:$16 sps:$4 sm:$0xff]   ;;  %v14800_v40 = vld [vmem:[%s16914_s29 + $0xd84] ss:$16 sps:$4 sm:$0xff]  }
 0x1e6   : > { %10255 = vmatprep.subr.bf16.mxu0 %v14715_v29  ;;  %11280 = vmatprep.subr.bf16.mxu1 %v14718_v42  ;;  %v14803_v29 = vld [vmem:[%s16914_s29 + $0xd8c] ss:$16 sps:$4 sm:$0xff]   ;;  %v14798_v42 = vld [vmem:[%s16914_s29 + $0xd80] ss:$16 sps:$4 sm:$0xff]  }
 0x1e9   : > { %10256 = vmatpush1.bf16.msra.mxu0 %v14713_v45  ;;  %11281 = vmatpush1.bf16.msra.mxu1 %v14716_v46  ;;  %v14801_v45 = vld [vmem:[%s16914_s29 + $0xd88] ss:$16 sps:$4 sm:$0xff]   ;;  %v14806_v46 = vld [vmem:[%s16914_s29 + $0xda4] ss:$16 sps:$4 sm:$0xff]  }
 0x1ea   : > { %10257 = vmatprep.subr.bf16.mxu0 %v14721_v26  ;;  %11282 = vmatprep.subr.bf16.mxu1 %v14724_v47  ;;  %v14809_v26 = vld [vmem:[%s16914_s29 + $0xdac] ss:$16 sps:$4 sm:$0xff]   ;;  %v14804_v47 = vld [vmem:[%s16914_s29 + $0xda0] ss:$16 sps:$4 sm:$0xff]  }
 0x1ed   : > { %10258 = vmatpush1.bf16.msra.mxu0 %v14719_v49  ;;  %11283 = vmatpush1.bf16.msra.mxu1 %v14722_v51  ;;  %v14807_v49 = vld [vmem:[%s16914_s29 + $0xda8] ss:$16 sps:$4 sm:$0xff]   ;;  %v14812_v51 = vld [vmem:[%s16914_s29 + $0xdc4] ss:$16 sps:$4 sm:$0xff]  }
 0x1ee   : > { %10268 = vmatprep.subr.bf16.mxu0 %v14728_v52  ;;  %11293 = vmatprep.subr.bf16.mxu1 %v14731_v33  ;;  %v14815_v52 = vld [vmem:[%s16914_s29 + $0xdcc] ss:$16 sps:$4 sm:$0xff]   ;;  %v356_v33 = vcombine.high %v17372_v43, %v17372_v43  ;;  %v14816_v43 = vld [vmem:[%s16914_s29 + $0xde0] ss:$16 sps:$4 sm:$0xff]  }
 0x1f0   : > { %10260 = vmatmul.mubr.bf16.vlgmr.msra.gmra.mrb[0].mxu0 %v575_v54  ;;  %11285 = vmatmul.mubr.bf16.vlgmr.msra.gmra.mrb[0].mxu1 %v575_v54  ;;  %v14813_v54 = vld [vmem:[%s16914_s29 + $0xdc8] ss:$16 sps:$4 sm:$0xff]  }
 0x1f1   : > { %10269 = vmatpush1.bf16.msra.mxu0 %v14726_v55  ;;  %11294 = vmatpush1.bf16.msra.mxu1 %v14729_v56  ;;  %v14818_v55 = vld [vmem:[%s16914_s29 + $0xde4] ss:$16 sps:$4 sm:$0xff]   ;;  %v14821_v56 = vld [vmem:[%s16914_s29 + $0xdec] ss:$16 sps:$4 sm:$0xff]  }
 0x1f2   : > { %10270 = vmatprep.subr.bf16.mxu0 %v14734_v57  ;;  %11295 = vmatprep.subr.bf16.mxu1 %v14737_v58  ;;  %v17453_v57 = vrot.slane %v356_v33, %v16988_v50  ;;  %v14819_v58 = vld [vmem:[%s16914_s29 + $0xde8] ss:$16 sps:$4 sm:$0xff]  }
 0x1f3   : > { %10300 = vmatprep.mubr.bf16.mxu0 %v578_v59  ;;  %11325 = vmatprep.mubr.bf16.mxu1 %v578_v59  ;;  %v14824_v59 = vld [vmem:[%s16914_s29 + $0xe04] ss:$16 sps:$4 sm:$0xff]   ;;  %v14897_v33 = vld [vmem:[%s16914_s29 + $0xf88] ss:$16 sps:$4 sm:$0xff]  }
 0x1f5   : > { %10271 = vmatpush1.bf16.msra.mxu0 %v14732_v41  ;;  %11296 = vmatpush1.bf16.msra.mxu1 %v14735_v60  ;;  %v14827_v41 = vld [vmem:[%s16914_s29 + $0xe0c] ss:$16 sps:$4 sm:$0xff]   ;;  %v372_v60 = vcombine.high %v17453_v57, %v17453_v57 }
 0x1f6   : > { %10272 = vmatprep.subr.bf16.mxu0 %v14740_v61  ;;  %11297 = vmatprep.subr.bf16.mxu1 %v14743_v62  ;;  %v577_v61 = vpack.c.bf16 %v17380_v48, %v17380_v48  ;;  %v14822_v62 = vld [vmem:[%s16914_s29 + $0xe00] ss:$16 sps:$4 sm:$0xff]  }
 0x1f7   : > { %v14828_v48 = vld [vmem:[%s16914_s29 + $0xe20] ss:$16 sps:$4 sm:$0xff]  }
 0x1f9   : > { %10273 = vmatpush1.bf16.msra.mxu0 %v14738_v63  ;;  %11298 = vmatpush1.bf16.msra.mxu1 %v14741_v0  ;;  %v14825_v63 = vld [vmem:[%s16914_s29 + $0xe08] ss:$16 sps:$4 sm:$0xff]   ;;  %v14830_v0 = vld [vmem:[%s16914_s29 + $0xe24] ss:$16 sps:$4 sm:$0xff]  }
 0x1fa   : > { %10274 = vmatprep.subr.bf16.mxu0 %v14746_v1  ;;  %11299 = vmatprep.subr.bf16.mxu1 %v14749_v2  ;;  %v14833_v1 = vld [vmem:[%s16914_s29 + $0xe2c] ss:$16 sps:$4 sm:$0xff]   ;;  %v580_v2 = vpack.c.bf16 %v372_v60, %v372_v60  ;;  %v14909_v60 = vld [vmem:[%s16914_s29 + $0xfc8] ss:$16 sps:$4 sm:$0xff]  }
 0x1fd   : > { %10275 = vmatpush1.bf16.msra.mxu0 %v14744_v3  ;;  %11300 = vmatpush1.bf16.msra.mxu1 %v14747_v4  ;;  %v14831_v3 = vld [vmem:[%s16914_s29 + $0xe28] ss:$16 sps:$4 sm:$0xff]   ;;  %v14836_v4 = vld [vmem:[%s16914_s29 + $0xe44] ss:$16 sps:$4 sm:$0xff]  }
 0x1fe   : > { %10276 = vmatprep.subr.bf16.mxu0 %v14752_v5  ;;  %11301 = vmatprep.subr.bf16.mxu1 %v14755_v6  ;;  %v14839_v5 = vld [vmem:[%s16914_s29 + $0xe4c] ss:$16 sps:$4 sm:$0xff]   ;;  %v14834_v6 = vld [vmem:[%s16914_s29 + $0xe40] ss:$16 sps:$4 sm:$0xff]  }
 0x201   : > { %10277 = vmatpush1.bf16.msra.mxu0 %v14750_v7  ;;  %11302 = vmatpush1.bf16.msra.mxu1 %v14753_v8  ;;  %v14837_v7 = vld [vmem:[%s16914_s29 + $0xe48] ss:$16 sps:$4 sm:$0xff]   ;;  %v14842_v8 = vld [vmem:[%s16914_s29 + $0xe64] ss:$16 sps:$4 sm:$0xff]  }
 0x202   : > { %10278 = vmatprep.subr.bf16.mxu0 %v14758_v9  ;;  %11303 = vmatprep.subr.bf16.mxu1 %v14761_v11  ;;  %v14845_v9 = vld [vmem:[%s16914_s29 + $0xe6c] ss:$16 sps:$4 sm:$0xff]   ;;  %v14840_v11 = vld [vmem:[%s16914_s29 + $0xe60] ss:$16 sps:$4 sm:$0xff]  }
 0x205   : > { %10279 = vmatpush1.bf16.msra.mxu0 %v14756_v12  ;;  %11304 = vmatpush1.bf16.msra.mxu1 %v14759_v13  ;;  %v14843_v12 = vld [vmem:[%s16914_s29 + $0xe68] ss:$16 sps:$4 sm:$0xff]   ;;  %v14848_v13 = vld [vmem:[%s16914_s29 + $0xe84] ss:$16 sps:$4 sm:$0xff]  }
 0x206   : > { %10280 = vmatprep.subr.bf16.mxu0 %v14764_v14  ;;  %11305 = vmatprep.subr.bf16.mxu1 %v14767_v15  ;;  %v14851_v14 = vld [vmem:[%s16914_s29 + $0xe8c] ss:$16 sps:$4 sm:$0xff]   ;;  %v14846_v15 = vld [vmem:[%s16914_s29 + $0xe80] ss:$16 sps:$4 sm:$0xff]  }
 0x209   : > { %10281 = vmatpush1.bf16.msra.mxu0 %v14762_v16  ;;  %11306 = vmatpush1.bf16.msra.mxu1 %v14765_v17  ;;  %v14849_v16 = vld [vmem:[%s16914_s29 + $0xe88] ss:$16 sps:$4 sm:$0xff]   ;;  %v14854_v17 = vld [vmem:[%s16914_s29 + $0xea4] ss:$16 sps:$4 sm:$0xff]  }
 0x20a   : > { %10282 = vmatprep.subr.bf16.mxu0 %v14770_v18  ;;  %11307 = vmatprep.subr.bf16.mxu1 %v14773_v19  ;;  %v14857_v18 = vld [vmem:[%s16914_s29 + $0xeac] ss:$16 sps:$4 sm:$0xff]   ;;  %v14852_v19 = vld [vmem:[%s16914_s29 + $0xea0] ss:$16 sps:$4 sm:$0xff]  }
 0x20d   : > { %10283 = vmatpush1.bf16.msra.mxu0 %v14768_v20  ;;  %11308 = vmatpush1.bf16.msra.mxu1 %v14771_v21  ;;  %v14855_v20 = vld [vmem:[%s16914_s29 + $0xea8] ss:$16 sps:$4 sm:$0xff]   ;;  %v14860_v21 = vld [vmem:[%s16914_s29 + $0xec4] ss:$16 sps:$4 sm:$0xff]  }
 0x20e   : > { %10284 = vmatprep.subr.bf16.mxu0 %v14776_v22  ;;  %11309 = vmatprep.subr.bf16.mxu1 %v14779_v23  ;;  %v14863_v22 = vld [vmem:[%s16914_s29 + $0xecc] ss:$16 sps:$4 sm:$0xff]   ;;  %v14858_v23 = vld [vmem:[%s16914_s29 + $0xec0] ss:$16 sps:$4 sm:$0xff]  }
 0x211   : > { %10285 = vmatpush1.bf16.msra.mxu0 %v14774_v25  ;;  %11310 = vmatpush1.bf16.msra.mxu1 %v14777_v24  ;;  %v14861_v25 = vld [vmem:[%s16914_s29 + $0xec8] ss:$16 sps:$4 sm:$0xff]   ;;  %v14866_v24 = vld [vmem:[%s16914_s29 + $0xee4] ss:$16 sps:$4 sm:$0xff]  }
 0x212   : > { %10286 = vmatprep.subr.bf16.mxu0 %v14782_v10  ;;  %11311 = vmatprep.subr.bf16.mxu1 %v14785_v28  ;;  %v14869_v10 = vld [vmem:[%s16914_s29 + $0xeec] ss:$16 sps:$4 sm:$0xff]   ;;  %v14864_v28 = vld [vmem:[%s16914_s29 + $0xee0] ss:$16 sps:$4 sm:$0xff]  }
 0x215   : > { %10287 = vmatpush1.bf16.msra.mxu0 %v14780_v30  ;;  %11312 = vmatpush1.bf16.msra.mxu1 %v14783_v31  ;;  %v14867_v30 = vld [vmem:[%s16914_s29 + $0xee8] ss:$16 sps:$4 sm:$0xff]   ;;  %v14872_v31 = vld [vmem:[%s16914_s29 + $0xf04] ss:$16 sps:$4 sm:$0xff]  }
 0x216   : > { %10288 = vmatprep.subr.bf16.mxu0 %v14788_v32  ;;  %11313 = vmatprep.subr.bf16.mxu1 %v14791_v34  ;;  %v14875_v32 = vld [vmem:[%s16914_s29 + $0xf0c] ss:$16 sps:$4 sm:$0xff]   ;;  %v14870_v34 = vld [vmem:[%s16914_s29 + $0xf00] ss:$16 sps:$4 sm:$0xff]  }
 0x219   : > { %10289 = vmatpush1.bf16.msra.mxu0 %v14786_v35  ;;  %11314 = vmatpush1.bf16.msra.mxu1 %v14789_v36  ;;  %v14873_v35 = vld [vmem:[%s16914_s29 + $0xf08] ss:$16 sps:$4 sm:$0xff]   ;;  %v14878_v36 = vld [vmem:[%s16914_s29 + $0xf24] ss:$16 sps:$4 sm:$0xff]  }
 0x21a   : > { %10290 = vmatprep.subr.bf16.mxu0 %v14794_v27  ;;  %11315 = vmatprep.subr.bf16.mxu1 %v14797_v37  ;;  %v14881_v27 = vld [vmem:[%s16914_s29 + $0xf2c] ss:$16 sps:$4 sm:$0xff]   ;;  %v14876_v37 = vld [vmem:[%s16914_s29 + $0xf20] ss:$16 sps:$4 sm:$0xff]  }
 0x21d   : > { %10291 = vmatpush1.bf16.msra.mxu0 %v14792_v38  ;;  %11316 = vmatpush1.bf16.msra.mxu1 %v14795_v39  ;;  %v14879_v38 = vld [vmem:[%s16914_s29 + $0xf28] ss:$16 sps:$4 sm:$0xff]   ;;  %v14884_v39 = vld [vmem:[%s16914_s29 + $0xf44] ss:$16 sps:$4 sm:$0xff]  }
 0x21e   : > { %10292 = vmatprep.subr.bf16.mxu0 %v14800_v40  ;;  %11317 = vmatprep.subr.bf16.mxu1 %v14803_v29  ;;  %v14887_v40 = vld [vmem:[%s16914_s29 + $0xf4c] ss:$16 sps:$4 sm:$0xff]   ;;  %v14882_v29 = vld [vmem:[%s16914_s29 + $0xf40] ss:$16 sps:$4 sm:$0xff]  }
 0x221   : > { %10293 = vmatpush1.bf16.msra.mxu0 %v14798_v42  ;;  %11318 = vmatpush1.bf16.msra.mxu1 %v14801_v45  ;;  %v14885_v42 = vld [vmem:[%s16914_s29 + $0xf48] ss:$16 sps:$4 sm:$0xff]   ;;  %v14890_v45 = vld [vmem:[%s16914_s29 + $0xf64] ss:$16 sps:$4 sm:$0xff]  }
 0x222   : > { %10294 = vmatprep.subr.bf16.mxu0 %v14806_v46  ;;  %11319 = vmatprep.subr.bf16.mxu1 %v14809_v26  ;;  %v14893_v46 = vld [vmem:[%s16914_s29 + $0xf6c] ss:$16 sps:$4 sm:$0xff]   ;;  %v14888_v26 = vld [vmem:[%s16914_s29 + $0xf60] ss:$16 sps:$4 sm:$0xff]  }
 0x225   : > { %10295 = vmatpush1.bf16.msra.mxu0 %v14804_v47  ;;  %11320 = vmatpush1.bf16.msra.mxu1 %v14807_v49  ;;  %v14891_v47 = vld [vmem:[%s16914_s29 + $0xf68] ss:$16 sps:$4 sm:$0xff]   ;;  %v14896_v49 = vld [vmem:[%s16914_s29 + $0xf84] ss:$16 sps:$4 sm:$0xff]  }
 0x226   : > { %10296 = vmatprep.subr.bf16.mxu0 %v14812_v51  ;;  %11321 = vmatprep.subr.bf16.mxu1 %v14815_v52  ;;  %v14899_v51 = vld [vmem:[%s16914_s29 + $0xf8c] ss:$16 sps:$4 sm:$0xff]   ;;  %v14894_v52 = vld [vmem:[%s16914_s29 + $0xf80] ss:$16 sps:$4 sm:$0xff]  }
 0x229   : > { %10297 = vmatpush1.bf16.msra.mxu0 %v14810_v53  ;;  %11322 = vmatpush1.bf16.msra.mxu1 %v14813_v54  ;;  %v14902_v53 = vld [vmem:[%s16914_s29 + $0xfa4] ss:$16 sps:$4 sm:$0xff]   ;;  %v14905_v54 = vld [vmem:[%s16914_s29 + $0xfac] ss:$16 sps:$4 sm:$0xff]  }
 0x22a   : > { %10298 = vmatprep.subr.bf16.mxu0 %v14818_v55  ;;  %11323 = vmatprep.subr.bf16.mxu1 %v14821_v56  ;;  %v14900_v55 = vld [vmem:[%s16914_s29 + $0xfa0] ss:$16 sps:$4 sm:$0xff]   ;;  %v14903_v56 = vld [vmem:[%s16914_s29 + $0xfa8] ss:$16 sps:$4 sm:$0xff]  }
 0x22d   : > { %10299 = vmatpush1.bf16.msra.mxu0 %v14816_v43  ;;  %11324 = vmatpush1.bf16.msra.mxu1 %v14819_v58  ;;  %v14908_v43 = vld [vmem:[%s16914_s29 + $0xfc4] ss:$16 sps:$4 sm:$0xff]   ;;  %v14911_v58 = vld [vmem:[%s16914_s29 + $0xfcc] ss:$16 sps:$4 sm:$0xff]  }
 0x22e   : > { %10309 = vmatprep.subr.bf16.mxu0 %v14824_v59  ;;  %11334 = vmatprep.subr.bf16.mxu1 %v14827_v41  ;;  %v17520_v59 = vld [vmem:[%s16938_s9 + $0x20] sm:$0xff]  ;;  %v14906_v41 = vld [vmem:[%s16914_s29 + $0xfc0] ss:$16 sps:$4 sm:$0xff]  }
 0x230   : > { %10301 = vmatmul.mubr.bf16.vlgmr.msra.gmra.mrb[0].mxu0 %v577_v61  ;;  %11326 = vmatmul.mubr.bf16.vlgmr.msra.gmra.mrb[0].mxu1 %v577_v61  ;;  %v14914_v61 = vld [vmem:[%s16914_s29 + $0xfe4] ss:$16 sps:$4 sm:$0xff]  }
 0x231   : > { %10310 = vmatpush1.bf16.msra.mxu0 %v14822_v62  ;;  %11335 = vmatpush1.bf16.msra.mxu1 %v14825_v63  ;;  %v14917_v62 = vld [vmem:[%s16914_s29 + $0xfec] ss:$16 sps:$4 sm:$0xff]   ;;  %v17528_v63 = vrot.slane %v17520_v59, %v16988_v50 }
 0x232   : > { %10311 = vmatprep.subr.bf16.mxu0 %v14830_v0  ;;  %11336 = vmatprep.subr.bf16.mxu1 %v14833_v1  ;;  %v14912_v0 = vld [vmem:[%s16914_s29 + $0xfe0] ss:$16 sps:$4 sm:$0xff]   ;;  %v14915_v1 = vld [vmem:[%s16914_s29 + $0xfe8] ss:$16 sps:$4 sm:$0xff]  }
 0x233   : > { %10341 = vmatprep.mubr.bf16.mxu0 %v580_v2  ;;  %11366 = vmatprep.mubr.bf16.mxu1 %v580_v2  ;;  %v14921_v2 = vld [vmem:[%s16914_s29 + $0x1004] ss:$16 sps:$4 sm:$0xff]  }
 0x235   : > { %10312 = vmatpush1.bf16.msra.mxu0 %v14828_v48  ;;  %11337 = vmatpush1.bf16.msra.mxu1 %v14831_v3  ;;  %v14924_v48 = vld [vmem:[%s16914_s29 + $0x100c] ss:$16 sps:$4 sm:$0xff]   ;;  %v388_v3 = vcombine.high %v17528_v63, %v17528_v63 }
 0x236   : > { %10313 = vmatprep.subr.bf16.mxu0 %v14836_v4  ;;  %11338 = vmatprep.subr.bf16.mxu1 %v14839_v5  ;;  %v579_v4 = vpack.c.bf16 %v17453_v57, %v17453_v57  ;;  %v14919_v5 = vld [vmem:[%s16914_s29 + $0x1000] ss:$16 sps:$4 sm:$0xff]  }
 0x237   : > { %v14925_v57 = vld [vmem:[%s16914_s29 + $0x1020] ss:$16 sps:$4 sm:$0xff]  }
 0x239   : > { %10314 = vmatpush1.bf16.msra.mxu0 %v14834_v6  ;;  %11339 = vmatpush1.bf16.msra.mxu1 %v14837_v7  ;;  %v14922_v6 = vld [vmem:[%s16914_s29 + $0x1008] ss:$16 sps:$4 sm:$0xff]   ;;  %v14927_v7 = vld [vmem:[%s16914_s29 + $0x1024] ss:$16 sps:$4 sm:$0xff]  }
 0x23a   : > { %10315 = vmatprep.subr.bf16.mxu0 %v14842_v8  ;;  %11340 = vmatprep.subr.bf16.mxu1 %v14845_v9  ;;  %v14930_v8 = vld [vmem:[%s16914_s29 + $0x102c] ss:$16 sps:$4 sm:$0xff]   ;;  %v582_v9 = vpack.c.bf16 %v388_v3, %v388_v3  ;;  %v15003_v3 = vld [vmem:[%s16914_s29 + $0x11c0] ss:$16 sps:$4 sm:$0xff]  }
 0x23d   : > { %10316 = vmatpush1.bf16.msra.mxu0 %v14840_v11  ;;  %11341 = vmatpush1.bf16.msra.mxu1 %v14843_v12  ;;  %v14928_v11 = vld [vmem:[%s16914_s29 + $0x1028] ss:$16 sps:$4 sm:$0xff]   ;;  %v14933_v12 = vld [vmem:[%s16914_s29 + $0x1044] ss:$16 sps:$4 sm:$0xff]  }
 0x23e   : > { %10317 = vmatprep.subr.bf16.mxu0 %v14848_v13  ;;  %11342 = vmatprep.subr.bf16.mxu1 %v14851_v14  ;;  %v14936_v13 = vld [vmem:[%s16914_s29 + $0x104c] ss:$16 sps:$4 sm:$0xff]   ;;  %v14931_v14 = vld [vmem:[%s16914_s29 + $0x1040] ss:$16 sps:$4 sm:$0xff]  }
 0x241   : > { %10318 = vmatpush1.bf16.msra.mxu0 %v14846_v15  ;;  %11343 = vmatpush1.bf16.msra.mxu1 %v14849_v16  ;;  %v14934_v15 = vld [vmem:[%s16914_s29 + $0x1048] ss:$16 sps:$4 sm:$0xff]   ;;  %v14939_v16 = vld [vmem:[%s16914_s29 + $0x1064] ss:$16 sps:$4 sm:$0xff]  }
 0x242   : > { %10319 = vmatprep.subr.bf16.mxu0 %v14854_v17  ;;  %11344 = vmatprep.subr.bf16.mxu1 %v14857_v18  ;;  %v14942_v17 = vld [vmem:[%s16914_s29 + $0x106c] ss:$16 sps:$4 sm:$0xff]   ;;  %v14937_v18 = vld [vmem:[%s16914_s29 + $0x1060] ss:$16 sps:$4 sm:$0xff]  }
 0x245   : > { %10320 = vmatpush1.bf16.msra.mxu0 %v14852_v19  ;;  %11345 = vmatpush1.bf16.msra.mxu1 %v14855_v20  ;;  %v14940_v19 = vld [vmem:[%s16914_s29 + $0x1068] ss:$16 sps:$4 sm:$0xff]   ;;  %v14945_v20 = vld [vmem:[%s16914_s29 + $0x1084] ss:$16 sps:$4 sm:$0xff]  }
 0x246   : > { %10321 = vmatprep.subr.bf16.mxu0 %v14860_v21  ;;  %11346 = vmatprep.subr.bf16.mxu1 %v14863_v22  ;;  %v14948_v21 = vld [vmem:[%s16914_s29 + $0x108c] ss:$16 sps:$4 sm:$0xff]   ;;  %v14943_v22 = vld [vmem:[%s16914_s29 + $0x1080] ss:$16 sps:$4 sm:$0xff]  }
 0x249   : > { %10322 = vmatpush1.bf16.msra.mxu0 %v14858_v23  ;;  %11347 = vmatpush1.bf16.msra.mxu1 %v14861_v25  ;;  %v14946_v23 = vld [vmem:[%s16914_s29 + $0x1088] ss:$16 sps:$4 sm:$0xff]   ;;  %v14951_v25 = vld [vmem:[%s16914_s29 + $0x10a4] ss:$16 sps:$4 sm:$0xff]  }
 0x24a   : > { %10323 = vmatprep.subr.bf16.mxu0 %v14866_v24  ;;  %11348 = vmatprep.subr.bf16.mxu1 %v14869_v10  ;;  %v14954_v24 = vld [vmem:[%s16914_s29 + $0x10ac] ss:$16 sps:$4 sm:$0xff]   ;;  %v14949_v10 = vld [vmem:[%s16914_s29 + $0x10a0] ss:$16 sps:$4 sm:$0xff]  }
 0x24d   : > { %10324 = vmatpush1.bf16.msra.mxu0 %v14864_v28  ;;  %11349 = vmatpush1.bf16.msra.mxu1 %v14867_v30  ;;  %v14952_v28 = vld [vmem:[%s16914_s29 + $0x10a8] ss:$16 sps:$4 sm:$0xff]   ;;  %v14957_v30 = vld [vmem:[%s16914_s29 + $0x10c4] ss:$16 sps:$4 sm:$0xff]  }
 0x24e   : > { %10325 = vmatprep.subr.bf16.mxu0 %v14872_v31  ;;  %11350 = vmatprep.subr.bf16.mxu1 %v14875_v32  ;;  %v14960_v31 = vld [vmem:[%s16914_s29 + $0x10cc] ss:$16 sps:$4 sm:$0xff]   ;;  %v14955_v32 = vld [vmem:[%s16914_s29 + $0x10c0] ss:$16 sps:$4 sm:$0xff]  }
 0x251   : > { %10326 = vmatpush1.bf16.msra.mxu0 %v14870_v34  ;;  %11351 = vmatpush1.bf16.msra.mxu1 %v14873_v35  ;;  %v14958_v34 = vld [vmem:[%s16914_s29 + $0x10c8] ss:$16 sps:$4 sm:$0xff]   ;;  %v14963_v35 = vld [vmem:[%s16914_s29 + $0x10e4] ss:$16 sps:$4 sm:$0xff]  }
 0x252   : > { %10327 = vmatprep.subr.bf16.mxu0 %v14878_v36  ;;  %11352 = vmatprep.subr.bf16.mxu1 %v14881_v27  ;;  %v14966_v36 = vld [vmem:[%s16914_s29 + $0x10ec] ss:$16 sps:$4 sm:$0xff]   ;;  %v14961_v27 = vld [vmem:[%s16914_s29 + $0x10e0] ss:$16 sps:$4 sm:$0xff]  }
 0x255   : > { %10328 = vmatpush1.bf16.msra.mxu0 %v14876_v37  ;;  %11353 = vmatpush1.bf16.msra.mxu1 %v14879_v38  ;;  %v14964_v37 = vld [vmem:[%s16914_s29 + $0x10e8] ss:$16 sps:$4 sm:$0xff]   ;;  %v14969_v38 = vld [vmem:[%s16914_s29 + $0x1104] ss:$16 sps:$4 sm:$0xff]  }
 0x256   : > { %10329 = vmatprep.subr.bf16.mxu0 %v14884_v39  ;;  %11354 = vmatprep.subr.bf16.mxu1 %v14887_v40  ;;  %v14972_v39 = vld [vmem:[%s16914_s29 + $0x110c] ss:$16 sps:$4 sm:$0xff]   ;;  %v14967_v40 = vld [vmem:[%s16914_s29 + $0x1100] ss:$16 sps:$4 sm:$0xff]  }
 0x259   : > { %10330 = vmatpush1.bf16.msra.mxu0 %v14882_v29  ;;  %11355 = vmatpush1.bf16.msra.mxu1 %v14885_v42  ;;  %v14970_v29 = vld [vmem:[%s16914_s29 + $0x1108] ss:$16 sps:$4 sm:$0xff]   ;;  %v14975_v42 = vld [vmem:[%s16914_s29 + $0x1124] ss:$16 sps:$4 sm:$0xff]  }
 0x25a   : > { %10331 = vmatprep.subr.bf16.mxu0 %v14890_v45  ;;  %11356 = vmatprep.subr.bf16.mxu1 %v14893_v46  ;;  %v14978_v45 = vld [vmem:[%s16914_s29 + $0x112c] ss:$16 sps:$4 sm:$0xff]   ;;  %v14973_v46 = vld [vmem:[%s16914_s29 + $0x1120] ss:$16 sps:$4 sm:$0xff]  }
 0x25d   : > { %10332 = vmatpush1.bf16.msra.mxu0 %v14888_v26  ;;  %11357 = vmatpush1.bf16.msra.mxu1 %v14891_v47  ;;  %v14976_v26 = vld [vmem:[%s16914_s29 + $0x1128] ss:$16 sps:$4 sm:$0xff]   ;;  %v14981_v47 = vld [vmem:[%s16914_s29 + $0x1144] ss:$16 sps:$4 sm:$0xff]  }
 0x25e   : > { %10333 = vmatprep.subr.bf16.mxu0 %v14896_v49  ;;  %11358 = vmatprep.subr.bf16.mxu1 %v14899_v51  ;;  %v14984_v49 = vld [vmem:[%s16914_s29 + $0x114c] ss:$16 sps:$4 sm:$0xff]   ;;  %v14979_v51 = vld [vmem:[%s16914_s29 + $0x1140] ss:$16 sps:$4 sm:$0xff]  }
 0x261   : > { %10334 = vmatpush1.bf16.msra.mxu0 %v14894_v52  ;;  %11359 = vmatpush1.bf16.msra.mxu1 %v14897_v33  ;;  %v14982_v52 = vld [vmem:[%s16914_s29 + $0x1148] ss:$16 sps:$4 sm:$0xff]   ;;  %v14987_v33 = vld [vmem:[%s16914_s29 + $0x1164] ss:$16 sps:$4 sm:$0xff]  }
 0x262   : > { %10335 = vmatprep.subr.bf16.mxu0 %v14902_v53  ;;  %11360 = vmatprep.subr.bf16.mxu1 %v14905_v54  ;;  %v14990_v53 = vld [vmem:[%s16914_s29 + $0x116c] ss:$16 sps:$4 sm:$0xff]   ;;  %v14985_v54 = vld [vmem:[%s16914_s29 + $0x1160] ss:$16 sps:$4 sm:$0xff]  }
 0x265   : > { %10336 = vmatpush1.bf16.msra.mxu0 %v14900_v55  ;;  %11361 = vmatpush1.bf16.msra.mxu1 %v14903_v56  ;;  %v14988_v55 = vld [vmem:[%s16914_s29 + $0x1168] ss:$16 sps:$4 sm:$0xff]   ;;  %v14993_v56 = vld [vmem:[%s16914_s29 + $0x1184] ss:$16 sps:$4 sm:$0xff]  }
 0x266   : > { %10337 = vmatprep.subr.bf16.mxu0 %v14908_v43  ;;  %11362 = vmatprep.subr.bf16.mxu1 %v14911_v58  ;;  %v14996_v43 = vld [vmem:[%s16914_s29 + $0x118c] ss:$16 sps:$4 sm:$0xff]   ;;  %v14991_v58 = vld [vmem:[%s16914_s29 + $0x1180] ss:$16 sps:$4 sm:$0xff]  }
 0x269   : > { %10338 = vmatpush1.bf16.msra.mxu0 %v14906_v41  ;;  %11363 = vmatpush1.bf16.msra.mxu1 %v14909_v60  ;;  %v14994_v41 = vld [vmem:[%s16914_s29 + $0x1188] ss:$16 sps:$4 sm:$0xff]   ;;  %v14999_v60 = vld [vmem:[%s16914_s29 + $0x11a4] ss:$16 sps:$4 sm:$0xff]  }
 0x26a   : > { %10339 = vmatprep.subr.bf16.mxu0 %v14914_v61  ;;  %11364 = vmatprep.subr.bf16.mxu1 %v14917_v62  ;;  %v15002_v61 = vld [vmem:[%s16914_s29 + $0x11ac] ss:$16 sps:$4 sm:$0xff]   ;;  %v14997_v62 = vld [vmem:[%s16914_s29 + $0x11a0] ss:$16 sps:$4 sm:$0xff]  }
 0x26d   : > { %10340 = vmatpush1.bf16.msra.mxu0 %v14912_v0  ;;  %11365 = vmatpush1.bf16.msra.mxu1 %v14915_v1  ;;  %v15000_v0 = vld [vmem:[%s16914_s29 + $0x11a8] ss:$16 sps:$4 sm:$0xff]   ;;  %v15005_v1 = vld [vmem:[%s16914_s29 + $0x11c4] ss:$16 sps:$4 sm:$0xff]  }
 0x26e   : > { %10350 = vmatprep.subr.bf16.mxu0 %v14921_v2  ;;  %11375 = vmatprep.subr.bf16.mxu1 %v14924_v48  ;;  %v15008_v2 = vld [vmem:[%s16914_s29 + $0x11cc] ss:$16 sps:$4 sm:$0xff]   ;;  %v373_v48 = vcombine.high %v17520_v59, %v17520_v59  ;;  %v15009_v59 = vld [vmem:[%s16914_s29 + $0x11e0] ss:$16 sps:$4 sm:$0xff]  }
 0x270   : > { %10342 = vmatmul.mubr.bf16.vlgmr.msra.gmra.mrb[0].mxu0 %v579_v4  ;;  %11367 = vmatmul.mubr.bf16.vlgmr.msra.gmra.mrb[0].mxu1 %v579_v4  ;;  %v15006_v4 = vld [vmem:[%s16914_s29 + $0x11c8] ss:$16 sps:$4 sm:$0xff]  }
 0x271   : > { %10351 = vmatpush1.bf16.msra.mxu0 %v14919_v5  ;;  %11376 = vmatpush1.bf16.msra.mxu1 %v14922_v6  ;;  %v15011_v5 = vld [vmem:[%s16914_s29 + $0x11e4] ss:$16 sps:$4 sm:$0xff]   ;;  %v15014_v6 = vld [vmem:[%s16914_s29 + $0x11ec] ss:$16 sps:$4 sm:$0xff]  }
 0x272   : > { %10352 = vmatprep.subr.bf16.mxu0 %v14927_v7  ;;  %11377 = vmatprep.subr.bf16.mxu1 %v14930_v8  ;;  %v17601_v7 = vrot.slane %v373_v48, %v16988_v50  ;;  %v15012_v8 = vld [vmem:[%s16914_s29 + $0x11e8] ss:$16 sps:$4 sm:$0xff]  }
 0x273   : > { %10382 = vmatprep.mubr.bf16.mxu0 %v582_v9  ;;  %11407 = vmatprep.mubr.bf16.mxu1 %v582_v9  ;;  %v15017_v9 = vld [vmem:[%s16914_s29 + $0x1204] ss:$16 sps:$4 sm:$0xff]   ;;  %v15090_v48 = vld [vmem:[%s16914_s29 + $0x1388] ss:$16 sps:$4 sm:$0xff]  }
 0x275   : > { %10353 = vmatpush1.bf16.msra.mxu0 %v14925_v57  ;;  %11378 = vmatpush1.bf16.msra.mxu1 %v14928_v11  ;;  %v15020_v57 = vld [vmem:[%s16914_s29 + $0x120c] ss:$16 sps:$4 sm:$0xff]   ;;  %v389_v11 = vcombine.high %v17601_v7, %v17601_v7 }
 0x276   : > { %10354 = vmatprep.subr.bf16.mxu0 %v14933_v12  ;;  %11379 = vmatprep.subr.bf16.mxu1 %v14936_v13  ;;  %v581_v12 = vpack.c.bf16 %v17528_v63, %v17528_v63  ;;  %v15015_v13 = vld [vmem:[%s16914_s29 + $0x1200] ss:$16 sps:$4 sm:$0xff]  }
 0x277   : > { %v15021_v63 = vld [vmem:[%s16914_s29 + $0x1220] ss:$16 sps:$4 sm:$0xff]  }
 0x279   : > { %10355 = vmatpush1.bf16.msra.mxu0 %v14931_v14  ;;  %11380 = vmatpush1.bf16.msra.mxu1 %v14934_v15  ;;  %v15018_v14 = vld [vmem:[%s16914_s29 + $0x1208] ss:$16 sps:$4 sm:$0xff]   ;;  %v15023_v15 = vld [vmem:[%s16914_s29 + $0x1224] ss:$16 sps:$4 sm:$0xff]  }
 0x27a   : > { %10356 = vmatprep.subr.bf16.mxu0 %v14939_v16  ;;  %11381 = vmatprep.subr.bf16.mxu1 %v14942_v17  ;;  %v15026_v16 = vld [vmem:[%s16914_s29 + $0x122c] ss:$16 sps:$4 sm:$0xff]   ;;  %v584_v17 = vpack.c.bf16 %v389_v11, %v389_v11  ;;  %v15102_v11 = vld [vmem:[%s16914_s29 + $0x13c8] ss:$16 sps:$4 sm:$0xff]  }
 0x27d   : > { %10357 = vmatpush1.bf16.msra.mxu0 %v14937_v18  ;;  %11382 = vmatpush1.bf16.msra.mxu1 %v14940_v19  ;;  %v15024_v18 = vld [vmem:[%s16914_s29 + $0x1228] ss:$16 sps:$4 sm:$0xff]   ;;  %v15029_v19 = vld [vmem:[%s16914_s29 + $0x1244] ss:$16 sps:$4 sm:$0xff]  }
 0x27e   : > { %10358 = vmatprep.subr.bf16.mxu0 %v14945_v20  ;;  %11383 = vmatprep.subr.bf16.mxu1 %v14948_v21  ;;  %v15032_v20 = vld [vmem:[%s16914_s29 + $0x124c] ss:$16 sps:$4 sm:$0xff]   ;;  %v15027_v21 = vld [vmem:[%s16914_s29 + $0x1240] ss:$16 sps:$4 sm:$0xff]  }
 0x281   : > { %10359 = vmatpush1.bf16.msra.mxu0 %v14943_v22  ;;  %11384 = vmatpush1.bf16.msra.mxu1 %v14946_v23  ;;  %v15030_v22 = vld [vmem:[%s16914_s29 + $0x1248] ss:$16 sps:$4 sm:$0xff]   ;;  %v15035_v23 = vld [vmem:[%s16914_s29 + $0x1264] ss:$16 sps:$4 sm:$0xff]  }
 0x282   : > { %10360 = vmatprep.subr.bf16.mxu0 %v14951_v25  ;;  %11385 = vmatprep.subr.bf16.mxu1 %v14954_v24  ;;  %v15038_v25 = vld [vmem:[%s16914_s29 + $0x126c] ss:$16 sps:$4 sm:$0xff]   ;;  %v15033_v24 = vld [vmem:[%s16914_s29 + $0x1260] ss:$16 sps:$4 sm:$0xff]  }
 0x285   : > { %10361 = vmatpush1.bf16.msra.mxu0 %v14949_v10  ;;  %11386 = vmatpush1.bf16.msra.mxu1 %v14952_v28  ;;  %v15036_v10 = vld [vmem:[%s16914_s29 + $0x1268] ss:$16 sps:$4 sm:$0xff]   ;;  %v15041_v28 = vld [vmem:[%s16914_s29 + $0x1284] ss:$16 sps:$4 sm:$0xff]  }
 0x286   : > { %10362 = vmatprep.subr.bf16.mxu0 %v14957_v30  ;;  %11387 = vmatprep.subr.bf16.mxu1 %v14960_v31  ;;  %v15044_v30 = vld [vmem:[%s16914_s29 + $0x128c] ss:$16 sps:$4 sm:$0xff]   ;;  %v15039_v31 = vld [vmem:[%s16914_s29 + $0x1280] ss:$16 sps:$4 sm:$0xff]  }
 0x289   : > { %10363 = vmatpush1.bf16.msra.mxu0 %v14955_v32  ;;  %11388 = vmatpush1.bf16.msra.mxu1 %v14958_v34  ;;  %v15042_v32 = vld [vmem:[%s16914_s29 + $0x1288] ss:$16 sps:$4 sm:$0xff]   ;;  %v15047_v34 = vld [vmem:[%s16914_s29 + $0x12a4] ss:$16 sps:$4 sm:$0xff]  }
 0x28a   : > { %10364 = vmatprep.subr.bf16.mxu0 %v14963_v35  ;;  %11389 = vmatprep.subr.bf16.mxu1 %v14966_v36  ;;  %v15050_v35 = vld [vmem:[%s16914_s29 + $0x12ac] ss:$16 sps:$4 sm:$0xff]   ;;  %v15045_v36 = vld [vmem:[%s16914_s29 + $0x12a0] ss:$16 sps:$4 sm:$0xff]  }
 0x28d   : > { %10365 = vmatpush1.bf16.msra.mxu0 %v14961_v27  ;;  %11390 = vmatpush1.bf16.msra.mxu1 %v14964_v37  ;;  %v15048_v27 = vld [vmem:[%s16914_s29 + $0x12a8] ss:$16 sps:$4 sm:$0xff]   ;;  %v15053_v37 = vld [vmem:[%s16914_s29 + $0x12c4] ss:$16 sps:$4 sm:$0xff]  }
 0x28e   : > { %10366 = vmatprep.subr.bf16.mxu0 %v14969_v38  ;;  %11391 = vmatprep.subr.bf16.mxu1 %v14972_v39  ;;  %v15056_v38 = vld [vmem:[%s16914_s29 + $0x12cc] ss:$16 sps:$4 sm:$0xff]   ;;  %v15051_v39 = vld [vmem:[%s16914_s29 + $0x12c0] ss:$16 sps:$4 sm:$0xff]  }
 0x291   : > { %10367 = vmatpush1.bf16.msra.mxu0 %v14967_v40  ;;  %11392 = vmatpush1.bf16.msra.mxu1 %v14970_v29  ;;  %v15054_v40 = vld [vmem:[%s16914_s29 + $0x12c8] ss:$16 sps:$4 sm:$0xff]   ;;  %v15059_v29 = vld [vmem:[%s16914_s29 + $0x12e4] ss:$16 sps:$4 sm:$0xff]  }
 0x292   : > { %10368 = vmatprep.subr.bf16.mxu0 %v14975_v42  ;;  %11393 = vmatprep.subr.bf16.mxu1 %v14978_v45  ;;  %v15062_v42 = vld [vmem:[%s16914_s29 + $0x12ec] ss:$16 sps:$4 sm:$0xff]   ;;  %v15057_v45 = vld [vmem:[%s16914_s29 + $0x12e0] ss:$16 sps:$4 sm:$0xff]  }
 0x295   : > { %10369 = vmatpush1.bf16.msra.mxu0 %v14973_v46  ;;  %11394 = vmatpush1.bf16.msra.mxu1 %v14976_v26  ;;  %v15060_v46 = vld [vmem:[%s16914_s29 + $0x12e8] ss:$16 sps:$4 sm:$0xff]   ;;  %v15065_v26 = vld [vmem:[%s16914_s29 + $0x1304] ss:$16 sps:$4 sm:$0xff]  }
 0x296   : > { %10370 = vmatprep.subr.bf16.mxu0 %v14981_v47  ;;  %11395 = vmatprep.subr.bf16.mxu1 %v14984_v49  ;;  %v15068_v47 = vld [vmem:[%s16914_s29 + $0x130c] ss:$16 sps:$4 sm:$0xff]   ;;  %v15063_v49 = vld [vmem:[%s16914_s29 + $0x1300] ss:$16 sps:$4 sm:$0xff]  }
 0x299   : > { %10371 = vmatpush1.bf16.msra.mxu0 %v14979_v51  ;;  %11396 = vmatpush1.bf16.msra.mxu1 %v14982_v52  ;;  %v15066_v51 = vld [vmem:[%s16914_s29 + $0x1308] ss:$16 sps:$4 sm:$0xff]   ;;  %v15071_v52 = vld [vmem:[%s16914_s29 + $0x1324] ss:$16 sps:$4 sm:$0xff]  }
 0x29a   : > { %10372 = vmatprep.subr.bf16.mxu0 %v14987_v33  ;;  %11397 = vmatprep.subr.bf16.mxu1 %v14990_v53  ;;  %v15074_v33 = vld [vmem:[%s16914_s29 + $0x132c] ss:$16 sps:$4 sm:$0xff]   ;;  %v15069_v53 = vld [vmem:[%s16914_s29 + $0x1320] ss:$16 sps:$4 sm:$0xff]  }
 0x29d   : > { %10373 = vmatpush1.bf16.msra.mxu0 %v14985_v54  ;;  %11398 = vmatpush1.bf16.msra.mxu1 %v14988_v55  ;;  %v15072_v54 = vld [vmem:[%s16914_s29 + $0x1328] ss:$16 sps:$4 sm:$0xff]   ;;  %v15077_v55 = vld [vmem:[%s16914_s29 + $0x1344] ss:$16 sps:$4 sm:$0xff]  }
 0x29e   : > { %10374 = vmatprep.subr.bf16.mxu0 %v14993_v56  ;;  %11399 = vmatprep.subr.bf16.mxu1 %v14996_v43  ;;  %v15080_v56 = vld [vmem:[%s16914_s29 + $0x134c] ss:$16 sps:$4 sm:$0xff]   ;;  %v15075_v43 = vld [vmem:[%s16914_s29 + $0x1340] ss:$16 sps:$4 sm:$0xff]  }
 0x2a1   : > { %10375 = vmatpush1.bf16.msra.mxu0 %v14991_v58  ;;  %11400 = vmatpush1.bf16.msra.mxu1 %v14994_v41  ;;  %v15078_v58 = vld [vmem:[%s16914_s29 + $0x1348] ss:$16 sps:$4 sm:$0xff]   ;;  %v15083_v41 = vld [vmem:[%s16914_s29 + $0x1364] ss:$16 sps:$4 sm:$0xff]  }
 0x2a2   : > { %10376 = vmatprep.subr.bf16.mxu0 %v14999_v60  ;;  %11401 = vmatprep.subr.bf16.mxu1 %v15002_v61  ;;  %v15086_v60 = vld [vmem:[%s16914_s29 + $0x136c] ss:$16 sps:$4 sm:$0xff]   ;;  %v15081_v61 = vld [vmem:[%s16914_s29 + $0x1360] ss:$16 sps:$4 sm:$0xff]  }
 0x2a5   : > { %10377 = vmatpush1.bf16.msra.mxu0 %v14997_v62  ;;  %11402 = vmatpush1.bf16.msra.mxu1 %v15000_v0  ;;  %v15084_v62 = vld [vmem:[%s16914_s29 + $0x1368] ss:$16 sps:$4 sm:$0xff]   ;;  %v15089_v0 = vld [vmem:[%s16914_s29 + $0x1384] ss:$16 sps:$4 sm:$0xff]  }
 0x2a6   : > { %10378 = vmatprep.subr.bf16.mxu0 %v15005_v1  ;;  %11403 = vmatprep.subr.bf16.mxu1 %v15008_v2  ;;  %v15092_v1 = vld [vmem:[%s16914_s29 + $0x138c] ss:$16 sps:$4 sm:$0xff]   ;;  %v15087_v2 = vld [vmem:[%s16914_s29 + $0x1380] ss:$16 sps:$4 sm:$0xff]  }
 0x2a9   : > { %10379 = vmatpush1.bf16.msra.mxu0 %v15003_v3  ;;  %11404 = vmatpush1.bf16.msra.mxu1 %v15006_v4  ;;  %v15095_v3 = vld [vmem:[%s16914_s29 + $0x13a4] ss:$16 sps:$4 sm:$0xff]   ;;  %v15098_v4 = vld [vmem:[%s16914_s29 + $0x13ac] ss:$16 sps:$4 sm:$0xff]  }
 0x2aa   : > { %10380 = vmatprep.subr.bf16.mxu0 %v15011_v5  ;;  %11405 = vmatprep.subr.bf16.mxu1 %v15014_v6  ;;  %v15093_v5 = vld [vmem:[%s16914_s29 + $0x13a0] ss:$16 sps:$4 sm:$0xff]   ;;  %v15096_v6 = vld [vmem:[%s16914_s29 + $0x13a8] ss:$16 sps:$4 sm:$0xff]  }
 0x2ad   : > { %10381 = vmatpush1.bf16.msra.mxu0 %v15009_v59  ;;  %11406 = vmatpush1.bf16.msra.mxu1 %v15012_v8  ;;  %v15101_v59 = vld [vmem:[%s16914_s29 + $0x13c4] ss:$16 sps:$4 sm:$0xff]   ;;  %v15104_v8 = vld [vmem:[%s16914_s29 + $0x13cc] ss:$16 sps:$4 sm:$0xff]  }
 0x2ae   : > { %10391 = vmatprep.subr.bf16.mxu0 %v15017_v9  ;;  %11416 = vmatprep.subr.bf16.mxu1 %v15020_v57  ;;  %v17668_v9 = vld [vmem:[%s16938_s9 + $0x28] sm:$0xff] }
 0x2af   : > { %v15099_v57 = vld [vmem:[%s16914_s29 + $0x13c0] ss:$16 sps:$4 sm:$0xff]  }
 0x2b0   : > { %10383 = vmatmul.mubr.bf16.vlgmr.msra.gmra.mrb[0].mxu0 %v581_v12  ;;  %11408 = vmatmul.mubr.bf16.vlgmr.msra.gmra.mrb[0].mxu1 %v581_v12  ;;  %v15107_v12 = vld [vmem:[%s16914_s29 + $0x13e4] ss:$16 sps:$4 sm:$0xff]  }
 0x2b1   : > { %10392 = vmatpush1.bf16.msra.mxu0 %v15015_v13  ;;  %11417 = vmatpush1.bf16.msra.mxu1 %v15018_v14  ;;  %v15110_v13 = vld [vmem:[%s16914_s29 + $0x13ec] ss:$16 sps:$4 sm:$0xff]   ;;  %v17676_v14 = vrot.slane %v17668_v9, %v16988_v50 }
 0x2b2   : > { %10393 = vmatprep.subr.bf16.mxu0 %v15023_v15  ;;  %11418 = vmatprep.subr.bf16.mxu1 %v15026_v16  ;;  %v15105_v15 = vld [vmem:[%s16914_s29 + $0x13e0] ss:$16 sps:$4 sm:$0xff]   ;;  %v15108_v16 = vld [vmem:[%s16914_s29 + $0x13e8] ss:$16 sps:$4 sm:$0xff]  }
 0x2b3   : > { %10423 = vmatprep.mubr.bf16.mxu0 %v584_v17  ;;  %11448 = vmatprep.mubr.bf16.mxu1 %v584_v17  ;;  %v15114_v17 = vld [vmem:[%s16914_s29 + $0x1404] ss:$16 sps:$4 sm:$0xff]  }
 0x2b5   : > { %10394 = vmatpush1.bf16.msra.mxu0 %v15021_v63  ;;  %11419 = vmatpush1.bf16.msra.mxu1 %v15024_v18  ;;  %v15117_v63 = vld [vmem:[%s16914_s29 + $0x140c] ss:$16 sps:$4 sm:$0xff]   ;;  %v405_v18 = vcombine.high %v17676_v14, %v17676_v14 }
 0x2b6   : > { %10395 = vmatprep.subr.bf16.mxu0 %v15029_v19  ;;  %11420 = vmatprep.subr.bf16.mxu1 %v15032_v20  ;;  %v583_v19 = vpack.c.bf16 %v17601_v7, %v17601_v7  ;;  %v15112_v20 = vld [vmem:[%s16914_s29 + $0x1400] ss:$16 sps:$4 sm:$0xff]  }
 0x2b7   : > { %v15118_v7 = vld [vmem:[%s16914_s29 + $0x1420] ss:$16 sps:$4 sm:$0xff]  }
 0x2b9   : > { %10396 = vmatpush1.bf16.msra.mxu0 %v15027_v21  ;;  %11421 = vmatpush1.bf16.msra.mxu1 %v15030_v22  ;;  %v15115_v21 = vld [vmem:[%s16914_s29 + $0x1408] ss:$16 sps:$4 sm:$0xff]   ;;  %v15120_v22 = vld [vmem:[%s16914_s29 + $0x1424] ss:$16 sps:$4 sm:$0xff]  }
 0x2ba   : > { %10397 = vmatprep.subr.bf16.mxu0 %v15035_v23  ;;  %11422 = vmatprep.subr.bf16.mxu1 %v15038_v25  ;;  %v15123_v23 = vld [vmem:[%s16914_s29 + $0x142c] ss:$16 sps:$4 sm:$0xff]   ;;  %v586_v25 = vpack.c.bf16 %v405_v18, %v405_v18  ;;  %v15196_v18 = vld [vmem:[%s16914_s29 + $0x15c0] ss:$16 sps:$4 sm:$0xff]  }
 0x2bd   : > { %10398 = vmatpush1.bf16.msra.mxu0 %v15033_v24  ;;  %11423 = vmatpush1.bf16.msra.mxu1 %v15036_v10  ;;  %v15121_v24 = vld [vmem:[%s16914_s29 + $0x1428] ss:$16 sps:$4 sm:$0xff]   ;;  %v15126_v10 = vld [vmem:[%s16914_s29 + $0x1444] ss:$16 sps:$4 sm:$0xff]  }
 0x2be   : > { %10399 = vmatprep.subr.bf16.mxu0 %v15041_v28  ;;  %11424 = vmatprep.subr.bf16.mxu1 %v15044_v30  ;;  %v15129_v28 = vld [vmem:[%s16914_s29 + $0x144c] ss:$16 sps:$4 sm:$0xff]   ;;  %v15124_v30 = vld [vmem:[%s16914_s29 + $0x1440] ss:$16 sps:$4 sm:$0xff]  }
 0x2c1   : > { %10400 = vmatpush1.bf16.msra.mxu0 %v15039_v31  ;;  %11425 = vmatpush1.bf16.msra.mxu1 %v15042_v32  ;;  %v15127_v31 = vld [vmem:[%s16914_s29 + $0x1448] ss:$16 sps:$4 sm:$0xff]   ;;  %v15132_v32 = vld [vmem:[%s16914_s29 + $0x1464] ss:$16 sps:$4 sm:$0xff]  }
 0x2c2   : > { %10401 = vmatprep.subr.bf16.mxu0 %v15047_v34  ;;  %11426 = vmatprep.subr.bf16.mxu1 %v15050_v35  ;;  %v15135_v34 = vld [vmem:[%s16914_s29 + $0x146c] ss:$16 sps:$4 sm:$0xff]   ;;  %v15130_v35 = vld [vmem:[%s16914_s29 + $0x1460] ss:$16 sps:$4 sm:$0xff]  }
 0x2c5   : > { %10402 = vmatpush1.bf16.msra.mxu0 %v15045_v36  ;;  %11427 = vmatpush1.bf16.msra.mxu1 %v15048_v27  ;;  %v15133_v36 = vld [vmem:[%s16914_s29 + $0x1468] ss:$16 sps:$4 sm:$0xff]   ;;  %v15138_v27 = vld [vmem:[%s16914_s29 + $0x1484] ss:$16 sps:$4 sm:$0xff]  }
 0x2c6   : > { %10403 = vmatprep.subr.bf16.mxu0 %v15053_v37  ;;  %11428 = vmatprep.subr.bf16.mxu1 %v15056_v38  ;;  %v15141_v37 = vld [vmem:[%s16914_s29 + $0x148c] ss:$16 sps:$4 sm:$0xff]   ;;  %v15136_v38 = vld [vmem:[%s16914_s29 + $0x1480] ss:$16 sps:$4 sm:$0xff]  }
 0x2c9   : > { %10404 = vmatpush1.bf16.msra.mxu0 %v15051_v39  ;;  %11429 = vmatpush1.bf16.msra.mxu1 %v15054_v40  ;;  %v15139_v39 = vld [vmem:[%s16914_s29 + $0x1488] ss:$16 sps:$4 sm:$0xff]   ;;  %v15144_v40 = vld [vmem:[%s16914_s29 + $0x14a4] ss:$16 sps:$4 sm:$0xff]  }
 0x2ca   : > { %10405 = vmatprep.subr.bf16.mxu0 %v15059_v29  ;;  %11430 = vmatprep.subr.bf16.mxu1 %v15062_v42  ;;  %v15147_v29 = vld [vmem:[%s16914_s29 + $0x14ac] ss:$16 sps:$4 sm:$0xff]   ;;  %v15142_v42 = vld [vmem:[%s16914_s29 + $0x14a0] ss:$16 sps:$4 sm:$0xff]  }
 0x2cd   : > { %10406 = vmatpush1.bf16.msra.mxu0 %v15057_v45  ;;  %11431 = vmatpush1.bf16.msra.mxu1 %v15060_v46  ;;  %v15145_v45 = vld [vmem:[%s16914_s29 + $0x14a8] ss:$16 sps:$4 sm:$0xff]   ;;  %v15150_v46 = vld [vmem:[%s16914_s29 + $0x14c4] ss:$16 sps:$4 sm:$0xff]  }
 0x2ce   : > { %10407 = vmatprep.subr.bf16.mxu0 %v15065_v26  ;;  %11432 = vmatprep.subr.bf16.mxu1 %v15068_v47  ;;  %v15153_v26 = vld [vmem:[%s16914_s29 + $0x14cc] ss:$16 sps:$4 sm:$0xff]   ;;  %v15148_v47 = vld [vmem:[%s16914_s29 + $0x14c0] ss:$16 sps:$4 sm:$0xff]  }
 0x2d1   : > { %10408 = vmatpush1.bf16.msra.mxu0 %v15063_v49  ;;  %11433 = vmatpush1.bf16.msra.mxu1 %v15066_v51  ;;  %v15151_v49 = vld [vmem:[%s16914_s29 + $0x14c8] ss:$16 sps:$4 sm:$0xff]   ;;  %v15156_v51 = vld [vmem:[%s16914_s29 + $0x14e4] ss:$16 sps:$4 sm:$0xff]  }
 0x2d2   : > { %10409 = vmatprep.subr.bf16.mxu0 %v15071_v52  ;;  %11434 = vmatprep.subr.bf16.mxu1 %v15074_v33  ;;  %v15159_v52 = vld [vmem:[%s16914_s29 + $0x14ec] ss:$16 sps:$4 sm:$0xff]   ;;  %v15154_v33 = vld [vmem:[%s16914_s29 + $0x14e0] ss:$16 sps:$4 sm:$0xff]  }
 0x2d5   : > { %10410 = vmatpush1.bf16.msra.mxu0 %v15069_v53  ;;  %11435 = vmatpush1.bf16.msra.mxu1 %v15072_v54  ;;  %v15157_v53 = vld [vmem:[%s16914_s29 + $0x14e8] ss:$16 sps:$4 sm:$0xff]   ;;  %v15162_v54 = vld [vmem:[%s16914_s29 + $0x1504] ss:$16 sps:$4 sm:$0xff]  }
 0x2d6   : > { %10411 = vmatprep.subr.bf16.mxu0 %v15077_v55  ;;  %11436 = vmatprep.subr.bf16.mxu1 %v15080_v56  ;;  %v15165_v55 = vld [vmem:[%s16914_s29 + $0x150c] ss:$16 sps:$4 sm:$0xff]   ;;  %v15160_v56 = vld [vmem:[%s16914_s29 + $0x1500] ss:$16 sps:$4 sm:$0xff]  }
 0x2d9   : > { %10412 = vmatpush1.bf16.msra.mxu0 %v15075_v43  ;;  %11437 = vmatpush1.bf16.msra.mxu1 %v15078_v58  ;;  %v15163_v43 = vld [vmem:[%s16914_s29 + $0x1508] ss:$16 sps:$4 sm:$0xff]   ;;  %v15168_v58 = vld [vmem:[%s16914_s29 + $0x1524] ss:$16 sps:$4 sm:$0xff]  }
 0x2da   : > { %10413 = vmatprep.subr.bf16.mxu0 %v15083_v41  ;;  %11438 = vmatprep.subr.bf16.mxu1 %v15086_v60  ;;  %v15171_v41 = vld [vmem:[%s16914_s29 + $0x152c] ss:$16 sps:$4 sm:$0xff]   ;;  %v15166_v60 = vld [vmem:[%s16914_s29 + $0x1520] ss:$16 sps:$4 sm:$0xff]  }
 0x2dd   : > { %10414 = vmatpush1.bf16.msra.mxu0 %v15081_v61  ;;  %11439 = vmatpush1.bf16.msra.mxu1 %v15084_v62  ;;  %v15169_v61 = vld [vmem:[%s16914_s29 + $0x1528] ss:$16 sps:$4 sm:$0xff]   ;;  %v15174_v62 = vld [vmem:[%s16914_s29 + $0x1544] ss:$16 sps:$4 sm:$0xff]  }
 0x2de   : > { %10415 = vmatprep.subr.bf16.mxu0 %v15089_v0  ;;  %11440 = vmatprep.subr.bf16.mxu1 %v15092_v1  ;;  %v15177_v0 = vld [vmem:[%s16914_s29 + $0x154c] ss:$16 sps:$4 sm:$0xff]   ;;  %v15172_v1 = vld [vmem:[%s16914_s29 + $0x1540] ss:$16 sps:$4 sm:$0xff]  }
 0x2e1   : > { %10416 = vmatpush1.bf16.msra.mxu0 %v15087_v2  ;;  %11441 = vmatpush1.bf16.msra.mxu1 %v15090_v48  ;;  %v15175_v2 = vld [vmem:[%s16914_s29 + $0x1548] ss:$16 sps:$4 sm:$0xff]   ;;  %v15180_v48 = vld [vmem:[%s16914_s29 + $0x1564] ss:$16 sps:$4 sm:$0xff]  }
 0x2e2   : > { %10417 = vmatprep.subr.bf16.mxu0 %v15095_v3  ;;  %11442 = vmatprep.subr.bf16.mxu1 %v15098_v4  ;;  %v15183_v3 = vld [vmem:[%s16914_s29 + $0x156c] ss:$16 sps:$4 sm:$0xff]   ;;  %v15178_v4 = vld [vmem:[%s16914_s29 + $0x1560] ss:$16 sps:$4 sm:$0xff]  }
 0x2e5   : > { %10418 = vmatpush1.bf16.msra.mxu0 %v15093_v5  ;;  %11443 = vmatpush1.bf16.msra.mxu1 %v15096_v6  ;;  %v15181_v5 = vld [vmem:[%s16914_s29 + $0x1568] ss:$16 sps:$4 sm:$0xff]   ;;  %v15186_v6 = vld [vmem:[%s16914_s29 + $0x1584] ss:$16 sps:$4 sm:$0xff]  }
 0x2e6   : > { %10419 = vmatprep.subr.bf16.mxu0 %v15101_v59  ;;  %11444 = vmatprep.subr.bf16.mxu1 %v15104_v8  ;;  %v15189_v59 = vld [vmem:[%s16914_s29 + $0x158c] ss:$16 sps:$4 sm:$0xff]   ;;  %v15184_v8 = vld [vmem:[%s16914_s29 + $0x1580] ss:$16 sps:$4 sm:$0xff]  }
 0x2e9   : > { %10420 = vmatpush1.bf16.msra.mxu0 %v15099_v57  ;;  %11445 = vmatpush1.bf16.msra.mxu1 %v15102_v11  ;;  %v15187_v57 = vld [vmem:[%s16914_s29 + $0x1588] ss:$16 sps:$4 sm:$0xff]   ;;  %v15192_v11 = vld [vmem:[%s16914_s29 + $0x15a4] ss:$16 sps:$4 sm:$0xff]  }
 0x2ea   : > { %10421 = vmatprep.subr.bf16.mxu0 %v15107_v12  ;;  %11446 = vmatprep.subr.bf16.mxu1 %v15110_v13  ;;  %v15195_v12 = vld [vmem:[%s16914_s29 + $0x15ac] ss:$16 sps:$4 sm:$0xff]   ;;  %v15190_v13 = vld [vmem:[%s16914_s29 + $0x15a0] ss:$16 sps:$4 sm:$0xff]  }
 0x2ed   : > { %10422 = vmatpush1.bf16.msra.mxu0 %v15105_v15  ;;  %11447 = vmatpush1.bf16.msra.mxu1 %v15108_v16  ;;  %v15193_v15 = vld [vmem:[%s16914_s29 + $0x15a8] ss:$16 sps:$4 sm:$0xff]   ;;  %v15198_v16 = vld [vmem:[%s16914_s29 + $0x15c4] ss:$16 sps:$4 sm:$0xff]  }
 0x2ee   : > { %10432 = vmatprep.subr.bf16.mxu0 %v15114_v17  ;;  %11457 = vmatprep.subr.bf16.mxu1 %v15117_v63  ;;  %v15201_v17 = vld [vmem:[%s16914_s29 + $0x15cc] ss:$16 sps:$4 sm:$0xff]   ;;  %v390_v63 = vcombine.high %v17668_v9, %v17668_v9  ;;  %v15202_v9 = vld [vmem:[%s16914_s29 + $0x15e0] ss:$16 sps:$4 sm:$0xff]  }
 0x2f0   : > { %10424 = vmatmul.mubr.bf16.vlgmr.msra.gmra.mrb[0].mxu0 %v583_v19  ;;  %11449 = vmatmul.mubr.bf16.vlgmr.msra.gmra.mrb[0].mxu1 %v583_v19  ;;  %v15199_v19 = vld [vmem:[%s16914_s29 + $0x15c8] ss:$16 sps:$4 sm:$0xff]  }
 0x2f1   : > { %10433 = vmatpush1.bf16.msra.mxu0 %v15112_v20  ;;  %11458 = vmatpush1.bf16.msra.mxu1 %v15115_v21  ;;  %v15204_v20 = vld [vmem:[%s16914_s29 + $0x15e4] ss:$16 sps:$4 sm:$0xff]   ;;  %v15207_v21 = vld [vmem:[%s16914_s29 + $0x15ec] ss:$16 sps:$4 sm:$0xff]  }
 0x2f2   : > { %10434 = vmatprep.subr.bf16.mxu0 %v15120_v22  ;;  %11459 = vmatprep.subr.bf16.mxu1 %v15123_v23  ;;  %v17749_v22 = vrot.slane %v390_v63, %v16988_v50  ;;  %v15205_v23 = vld [vmem:[%s16914_s29 + $0x15e8] ss:$16 sps:$4 sm:$0xff]  }
 0x2f3   : > { %10464 = vmatprep.mubr.bf16.mxu0 %v586_v25  ;;  %11489 = vmatprep.mubr.bf16.mxu1 %v586_v25  ;;  %v15210_v25 = vld [vmem:[%s16914_s29 + $0x1604] ss:$16 sps:$4 sm:$0xff]   ;;  %v15283_v63 = vld [vmem:[%s16914_s29 + $0x1788] ss:$16 sps:$4 sm:$0xff]  }
 0x2f5   : > { %10435 = vmatpush1.bf16.msra.mxu0 %v15118_v7  ;;  %11460 = vmatpush1.bf16.msra.mxu1 %v15121_v24  ;;  %v15213_v7 = vld [vmem:[%s16914_s29 + $0x160c] ss:$16 sps:$4 sm:$0xff]   ;;  %v406_v24 = vcombine.high %v17749_v22, %v17749_v22 }
 0x2f6   : > { %10436 = vmatprep.subr.bf16.mxu0 %v15126_v10  ;;  %11461 = vmatprep.subr.bf16.mxu1 %v15129_v28  ;;  %v585_v10 = vpack.c.bf16 %v17676_v14, %v17676_v14  ;;  %v15208_v28 = vld [vmem:[%s16914_s29 + $0x1600] ss:$16 sps:$4 sm:$0xff]  }
 0x2f7   : > { %v15214_v14 = vld [vmem:[%s16914_s29 + $0x1620] ss:$16 sps:$4 sm:$0xff]  }
 0x2f9   : > { %10437 = vmatpush1.bf16.msra.mxu0 %v15124_v30  ;;  %11462 = vmatpush1.bf16.msra.mxu1 %v15127_v31  ;;  %v15211_v30 = vld [vmem:[%s16914_s29 + $0x1608] ss:$16 sps:$4 sm:$0xff]   ;;  %v15216_v31 = vld [vmem:[%s16914_s29 + $0x1624] ss:$16 sps:$4 sm:$0xff]  }
 0x2fa   : > { %10438 = vmatprep.subr.bf16.mxu0 %v15132_v32  ;;  %11463 = vmatprep.subr.bf16.mxu1 %v15135_v34  ;;  %v15219_v32 = vld [vmem:[%s16914_s29 + $0x162c] ss:$16 sps:$4 sm:$0xff]   ;;  %v588_v34 = vpack.c.bf16 %v406_v24, %v406_v24  ;;  %v15295_v24 = vld [vmem:[%s16914_s29 + $0x17c8] ss:$16 sps:$4 sm:$0xff]  }
 0x2fd   : > { %10439 = vmatpush1.bf16.msra.mxu0 %v15130_v35  ;;  %11464 = vmatpush1.bf16.msra.mxu1 %v15133_v36  ;;  %v15217_v35 = vld [vmem:[%s16914_s29 + $0x1628] ss:$16 sps:$4 sm:$0xff]   ;;  %v15222_v36 = vld [vmem:[%s16914_s29 + $0x1644] ss:$16 sps:$4 sm:$0xff]  }
 0x2fe   : > { %10440 = vmatprep.subr.bf16.mxu0 %v15138_v27  ;;  %11465 = vmatprep.subr.bf16.mxu1 %v15141_v37  ;;  %v15225_v27 = vld [vmem:[%s16914_s29 + $0x164c] ss:$16 sps:$4 sm:$0xff]   ;;  %v15220_v37 = vld [vmem:[%s16914_s29 + $0x1640] ss:$16 sps:$4 sm:$0xff]  }
 0x301   : > { %10441 = vmatpush1.bf16.msra.mxu0 %v15136_v38  ;;  %11466 = vmatpush1.bf16.msra.mxu1 %v15139_v39  ;;  %v15223_v38 = vld [vmem:[%s16914_s29 + $0x1648] ss:$16 sps:$4 sm:$0xff]   ;;  %v15228_v39 = vld [vmem:[%s16914_s29 + $0x1664] ss:$16 sps:$4 sm:$0xff]  }
 0x302   : > { %10442 = vmatprep.subr.bf16.mxu0 %v15144_v40  ;;  %11467 = vmatprep.subr.bf16.mxu1 %v15147_v29  ;;  %v15231_v40 = vld [vmem:[%s16914_s29 + $0x166c] ss:$16 sps:$4 sm:$0xff]   ;;  %v15226_v29 = vld [vmem:[%s16914_s29 + $0x1660] ss:$16 sps:$4 sm:$0xff]  }
 0x305   : > { %10443 = vmatpush1.bf16.msra.mxu0 %v15142_v42  ;;  %11468 = vmatpush1.bf16.msra.mxu1 %v15145_v45  ;;  %v15229_v42 = vld [vmem:[%s16914_s29 + $0x1668] ss:$16 sps:$4 sm:$0xff]   ;;  %v15234_v45 = vld [vmem:[%s16914_s29 + $0x1684] ss:$16 sps:$4 sm:$0xff]  }
 0x306   : > { %10444 = vmatprep.subr.bf16.mxu0 %v15150_v46  ;;  %11469 = vmatprep.subr.bf16.mxu1 %v15153_v26  ;;  %v15237_v46 = vld [vmem:[%s16914_s29 + $0x168c] ss:$16 sps:$4 sm:$0xff]   ;;  %v15232_v26 = vld [vmem:[%s16914_s29 + $0x1680] ss:$16 sps:$4 sm:$0xff]  }
 0x309   : > { %10445 = vmatpush1.bf16.msra.mxu0 %v15148_v47  ;;  %11470 = vmatpush1.bf16.msra.mxu1 %v15151_v49  ;;  %v15235_v47 = vld [vmem:[%s16914_s29 + $0x1688] ss:$16 sps:$4 sm:$0xff]   ;;  %v15240_v49 = vld [vmem:[%s16914_s29 + $0x16a4] ss:$16 sps:$4 sm:$0xff]  }
 0x30a   : > { %10446 = vmatprep.subr.bf16.mxu0 %v15156_v51  ;;  %11471 = vmatprep.subr.bf16.mxu1 %v15159_v52  ;;  %v15243_v51 = vld [vmem:[%s16914_s29 + $0x16ac] ss:$16 sps:$4 sm:$0xff]   ;;  %v15238_v52 = vld [vmem:[%s16914_s29 + $0x16a0] ss:$16 sps:$4 sm:$0xff]  }
 0x30d   : > { %10447 = vmatpush1.bf16.msra.mxu0 %v15154_v33  ;;  %11472 = vmatpush1.bf16.msra.mxu1 %v15157_v53  ;;  %v15241_v33 = vld [vmem:[%s16914_s29 + $0x16a8] ss:$16 sps:$4 sm:$0xff]   ;;  %v15246_v53 = vld [vmem:[%s16914_s29 + $0x16c4] ss:$16 sps:$4 sm:$0xff]  }
 0x30e   : > { %10448 = vmatprep.subr.bf16.mxu0 %v15162_v54  ;;  %11473 = vmatprep.subr.bf16.mxu1 %v15165_v55  ;;  %v15249_v54 = vld [vmem:[%s16914_s29 + $0x16cc] ss:$16 sps:$4 sm:$0xff]   ;;  %v15244_v55 = vld [vmem:[%s16914_s29 + $0x16c0] ss:$16 sps:$4 sm:$0xff]  }
 0x311   : > { %10449 = vmatpush1.bf16.msra.mxu0 %v15160_v56  ;;  %11474 = vmatpush1.bf16.msra.mxu1 %v15163_v43  ;;  %v15247_v56 = vld [vmem:[%s16914_s29 + $0x16c8] ss:$16 sps:$4 sm:$0xff]   ;;  %v15252_v43 = vld [vmem:[%s16914_s29 + $0x16e4] ss:$16 sps:$4 sm:$0xff]  }
 0x312   : > { %10450 = vmatprep.subr.bf16.mxu0 %v15168_v58  ;;  %11475 = vmatprep.subr.bf16.mxu1 %v15171_v41  ;;  %v15255_v58 = vld [vmem:[%s16914_s29 + $0x16ec] ss:$16 sps:$4 sm:$0xff]   ;;  %v15250_v41 = vld [vmem:[%s16914_s29 + $0x16e0] ss:$16 sps:$4 sm:$0xff]  }
 0x315   : > { %10451 = vmatpush1.bf16.msra.mxu0 %v15166_v60  ;;  %11476 = vmatpush1.bf16.msra.mxu1 %v15169_v61  ;;  %v15253_v60 = vld [vmem:[%s16914_s29 + $0x16e8] ss:$16 sps:$4 sm:$0xff]   ;;  %v15258_v61 = vld [vmem:[%s16914_s29 + $0x1704] ss:$16 sps:$4 sm:$0xff]  }
 0x316   : > { %10452 = vmatprep.subr.bf16.mxu0 %v15174_v62  ;;  %11477 = vmatprep.subr.bf16.mxu1 %v15177_v0  ;;  %v15261_v62 = vld [vmem:[%s16914_s29 + $0x170c] ss:$16 sps:$4 sm:$0xff]   ;;  %v15256_v0 = vld [vmem:[%s16914_s29 + $0x1700] ss:$16 sps:$4 sm:$0xff]  }
 0x319   : > { %10453 = vmatpush1.bf16.msra.mxu0 %v15172_v1  ;;  %11478 = vmatpush1.bf16.msra.mxu1 %v15175_v2  ;;  %v15259_v1 = vld [vmem:[%s16914_s29 + $0x1708] ss:$16 sps:$4 sm:$0xff]   ;;  %v15264_v2 = vld [vmem:[%s16914_s29 + $0x1724] ss:$16 sps:$4 sm:$0xff]  }
 0x31a   : > { %10454 = vmatprep.subr.bf16.mxu0 %v15180_v48  ;;  %11479 = vmatprep.subr.bf16.mxu1 %v15183_v3  ;;  %v15267_v48 = vld [vmem:[%s16914_s29 + $0x172c] ss:$16 sps:$4 sm:$0xff]   ;;  %v15262_v3 = vld [vmem:[%s16914_s29 + $0x1720] ss:$16 sps:$4 sm:$0xff]  }
 0x31d   : > { %10455 = vmatpush1.bf16.msra.mxu0 %v15178_v4  ;;  %11480 = vmatpush1.bf16.msra.mxu1 %v15181_v5  ;;  %v15265_v4 = vld [vmem:[%s16914_s29 + $0x1728] ss:$16 sps:$4 sm:$0xff]   ;;  %v15270_v5 = vld [vmem:[%s16914_s29 + $0x1744] ss:$16 sps:$4 sm:$0xff]  }
 0x31e   : > { %10456 = vmatprep.subr.bf16.mxu0 %v15186_v6  ;;  %11481 = vmatprep.subr.bf16.mxu1 %v15189_v59  ;;  %v15273_v6 = vld [vmem:[%s16914_s29 + $0x174c] ss:$16 sps:$4 sm:$0xff]   ;;  %v15268_v59 = vld [vmem:[%s16914_s29 + $0x1740] ss:$16 sps:$4 sm:$0xff]  }
 0x321   : > { %10457 = vmatpush1.bf16.msra.mxu0 %v15184_v8  ;;  %11482 = vmatpush1.bf16.msra.mxu1 %v15187_v57  ;;  %v15271_v8 = vld [vmem:[%s16914_s29 + $0x1748] ss:$16 sps:$4 sm:$0xff]   ;;  %v15276_v57 = vld [vmem:[%s16914_s29 + $0x1764] ss:$16 sps:$4 sm:$0xff]  }
 0x322   : > { %10458 = vmatprep.subr.bf16.mxu0 %v15192_v11  ;;  %11483 = vmatprep.subr.bf16.mxu1 %v15195_v12  ;;  %v15279_v11 = vld [vmem:[%s16914_s29 + $0x176c] ss:$16 sps:$4 sm:$0xff]   ;;  %v15274_v12 = vld [vmem:[%s16914_s29 + $0x1760] ss:$16 sps:$4 sm:$0xff]  }
 0x325   : > { %10459 = vmatpush1.bf16.msra.mxu0 %v15190_v13  ;;  %11484 = vmatpush1.bf16.msra.mxu1 %v15193_v15  ;;  %v15277_v13 = vld [vmem:[%s16914_s29 + $0x1768] ss:$16 sps:$4 sm:$0xff]   ;;  %v15282_v15 = vld [vmem:[%s16914_s29 + $0x1784] ss:$16 sps:$4 sm:$0xff]  }
 0x326   : > { %10460 = vmatprep.subr.bf16.mxu0 %v15198_v16  ;;  %11485 = vmatprep.subr.bf16.mxu1 %v15201_v17  ;;  %v15285_v16 = vld [vmem:[%s16914_s29 + $0x178c] ss:$16 sps:$4 sm:$0xff]   ;;  %v15280_v17 = vld [vmem:[%s16914_s29 + $0x1780] ss:$16 sps:$4 sm:$0xff]  }
 0x329   : > { %10461 = vmatpush1.bf16.msra.mxu0 %v15196_v18  ;;  %11486 = vmatpush1.bf16.msra.mxu1 %v15199_v19  ;;  %v15288_v18 = vld [vmem:[%s16914_s29 + $0x17a4] ss:$16 sps:$4 sm:$0xff]   ;;  %v15291_v19 = vld [vmem:[%s16914_s29 + $0x17ac] ss:$16 sps:$4 sm:$0xff]  }
 0x32a   : > { %10462 = vmatprep.subr.bf16.mxu0 %v15204_v20  ;;  %11487 = vmatprep.subr.bf16.mxu1 %v15207_v21  ;;  %v15286_v20 = vld [vmem:[%s16914_s29 + $0x17a0] ss:$16 sps:$4 sm:$0xff]   ;;  %v15289_v21 = vld [vmem:[%s16914_s29 + $0x17a8] ss:$16 sps:$4 sm:$0xff]  }
 0x32d   : > { %10463 = vmatpush1.bf16.msra.mxu0 %v15202_v9  ;;  %11488 = vmatpush1.bf16.msra.mxu1 %v15205_v23  ;;  %v15294_v9 = vld [vmem:[%s16914_s29 + $0x17c4] ss:$16 sps:$4 sm:$0xff]   ;;  %v15297_v23 = vld [vmem:[%s16914_s29 + $0x17cc] ss:$16 sps:$4 sm:$0xff]  }
 0x32e   : > { %10473 = vmatprep.subr.bf16.mxu0 %v15210_v25  ;;  %11498 = vmatprep.subr.bf16.mxu1 %v15213_v7  ;;  %v17816_v25 = vld [vmem:[%s16938_s9 + $0x30] sm:$0xff]  ;;  %v15292_v7 = vld [vmem:[%s16914_s29 + $0x17c0] ss:$16 sps:$4 sm:$0xff]  }
 0x330   : > { %10465 = vmatmul.mubr.bf16.vlgmr.msra.gmra.mrb[0].mxu0 %v585_v10  ;;  %11490 = vmatmul.mubr.bf16.vlgmr.msra.gmra.mrb[0].mxu1 %v585_v10  ;;  %v15300_v10 = vld [vmem:[%s16914_s29 + $0x17e4] ss:$16 sps:$4 sm:$0xff]  }
 0x331   : > { %10474 = vmatpush1.bf16.msra.mxu0 %v15208_v28  ;;  %11499 = vmatpush1.bf16.msra.mxu1 %v15211_v30  ;;  %v15303_v28 = vld [vmem:[%s16914_s29 + $0x17ec] ss:$16 sps:$4 sm:$0xff]   ;;  %v17824_v30 = vrot.slane %v17816_v25, %v16988_v50 }
 0x332   : > { %10475 = vmatprep.subr.bf16.mxu0 %v15216_v31  ;;  %11500 = vmatprep.subr.bf16.mxu1 %v15219_v32  ;;  %v15298_v31 = vld [vmem:[%s16914_s29 + $0x17e0] ss:$16 sps:$4 sm:$0xff]   ;;  %v15301_v32 = vld [vmem:[%s16914_s29 + $0x17e8] ss:$16 sps:$4 sm:$0xff]  }
 0x333   : > { %10505 = vmatprep.mubr.bf16.mxu0 %v588_v34  ;;  %11530 = vmatprep.mubr.bf16.mxu1 %v588_v34  ;;  %v15307_v34 = vld [vmem:[%s16914_s29 + $0x1804] ss:$16 sps:$4 sm:$0xff]  }
 0x335   : > { %10476 = vmatpush1.bf16.msra.mxu0 %v15214_v14  ;;  %11501 = vmatpush1.bf16.msra.mxu1 %v15217_v35  ;;  %v15310_v14 = vld [vmem:[%s16914_s29 + $0x180c] ss:$16 sps:$4 sm:$0xff]   ;;  %v422_v35 = vcombine.high %v17824_v30, %v17824_v30 }
 0x336   : > { %10477 = vmatprep.subr.bf16.mxu0 %v15222_v36  ;;  %11502 = vmatprep.subr.bf16.mxu1 %v15225_v27  ;;  %v587_v36 = vpack.c.bf16 %v17749_v22, %v17749_v22  ;;  %v15305_v27 = vld [vmem:[%s16914_s29 + $0x1800] ss:$16 sps:$4 sm:$0xff]  }
 0x337   : > { %v15311_v22 = vld [vmem:[%s16914_s29 + $0x1820] ss:$16 sps:$4 sm:$0xff]  }
 0x339   : > { %10478 = vmatpush1.bf16.msra.mxu0 %v15220_v37  ;;  %11503 = vmatpush1.bf16.msra.mxu1 %v15223_v38  ;;  %v15308_v37 = vld [vmem:[%s16914_s29 + $0x1808] ss:$16 sps:$4 sm:$0xff]   ;;  %v15313_v38 = vld [vmem:[%s16914_s29 + $0x1824] ss:$16 sps:$4 sm:$0xff]  }
 0x33a   : > { %10479 = vmatprep.subr.bf16.mxu0 %v15228_v39  ;;  %11504 = vmatprep.subr.bf16.mxu1 %v15231_v40  ;;  %v15316_v39 = vld [vmem:[%s16914_s29 + $0x182c] ss:$16 sps:$4 sm:$0xff]   ;;  %v590_v40 = vpack.c.bf16 %v422_v35, %v422_v35  ;;  %v15389_v35 = vld [vmem:[%s16914_s29 + $0x19c0] ss:$16 sps:$4 sm:$0xff]  }
 0x33d   : > { %10480 = vmatpush1.bf16.msra.mxu0 %v15226_v29  ;;  %11505 = vmatpush1.bf16.msra.mxu1 %v15229_v42  ;;  %v15314_v29 = vld [vmem:[%s16914_s29 + $0x1828] ss:$16 sps:$4 sm:$0xff]   ;;  %v15319_v42 = vld [vmem:[%s16914_s29 + $0x1844] ss:$16 sps:$4 sm:$0xff]  }
 0x33e   : > { %10481 = vmatprep.subr.bf16.mxu0 %v15234_v45  ;;  %11506 = vmatprep.subr.bf16.mxu1 %v15237_v46  ;;  %v15322_v45 = vld [vmem:[%s16914_s29 + $0x184c] ss:$16 sps:$4 sm:$0xff]   ;;  %v15317_v46 = vld [vmem:[%s16914_s29 + $0x1840] ss:$16 sps:$4 sm:$0xff]  }
 0x341   : > { %10482 = vmatpush1.bf16.msra.mxu0 %v15232_v26  ;;  %11507 = vmatpush1.bf16.msra.mxu1 %v15235_v47  ;;  %v15320_v26 = vld [vmem:[%s16914_s29 + $0x1848] ss:$16 sps:$4 sm:$0xff]   ;;  %v15325_v47 = vld [vmem:[%s16914_s29 + $0x1864] ss:$16 sps:$4 sm:$0xff]  }
 0x342   : > { %10483 = vmatprep.subr.bf16.mxu0 %v15240_v49  ;;  %11508 = vmatprep.subr.bf16.mxu1 %v15243_v51  ;;  %v15328_v49 = vld [vmem:[%s16914_s29 + $0x186c] ss:$16 sps:$4 sm:$0xff]   ;;  %v15323_v51 = vld [vmem:[%s16914_s29 + $0x1860] ss:$16 sps:$4 sm:$0xff]  }
 0x345   : > { %10484 = vmatpush1.bf16.msra.mxu0 %v15238_v52  ;;  %11509 = vmatpush1.bf16.msra.mxu1 %v15241_v33  ;;  %v15326_v52 = vld [vmem:[%s16914_s29 + $0x1868] ss:$16 sps:$4 sm:$0xff]   ;;  %v15331_v33 = vld [vmem:[%s16914_s29 + $0x1884] ss:$16 sps:$4 sm:$0xff]  }
 0x346   : > { %10485 = vmatprep.subr.bf16.mxu0 %v15246_v53  ;;  %11510 = vmatprep.subr.bf16.mxu1 %v15249_v54  ;;  %v15334_v53 = vld [vmem:[%s16914_s29 + $0x188c] ss:$16 sps:$4 sm:$0xff]   ;;  %v15329_v54 = vld [vmem:[%s16914_s29 + $0x1880] ss:$16 sps:$4 sm:$0xff]  }
 0x349   : > { %10486 = vmatpush1.bf16.msra.mxu0 %v15244_v55  ;;  %11511 = vmatpush1.bf16.msra.mxu1 %v15247_v56  ;;  %v15332_v55 = vld [vmem:[%s16914_s29 + $0x1888] ss:$16 sps:$4 sm:$0xff]   ;;  %v15337_v56 = vld [vmem:[%s16914_s29 + $0x18a4] ss:$16 sps:$4 sm:$0xff]  }
 0x34a   : > { %10487 = vmatprep.subr.bf16.mxu0 %v15252_v43  ;;  %11512 = vmatprep.subr.bf16.mxu1 %v15255_v58  ;;  %v15340_v43 = vld [vmem:[%s16914_s29 + $0x18ac] ss:$16 sps:$4 sm:$0xff]   ;;  %v15335_v58 = vld [vmem:[%s16914_s29 + $0x18a0] ss:$16 sps:$4 sm:$0xff]  }
 0x34d   : > { %10488 = vmatpush1.bf16.msra.mxu0 %v15250_v41  ;;  %11513 = vmatpush1.bf16.msra.mxu1 %v15253_v60  ;;  %v15338_v41 = vld [vmem:[%s16914_s29 + $0x18a8] ss:$16 sps:$4 sm:$0xff]   ;;  %v15343_v60 = vld [vmem:[%s16914_s29 + $0x18c4] ss:$16 sps:$4 sm:$0xff]  }
 0x34e   : > { %10489 = vmatprep.subr.bf16.mxu0 %v15258_v61  ;;  %11514 = vmatprep.subr.bf16.mxu1 %v15261_v62  ;;  %v15346_v61 = vld [vmem:[%s16914_s29 + $0x18cc] ss:$16 sps:$4 sm:$0xff]   ;;  %v15341_v62 = vld [vmem:[%s16914_s29 + $0x18c0] ss:$16 sps:$4 sm:$0xff]  }
 0x351   : > { %10490 = vmatpush1.bf16.msra.mxu0 %v15256_v0  ;;  %11515 = vmatpush1.bf16.msra.mxu1 %v15259_v1  ;;  %v15344_v0 = vld [vmem:[%s16914_s29 + $0x18c8] ss:$16 sps:$4 sm:$0xff]   ;;  %v15349_v1 = vld [vmem:[%s16914_s29 + $0x18e4] ss:$16 sps:$4 sm:$0xff]  }
 0x352   : > { %10491 = vmatprep.subr.bf16.mxu0 %v15264_v2  ;;  %11516 = vmatprep.subr.bf16.mxu1 %v15267_v48  ;;  %v15352_v2 = vld [vmem:[%s16914_s29 + $0x18ec] ss:$16 sps:$4 sm:$0xff]   ;;  %v15347_v48 = vld [vmem:[%s16914_s29 + $0x18e0] ss:$16 sps:$4 sm:$0xff]  }
 0x355   : > { %10492 = vmatpush1.bf16.msra.mxu0 %v15262_v3  ;;  %11517 = vmatpush1.bf16.msra.mxu1 %v15265_v4  ;;  %v15350_v3 = vld [vmem:[%s16914_s29 + $0x18e8] ss:$16 sps:$4 sm:$0xff]   ;;  %v15355_v4 = vld [vmem:[%s16914_s29 + $0x1904] ss:$16 sps:$4 sm:$0xff]  }
 0x356   : > { %10493 = vmatprep.subr.bf16.mxu0 %v15270_v5  ;;  %11518 = vmatprep.subr.bf16.mxu1 %v15273_v6  ;;  %v15358_v5 = vld [vmem:[%s16914_s29 + $0x190c] ss:$16 sps:$4 sm:$0xff]   ;;  %v15353_v6 = vld [vmem:[%s16914_s29 + $0x1900] ss:$16 sps:$4 sm:$0xff]  }
 0x359   : > { %10494 = vmatpush1.bf16.msra.mxu0 %v15268_v59  ;;  %11519 = vmatpush1.bf16.msra.mxu1 %v15271_v8  ;;  %v15356_v59 = vld [vmem:[%s16914_s29 + $0x1908] ss:$16 sps:$4 sm:$0xff]   ;;  %v15361_v8 = vld [vmem:[%s16914_s29 + $0x1924] ss:$16 sps:$4 sm:$0xff]  }
 0x35a   : > { %10495 = vmatprep.subr.bf16.mxu0 %v15276_v57  ;;  %11520 = vmatprep.subr.bf16.mxu1 %v15279_v11  ;;  %v15364_v57 = vld [vmem:[%s16914_s29 + $0x192c] ss:$16 sps:$4 sm:$0xff]   ;;  %v15359_v11 = vld [vmem:[%s16914_s29 + $0x1920] ss:$16 sps:$4 sm:$0xff]  }
 0x35d   : > { %10496 = vmatpush1.bf16.msra.mxu0 %v15274_v12  ;;  %11521 = vmatpush1.bf16.msra.mxu1 %v15277_v13  ;;  %v15362_v12 = vld [vmem:[%s16914_s29 + $0x1928] ss:$16 sps:$4 sm:$0xff]   ;;  %v15367_v13 = vld [vmem:[%s16914_s29 + $0x1944] ss:$16 sps:$4 sm:$0xff]  }
 0x35e   : > { %10497 = vmatprep.subr.bf16.mxu0 %v15282_v15  ;;  %11522 = vmatprep.subr.bf16.mxu1 %v15285_v16  ;;  %v15370_v15 = vld [vmem:[%s16914_s29 + $0x194c] ss:$16 sps:$4 sm:$0xff]   ;;  %v15365_v16 = vld [vmem:[%s16914_s29 + $0x1940] ss:$16 sps:$4 sm:$0xff]  }
 0x361   : > { %10498 = vmatpush1.bf16.msra.mxu0 %v15280_v17  ;;  %11523 = vmatpush1.bf16.msra.mxu1 %v15283_v63  ;;  %v15368_v17 = vld [vmem:[%s16914_s29 + $0x1948] ss:$16 sps:$4 sm:$0xff]   ;;  %v15373_v63 = vld [vmem:[%s16914_s29 + $0x1964] ss:$16 sps:$4 sm:$0xff]  }
 0x362   : > { %10499 = vmatprep.subr.bf16.mxu0 %v15288_v18  ;;  %11524 = vmatprep.subr.bf16.mxu1 %v15291_v19  ;;  %v15376_v18 = vld [vmem:[%s16914_s29 + $0x196c] ss:$16 sps:$4 sm:$0xff]   ;;  %v15371_v19 = vld [vmem:[%s16914_s29 + $0x1960] ss:$16 sps:$4 sm:$0xff]  }
 0x365   : > { %10500 = vmatpush1.bf16.msra.mxu0 %v15286_v20  ;;  %11525 = vmatpush1.bf16.msra.mxu1 %v15289_v21  ;;  %v15374_v20 = vld [vmem:[%s16914_s29 + $0x1968] ss:$16 sps:$4 sm:$0xff]   ;;  %v15379_v21 = vld [vmem:[%s16914_s29 + $0x1984] ss:$16 sps:$4 sm:$0xff]  }
 0x366   : > { %10501 = vmatprep.subr.bf16.mxu0 %v15294_v9  ;;  %11526 = vmatprep.subr.bf16.mxu1 %v15297_v23  ;;  %v15382_v9 = vld [vmem:[%s16914_s29 + $0x198c] ss:$16 sps:$4 sm:$0xff]   ;;  %v15377_v23 = vld [vmem:[%s16914_s29 + $0x1980] ss:$16 sps:$4 sm:$0xff]  }
 0x369   : > { %10502 = vmatpush1.bf16.msra.mxu0 %v15292_v7  ;;  %11527 = vmatpush1.bf16.msra.mxu1 %v15295_v24  ;;  %v15380_v7 = vld [vmem:[%s16914_s29 + $0x1988] ss:$16 sps:$4 sm:$0xff]   ;;  %v15385_v24 = vld [vmem:[%s16914_s29 + $0x19a4] ss:$16 sps:$4 sm:$0xff]  }
 0x36a   : > { %10503 = vmatprep.subr.bf16.mxu0 %v15300_v10  ;;  %11528 = vmatprep.subr.bf16.mxu1 %v15303_v28  ;;  %v15388_v10 = vld [vmem:[%s16914_s29 + $0x19ac] ss:$16 sps:$4 sm:$0xff]   ;;  %v15383_v28 = vld [vmem:[%s16914_s29 + $0x19a0] ss:$16 sps:$4 sm:$0xff]  }
 0x36d   : > { %10504 = vmatpush1.bf16.msra.mxu0 %v15298_v31  ;;  %11529 = vmatpush1.bf16.msra.mxu1 %v15301_v32  ;;  %v15386_v31 = vld [vmem:[%s16914_s29 + $0x19a8] ss:$16 sps:$4 sm:$0xff]   ;;  %v15391_v32 = vld [vmem:[%s16914_s29 + $0x19c4] ss:$16 sps:$4 sm:$0xff]  }
 0x36e   : > { %10514 = vmatprep.subr.bf16.mxu0 %v15307_v34  ;;  %11539 = vmatprep.subr.bf16.mxu1 %v15310_v14  ;;  %v15394_v34 = vld [vmem:[%s16914_s29 + $0x19cc] ss:$16 sps:$4 sm:$0xff]   ;;  %v407_v14 = vcombine.high %v17816_v25, %v17816_v25  ;;  %v15395_v25 = vld [vmem:[%s16914_s29 + $0x19e0] ss:$16 sps:$4 sm:$0xff]  }
 0x370   : > { %10506 = vmatmul.mubr.bf16.vlgmr.msra.gmra.mrb[0].mxu0 %v587_v36  ;;  %11531 = vmatmul.mubr.bf16.vlgmr.msra.gmra.mrb[0].mxu1 %v587_v36  ;;  %v15392_v36 = vld [vmem:[%s16914_s29 + $0x19c8] ss:$16 sps:$4 sm:$0xff]  }
 0x371   : > { %10515 = vmatpush1.bf16.msra.mxu0 %v15305_v27  ;;  %11540 = vmatpush1.bf16.msra.mxu1 %v15308_v37  ;;  %v15397_v27 = vld [vmem:[%s16914_s29 + $0x19e4] ss:$16 sps:$4 sm:$0xff]   ;;  %v15400_v37 = vld [vmem:[%s16914_s29 + $0x19ec] ss:$16 sps:$4 sm:$0xff]  }
 0x372   : > { %10516 = vmatprep.subr.bf16.mxu0 %v15313_v38  ;;  %11541 = vmatprep.subr.bf16.mxu1 %v15316_v39  ;;  %v17897_v38 = vrot.slane %v407_v14, %v16988_v50  ;;  %v15398_v39 = vld [vmem:[%s16914_s29 + $0x19e8] ss:$16 sps:$4 sm:$0xff]  }
 0x373   : > { %10546 = vmatprep.mubr.bf16.mxu0 %v590_v40  ;;  %11571 = vmatprep.mubr.bf16.mxu1 %v590_v40  ;;  %v15403_v40 = vld [vmem:[%s16914_s29 + $0x1a04] ss:$16 sps:$4 sm:$0xff]   ;;  %v15476_v14 = vld [vmem:[%s16914_s29 + $0x1b88] ss:$16 sps:$4 sm:$0xff]  }
 0x375   : > { %10517 = vmatpush1.bf16.msra.mxu0 %v15311_v22  ;;  %11542 = vmatpush1.bf16.msra.mxu1 %v15314_v29  ;;  %v15406_v22 = vld [vmem:[%s16914_s29 + $0x1a0c] ss:$16 sps:$4 sm:$0xff]   ;;  %v423_v29 = vcombine.high %v17897_v38, %v17897_v38 }
 0x376   : > { %10518 = vmatprep.subr.bf16.mxu0 %v15319_v42  ;;  %11543 = vmatprep.subr.bf16.mxu1 %v15322_v45  ;;  %v589_v42 = vpack.c.bf16 %v17824_v30, %v17824_v30  ;;  %v15401_v45 = vld [vmem:[%s16914_s29 + $0x1a00] ss:$16 sps:$4 sm:$0xff]  }
 0x377   : > { %v15407_v30 = vld [vmem:[%s16914_s29 + $0x1a20] ss:$16 sps:$4 sm:$0xff]  }
 0x379   : > { %10519 = vmatpush1.bf16.msra.mxu0 %v15317_v46  ;;  %11544 = vmatpush1.bf16.msra.mxu1 %v15320_v26  ;;  %v15404_v46 = vld [vmem:[%s16914_s29 + $0x1a08] ss:$16 sps:$4 sm:$0xff]   ;;  %v15409_v26 = vld [vmem:[%s16914_s29 + $0x1a24] ss:$16 sps:$4 sm:$0xff]  }
 0x37a   : > { %10520 = vmatprep.subr.bf16.mxu0 %v15325_v47  ;;  %11545 = vmatprep.subr.bf16.mxu1 %v15328_v49  ;;  %v15412_v47 = vld [vmem:[%s16914_s29 + $0x1a2c] ss:$16 sps:$4 sm:$0xff]   ;;  %v592_v49 = vpack.c.bf16 %v423_v29, %v423_v29  ;;  %v15488_v29 = vld [vmem:[%s16914_s29 + $0x1bc8] ss:$16 sps:$4 sm:$0xff]  }
 0x37d   : > { %10521 = vmatpush1.bf16.msra.mxu0 %v15323_v51  ;;  %11546 = vmatpush1.bf16.msra.mxu1 %v15326_v52  ;;  %v15410_v51 = vld [vmem:[%s16914_s29 + $0x1a28] ss:$16 sps:$4 sm:$0xff]   ;;  %v15415_v52 = vld [vmem:[%s16914_s29 + $0x1a44] ss:$16 sps:$4 sm:$0xff]  }
 0x37e   : > { %10522 = vmatprep.subr.bf16.mxu0 %v15331_v33  ;;  %11547 = vmatprep.subr.bf16.mxu1 %v15334_v53  ;;  %v15418_v33 = vld [vmem:[%s16914_s29 + $0x1a4c] ss:$16 sps:$4 sm:$0xff]   ;;  %v15413_v53 = vld [vmem:[%s16914_s29 + $0x1a40] ss:$16 sps:$4 sm:$0xff]  }
 0x381   : > { %10523 = vmatpush1.bf16.msra.mxu0 %v15329_v54  ;;  %11548 = vmatpush1.bf16.msra.mxu1 %v15332_v55  ;;  %v15416_v54 = vld [vmem:[%s16914_s29 + $0x1a48] ss:$16 sps:$4 sm:$0xff]   ;;  %v15421_v55 = vld [vmem:[%s16914_s29 + $0x1a64] ss:$16 sps:$4 sm:$0xff]  }
 0x382   : > { %10524 = vmatprep.subr.bf16.mxu0 %v15337_v56  ;;  %11549 = vmatprep.subr.bf16.mxu1 %v15340_v43  ;;  %v15424_v56 = vld [vmem:[%s16914_s29 + $0x1a6c] ss:$16 sps:$4 sm:$0xff]   ;;  %v15419_v43 = vld [vmem:[%s16914_s29 + $0x1a60] ss:$16 sps:$4 sm:$0xff]  }
 0x385   : > { %10525 = vmatpush1.bf16.msra.mxu0 %v15335_v58  ;;  %11550 = vmatpush1.bf16.msra.mxu1 %v15338_v41  ;;  %v15422_v58 = vld [vmem:[%s16914_s29 + $0x1a68] ss:$16 sps:$4 sm:$0xff]   ;;  %v15427_v41 = vld [vmem:[%s16914_s29 + $0x1a84] ss:$16 sps:$4 sm:$0xff]  }
 0x386   : > { %10526 = vmatprep.subr.bf16.mxu0 %v15343_v60  ;;  %11551 = vmatprep.subr.bf16.mxu1 %v15346_v61  ;;  %v15430_v60 = vld [vmem:[%s16914_s29 + $0x1a8c] ss:$16 sps:$4 sm:$0xff]   ;;  %v15425_v61 = vld [vmem:[%s16914_s29 + $0x1a80] ss:$16 sps:$4 sm:$0xff]  }
 0x389   : > { %10527 = vmatpush1.bf16.msra.mxu0 %v15341_v62  ;;  %11552 = vmatpush1.bf16.msra.mxu1 %v15344_v0  ;;  %v15428_v62 = vld [vmem:[%s16914_s29 + $0x1a88] ss:$16 sps:$4 sm:$0xff]   ;;  %v15433_v0 = vld [vmem:[%s16914_s29 + $0x1aa4] ss:$16 sps:$4 sm:$0xff]  }
 0x38a   : > { %10528 = vmatprep.subr.bf16.mxu0 %v15349_v1  ;;  %11553 = vmatprep.subr.bf16.mxu1 %v15352_v2  ;;  %v15436_v1 = vld [vmem:[%s16914_s29 + $0x1aac] ss:$16 sps:$4 sm:$0xff]   ;;  %v15431_v2 = vld [vmem:[%s16914_s29 + $0x1aa0] ss:$16 sps:$4 sm:$0xff]  }
 0x38d   : > { %10529 = vmatpush1.bf16.msra.mxu0 %v15347_v48  ;;  %11554 = vmatpush1.bf16.msra.mxu1 %v15350_v3  ;;  %v15434_v48 = vld [vmem:[%s16914_s29 + $0x1aa8] ss:$16 sps:$4 sm:$0xff]   ;;  %v15439_v3 = vld [vmem:[%s16914_s29 + $0x1ac4] ss:$16 sps:$4 sm:$0xff]  }
 0x38e   : > { %10530 = vmatprep.subr.bf16.mxu0 %v15355_v4  ;;  %11555 = vmatprep.subr.bf16.mxu1 %v15358_v5  ;;  %v15442_v4 = vld [vmem:[%s16914_s29 + $0x1acc] ss:$16 sps:$4 sm:$0xff]   ;;  %v15437_v5 = vld [vmem:[%s16914_s29 + $0x1ac0] ss:$16 sps:$4 sm:$0xff]  }
 0x391   : > { %10531 = vmatpush1.bf16.msra.mxu0 %v15353_v6  ;;  %11556 = vmatpush1.bf16.msra.mxu1 %v15356_v59  ;;  %v15440_v6 = vld [vmem:[%s16914_s29 + $0x1ac8] ss:$16 sps:$4 sm:$0xff]   ;;  %v15445_v59 = vld [vmem:[%s16914_s29 + $0x1ae4] ss:$16 sps:$4 sm:$0xff]  }
 0x392   : > { %10532 = vmatprep.subr.bf16.mxu0 %v15361_v8  ;;  %11557 = vmatprep.subr.bf16.mxu1 %v15364_v57  ;;  %v15448_v8 = vld [vmem:[%s16914_s29 + $0x1aec] ss:$16 sps:$4 sm:$0xff]   ;;  %v15443_v57 = vld [vmem:[%s16914_s29 + $0x1ae0] ss:$16 sps:$4 sm:$0xff]  }
 0x395   : > { %10533 = vmatpush1.bf16.msra.mxu0 %v15359_v11  ;;  %11558 = vmatpush1.bf16.msra.mxu1 %v15362_v12  ;;  %v15446_v11 = vld [vmem:[%s16914_s29 + $0x1ae8] ss:$16 sps:$4 sm:$0xff]   ;;  %v15451_v12 = vld [vmem:[%s16914_s29 + $0x1b04] ss:$16 sps:$4 sm:$0xff]  }
 0x396   : > { %10534 = vmatprep.subr.bf16.mxu0 %v15367_v13  ;;  %11559 = vmatprep.subr.bf16.mxu1 %v15370_v15  ;;  %v15454_v13 = vld [vmem:[%s16914_s29 + $0x1b0c] ss:$16 sps:$4 sm:$0xff]   ;;  %v15449_v15 = vld [vmem:[%s16914_s29 + $0x1b00] ss:$16 sps:$4 sm:$0xff]  }
 0x399   : > { %10535 = vmatpush1.bf16.msra.mxu0 %v15365_v16  ;;  %11560 = vmatpush1.bf16.msra.mxu1 %v15368_v17  ;;  %v15452_v16 = vld [vmem:[%s16914_s29 + $0x1b08] ss:$16 sps:$4 sm:$0xff]   ;;  %v15457_v17 = vld [vmem:[%s16914_s29 + $0x1b24] ss:$16 sps:$4 sm:$0xff]  }
 0x39a   : > { %10536 = vmatprep.subr.bf16.mxu0 %v15373_v63  ;;  %11561 = vmatprep.subr.bf16.mxu1 %v15376_v18  ;;  %v15460_v63 = vld [vmem:[%s16914_s29 + $0x1b2c] ss:$16 sps:$4 sm:$0xff]   ;;  %v15455_v18 = vld [vmem:[%s16914_s29 + $0x1b20] ss:$16 sps:$4 sm:$0xff]  }
 0x39d   : > { %10537 = vmatpush1.bf16.msra.mxu0 %v15371_v19  ;;  %11562 = vmatpush1.bf16.msra.mxu1 %v15374_v20  ;;  %v15458_v19 = vld [vmem:[%s16914_s29 + $0x1b28] ss:$16 sps:$4 sm:$0xff]   ;;  %v15463_v20 = vld [vmem:[%s16914_s29 + $0x1b44] ss:$16 sps:$4 sm:$0xff]  }
 0x39e   : > { %10538 = vmatprep.subr.bf16.mxu0 %v15379_v21  ;;  %11563 = vmatprep.subr.bf16.mxu1 %v15382_v9  ;;  %v15466_v21 = vld [vmem:[%s16914_s29 + $0x1b4c] ss:$16 sps:$4 sm:$0xff]   ;;  %v15461_v9 = vld [vmem:[%s16914_s29 + $0x1b40] ss:$16 sps:$4 sm:$0xff]  }
 0x3a1   : > { %10539 = vmatpush1.bf16.msra.mxu0 %v15377_v23  ;;  %11564 = vmatpush1.bf16.msra.mxu1 %v15380_v7  ;;  %v15464_v23 = vld [vmem:[%s16914_s29 + $0x1b48] ss:$16 sps:$4 sm:$0xff]   ;;  %v15469_v7 = vld [vmem:[%s16914_s29 + $0x1b64] ss:$16 sps:$4 sm:$0xff]  }
 0x3a2   : > { %10540 = vmatprep.subr.bf16.mxu0 %v15385_v24  ;;  %11565 = vmatprep.subr.bf16.mxu1 %v15388_v10  ;;  %v15472_v24 = vld [vmem:[%s16914_s29 + $0x1b6c] ss:$16 sps:$4 sm:$0xff]   ;;  %v15467_v10 = vld [vmem:[%s16914_s29 + $0x1b60] ss:$16 sps:$4 sm:$0xff]  }
 0x3a5   : > { %10541 = vmatpush1.bf16.msra.mxu0 %v15383_v28  ;;  %11566 = vmatpush1.bf16.msra.mxu1 %v15386_v31  ;;  %v15470_v28 = vld [vmem:[%s16914_s29 + $0x1b68] ss:$16 sps:$4 sm:$0xff]   ;;  %v15475_v31 = vld [vmem:[%s16914_s29 + $0x1b84] ss:$16 sps:$4 sm:$0xff]  }
 0x3a6   : > { %10542 = vmatprep.subr.bf16.mxu0 %v15391_v32  ;;  %11567 = vmatprep.subr.bf16.mxu1 %v15394_v34  ;;  %v15478_v32 = vld [vmem:[%s16914_s29 + $0x1b8c] ss:$16 sps:$4 sm:$0xff]   ;;  %v15473_v34 = vld [vmem:[%s16914_s29 + $0x1b80] ss:$16 sps:$4 sm:$0xff]  }
 0x3a9   : > { %10543 = vmatpush1.bf16.msra.mxu0 %v15389_v35  ;;  %11568 = vmatpush1.bf16.msra.mxu1 %v15392_v36  ;;  %v15481_v35 = vld [vmem:[%s16914_s29 + $0x1ba4] ss:$16 sps:$4 sm:$0xff]   ;;  %v15484_v36 = vld [vmem:[%s16914_s29 + $0x1bac] ss:$16 sps:$4 sm:$0xff]  }
 0x3aa   : > { %10544 = vmatprep.subr.bf16.mxu0 %v15397_v27  ;;  %11569 = vmatprep.subr.bf16.mxu1 %v15400_v37  ;;  %v15479_v27 = vld [vmem:[%s16914_s29 + $0x1ba0] ss:$16 sps:$4 sm:$0xff]   ;;  %v15482_v37 = vld [vmem:[%s16914_s29 + $0x1ba8] ss:$16 sps:$4 sm:$0xff]  }
 0x3ad   : > { %10545 = vmatpush1.bf16.msra.mxu0 %v15395_v25  ;;  %11570 = vmatpush1.bf16.msra.mxu1 %v15398_v39  ;;  %v15487_v25 = vld [vmem:[%s16914_s29 + $0x1bc4] ss:$16 sps:$4 sm:$0xff]   ;;  %v15490_v39 = vld [vmem:[%s16914_s29 + $0x1bcc] ss:$16 sps:$4 sm:$0xff]  }
 0x3ae   : > { %10555 = vmatprep.subr.bf16.mxu0 %v15403_v40  ;;  %11580 = vmatprep.subr.bf16.mxu1 %v15406_v22  ;;  %v17964_v40 = vld [vmem:[%s16938_s9 + $0x38] sm:$0xff] }
 0x3af   : > { %v15485_v22 = vld [vmem:[%s16914_s29 + $0x1bc0] ss:$16 sps:$4 sm:$0xff]  }
 0x3b0   : > { %10547 = vmatmul.mubr.bf16.vlgmr.msra.gmra.mrb[0].mxu0 %v589_v42  ;;  %11572 = vmatmul.mubr.bf16.vlgmr.msra.gmra.mrb[0].mxu1 %v589_v42  ;;  %v15493_v42 = vld [vmem:[%s16914_s29 + $0x1be4] ss:$16 sps:$4 sm:$0xff]  }
 0x3b1   : > { %10556 = vmatpush1.bf16.msra.mxu0 %v15401_v45  ;;  %11581 = vmatpush1.bf16.msra.mxu1 %v15404_v46  ;;  %v15496_v45 = vld [vmem:[%s16914_s29 + $0x1bec] ss:$16 sps:$4 sm:$0xff]   ;;  %v17972_v46 = vrot.slane %v17964_v40, %v16988_v50 }
 0x3b2   : > { %10557 = vmatprep.subr.bf16.mxu0 %v15409_v26  ;;  %11582 = vmatprep.subr.bf16.mxu1 %v15412_v47  ;;  %v15491_v26 = vld [vmem:[%s16914_s29 + $0x1be0] ss:$16 sps:$4 sm:$0xff]   ;;  %v15494_v47 = vld [vmem:[%s16914_s29 + $0x1be8] ss:$16 sps:$4 sm:$0xff]  }
 0x3b3   : > { %10587 = vmatprep.mubr.bf16.mxu0 %v592_v49  ;;  %11612 = vmatprep.mubr.bf16.mxu1 %v592_v49  ;;  %v15500_v49 = vld [vmem:[%s16914_s29 + $0x1c04] ss:$16 sps:$4 sm:$0xff]  }
 0x3b5   : > { %10558 = vmatpush1.bf16.msra.mxu0 %v15407_v30  ;;  %11583 = vmatpush1.bf16.msra.mxu1 %v15410_v51  ;;  %v15503_v30 = vld [vmem:[%s16914_s29 + $0x1c0c] ss:$16 sps:$4 sm:$0xff]   ;;  %v439_v51 = vcombine.high %v17972_v46, %v17972_v46 }
 0x3b6   : > { %10559 = vmatprep.subr.bf16.mxu0 %v15415_v52  ;;  %11584 = vmatprep.subr.bf16.mxu1 %v15418_v33  ;;  %v591_v52 = vpack.c.bf16 %v17897_v38, %v17897_v38  ;;  %v15498_v33 = vld [vmem:[%s16914_s29 + $0x1c00] ss:$16 sps:$4 sm:$0xff]  }
 0x3b7   : > { %v15504_v38 = vld [vmem:[%s16914_s29 + $0x1c20] ss:$16 sps:$4 sm:$0xff]  }
 0x3b9   : > { %10560 = vmatpush1.bf16.msra.mxu0 %v15413_v53  ;;  %11585 = vmatpush1.bf16.msra.mxu1 %v15416_v54  ;;  %v15501_v53 = vld [vmem:[%s16914_s29 + $0x1c08] ss:$16 sps:$4 sm:$0xff]   ;;  %v15506_v54 = vld [vmem:[%s16914_s29 + $0x1c24] ss:$16 sps:$4 sm:$0xff]  }
 0x3ba   : > { %10561 = vmatprep.subr.bf16.mxu0 %v15421_v55  ;;  %11586 = vmatprep.subr.bf16.mxu1 %v15424_v56  ;;  %v15509_v55 = vld [vmem:[%s16914_s29 + $0x1c2c] ss:$16 sps:$4 sm:$0xff]   ;;  %v594_v56 = vpack.c.bf16 %v439_v51, %v439_v51  ;;  %v15582_v51 = vld [vmem:[%s16914_s29 + $0x1dc0] ss:$16 sps:$4 sm:$0xff]  }
 0x3bd   : > { %10562 = vmatpush1.bf16.msra.mxu0 %v15419_v43  ;;  %11587 = vmatpush1.bf16.msra.mxu1 %v15422_v58  ;;  %v15507_v43 = vld [vmem:[%s16914_s29 + $0x1c28] ss:$16 sps:$4 sm:$0xff]   ;;  %v15512_v58 = vld [vmem:[%s16914_s29 + $0x1c44] ss:$16 sps:$4 sm:$0xff]  }
 0x3be   : > { %10563 = vmatprep.subr.bf16.mxu0 %v15427_v41  ;;  %11588 = vmatprep.subr.bf16.mxu1 %v15430_v60  ;;  %v15515_v41 = vld [vmem:[%s16914_s29 + $0x1c4c] ss:$16 sps:$4 sm:$0xff]   ;;  %v15510_v60 = vld [vmem:[%s16914_s29 + $0x1c40] ss:$16 sps:$4 sm:$0xff]  }
 0x3c1   : > { %10564 = vmatpush1.bf16.msra.mxu0 %v15425_v61  ;;  %11589 = vmatpush1.bf16.msra.mxu1 %v15428_v62  ;;  %v15513_v61 = vld [vmem:[%s16914_s29 + $0x1c48] ss:$16 sps:$4 sm:$0xff]   ;;  %v15518_v62 = vld [vmem:[%s16914_s29 + $0x1c64] ss:$16 sps:$4 sm:$0xff]  }
 0x3c2   : > { %10565 = vmatprep.subr.bf16.mxu0 %v15433_v0  ;;  %11590 = vmatprep.subr.bf16.mxu1 %v15436_v1  ;;  %v15521_v0 = vld [vmem:[%s16914_s29 + $0x1c6c] ss:$16 sps:$4 sm:$0xff]   ;;  %v15516_v1 = vld [vmem:[%s16914_s29 + $0x1c60] ss:$16 sps:$4 sm:$0xff]  }
 0x3c5   : > { %10566 = vmatpush1.bf16.msra.mxu0 %v15431_v2  ;;  %11591 = vmatpush1.bf16.msra.mxu1 %v15434_v48  ;;  %v15519_v2 = vld [vmem:[%s16914_s29 + $0x1c68] ss:$16 sps:$4 sm:$0xff]   ;;  %v15524_v48 = vld [vmem:[%s16914_s29 + $0x1c84] ss:$16 sps:$4 sm:$0xff]  }
 0x3c6   : > { %10567 = vmatprep.subr.bf16.mxu0 %v15439_v3  ;;  %11592 = vmatprep.subr.bf16.mxu1 %v15442_v4  ;;  %v15527_v3 = vld [vmem:[%s16914_s29 + $0x1c8c] ss:$16 sps:$4 sm:$0xff]   ;;  %v15522_v4 = vld [vmem:[%s16914_s29 + $0x1c80] ss:$16 sps:$4 sm:$0xff]  }
 0x3c9   : > { %10568 = vmatpush1.bf16.msra.mxu0 %v15437_v5  ;;  %11593 = vmatpush1.bf16.msra.mxu1 %v15440_v6  ;;  %v15525_v5 = vld [vmem:[%s16914_s29 + $0x1c88] ss:$16 sps:$4 sm:$0xff]   ;;  %v15530_v6 = vld [vmem:[%s16914_s29 + $0x1ca4] ss:$16 sps:$4 sm:$0xff]  }
 0x3ca   : > { %10569 = vmatprep.subr.bf16.mxu0 %v15445_v59  ;;  %11594 = vmatprep.subr.bf16.mxu1 %v15448_v8  ;;  %v15533_v59 = vld [vmem:[%s16914_s29 + $0x1cac] ss:$16 sps:$4 sm:$0xff]   ;;  %v15528_v8 = vld [vmem:[%s16914_s29 + $0x1ca0] ss:$16 sps:$4 sm:$0xff]  }
 0x3cd   : > { %10570 = vmatpush1.bf16.msra.mxu0 %v15443_v57  ;;  %11595 = vmatpush1.bf16.msra.mxu1 %v15446_v11  ;;  %v15531_v57 = vld [vmem:[%s16914_s29 + $0x1ca8] ss:$16 sps:$4 sm:$0xff]   ;;  %v15536_v11 = vld [vmem:[%s16914_s29 + $0x1cc4] ss:$16 sps:$4 sm:$0xff]  }
 0x3ce   : > { %10571 = vmatprep.subr.bf16.mxu0 %v15451_v12  ;;  %11596 = vmatprep.subr.bf16.mxu1 %v15454_v13  ;;  %v15539_v12 = vld [vmem:[%s16914_s29 + $0x1ccc] ss:$16 sps:$4 sm:$0xff]   ;;  %v15534_v13 = vld [vmem:[%s16914_s29 + $0x1cc0] ss:$16 sps:$4 sm:$0xff]  }
 0x3d1   : > { %10572 = vmatpush1.bf16.msra.mxu0 %v15449_v15  ;;  %11597 = vmatpush1.bf16.msra.mxu1 %v15452_v16  ;;  %v15537_v15 = vld [vmem:[%s16914_s29 + $0x1cc8] ss:$16 sps:$4 sm:$0xff]   ;;  %v15542_v16 = vld [vmem:[%s16914_s29 + $0x1ce4] ss:$16 sps:$4 sm:$0xff]  }
 0x3d2   : > { %10573 = vmatprep.subr.bf16.mxu0 %v15457_v17  ;;  %11598 = vmatprep.subr.bf16.mxu1 %v15460_v63  ;;  %v15545_v17 = vld [vmem:[%s16914_s29 + $0x1cec] ss:$16 sps:$4 sm:$0xff]   ;;  %v15540_v63 = vld [vmem:[%s16914_s29 + $0x1ce0] ss:$16 sps:$4 sm:$0xff]  }
 0x3d5   : > { %10574 = vmatpush1.bf16.msra.mxu0 %v15455_v18  ;;  %11599 = vmatpush1.bf16.msra.mxu1 %v15458_v19  ;;  %v15543_v18 = vld [vmem:[%s16914_s29 + $0x1ce8] ss:$16 sps:$4 sm:$0xff]   ;;  %v15548_v19 = vld [vmem:[%s16914_s29 + $0x1d04] ss:$16 sps:$4 sm:$0xff]  }
 0x3d6   : > { %10575 = vmatprep.subr.bf16.mxu0 %v15463_v20  ;;  %11600 = vmatprep.subr.bf16.mxu1 %v15466_v21  ;;  %v15551_v20 = vld [vmem:[%s16914_s29 + $0x1d0c] ss:$16 sps:$4 sm:$0xff]   ;;  %v15546_v21 = vld [vmem:[%s16914_s29 + $0x1d00] ss:$16 sps:$4 sm:$0xff]  }
 0x3d9   : > { %10576 = vmatpush1.bf16.msra.mxu0 %v15461_v9  ;;  %11601 = vmatpush1.bf16.msra.mxu1 %v15464_v23  ;;  %v15549_v9 = vld [vmem:[%s16914_s29 + $0x1d08] ss:$16 sps:$4 sm:$0xff]   ;;  %v15554_v23 = vld [vmem:[%s16914_s29 + $0x1d24] ss:$16 sps:$4 sm:$0xff]  }
 0x3da   : > { %10577 = vmatprep.subr.bf16.mxu0 %v15469_v7  ;;  %11602 = vmatprep.subr.bf16.mxu1 %v15472_v24  ;;  %v15557_v7 = vld [vmem:[%s16914_s29 + $0x1d2c] ss:$16 sps:$4 sm:$0xff]   ;;  %v15552_v24 = vld [vmem:[%s16914_s29 + $0x1d20] ss:$16 sps:$4 sm:$0xff]  }
 0x3dd   : > { %10578 = vmatpush1.bf16.msra.mxu0 %v15467_v10  ;;  %11603 = vmatpush1.bf16.msra.mxu1 %v15470_v28  ;;  %v15555_v10 = vld [vmem:[%s16914_s29 + $0x1d28] ss:$16 sps:$4 sm:$0xff]   ;;  %v15560_v28 = vld [vmem:[%s16914_s29 + $0x1d44] ss:$16 sps:$4 sm:$0xff]  }
 0x3de   : > { %10579 = vmatprep.subr.bf16.mxu0 %v15475_v31  ;;  %11604 = vmatprep.subr.bf16.mxu1 %v15478_v32  ;;  %v15563_v31 = vld [vmem:[%s16914_s29 + $0x1d4c] ss:$16 sps:$4 sm:$0xff]   ;;  %v15558_v32 = vld [vmem:[%s16914_s29 + $0x1d40] ss:$16 sps:$4 sm:$0xff]  }
 0x3e1   : > { %10580 = vmatpush1.bf16.msra.mxu0 %v15473_v34  ;;  %11605 = vmatpush1.bf16.msra.mxu1 %v15476_v14  ;;  %v15561_v34 = vld [vmem:[%s16914_s29 + $0x1d48] ss:$16 sps:$4 sm:$0xff]   ;;  %v15566_v14 = vld [vmem:[%s16914_s29 + $0x1d64] ss:$16 sps:$4 sm:$0xff]  }
 0x3e2   : > { %10581 = vmatprep.subr.bf16.mxu0 %v15481_v35  ;;  %11606 = vmatprep.subr.bf16.mxu1 %v15484_v36  ;;  %v15569_v35 = vld [vmem:[%s16914_s29 + $0x1d6c] ss:$16 sps:$4 sm:$0xff]   ;;  %v15564_v36 = vld [vmem:[%s16914_s29 + $0x1d60] ss:$16 sps:$4 sm:$0xff]  }
 0x3e5   : > { %10582 = vmatpush1.bf16.msra.mxu0 %v15479_v27  ;;  %11607 = vmatpush1.bf16.msra.mxu1 %v15482_v37  ;;  %v15567_v27 = vld [vmem:[%s16914_s29 + $0x1d68] ss:$16 sps:$4 sm:$0xff]   ;;  %v15572_v37 = vld [vmem:[%s16914_s29 + $0x1d84] ss:$16 sps:$4 sm:$0xff]  }
 0x3e6   : > { %10583 = vmatprep.subr.bf16.mxu0 %v15487_v25  ;;  %11608 = vmatprep.subr.bf16.mxu1 %v15490_v39  ;;  %v15575_v25 = vld [vmem:[%s16914_s29 + $0x1d8c] ss:$16 sps:$4 sm:$0xff]   ;;  %v15570_v39 = vld [vmem:[%s16914_s29 + $0x1d80] ss:$16 sps:$4 sm:$0xff]  }
 0x3e9   : > { %10584 = vmatpush1.bf16.msra.mxu0 %v15485_v22  ;;  %11609 = vmatpush1.bf16.msra.mxu1 %v15488_v29  ;;  %v15573_v22 = vld [vmem:[%s16914_s29 + $0x1d88] ss:$16 sps:$4 sm:$0xff]   ;;  %v15578_v29 = vld [vmem:[%s16914_s29 + $0x1da4] ss:$16 sps:$4 sm:$0xff]  }
 0x3ea   : > { %10585 = vmatprep.subr.bf16.mxu0 %v15493_v42  ;;  %11610 = vmatprep.subr.bf16.mxu1 %v15496_v45  ;;  %v15581_v42 = vld [vmem:[%s16914_s29 + $0x1dac] ss:$16 sps:$4 sm:$0xff]   ;;  %v15576_v45 = vld [vmem:[%s16914_s29 + $0x1da0] ss:$16 sps:$4 sm:$0xff]  }
 0x3ed   : > { %10586 = vmatpush1.bf16.msra.mxu0 %v15491_v26  ;;  %11611 = vmatpush1.bf16.msra.mxu1 %v15494_v47  ;;  %v15579_v26 = vld [vmem:[%s16914_s29 + $0x1da8] ss:$16 sps:$4 sm:$0xff]   ;;  %v15584_v47 = vld [vmem:[%s16914_s29 + $0x1dc4] ss:$16 sps:$4 sm:$0xff]  }
 0x3ee   : > { %10596 = vmatprep.subr.bf16.mxu0 %v15500_v49  ;;  %11621 = vmatprep.subr.bf16.mxu1 %v15503_v30  ;;  %v15587_v49 = vld [vmem:[%s16914_s29 + $0x1dcc] ss:$16 sps:$4 sm:$0xff]   ;;  %v424_v30 = vcombine.high %v17964_v40, %v17964_v40  ;;  %v15588_v40 = vld [vmem:[%s16914_s29 + $0x1de0] ss:$16 sps:$4 sm:$0xff]  }
 0x3f0   : > { %10588 = vmatmul.mubr.bf16.vlgmr.msra.gmra.mrb[0].mxu0 %v591_v52  ;;  %11613 = vmatmul.mubr.bf16.vlgmr.msra.gmra.mrb[0].mxu1 %v591_v52  ;;  %v15585_v52 = vld [vmem:[%s16914_s29 + $0x1dc8] ss:$16 sps:$4 sm:$0xff]  }
 0x3f1   : > { %10597 = vmatpush1.bf16.msra.mxu0 %v15498_v33  ;;  %11622 = vmatpush1.bf16.msra.mxu1 %v15501_v53  ;;  %v15590_v33 = vld [vmem:[%s16914_s29 + $0x1de4] ss:$16 sps:$4 sm:$0xff]   ;;  %v15593_v53 = vld [vmem:[%s16914_s29 + $0x1dec] ss:$16 sps:$4 sm:$0xff]  }
 0x3f2   : > { %10598 = vmatprep.subr.bf16.mxu0 %v15506_v54  ;;  %11623 = vmatprep.subr.bf16.mxu1 %v15509_v55  ;;  %v18045_v54 = vrot.slane %v424_v30, %v16988_v50  ;;  %v15591_v55 = vld [vmem:[%s16914_s29 + $0x1de8] ss:$16 sps:$4 sm:$0xff]  }
 0x3f3   : > { %10628 = vmatprep.mubr.bf16.mxu0 %v594_v56  ;;  %11653 = vmatprep.mubr.bf16.mxu1 %v594_v56  ;;  %v15596_v56 = vld [vmem:[%s16914_s29 + $0x1e04] ss:$16 sps:$4 sm:$0xff]   ;;  %v15669_v30 = vld [vmem:[%s16914_s29 + $0x1f88] ss:$16 sps:$4 sm:$0xff]  }
 0x3f5   : > { %10599 = vmatpush1.bf16.msra.mxu0 %v15504_v38  ;;  %11624 = vmatpush1.bf16.msra.mxu1 %v15507_v43  ;;  %v15599_v38 = vld [vmem:[%s16914_s29 + $0x1e0c] ss:$16 sps:$4 sm:$0xff]   ;;  %v440_v43 = vcombine.high %v18045_v54, %v18045_v54 }
 0x3f6   : > { %10600 = vmatprep.subr.bf16.mxu0 %v15512_v58  ;;  %11625 = vmatprep.subr.bf16.mxu1 %v15515_v41  ;;  %v593_v58 = vpack.c.bf16 %v17972_v46, %v17972_v46  ;;  %v15594_v41 = vld [vmem:[%s16914_s29 + $0x1e00] ss:$16 sps:$4 sm:$0xff]  }
 0x3f7   : > { %v15600_v46 = vld [vmem:[%s16914_s29 + $0x1e20] ss:$16 sps:$4 sm:$0xff]  }
 0x3f9   : > { %10601 = vmatpush1.bf16.msra.mxu0 %v15510_v60  ;;  %11626 = vmatpush1.bf16.msra.mxu1 %v15513_v61  ;;  %v15597_v60 = vld [vmem:[%s16914_s29 + $0x1e08] ss:$16 sps:$4 sm:$0xff]   ;;  %v15602_v61 = vld [vmem:[%s16914_s29 + $0x1e24] ss:$16 sps:$4 sm:$0xff]  }
 0x3fa   : > { %10602 = vmatprep.subr.bf16.mxu0 %v15518_v62  ;;  %11627 = vmatprep.subr.bf16.mxu1 %v15521_v0  ;;  %v15605_v62 = vld [vmem:[%s16914_s29 + $0x1e2c] ss:$16 sps:$4 sm:$0xff]   ;;  %v596_v0 = vpack.c.bf16 %v440_v43, %v440_v43  ;;  %v15681_v43 = vld [vmem:[%s16914_s29 + $0x1fc8] ss:$16 sps:$4 sm:$0xff]  }
 0x3fd   : > { %10603 = vmatpush1.bf16.msra.mxu0 %v15516_v1  ;;  %11628 = vmatpush1.bf16.msra.mxu1 %v15519_v2  ;;  %v15603_v1 = vld [vmem:[%s16914_s29 + $0x1e28] ss:$16 sps:$4 sm:$0xff]   ;;  %v15608_v2 = vld [vmem:[%s16914_s29 + $0x1e44] ss:$16 sps:$4 sm:$0xff]  }
 0x3fe   : > { %10604 = vmatprep.subr.bf16.mxu0 %v15524_v48  ;;  %11629 = vmatprep.subr.bf16.mxu1 %v15527_v3  ;;  %v15611_v48 = vld [vmem:[%s16914_s29 + $0x1e4c] ss:$16 sps:$4 sm:$0xff]   ;;  %v15606_v3 = vld [vmem:[%s16914_s29 + $0x1e40] ss:$16 sps:$4 sm:$0xff]  }
 0x401   : > { %10605 = vmatpush1.bf16.msra.mxu0 %v15522_v4  ;;  %11630 = vmatpush1.bf16.msra.mxu1 %v15525_v5  ;;  %v15609_v4 = vld [vmem:[%s16914_s29 + $0x1e48] ss:$16 sps:$4 sm:$0xff]   ;;  %v15614_v5 = vld [vmem:[%s16914_s29 + $0x1e64] ss:$16 sps:$4 sm:$0xff]  }
 0x402   : > { %10606 = vmatprep.subr.bf16.mxu0 %v15530_v6  ;;  %11631 = vmatprep.subr.bf16.mxu1 %v15533_v59  ;;  %v15617_v6 = vld [vmem:[%s16914_s29 + $0x1e6c] ss:$16 sps:$4 sm:$0xff]   ;;  %v15612_v59 = vld [vmem:[%s16914_s29 + $0x1e60] ss:$16 sps:$4 sm:$0xff]  }
 0x405   : > { %10607 = vmatpush1.bf16.msra.mxu0 %v15528_v8  ;;  %11632 = vmatpush1.bf16.msra.mxu1 %v15531_v57  ;;  %v15615_v8 = vld [vmem:[%s16914_s29 + $0x1e68] ss:$16 sps:$4 sm:$0xff]   ;;  %v15620_v57 = vld [vmem:[%s16914_s29 + $0x1e84] ss:$16 sps:$4 sm:$0xff]  }
 0x406   : > { %10608 = vmatprep.subr.bf16.mxu0 %v15536_v11  ;;  %11633 = vmatprep.subr.bf16.mxu1 %v15539_v12  ;;  %v15623_v11 = vld [vmem:[%s16914_s29 + $0x1e8c] ss:$16 sps:$4 sm:$0xff]   ;;  %v15618_v12 = vld [vmem:[%s16914_s29 + $0x1e80] ss:$16 sps:$4 sm:$0xff]  }
 0x409   : > { %10609 = vmatpush1.bf16.msra.mxu0 %v15534_v13  ;;  %11634 = vmatpush1.bf16.msra.mxu1 %v15537_v15  ;;  %v15621_v13 = vld [vmem:[%s16914_s29 + $0x1e88] ss:$16 sps:$4 sm:$0xff]   ;;  %v15626_v15 = vld [vmem:[%s16914_s29 + $0x1ea4] ss:$16 sps:$4 sm:$0xff]  }
 0x40a   : > { %10610 = vmatprep.subr.bf16.mxu0 %v15542_v16  ;;  %11635 = vmatprep.subr.bf16.mxu1 %v15545_v17  ;;  %v15629_v16 = vld [vmem:[%s16914_s29 + $0x1eac] ss:$16 sps:$4 sm:$0xff]   ;;  %v15624_v17 = vld [vmem:[%s16914_s29 + $0x1ea0] ss:$16 sps:$4 sm:$0xff]  }
 0x40d   : > { %10611 = vmatpush1.bf16.msra.mxu0 %v15540_v63  ;;  %11636 = vmatpush1.bf16.msra.mxu1 %v15543_v18  ;;  %v15627_v63 = vld [vmem:[%s16914_s29 + $0x1ea8] ss:$16 sps:$4 sm:$0xff]   ;;  %v15632_v18 = vld [vmem:[%s16914_s29 + $0x1ec4] ss:$16 sps:$4 sm:$0xff]  }
 0x40e   : > { %10612 = vmatprep.subr.bf16.mxu0 %v15548_v19  ;;  %11637 = vmatprep.subr.bf16.mxu1 %v15551_v20  ;;  %v15635_v19 = vld [vmem:[%s16914_s29 + $0x1ecc] ss:$16 sps:$4 sm:$0xff]   ;;  %v15630_v20 = vld [vmem:[%s16914_s29 + $0x1ec0] ss:$16 sps:$4 sm:$0xff]  }
 0x411   : > { %10613 = vmatpush1.bf16.msra.mxu0 %v15546_v21  ;;  %11638 = vmatpush1.bf16.msra.mxu1 %v15549_v9  ;;  %v15633_v21 = vld [vmem:[%s16914_s29 + $0x1ec8] ss:$16 sps:$4 sm:$0xff]   ;;  %v15638_v9 = vld [vmem:[%s16914_s29 + $0x1ee4] ss:$16 sps:$4 sm:$0xff]  }
 0x412   : > { %10614 = vmatprep.subr.bf16.mxu0 %v15554_v23  ;;  %11639 = vmatprep.subr.bf16.mxu1 %v15557_v7  ;;  %v15641_v23 = vld [vmem:[%s16914_s29 + $0x1eec] ss:$16 sps:$4 sm:$0xff]   ;;  %v15636_v7 = vld [vmem:[%s16914_s29 + $0x1ee0] ss:$16 sps:$4 sm:$0xff]  }
 0x415   : > { %10615 = vmatpush1.bf16.msra.mxu0 %v15552_v24  ;;  %11640 = vmatpush1.bf16.msra.mxu1 %v15555_v10  ;;  %v15639_v24 = vld [vmem:[%s16914_s29 + $0x1ee8] ss:$16 sps:$4 sm:$0xff]   ;;  %v15644_v10 = vld [vmem:[%s16914_s29 + $0x1f04] ss:$16 sps:$4 sm:$0xff]  }
 0x416   : > { %10616 = vmatprep.subr.bf16.mxu0 %v15560_v28  ;;  %11641 = vmatprep.subr.bf16.mxu1 %v15563_v31  ;;  %v15647_v28 = vld [vmem:[%s16914_s29 + $0x1f0c] ss:$16 sps:$4 sm:$0xff]   ;;  %v15642_v31 = vld [vmem:[%s16914_s29 + $0x1f00] ss:$16 sps:$4 sm:$0xff]  }
 0x419   : > { %10617 = vmatpush1.bf16.msra.mxu0 %v15558_v32  ;;  %11642 = vmatpush1.bf16.msra.mxu1 %v15561_v34  ;;  %v15645_v32 = vld [vmem:[%s16914_s29 + $0x1f08] ss:$16 sps:$4 sm:$0xff]   ;;  %v15650_v34 = vld [vmem:[%s16914_s29 + $0x1f24] ss:$16 sps:$4 sm:$0xff]  }
 0x41a   : > { %10618 = vmatprep.subr.bf16.mxu0 %v15566_v14  ;;  %11643 = vmatprep.subr.bf16.mxu1 %v15569_v35  ;;  %v15653_v14 = vld [vmem:[%s16914_s29 + $0x1f2c] ss:$16 sps:$4 sm:$0xff]   ;;  %v15648_v35 = vld [vmem:[%s16914_s29 + $0x1f20] ss:$16 sps:$4 sm:$0xff]  }
 0x41d   : > { %10619 = vmatpush1.bf16.msra.mxu0 %v15564_v36  ;;  %11644 = vmatpush1.bf16.msra.mxu1 %v15567_v27  ;;  %v15651_v36 = vld [vmem:[%s16914_s29 + $0x1f28] ss:$16 sps:$4 sm:$0xff]   ;;  %v15656_v27 = vld [vmem:[%s16914_s29 + $0x1f44] ss:$16 sps:$4 sm:$0xff]  }
 0x41e   : > { %10620 = vmatprep.subr.bf16.mxu0 %v15572_v37  ;;  %11645 = vmatprep.subr.bf16.mxu1 %v15575_v25  ;;  %v15659_v37 = vld [vmem:[%s16914_s29 + $0x1f4c] ss:$16 sps:$4 sm:$0xff]   ;;  %v15654_v25 = vld [vmem:[%s16914_s29 + $0x1f40] ss:$16 sps:$4 sm:$0xff]  }
 0x421   : > { %10621 = vmatpush1.bf16.msra.mxu0 %v15570_v39  ;;  %11646 = vmatpush1.bf16.msra.mxu1 %v15573_v22  ;;  %v15657_v39 = vld [vmem:[%s16914_s29 + $0x1f48] ss:$16 sps:$4 sm:$0xff]   ;;  %v15662_v22 = vld [vmem:[%s16914_s29 + $0x1f64] ss:$16 sps:$4 sm:$0xff]  }
 0x422   : > { %10622 = vmatprep.subr.bf16.mxu0 %v15578_v29  ;;  %11647 = vmatprep.subr.bf16.mxu1 %v15581_v42  ;;  %v15665_v29 = vld [vmem:[%s16914_s29 + $0x1f6c] ss:$16 sps:$4 sm:$0xff]   ;;  %v15660_v42 = vld [vmem:[%s16914_s29 + $0x1f60] ss:$16 sps:$4 sm:$0xff]  }
 0x425   : > { %10623 = vmatpush1.bf16.msra.mxu0 %v15576_v45  ;;  %11648 = vmatpush1.bf16.msra.mxu1 %v15579_v26  ;;  %v15663_v45 = vld [vmem:[%s16914_s29 + $0x1f68] ss:$16 sps:$4 sm:$0xff]   ;;  %v15668_v26 = vld [vmem:[%s16914_s29 + $0x1f84] ss:$16 sps:$4 sm:$0xff]  }
 0x426   : > { %10624 = vmatprep.subr.bf16.mxu0 %v15584_v47  ;;  %11649 = vmatprep.subr.bf16.mxu1 %v15587_v49  ;;  %v15671_v47 = vld [vmem:[%s16914_s29 + $0x1f8c] ss:$16 sps:$4 sm:$0xff]   ;;  %v15666_v49 = vld [vmem:[%s16914_s29 + $0x1f80] ss:$16 sps:$4 sm:$0xff]  }
 0x429   : > { %10625 = vmatpush1.bf16.msra.mxu0 %v15582_v51  ;;  %11650 = vmatpush1.bf16.msra.mxu1 %v15585_v52  ;;  %v15674_v51 = vld [vmem:[%s16914_s29 + $0x1fa4] ss:$16 sps:$4 sm:$0xff]   ;;  %v15677_v52 = vld [vmem:[%s16914_s29 + $0x1fac] ss:$16 sps:$4 sm:$0xff]  }
 0x42a   : > { %10626 = vmatprep.subr.bf16.mxu0 %v15590_v33  ;;  %11651 = vmatprep.subr.bf16.mxu1 %v15593_v53  ;;  %v15672_v33 = vld [vmem:[%s16914_s29 + $0x1fa0] ss:$16 sps:$4 sm:$0xff]   ;;  %v15675_v53 = vld [vmem:[%s16914_s29 + $0x1fa8] ss:$16 sps:$4 sm:$0xff]  }
 0x42d   : > { %10627 = vmatpush1.bf16.msra.mxu0 %v15588_v40  ;;  %11652 = vmatpush1.bf16.msra.mxu1 %v15591_v55  ;;  %v15680_v40 = vld [vmem:[%s16914_s29 + $0x1fc4] ss:$16 sps:$4 sm:$0xff]   ;;  %v15683_v55 = vld [vmem:[%s16914_s29 + $0x1fcc] ss:$16 sps:$4 sm:$0xff]  }
 0x42e   : > { %10637 = vmatprep.subr.bf16.mxu0 %v15596_v56  ;;  %11662 = vmatprep.subr.bf16.mxu1 %v15599_v38  ;;  %v18112_v56 = vld [vmem:[%s16938_s9 + $0x40] sm:$0xff]  ;;  %v15678_v38 = vld [vmem:[%s16914_s29 + $0x1fc0] ss:$16 sps:$4 sm:$0xff]  }
 0x430   : > { %10629 = vmatmul.mubr.bf16.vlgmr.msra.gmra.mrb[0].mxu0 %v593_v58  ;;  %11654 = vmatmul.mubr.bf16.vlgmr.msra.gmra.mrb[0].mxu1 %v593_v58  ;;  %v15686_v58 = vld [vmem:[%s16914_s29 + $0x1fe4] ss:$16 sps:$4 sm:$0xff]  }
 0x431   : > { %10638 = vmatpush1.bf16.msra.mxu0 %v15594_v41  ;;  %11663 = vmatpush1.bf16.msra.mxu1 %v15597_v60  ;;  %v15689_v41 = vld [vmem:[%s16914_s29 + $0x1fec] ss:$16 sps:$4 sm:$0xff]   ;;  %v18120_v60 = vrot.slane %v18112_v56, %v16988_v50 }
 0x432   : > { %10639 = vmatprep.subr.bf16.mxu0 %v15602_v61  ;;  %11664 = vmatprep.subr.bf16.mxu1 %v15605_v62  ;;  %v15684_v61 = vld [vmem:[%s16914_s29 + $0x1fe0] ss:$16 sps:$4 sm:$0xff]   ;;  %v15687_v62 = vld [vmem:[%s16914_s29 + $0x1fe8] ss:$16 sps:$4 sm:$0xff]  }
 0x433   : > { %10669 = vmatprep.mubr.bf16.mxu0 %v596_v0  ;;  %11694 = vmatprep.mubr.bf16.mxu1 %v596_v0  ;;  %v15693_v0 = vld [vmem:[%s16914_s29 + $0x2004] ss:$16 sps:$4 sm:$0xff]  }
 0x435   : > { %10640 = vmatpush1.bf16.msra.mxu0 %v15600_v46  ;;  %11665 = vmatpush1.bf16.msra.mxu1 %v15603_v1  ;;  %v15696_v46 = vld [vmem:[%s16914_s29 + $0x200c] ss:$16 sps:$4 sm:$0xff]   ;;  %v456_v1 = vcombine.high %v18120_v60, %v18120_v60 }
 0x436   : > { %10641 = vmatprep.subr.bf16.mxu0 %v15608_v2  ;;  %11666 = vmatprep.subr.bf16.mxu1 %v15611_v48  ;;  %v595_v2 = vpack.c.bf16 %v18045_v54, %v18045_v54  ;;  %v15691_v48 = vld [vmem:[%s16914_s29 + $0x2000] ss:$16 sps:$4 sm:$0xff]  }
 0x437   : > { %v15697_v54 = vld [vmem:[%s16914_s29 + $0x2020] ss:$16 sps:$4 sm:$0xff]  }
 0x439   : > { %10642 = vmatpush1.bf16.msra.mxu0 %v15606_v3  ;;  %11667 = vmatpush1.bf16.msra.mxu1 %v15609_v4  ;;  %v15694_v3 = vld [vmem:[%s16914_s29 + $0x2008] ss:$16 sps:$4 sm:$0xff]   ;;  %v15699_v4 = vld [vmem:[%s16914_s29 + $0x2024] ss:$16 sps:$4 sm:$0xff]  }
 0x43a   : > { %10643 = vmatprep.subr.bf16.mxu0 %v15614_v5  ;;  %11668 = vmatprep.subr.bf16.mxu1 %v15617_v6  ;;  %v15702_v5 = vld [vmem:[%s16914_s29 + $0x202c] ss:$16 sps:$4 sm:$0xff]   ;;  %v598_v6 = vpack.c.bf16 %v456_v1, %v456_v1  ;;  %v15775_v1 = vld [vmem:[%s16914_s29 + $0x21c0] ss:$16 sps:$4 sm:$0xff]  }
 0x43d   : > { %10644 = vmatpush1.bf16.msra.mxu0 %v15612_v59  ;;  %11669 = vmatpush1.bf16.msra.mxu1 %v15615_v8  ;;  %v15700_v59 = vld [vmem:[%s16914_s29 + $0x2028] ss:$16 sps:$4 sm:$0xff]   ;;  %v15705_v8 = vld [vmem:[%s16914_s29 + $0x2044] ss:$16 sps:$4 sm:$0xff]  }
 0x43e   : > { %10645 = vmatprep.subr.bf16.mxu0 %v15620_v57  ;;  %11670 = vmatprep.subr.bf16.mxu1 %v15623_v11  ;;  %v15708_v57 = vld [vmem:[%s16914_s29 + $0x204c] ss:$16 sps:$4 sm:$0xff]   ;;  %v15703_v11 = vld [vmem:[%s16914_s29 + $0x2040] ss:$16 sps:$4 sm:$0xff]  }
 0x441   : > { %10646 = vmatpush1.bf16.msra.mxu0 %v15618_v12  ;;  %11671 = vmatpush1.bf16.msra.mxu1 %v15621_v13  ;;  %v15706_v12 = vld [vmem:[%s16914_s29 + $0x2048] ss:$16 sps:$4 sm:$0xff]   ;;  %v15711_v13 = vld [vmem:[%s16914_s29 + $0x2064] ss:$16 sps:$4 sm:$0xff]  }
 0x442   : > { %10647 = vmatprep.subr.bf16.mxu0 %v15626_v15  ;;  %11672 = vmatprep.subr.bf16.mxu1 %v15629_v16  ;;  %v15714_v15 = vld [vmem:[%s16914_s29 + $0x206c] ss:$16 sps:$4 sm:$0xff]   ;;  %v15709_v16 = vld [vmem:[%s16914_s29 + $0x2060] ss:$16 sps:$4 sm:$0xff]  }
 0x445   : > { %10648 = vmatpush1.bf16.msra.mxu0 %v15624_v17  ;;  %11673 = vmatpush1.bf16.msra.mxu1 %v15627_v63  ;;  %v15712_v17 = vld [vmem:[%s16914_s29 + $0x2068] ss:$16 sps:$4 sm:$0xff]   ;;  %v15717_v63 = vld [vmem:[%s16914_s29 + $0x2084] ss:$16 sps:$4 sm:$0xff]  }
 0x446   : > { %10649 = vmatprep.subr.bf16.mxu0 %v15632_v18  ;;  %11674 = vmatprep.subr.bf16.mxu1 %v15635_v19  ;;  %v15720_v18 = vld [vmem:[%s16914_s29 + $0x208c] ss:$16 sps:$4 sm:$0xff]   ;;  %v15715_v19 = vld [vmem:[%s16914_s29 + $0x2080] ss:$16 sps:$4 sm:$0xff]  }
 0x449   : > { %10650 = vmatpush1.bf16.msra.mxu0 %v15630_v20  ;;  %11675 = vmatpush1.bf16.msra.mxu1 %v15633_v21  ;;  %v15718_v20 = vld [vmem:[%s16914_s29 + $0x2088] ss:$16 sps:$4 sm:$0xff]   ;;  %v15723_v21 = vld [vmem:[%s16914_s29 + $0x20a4] ss:$16 sps:$4 sm:$0xff]  }
 0x44a   : > { %10651 = vmatprep.subr.bf16.mxu0 %v15638_v9  ;;  %11676 = vmatprep.subr.bf16.mxu1 %v15641_v23  ;;  %v15726_v9 = vld [vmem:[%s16914_s29 + $0x20ac] ss:$16 sps:$4 sm:$0xff]   ;;  %v15721_v23 = vld [vmem:[%s16914_s29 + $0x20a0] ss:$16 sps:$4 sm:$0xff]  }
 0x44d   : > { %10652 = vmatpush1.bf16.msra.mxu0 %v15636_v7  ;;  %11677 = vmatpush1.bf16.msra.mxu1 %v15639_v24  ;;  %v15724_v7 = vld [vmem:[%s16914_s29 + $0x20a8] ss:$16 sps:$4 sm:$0xff]   ;;  %v15729_v24 = vld [vmem:[%s16914_s29 + $0x20c4] ss:$16 sps:$4 sm:$0xff]  }
 0x44e   : > { %10653 = vmatprep.subr.bf16.mxu0 %v15644_v10  ;;  %11678 = vmatprep.subr.bf16.mxu1 %v15647_v28  ;;  %v15732_v10 = vld [vmem:[%s16914_s29 + $0x20cc] ss:$16 sps:$4 sm:$0xff]   ;;  %v15727_v28 = vld [vmem:[%s16914_s29 + $0x20c0] ss:$16 sps:$4 sm:$0xff]  }
 0x451   : > { %10654 = vmatpush1.bf16.msra.mxu0 %v15642_v31  ;;  %11679 = vmatpush1.bf16.msra.mxu1 %v15645_v32  ;;  %v15730_v31 = vld [vmem:[%s16914_s29 + $0x20c8] ss:$16 sps:$4 sm:$0xff]   ;;  %v15735_v32 = vld [vmem:[%s16914_s29 + $0x20e4] ss:$16 sps:$4 sm:$0xff]  }
 0x452   : > { %10655 = vmatprep.subr.bf16.mxu0 %v15650_v34  ;;  %11680 = vmatprep.subr.bf16.mxu1 %v15653_v14  ;;  %v15738_v34 = vld [vmem:[%s16914_s29 + $0x20ec] ss:$16 sps:$4 sm:$0xff]   ;;  %v15733_v14 = vld [vmem:[%s16914_s29 + $0x20e0] ss:$16 sps:$4 sm:$0xff]  }
 0x455   : > { %10656 = vmatpush1.bf16.msra.mxu0 %v15648_v35  ;;  %11681 = vmatpush1.bf16.msra.mxu1 %v15651_v36  ;;  %v15736_v35 = vld [vmem:[%s16914_s29 + $0x20e8] ss:$16 sps:$4 sm:$0xff]   ;;  %v15741_v36 = vld [vmem:[%s16914_s29 + $0x2104] ss:$16 sps:$4 sm:$0xff]  }
 0x456   : > { %10657 = vmatprep.subr.bf16.mxu0 %v15656_v27  ;;  %11682 = vmatprep.subr.bf16.mxu1 %v15659_v37  ;;  %v15744_v27 = vld [vmem:[%s16914_s29 + $0x210c] ss:$16 sps:$4 sm:$0xff]   ;;  %v15739_v37 = vld [vmem:[%s16914_s29 + $0x2100] ss:$16 sps:$4 sm:$0xff]  }
 0x459   : > { %10658 = vmatpush1.bf16.msra.mxu0 %v15654_v25  ;;  %11683 = vmatpush1.bf16.msra.mxu1 %v15657_v39  ;;  %v15742_v25 = vld [vmem:[%s16914_s29 + $0x2108] ss:$16 sps:$4 sm:$0xff]   ;;  %v15747_v39 = vld [vmem:[%s16914_s29 + $0x2124] ss:$16 sps:$4 sm:$0xff]  }
 0x45a   : > { %10659 = vmatprep.subr.bf16.mxu0 %v15662_v22  ;;  %11684 = vmatprep.subr.bf16.mxu1 %v15665_v29  ;;  %v15750_v22 = vld [vmem:[%s16914_s29 + $0x212c] ss:$16 sps:$4 sm:$0xff]   ;;  %v15745_v29 = vld [vmem:[%s16914_s29 + $0x2120] ss:$16 sps:$4 sm:$0xff]  }
 0x45d   : > { %10660 = vmatpush1.bf16.msra.mxu0 %v15660_v42  ;;  %11685 = vmatpush1.bf16.msra.mxu1 %v15663_v45  ;;  %v15748_v42 = vld [vmem:[%s16914_s29 + $0x2128] ss:$16 sps:$4 sm:$0xff]   ;;  %v15753_v45 = vld [vmem:[%s16914_s29 + $0x2144] ss:$16 sps:$4 sm:$0xff]  }
 0x45e   : > { %10661 = vmatprep.subr.bf16.mxu0 %v15668_v26  ;;  %11686 = vmatprep.subr.bf16.mxu1 %v15671_v47  ;;  %v15756_v26 = vld [vmem:[%s16914_s29 + $0x214c] ss:$16 sps:$4 sm:$0xff]   ;;  %v15751_v47 = vld [vmem:[%s16914_s29 + $0x2140] ss:$16 sps:$4 sm:$0xff]  }
 0x461   : > { %10662 = vmatpush1.bf16.msra.mxu0 %v15666_v49  ;;  %11687 = vmatpush1.bf16.msra.mxu1 %v15669_v30  ;;  %v15754_v49 = vld [vmem:[%s16914_s29 + $0x2148] ss:$16 sps:$4 sm:$0xff]   ;;  %v15759_v30 = vld [vmem:[%s16914_s29 + $0x2164] ss:$16 sps:$4 sm:$0xff]  }
 0x462   : > { %10663 = vmatprep.subr.bf16.mxu0 %v15674_v51  ;;  %11688 = vmatprep.subr.bf16.mxu1 %v15677_v52  ;;  %v15762_v51 = vld [vmem:[%s16914_s29 + $0x216c] ss:$16 sps:$4 sm:$0xff]   ;;  %v15757_v52 = vld [vmem:[%s16914_s29 + $0x2160] ss:$16 sps:$4 sm:$0xff]  }
 0x465   : > { %10664 = vmatpush1.bf16.msra.mxu0 %v15672_v33  ;;  %11689 = vmatpush1.bf16.msra.mxu1 %v15675_v53  ;;  %v15760_v33 = vld [vmem:[%s16914_s29 + $0x2168] ss:$16 sps:$4 sm:$0xff]   ;;  %v15765_v53 = vld [vmem:[%s16914_s29 + $0x2184] ss:$16 sps:$4 sm:$0xff]  }
 0x466   : > { %10665 = vmatprep.subr.bf16.mxu0 %v15680_v40  ;;  %11690 = vmatprep.subr.bf16.mxu1 %v15683_v55  ;;  %v15768_v40 = vld [vmem:[%s16914_s29 + $0x218c] ss:$16 sps:$4 sm:$0xff]   ;;  %v15763_v55 = vld [vmem:[%s16914_s29 + $0x2180] ss:$16 sps:$4 sm:$0xff]  }
 0x469   : > { %10666 = vmatpush1.bf16.msra.mxu0 %v15678_v38  ;;  %11691 = vmatpush1.bf16.msra.mxu1 %v15681_v43  ;;  %v15766_v38 = vld [vmem:[%s16914_s29 + $0x2188] ss:$16 sps:$4 sm:$0xff]   ;;  %v15771_v43 = vld [vmem:[%s16914_s29 + $0x21a4] ss:$16 sps:$4 sm:$0xff]  }
 0x46a   : > { %10667 = vmatprep.subr.bf16.mxu0 %v15686_v58  ;;  %11692 = vmatprep.subr.bf16.mxu1 %v15689_v41  ;;  %v15774_v58 = vld [vmem:[%s16914_s29 + $0x21ac] ss:$16 sps:$4 sm:$0xff]   ;;  %v15769_v41 = vld [vmem:[%s16914_s29 + $0x21a0] ss:$16 sps:$4 sm:$0xff]  }
 0x46d   : > { %10668 = vmatpush1.bf16.msra.mxu0 %v15684_v61  ;;  %11693 = vmatpush1.bf16.msra.mxu1 %v15687_v62  ;;  %v15772_v61 = vld [vmem:[%s16914_s29 + $0x21a8] ss:$16 sps:$4 sm:$0xff]   ;;  %v15777_v62 = vld [vmem:[%s16914_s29 + $0x21c4] ss:$16 sps:$4 sm:$0xff]  }
 0x46e   : > { %10678 = vmatprep.subr.bf16.mxu0 %v15693_v0  ;;  %11703 = vmatprep.subr.bf16.mxu1 %v15696_v46  ;;  %v15780_v0 = vld [vmem:[%s16914_s29 + $0x21cc] ss:$16 sps:$4 sm:$0xff]   ;;  %v441_v46 = vcombine.high %v18112_v56, %v18112_v56  ;;  %v15781_v56 = vld [vmem:[%s16914_s29 + $0x21e0] ss:$16 sps:$4 sm:$0xff]  }
 0x470   : > { %10670 = vmatmul.mubr.bf16.vlgmr.msra.gmra.mrb[0].mxu0 %v595_v2  ;;  %11695 = vmatmul.mubr.bf16.vlgmr.msra.gmra.mrb[0].mxu1 %v595_v2  ;;  %v15778_v2 = vld [vmem:[%s16914_s29 + $0x21c8] ss:$16 sps:$4 sm:$0xff]  }
 0x471   : > { %10679 = vmatpush1.bf16.msra.mxu0 %v15691_v48  ;;  %11704 = vmatpush1.bf16.msra.mxu1 %v15694_v3  ;;  %v15783_v48 = vld [vmem:[%s16914_s29 + $0x21e4] ss:$16 sps:$4 sm:$0xff]   ;;  %v15786_v3 = vld [vmem:[%s16914_s29 + $0x21ec] ss:$16 sps:$4 sm:$0xff]  }
 0x472   : > { %10680 = vmatprep.subr.bf16.mxu0 %v15699_v4  ;;  %11705 = vmatprep.subr.bf16.mxu1 %v15702_v5  ;;  %v18193_v4 = vrot.slane %v441_v46, %v16988_v50  ;;  %v15784_v5 = vld [vmem:[%s16914_s29 + $0x21e8] ss:$16 sps:$4 sm:$0xff]  }
 0x473   : > { %10710 = vmatprep.mubr.bf16.mxu0 %v598_v6  ;;  %11735 = vmatprep.mubr.bf16.mxu1 %v598_v6  ;;  %v15789_v6 = vld [vmem:[%s16914_s29 + $0x2204] ss:$16 sps:$4 sm:$0xff]   ;;  %v15862_v46 = vld [vmem:[%s16914_s29 + $0x2388] ss:$16 sps:$4 sm:$0xff]  }
 0x475   : > { %10681 = vmatpush1.bf16.msra.mxu0 %v15697_v54  ;;  %11706 = vmatpush1.bf16.msra.mxu1 %v15700_v59  ;;  %v15792_v54 = vld [vmem:[%s16914_s29 + $0x220c] ss:$16 sps:$4 sm:$0xff]   ;;  %v457_v59 = vcombine.high %v18193_v4, %v18193_v4 }
 0x476   : > { %10682 = vmatprep.subr.bf16.mxu0 %v15705_v8  ;;  %11707 = vmatprep.subr.bf16.mxu1 %v15708_v57  ;;  %v597_v8 = vpack.c.bf16 %v18120_v60, %v18120_v60  ;;  %v15787_v57 = vld [vmem:[%s16914_s29 + $0x2200] ss:$16 sps:$4 sm:$0xff]  }
 0x477   : > { %v15793_v60 = vld [vmem:[%s16914_s29 + $0x2220] ss:$16 sps:$4 sm:$0xff]  }
 0x479   : > { %10683 = vmatpush1.bf16.msra.mxu0 %v15703_v11  ;;  %11708 = vmatpush1.bf16.msra.mxu1 %v15706_v12  ;;  %v15790_v11 = vld [vmem:[%s16914_s29 + $0x2208] ss:$16 sps:$4 sm:$0xff]   ;;  %v15795_v12 = vld [vmem:[%s16914_s29 + $0x2224] ss:$16 sps:$4 sm:$0xff]  }
 0x47a   : > { %10684 = vmatprep.subr.bf16.mxu0 %v15711_v13  ;;  %11709 = vmatprep.subr.bf16.mxu1 %v15714_v15  ;;  %v15798_v13 = vld [vmem:[%s16914_s29 + $0x222c] ss:$16 sps:$4 sm:$0xff]   ;;  %v600_v15 = vpack.c.bf16 %v457_v59, %v457_v59  ;;  %v15874_v59 = vld [vmem:[%s16914_s29 + $0x23c8] ss:$16 sps:$4 sm:$0xff]  }
 0x47d   : > { %10685 = vmatpush1.bf16.msra.mxu0 %v15709_v16  ;;  %11710 = vmatpush1.bf16.msra.mxu1 %v15712_v17  ;;  %v15796_v16 = vld [vmem:[%s16914_s29 + $0x2228] ss:$16 sps:$4 sm:$0xff]   ;;  %v15801_v17 = vld [vmem:[%s16914_s29 + $0x2244] ss:$16 sps:$4 sm:$0xff]  }
 0x47e   : > { %10686 = vmatprep.subr.bf16.mxu0 %v15717_v63  ;;  %11711 = vmatprep.subr.bf16.mxu1 %v15720_v18  ;;  %v15804_v63 = vld [vmem:[%s16914_s29 + $0x224c] ss:$16 sps:$4 sm:$0xff]   ;;  %v15799_v18 = vld [vmem:[%s16914_s29 + $0x2240] ss:$16 sps:$4 sm:$0xff]  }
 0x481   : > { %10687 = vmatpush1.bf16.msra.mxu0 %v15715_v19  ;;  %11712 = vmatpush1.bf16.msra.mxu1 %v15718_v20  ;;  %v15802_v19 = vld [vmem:[%s16914_s29 + $0x2248] ss:$16 sps:$4 sm:$0xff]   ;;  %v15807_v20 = vld [vmem:[%s16914_s29 + $0x2264] ss:$16 sps:$4 sm:$0xff]  }
 0x482   : > { %10688 = vmatprep.subr.bf16.mxu0 %v15723_v21  ;;  %11713 = vmatprep.subr.bf16.mxu1 %v15726_v9  ;;  %v15810_v21 = vld [vmem:[%s16914_s29 + $0x226c] ss:$16 sps:$4 sm:$0xff]   ;;  %v15805_v9 = vld [vmem:[%s16914_s29 + $0x2260] ss:$16 sps:$4 sm:$0xff]  }
 0x485   : > { %10689 = vmatpush1.bf16.msra.mxu0 %v15721_v23  ;;  %11714 = vmatpush1.bf16.msra.mxu1 %v15724_v7  ;;  %v15808_v23 = vld [vmem:[%s16914_s29 + $0x2268] ss:$16 sps:$4 sm:$0xff]   ;;  %v15813_v7 = vld [vmem:[%s16914_s29 + $0x2284] ss:$16 sps:$4 sm:$0xff]  }
 0x486   : > { %10690 = vmatprep.subr.bf16.mxu0 %v15729_v24  ;;  %11715 = vmatprep.subr.bf16.mxu1 %v15732_v10  ;;  %v15816_v24 = vld [vmem:[%s16914_s29 + $0x228c] ss:$16 sps:$4 sm:$0xff]   ;;  %v15811_v10 = vld [vmem:[%s16914_s29 + $0x2280] ss:$16 sps:$4 sm:$0xff]  }
 0x489   : > { %10691 = vmatpush1.bf16.msra.mxu0 %v15727_v28  ;;  %11716 = vmatpush1.bf16.msra.mxu1 %v15730_v31  ;;  %v15814_v28 = vld [vmem:[%s16914_s29 + $0x2288] ss:$16 sps:$4 sm:$0xff]   ;;  %v15819_v31 = vld [vmem:[%s16914_s29 + $0x22a4] ss:$16 sps:$4 sm:$0xff]  }
 0x48a   : > { %10692 = vmatprep.subr.bf16.mxu0 %v15735_v32  ;;  %11717 = vmatprep.subr.bf16.mxu1 %v15738_v34  ;;  %v15822_v32 = vld [vmem:[%s16914_s29 + $0x22ac] ss:$16 sps:$4 sm:$0xff]   ;;  %v15817_v34 = vld [vmem:[%s16914_s29 + $0x22a0] ss:$16 sps:$4 sm:$0xff]  }
 0x48d   : > { %10693 = vmatpush1.bf16.msra.mxu0 %v15733_v14  ;;  %11718 = vmatpush1.bf16.msra.mxu1 %v15736_v35  ;;  %v15820_v14 = vld [vmem:[%s16914_s29 + $0x22a8] ss:$16 sps:$4 sm:$0xff]   ;;  %v15825_v35 = vld [vmem:[%s16914_s29 + $0x22c4] ss:$16 sps:$4 sm:$0xff]  }
 0x48e   : > { %10694 = vmatprep.subr.bf16.mxu0 %v15741_v36  ;;  %11719 = vmatprep.subr.bf16.mxu1 %v15744_v27  ;;  %v15828_v36 = vld [vmem:[%s16914_s29 + $0x22cc] ss:$16 sps:$4 sm:$0xff]   ;;  %v15823_v27 = vld [vmem:[%s16914_s29 + $0x22c0] ss:$16 sps:$4 sm:$0xff]  }
 0x491   : > { %10695 = vmatpush1.bf16.msra.mxu0 %v15739_v37  ;;  %11720 = vmatpush1.bf16.msra.mxu1 %v15742_v25  ;;  %v15826_v37 = vld [vmem:[%s16914_s29 + $0x22c8] ss:$16 sps:$4 sm:$0xff]   ;;  %v15831_v25 = vld [vmem:[%s16914_s29 + $0x22e4] ss:$16 sps:$4 sm:$0xff]  }
 0x492   : > { %10696 = vmatprep.subr.bf16.mxu0 %v15747_v39  ;;  %11721 = vmatprep.subr.bf16.mxu1 %v15750_v22  ;;  %v15834_v39 = vld [vmem:[%s16914_s29 + $0x22ec] ss:$16 sps:$4 sm:$0xff]   ;;  %v15829_v22 = vld [vmem:[%s16914_s29 + $0x22e0] ss:$16 sps:$4 sm:$0xff]  }
 0x495   : > { %10697 = vmatpush1.bf16.msra.mxu0 %v15745_v29  ;;  %11722 = vmatpush1.bf16.msra.mxu1 %v15748_v42  ;;  %v15832_v29 = vld [vmem:[%s16914_s29 + $0x22e8] ss:$16 sps:$4 sm:$0xff]   ;;  %v15837_v42 = vld [vmem:[%s16914_s29 + $0x2304] ss:$16 sps:$4 sm:$0xff]  }
 0x496   : > { %10698 = vmatprep.subr.bf16.mxu0 %v15753_v45  ;;  %11723 = vmatprep.subr.bf16.mxu1 %v15756_v26  ;;  %v15840_v45 = vld [vmem:[%s16914_s29 + $0x230c] ss:$16 sps:$4 sm:$0xff]   ;;  %v15835_v26 = vld [vmem:[%s16914_s29 + $0x2300] ss:$16 sps:$4 sm:$0xff]  }
 0x499   : > { %10699 = vmatpush1.bf16.msra.mxu0 %v15751_v47  ;;  %11724 = vmatpush1.bf16.msra.mxu1 %v15754_v49  ;;  %v15838_v47 = vld [vmem:[%s16914_s29 + $0x2308] ss:$16 sps:$4 sm:$0xff]   ;;  %v15843_v49 = vld [vmem:[%s16914_s29 + $0x2324] ss:$16 sps:$4 sm:$0xff]  }
 0x49a   : > { %10700 = vmatprep.subr.bf16.mxu0 %v15759_v30  ;;  %11725 = vmatprep.subr.bf16.mxu1 %v15762_v51  ;;  %v15846_v30 = vld [vmem:[%s16914_s29 + $0x232c] ss:$16 sps:$4 sm:$0xff]   ;;  %v15841_v51 = vld [vmem:[%s16914_s29 + $0x2320] ss:$16 sps:$4 sm:$0xff]  }
 0x49d   : > { %10701 = vmatpush1.bf16.msra.mxu0 %v15757_v52  ;;  %11726 = vmatpush1.bf16.msra.mxu1 %v15760_v33  ;;  %v15844_v52 = vld [vmem:[%s16914_s29 + $0x2328] ss:$16 sps:$4 sm:$0xff]   ;;  %v15849_v33 = vld [vmem:[%s16914_s29 + $0x2344] ss:$16 sps:$4 sm:$0xff]  }
 0x49e   : > { %10702 = vmatprep.subr.bf16.mxu0 %v15765_v53  ;;  %11727 = vmatprep.subr.bf16.mxu1 %v15768_v40  ;;  %v15852_v53 = vld [vmem:[%s16914_s29 + $0x234c] ss:$16 sps:$4 sm:$0xff]   ;;  %v15847_v40 = vld [vmem:[%s16914_s29 + $0x2340] ss:$16 sps:$4 sm:$0xff]  }
 0x4a1   : > { %10703 = vmatpush1.bf16.msra.mxu0 %v15763_v55  ;;  %11728 = vmatpush1.bf16.msra.mxu1 %v15766_v38  ;;  %v15850_v55 = vld [vmem:[%s16914_s29 + $0x2348] ss:$16 sps:$4 sm:$0xff]   ;;  %v15855_v38 = vld [vmem:[%s16914_s29 + $0x2364] ss:$16 sps:$4 sm:$0xff]  }
 0x4a2   : > { %10704 = vmatprep.subr.bf16.mxu0 %v15771_v43  ;;  %11729 = vmatprep.subr.bf16.mxu1 %v15774_v58  ;;  %v15858_v43 = vld [vmem:[%s16914_s29 + $0x236c] ss:$16 sps:$4 sm:$0xff]   ;;  %v15853_v58 = vld [vmem:[%s16914_s29 + $0x2360] ss:$16 sps:$4 sm:$0xff]  }
 0x4a5   : > { %10705 = vmatpush1.bf16.msra.mxu0 %v15769_v41  ;;  %11730 = vmatpush1.bf16.msra.mxu1 %v15772_v61  ;;  %v15856_v41 = vld [vmem:[%s16914_s29 + $0x2368] ss:$16 sps:$4 sm:$0xff]   ;;  %v15861_v61 = vld [vmem:[%s16914_s29 + $0x2384] ss:$16 sps:$4 sm:$0xff]  }
 0x4a6   : > { %10706 = vmatprep.subr.bf16.mxu0 %v15777_v62  ;;  %11731 = vmatprep.subr.bf16.mxu1 %v15780_v0  ;;  %v15864_v62 = vld [vmem:[%s16914_s29 + $0x238c] ss:$16 sps:$4 sm:$0xff]   ;;  %v15859_v0 = vld [vmem:[%s16914_s29 + $0x2380] ss:$16 sps:$4 sm:$0xff]  }
 0x4a9   : > { %10707 = vmatpush1.bf16.msra.mxu0 %v15775_v1  ;;  %11732 = vmatpush1.bf16.msra.mxu1 %v15778_v2  ;;  %v15867_v1 = vld [vmem:[%s16914_s29 + $0x23a4] ss:$16 sps:$4 sm:$0xff]   ;;  %v15870_v2 = vld [vmem:[%s16914_s29 + $0x23ac] ss:$16 sps:$4 sm:$0xff]  }
 0x4aa   : > { %10708 = vmatprep.subr.bf16.mxu0 %v15783_v48  ;;  %11733 = vmatprep.subr.bf16.mxu1 %v15786_v3  ;;  %v15865_v48 = vld [vmem:[%s16914_s29 + $0x23a0] ss:$16 sps:$4 sm:$0xff]   ;;  %v15868_v3 = vld [vmem:[%s16914_s29 + $0x23a8] ss:$16 sps:$4 sm:$0xff]  }
 0x4ad   : > { %10709 = vmatpush1.bf16.msra.mxu0 %v15781_v56  ;;  %11734 = vmatpush1.bf16.msra.mxu1 %v15784_v5  ;;  %v15873_v56 = vld [vmem:[%s16914_s29 + $0x23c4] ss:$16 sps:$4 sm:$0xff]   ;;  %v15876_v5 = vld [vmem:[%s16914_s29 + $0x23cc] ss:$16 sps:$4 sm:$0xff]  }
 0x4ae   : > { %10719 = vmatprep.subr.bf16.mxu0 %v15789_v6  ;;  %11744 = vmatprep.subr.bf16.mxu1 %v15792_v54  ;;  %v18260_v6 = vld [vmem:[%s16938_s9 + $0x48] sm:$0xff] }
 0x4af   : > { %v15871_v54 = vld [vmem:[%s16914_s29 + $0x23c0] ss:$16 sps:$4 sm:$0xff]  }
 0x4b0   : > { %10711 = vmatmul.mubr.bf16.vlgmr.msra.gmra.mrb[0].mxu0 %v597_v8  ;;  %11736 = vmatmul.mubr.bf16.vlgmr.msra.gmra.mrb[0].mxu1 %v597_v8  ;;  %v15879_v8 = vld [vmem:[%s16914_s29 + $0x23e4] ss:$16 sps:$4 sm:$0xff]  }
 0x4b1   : > { %10720 = vmatpush1.bf16.msra.mxu0 %v15787_v57  ;;  %11745 = vmatpush1.bf16.msra.mxu1 %v15790_v11  ;;  %v15882_v57 = vld [vmem:[%s16914_s29 + $0x23ec] ss:$16 sps:$4 sm:$0xff]   ;;  %v18268_v11 = vrot.slane %v18260_v6, %v16988_v50 }
 0x4b2   : > { %10721 = vmatprep.subr.bf16.mxu0 %v15795_v12  ;;  %11746 = vmatprep.subr.bf16.mxu1 %v15798_v13  ;;  %v15877_v12 = vld [vmem:[%s16914_s29 + $0x23e0] ss:$16 sps:$4 sm:$0xff]   ;;  %v15880_v13 = vld [vmem:[%s16914_s29 + $0x23e8] ss:$16 sps:$4 sm:$0xff]  }
 0x4b3   : > { %10751 = vmatprep.mubr.bf16.mxu0 %v600_v15  ;;  %11776 = vmatprep.mubr.bf16.mxu1 %v600_v15  ;;  %v15886_v15 = vld [vmem:[%s16914_s29 + $0x2404] ss:$16 sps:$4 sm:$0xff]  }
 0x4b5   : > { %10722 = vmatpush1.bf16.msra.mxu0 %v15793_v60  ;;  %11747 = vmatpush1.bf16.msra.mxu1 %v15796_v16  ;;  %v15889_v60 = vld [vmem:[%s16914_s29 + $0x240c] ss:$16 sps:$4 sm:$0xff]   ;;  %v473_v16 = vcombine.high %v18268_v11, %v18268_v11 }
 0x4b6   : > { %10723 = vmatprep.subr.bf16.mxu0 %v15801_v17  ;;  %11748 = vmatprep.subr.bf16.mxu1 %v15804_v63  ;;  %v599_v17 = vpack.c.bf16 %v18193_v4, %v18193_v4  ;;  %v15884_v63 = vld [vmem:[%s16914_s29 + $0x2400] ss:$16 sps:$4 sm:$0xff]  }
 0x4b7   : > { %v15890_v4 = vld [vmem:[%s16914_s29 + $0x2420] ss:$16 sps:$4 sm:$0xff]  }
 0x4b9   : > { %10724 = vmatpush1.bf16.msra.mxu0 %v15799_v18  ;;  %11749 = vmatpush1.bf16.msra.mxu1 %v15802_v19  ;;  %v15887_v18 = vld [vmem:[%s16914_s29 + $0x2408] ss:$16 sps:$4 sm:$0xff]   ;;  %v15892_v19 = vld [vmem:[%s16914_s29 + $0x2424] ss:$16 sps:$4 sm:$0xff]  }
 0x4ba   : > { %10725 = vmatprep.subr.bf16.mxu0 %v15807_v20  ;;  %11750 = vmatprep.subr.bf16.mxu1 %v15810_v21  ;;  %v15895_v20 = vld [vmem:[%s16914_s29 + $0x242c] ss:$16 sps:$4 sm:$0xff]   ;;  %v602_v21 = vpack.c.bf16 %v473_v16, %v473_v16  ;;  %v15968_v16 = vld [vmem:[%s16914_s29 + $0x25c0] ss:$16 sps:$4 sm:$0xff]  }
 0x4bd   : > { %10726 = vmatpush1.bf16.msra.mxu0 %v15805_v9  ;;  %11751 = vmatpush1.bf16.msra.mxu1 %v15808_v23  ;;  %v15893_v9 = vld [vmem:[%s16914_s29 + $0x2428] ss:$16 sps:$4 sm:$0xff]   ;;  %v15898_v23 = vld [vmem:[%s16914_s29 + $0x2444] ss:$16 sps:$4 sm:$0xff]  }
 0x4be   : > { %10727 = vmatprep.subr.bf16.mxu0 %v15813_v7  ;;  %11752 = vmatprep.subr.bf16.mxu1 %v15816_v24  ;;  %v15901_v7 = vld [vmem:[%s16914_s29 + $0x244c] ss:$16 sps:$4 sm:$0xff]   ;;  %v15896_v24 = vld [vmem:[%s16914_s29 + $0x2440] ss:$16 sps:$4 sm:$0xff]  }
 0x4c1   : > { %10728 = vmatpush1.bf16.msra.mxu0 %v15811_v10  ;;  %11753 = vmatpush1.bf16.msra.mxu1 %v15814_v28  ;;  %v15899_v10 = vld [vmem:[%s16914_s29 + $0x2448] ss:$16 sps:$4 sm:$0xff]   ;;  %v15904_v28 = vld [vmem:[%s16914_s29 + $0x2464] ss:$16 sps:$4 sm:$0xff]  }
 0x4c2   : > { %10729 = vmatprep.subr.bf16.mxu0 %v15819_v31  ;;  %11754 = vmatprep.subr.bf16.mxu1 %v15822_v32  ;;  %v15907_v31 = vld [vmem:[%s16914_s29 + $0x246c] ss:$16 sps:$4 sm:$0xff]   ;;  %v15902_v32 = vld [vmem:[%s16914_s29 + $0x2460] ss:$16 sps:$4 sm:$0xff]  }
 0x4c5   : > { %10730 = vmatpush1.bf16.msra.mxu0 %v15817_v34  ;;  %11755 = vmatpush1.bf16.msra.mxu1 %v15820_v14  ;;  %v15905_v34 = vld [vmem:[%s16914_s29 + $0x2468] ss:$16 sps:$4 sm:$0xff]   ;;  %v15910_v14 = vld [vmem:[%s16914_s29 + $0x2484] ss:$16 sps:$4 sm:$0xff]  }
 0x4c6   : > { %10731 = vmatprep.subr.bf16.mxu0 %v15825_v35  ;;  %11756 = vmatprep.subr.bf16.mxu1 %v15828_v36  ;;  %v15913_v35 = vld [vmem:[%s16914_s29 + $0x248c] ss:$16 sps:$4 sm:$0xff]   ;;  %v15908_v36 = vld [vmem:[%s16914_s29 + $0x2480] ss:$16 sps:$4 sm:$0xff]  }
 0x4c9   : > { %10732 = vmatpush1.bf16.msra.mxu0 %v15823_v27  ;;  %11757 = vmatpush1.bf16.msra.mxu1 %v15826_v37  ;;  %v15911_v27 = vld [vmem:[%s16914_s29 + $0x2488] ss:$16 sps:$4 sm:$0xff]   ;;  %v15916_v37 = vld [vmem:[%s16914_s29 + $0x24a4] ss:$16 sps:$4 sm:$0xff]  }
 0x4ca   : > { %10733 = vmatprep.subr.bf16.mxu0 %v15831_v25  ;;  %11758 = vmatprep.subr.bf16.mxu1 %v15834_v39  ;;  %v15919_v25 = vld [vmem:[%s16914_s29 + $0x24ac] ss:$16 sps:$4 sm:$0xff]   ;;  %v15914_v39 = vld [vmem:[%s16914_s29 + $0x24a0] ss:$16 sps:$4 sm:$0xff]  }
 0x4cd   : > { %10734 = vmatpush1.bf16.msra.mxu0 %v15829_v22  ;;  %11759 = vmatpush1.bf16.msra.mxu1 %v15832_v29  ;;  %v15917_v22 = vld [vmem:[%s16914_s29 + $0x24a8] ss:$16 sps:$4 sm:$0xff]   ;;  %v15922_v29 = vld [vmem:[%s16914_s29 + $0x24c4] ss:$16 sps:$4 sm:$0xff]  }
 0x4ce   : > { %10735 = vmatprep.subr.bf16.mxu0 %v15837_v42  ;;  %11760 = vmatprep.subr.bf16.mxu1 %v15840_v45  ;;  %v15925_v42 = vld [vmem:[%s16914_s29 + $0x24cc] ss:$16 sps:$4 sm:$0xff]   ;;  %v15920_v45 = vld [vmem:[%s16914_s29 + $0x24c0] ss:$16 sps:$4 sm:$0xff]  }
 0x4d1   : > { %10736 = vmatpush1.bf16.msra.mxu0 %v15835_v26  ;;  %11761 = vmatpush1.bf16.msra.mxu1 %v15838_v47  ;;  %v15923_v26 = vld [vmem:[%s16914_s29 + $0x24c8] ss:$16 sps:$4 sm:$0xff]   ;;  %v15928_v47 = vld [vmem:[%s16914_s29 + $0x24e4] ss:$16 sps:$4 sm:$0xff]  }
 0x4d2   : > { %10737 = vmatprep.subr.bf16.mxu0 %v15843_v49  ;;  %11762 = vmatprep.subr.bf16.mxu1 %v15846_v30  ;;  %v15931_v49 = vld [vmem:[%s16914_s29 + $0x24ec] ss:$16 sps:$4 sm:$0xff]   ;;  %v15926_v30 = vld [vmem:[%s16914_s29 + $0x24e0] ss:$16 sps:$4 sm:$0xff]  }
 0x4d5   : > { %10738 = vmatpush1.bf16.msra.mxu0 %v15841_v51  ;;  %11763 = vmatpush1.bf16.msra.mxu1 %v15844_v52  ;;  %v15929_v51 = vld [vmem:[%s16914_s29 + $0x24e8] ss:$16 sps:$4 sm:$0xff]   ;;  %v15934_v52 = vld [vmem:[%s16914_s29 + $0x2504] ss:$16 sps:$4 sm:$0xff]  }
 0x4d6   : > { %10739 = vmatprep.subr.bf16.mxu0 %v15849_v33  ;;  %11764 = vmatprep.subr.bf16.mxu1 %v15852_v53  ;;  %v15937_v33 = vld [vmem:[%s16914_s29 + $0x250c] ss:$16 sps:$4 sm:$0xff]   ;;  %v15932_v53 = vld [vmem:[%s16914_s29 + $0x2500] ss:$16 sps:$4 sm:$0xff]  }
 0x4d9   : > { %10740 = vmatpush1.bf16.msra.mxu0 %v15847_v40  ;;  %11765 = vmatpush1.bf16.msra.mxu1 %v15850_v55  ;;  %v15935_v40 = vld [vmem:[%s16914_s29 + $0x2508] ss:$16 sps:$4 sm:$0xff]   ;;  %v15940_v55 = vld [vmem:[%s16914_s29 + $0x2524] ss:$16 sps:$4 sm:$0xff]  }
 0x4da   : > { %10741 = vmatprep.subr.bf16.mxu0 %v15855_v38  ;;  %11766 = vmatprep.subr.bf16.mxu1 %v15858_v43  ;;  %v15943_v38 = vld [vmem:[%s16914_s29 + $0x252c] ss:$16 sps:$4 sm:$0xff]   ;;  %v15938_v43 = vld [vmem:[%s16914_s29 + $0x2520] ss:$16 sps:$4 sm:$0xff]  }
 0x4dd   : > { %10742 = vmatpush1.bf16.msra.mxu0 %v15853_v58  ;;  %11767 = vmatpush1.bf16.msra.mxu1 %v15856_v41  ;;  %v15941_v58 = vld [vmem:[%s16914_s29 + $0x2528] ss:$16 sps:$4 sm:$0xff]   ;;  %v15946_v41 = vld [vmem:[%s16914_s29 + $0x2544] ss:$16 sps:$4 sm:$0xff]  }
 0x4de   : > { %10743 = vmatprep.subr.bf16.mxu0 %v15861_v61  ;;  %11768 = vmatprep.subr.bf16.mxu1 %v15864_v62  ;;  %v15949_v61 = vld [vmem:[%s16914_s29 + $0x254c] ss:$16 sps:$4 sm:$0xff]   ;;  %v15944_v62 = vld [vmem:[%s16914_s29 + $0x2540] ss:$16 sps:$4 sm:$0xff]  }
 0x4e1   : > { %10744 = vmatpush1.bf16.msra.mxu0 %v15859_v0  ;;  %11769 = vmatpush1.bf16.msra.mxu1 %v15862_v46  ;;  %v15947_v0 = vld [vmem:[%s16914_s29 + $0x2548] ss:$16 sps:$4 sm:$0xff]   ;;  %v15952_v46 = vld [vmem:[%s16914_s29 + $0x2564] ss:$16 sps:$4 sm:$0xff]  }
 0x4e2   : > { %10745 = vmatprep.subr.bf16.mxu0 %v15867_v1  ;;  %11770 = vmatprep.subr.bf16.mxu1 %v15870_v2  ;;  %v15955_v1 = vld [vmem:[%s16914_s29 + $0x256c] ss:$16 sps:$4 sm:$0xff]   ;;  %v15950_v2 = vld [vmem:[%s16914_s29 + $0x2560] ss:$16 sps:$4 sm:$0xff]  }
 0x4e5   : > { %10746 = vmatpush1.bf16.msra.mxu0 %v15865_v48  ;;  %11771 = vmatpush1.bf16.msra.mxu1 %v15868_v3  ;;  %v15953_v48 = vld [vmem:[%s16914_s29 + $0x2568] ss:$16 sps:$4 sm:$0xff]   ;;  %v15958_v3 = vld [vmem:[%s16914_s29 + $0x2584] ss:$16 sps:$4 sm:$0xff]  }
 0x4e6   : > { %10747 = vmatprep.subr.bf16.mxu0 %v15873_v56  ;;  %11772 = vmatprep.subr.bf16.mxu1 %v15876_v5  ;;  %v15961_v56 = vld [vmem:[%s16914_s29 + $0x258c] ss:$16 sps:$4 sm:$0xff]   ;;  %v15956_v5 = vld [vmem:[%s16914_s29 + $0x2580] ss:$16 sps:$4 sm:$0xff]  }
 0x4e9   : > { %10748 = vmatpush1.bf16.msra.mxu0 %v15871_v54  ;;  %11773 = vmatpush1.bf16.msra.mxu1 %v15874_v59  ;;  %v15959_v54 = vld [vmem:[%s16914_s29 + $0x2588] ss:$16 sps:$4 sm:$0xff]   ;;  %v15964_v59 = vld [vmem:[%s16914_s29 + $0x25a4] ss:$16 sps:$4 sm:$0xff]  }
 0x4ea   : > { %10749 = vmatprep.subr.bf16.mxu0 %v15879_v8  ;;  %11774 = vmatprep.subr.bf16.mxu1 %v15882_v57  ;;  %v15967_v8 = vld [vmem:[%s16914_s29 + $0x25ac] ss:$16 sps:$4 sm:$0xff]   ;;  %v15962_v57 = vld [vmem:[%s16914_s29 + $0x25a0] ss:$16 sps:$4 sm:$0xff]  }
 0x4ed   : > { %10750 = vmatpush1.bf16.msra.mxu0 %v15877_v12  ;;  %11775 = vmatpush1.bf16.msra.mxu1 %v15880_v13  ;;  %v15965_v12 = vld [vmem:[%s16914_s29 + $0x25a8] ss:$16 sps:$4 sm:$0xff]   ;;  %v15970_v13 = vld [vmem:[%s16914_s29 + $0x25c4] ss:$16 sps:$4 sm:$0xff]  }
 0x4ee   : > { %10760 = vmatprep.subr.bf16.mxu0 %v15886_v15  ;;  %11785 = vmatprep.subr.bf16.mxu1 %v15889_v60  ;;  %v15973_v15 = vld [vmem:[%s16914_s29 + $0x25cc] ss:$16 sps:$4 sm:$0xff]   ;;  %v458_v60 = vcombine.high %v18260_v6, %v18260_v6  ;;  %v15974_v6 = vld [vmem:[%s16914_s29 + $0x25e0] ss:$16 sps:$4 sm:$0xff]  }
 0x4f0   : > { %10752 = vmatmul.mubr.bf16.vlgmr.msra.gmra.mrb[0].mxu0 %v599_v17  ;;  %11777 = vmatmul.mubr.bf16.vlgmr.msra.gmra.mrb[0].mxu1 %v599_v17  ;;  %v15971_v17 = vld [vmem:[%s16914_s29 + $0x25c8] ss:$16 sps:$4 sm:$0xff]  }
 0x4f1   : > { %10761 = vmatpush1.bf16.msra.mxu0 %v15884_v63  ;;  %11786 = vmatpush1.bf16.msra.mxu1 %v15887_v18  ;;  %v15976_v63 = vld [vmem:[%s16914_s29 + $0x25e4] ss:$16 sps:$4 sm:$0xff]   ;;  %v15979_v18 = vld [vmem:[%s16914_s29 + $0x25ec] ss:$16 sps:$4 sm:$0xff]  }
 0x4f2   : > { %10762 = vmatprep.subr.bf16.mxu0 %v15892_v19  ;;  %11787 = vmatprep.subr.bf16.mxu1 %v15895_v20  ;;  %v18341_v19 = vrot.slane %v458_v60, %v16988_v50  ;;  %v15977_v20 = vld [vmem:[%s16914_s29 + $0x25e8] ss:$16 sps:$4 sm:$0xff]  }
 0x4f3   : > { %10792 = vmatprep.mubr.bf16.mxu0 %v602_v21  ;;  %11817 = vmatprep.mubr.bf16.mxu1 %v602_v21  ;;  %v15982_v21 = vld [vmem:[%s16914_s29 + $0x2604] ss:$16 sps:$4 sm:$0xff]   ;;  %v16055_v60 = vld [vmem:[%s16914_s29 + $0x2788] ss:$16 sps:$4 sm:$0xff]  }
 0x4f5   : > { %10763 = vmatpush1.bf16.msra.mxu0 %v15890_v4  ;;  %11788 = vmatpush1.bf16.msra.mxu1 %v15893_v9  ;;  %v15985_v4 = vld [vmem:[%s16914_s29 + $0x260c] ss:$16 sps:$4 sm:$0xff]   ;;  %v474_v9 = vcombine.high %v18341_v19, %v18341_v19 }
 0x4f6   : > { %10764 = vmatprep.subr.bf16.mxu0 %v15898_v23  ;;  %11789 = vmatprep.subr.bf16.mxu1 %v15901_v7  ;;  %v601_v23 = vpack.c.bf16 %v18268_v11, %v18268_v11  ;;  %v15980_v7 = vld [vmem:[%s16914_s29 + $0x2600] ss:$16 sps:$4 sm:$0xff]  }
 0x4f7   : > { %v15986_v11 = vld [vmem:[%s16914_s29 + $0x2620] ss:$16 sps:$4 sm:$0xff]  }
 0x4f9   : > { %10765 = vmatpush1.bf16.msra.mxu0 %v15896_v24  ;;  %11790 = vmatpush1.bf16.msra.mxu1 %v15899_v10  ;;  %v15983_v24 = vld [vmem:[%s16914_s29 + $0x2608] ss:$16 sps:$4 sm:$0xff]   ;;  %v15988_v10 = vld [vmem:[%s16914_s29 + $0x2624] ss:$16 sps:$4 sm:$0xff]  }
 0x4fa   : > { %10766 = vmatprep.subr.bf16.mxu0 %v15904_v28  ;;  %11791 = vmatprep.subr.bf16.mxu1 %v15907_v31  ;;  %v15991_v28 = vld [vmem:[%s16914_s29 + $0x262c] ss:$16 sps:$4 sm:$0xff]   ;;  %v604_v31 = vpack.c.bf16 %v474_v9, %v474_v9  ;;  %v16067_v9 = vld [vmem:[%s16914_s29 + $0x27c8] ss:$16 sps:$4 sm:$0xff]  }
 0x4fd   : > { %10767 = vmatpush1.bf16.msra.mxu0 %v15902_v32  ;;  %11792 = vmatpush1.bf16.msra.mxu1 %v15905_v34  ;;  %v15989_v32 = vld [vmem:[%s16914_s29 + $0x2628] ss:$16 sps:$4 sm:$0xff]   ;;  %v15994_v34 = vld [vmem:[%s16914_s29 + $0x2644] ss:$16 sps:$4 sm:$0xff]  }
 0x4fe   : > { %10768 = vmatprep.subr.bf16.mxu0 %v15910_v14  ;;  %11793 = vmatprep.subr.bf16.mxu1 %v15913_v35  ;;  %v15997_v14 = vld [vmem:[%s16914_s29 + $0x264c] ss:$16 sps:$4 sm:$0xff]   ;;  %v15992_v35 = vld [vmem:[%s16914_s29 + $0x2640] ss:$16 sps:$4 sm:$0xff]  }
 0x501   : > { %10769 = vmatpush1.bf16.msra.mxu0 %v15908_v36  ;;  %11794 = vmatpush1.bf16.msra.mxu1 %v15911_v27  ;;  %v15995_v36 = vld [vmem:[%s16914_s29 + $0x2648] ss:$16 sps:$4 sm:$0xff]   ;;  %v16000_v27 = vld [vmem:[%s16914_s29 + $0x2664] ss:$16 sps:$4 sm:$0xff]  }
 0x502   : > { %10770 = vmatprep.subr.bf16.mxu0 %v15916_v37  ;;  %11795 = vmatprep.subr.bf16.mxu1 %v15919_v25  ;;  %v16003_v37 = vld [vmem:[%s16914_s29 + $0x266c] ss:$16 sps:$4 sm:$0xff]   ;;  %v15998_v25 = vld [vmem:[%s16914_s29 + $0x2660] ss:$16 sps:$4 sm:$0xff]  }
 0x505   : > { %10771 = vmatpush1.bf16.msra.mxu0 %v15914_v39  ;;  %11796 = vmatpush1.bf16.msra.mxu1 %v15917_v22  ;;  %v16001_v39 = vld [vmem:[%s16914_s29 + $0x2668] ss:$16 sps:$4 sm:$0xff]   ;;  %v16006_v22 = vld [vmem:[%s16914_s29 + $0x2684] ss:$16 sps:$4 sm:$0xff]  }
 0x506   : > { %10772 = vmatprep.subr.bf16.mxu0 %v15922_v29  ;;  %11797 = vmatprep.subr.bf16.mxu1 %v15925_v42  ;;  %v16009_v29 = vld [vmem:[%s16914_s29 + $0x268c] ss:$16 sps:$4 sm:$0xff]   ;;  %v16004_v42 = vld [vmem:[%s16914_s29 + $0x2680] ss:$16 sps:$4 sm:$0xff]  }
 0x509   : > { %10773 = vmatpush1.bf16.msra.mxu0 %v15920_v45  ;;  %11798 = vmatpush1.bf16.msra.mxu1 %v15923_v26  ;;  %v16007_v45 = vld [vmem:[%s16914_s29 + $0x2688] ss:$16 sps:$4 sm:$0xff]   ;;  %v16012_v26 = vld [vmem:[%s16914_s29 + $0x26a4] ss:$16 sps:$4 sm:$0xff]  }
 0x50a   : > { %10774 = vmatprep.subr.bf16.mxu0 %v15928_v47  ;;  %11799 = vmatprep.subr.bf16.mxu1 %v15931_v49  ;;  %v16015_v47 = vld [vmem:[%s16914_s29 + $0x26ac] ss:$16 sps:$4 sm:$0xff]   ;;  %v16010_v49 = vld [vmem:[%s16914_s29 + $0x26a0] ss:$16 sps:$4 sm:$0xff]  }
 0x50d   : > { %10775 = vmatpush1.bf16.msra.mxu0 %v15926_v30  ;;  %11800 = vmatpush1.bf16.msra.mxu1 %v15929_v51  ;;  %v16013_v30 = vld [vmem:[%s16914_s29 + $0x26a8] ss:$16 sps:$4 sm:$0xff]   ;;  %v16018_v51 = vld [vmem:[%s16914_s29 + $0x26c4] ss:$16 sps:$4 sm:$0xff]  }
 0x50e   : > { %10776 = vmatprep.subr.bf16.mxu0 %v15934_v52  ;;  %11801 = vmatprep.subr.bf16.mxu1 %v15937_v33  ;;  %v16021_v52 = vld [vmem:[%s16914_s29 + $0x26cc] ss:$16 sps:$4 sm:$0xff]   ;;  %v16016_v33 = vld [vmem:[%s16914_s29 + $0x26c0] ss:$16 sps:$4 sm:$0xff]  }
 0x511   : > { %10777 = vmatpush1.bf16.msra.mxu0 %v15932_v53  ;;  %11802 = vmatpush1.bf16.msra.mxu1 %v15935_v40  ;;  %v16019_v53 = vld [vmem:[%s16914_s29 + $0x26c8] ss:$16 sps:$4 sm:$0xff]   ;;  %v16024_v40 = vld [vmem:[%s16914_s29 + $0x26e4] ss:$16 sps:$4 sm:$0xff]  }
 0x512   : > { %10778 = vmatprep.subr.bf16.mxu0 %v15940_v55  ;;  %11803 = vmatprep.subr.bf16.mxu1 %v15943_v38  ;;  %v16027_v55 = vld [vmem:[%s16914_s29 + $0x26ec] ss:$16 sps:$4 sm:$0xff]   ;;  %v16022_v38 = vld [vmem:[%s16914_s29 + $0x26e0] ss:$16 sps:$4 sm:$0xff]  }
 0x515   : > { %10779 = vmatpush1.bf16.msra.mxu0 %v15938_v43  ;;  %11804 = vmatpush1.bf16.msra.mxu1 %v15941_v58  ;;  %v16025_v43 = vld [vmem:[%s16914_s29 + $0x26e8] ss:$16 sps:$4 sm:$0xff]   ;;  %v16030_v58 = vld [vmem:[%s16914_s29 + $0x2704] ss:$16 sps:$4 sm:$0xff]  }
 0x516   : > { %10780 = vmatprep.subr.bf16.mxu0 %v15946_v41  ;;  %11805 = vmatprep.subr.bf16.mxu1 %v15949_v61  ;;  %v16033_v41 = vld [vmem:[%s16914_s29 + $0x270c] ss:$16 sps:$4 sm:$0xff]   ;;  %v16028_v61 = vld [vmem:[%s16914_s29 + $0x2700] ss:$16 sps:$4 sm:$0xff]  }
 0x519   : > { %10781 = vmatpush1.bf16.msra.mxu0 %v15944_v62  ;;  %11806 = vmatpush1.bf16.msra.mxu1 %v15947_v0  ;;  %v16031_v62 = vld [vmem:[%s16914_s29 + $0x2708] ss:$16 sps:$4 sm:$0xff]   ;;  %v16036_v0 = vld [vmem:[%s16914_s29 + $0x2724] ss:$16 sps:$4 sm:$0xff]  }
 0x51a   : > { %10782 = vmatprep.subr.bf16.mxu0 %v15952_v46  ;;  %11807 = vmatprep.subr.bf16.mxu1 %v15955_v1  ;;  %v16039_v46 = vld [vmem:[%s16914_s29 + $0x272c] ss:$16 sps:$4 sm:$0xff]   ;;  %v16034_v1 = vld [vmem:[%s16914_s29 + $0x2720] ss:$16 sps:$4 sm:$0xff]  }
 0x51d   : > { %10783 = vmatpush1.bf16.msra.mxu0 %v15950_v2  ;;  %11808 = vmatpush1.bf16.msra.mxu1 %v15953_v48  ;;  %v16037_v2 = vld [vmem:[%s16914_s29 + $0x2728] ss:$16 sps:$4 sm:$0xff]   ;;  %v16042_v48 = vld [vmem:[%s16914_s29 + $0x2744] ss:$16 sps:$4 sm:$0xff]  }
 0x51e   : > { %10784 = vmatprep.subr.bf16.mxu0 %v15958_v3  ;;  %11809 = vmatprep.subr.bf16.mxu1 %v15961_v56  ;;  %v16045_v3 = vld [vmem:[%s16914_s29 + $0x274c] ss:$16 sps:$4 sm:$0xff]   ;;  %v16040_v56 = vld [vmem:[%s16914_s29 + $0x2740] ss:$16 sps:$4 sm:$0xff]  }
 0x521   : > { %10785 = vmatpush1.bf16.msra.mxu0 %v15956_v5  ;;  %11810 = vmatpush1.bf16.msra.mxu1 %v15959_v54  ;;  %v16043_v5 = vld [vmem:[%s16914_s29 + $0x2748] ss:$16 sps:$4 sm:$0xff]   ;;  %v16048_v54 = vld [vmem:[%s16914_s29 + $0x2764] ss:$16 sps:$4 sm:$0xff]  }
 0x522   : > { %10786 = vmatprep.subr.bf16.mxu0 %v15964_v59  ;;  %11811 = vmatprep.subr.bf16.mxu1 %v15967_v8  ;;  %v16051_v59 = vld [vmem:[%s16914_s29 + $0x276c] ss:$16 sps:$4 sm:$0xff]   ;;  %v16046_v8 = vld [vmem:[%s16914_s29 + $0x2760] ss:$16 sps:$4 sm:$0xff]  }
 0x525   : > { %10787 = vmatpush1.bf16.msra.mxu0 %v15962_v57  ;;  %11812 = vmatpush1.bf16.msra.mxu1 %v15965_v12  ;;  %v16049_v57 = vld [vmem:[%s16914_s29 + $0x2768] ss:$16 sps:$4 sm:$0xff]   ;;  %v16054_v12 = vld [vmem:[%s16914_s29 + $0x2784] ss:$16 sps:$4 sm:$0xff]  }
 0x526   : > { %10788 = vmatprep.subr.bf16.mxu0 %v15970_v13  ;;  %11813 = vmatprep.subr.bf16.mxu1 %v15973_v15  ;;  %v16057_v13 = vld [vmem:[%s16914_s29 + $0x278c] ss:$16 sps:$4 sm:$0xff]   ;;  %v16052_v15 = vld [vmem:[%s16914_s29 + $0x2780] ss:$16 sps:$4 sm:$0xff]  }
 0x529   : > { %10789 = vmatpush1.bf16.msra.mxu0 %v15968_v16  ;;  %11814 = vmatpush1.bf16.msra.mxu1 %v15971_v17  ;;  %v16060_v16 = vld [vmem:[%s16914_s29 + $0x27a4] ss:$16 sps:$4 sm:$0xff]   ;;  %v16063_v17 = vld [vmem:[%s16914_s29 + $0x27ac] ss:$16 sps:$4 sm:$0xff]  }
 0x52a   : > { %10790 = vmatprep.subr.bf16.mxu0 %v15976_v63  ;;  %11815 = vmatprep.subr.bf16.mxu1 %v15979_v18  ;;  %v16058_v63 = vld [vmem:[%s16914_s29 + $0x27a0] ss:$16 sps:$4 sm:$0xff]   ;;  %v16061_v18 = vld [vmem:[%s16914_s29 + $0x27a8] ss:$16 sps:$4 sm:$0xff]  }
 0x52d   : > { %10791 = vmatpush1.bf16.msra.mxu0 %v15974_v6  ;;  %11816 = vmatpush1.bf16.msra.mxu1 %v15977_v20  ;;  %v16066_v6 = vld [vmem:[%s16914_s29 + $0x27c4] ss:$16 sps:$4 sm:$0xff]   ;;  %v16069_v20 = vld [vmem:[%s16914_s29 + $0x27cc] ss:$16 sps:$4 sm:$0xff]  }
 0x52e   : > { %10801 = vmatprep.subr.bf16.mxu0 %v15982_v21  ;;  %11826 = vmatprep.subr.bf16.mxu1 %v15985_v4  ;;  %v18408_v21 = vld [vmem:[%s16938_s9 + $0x50] sm:$0xff]  ;;  %v16064_v4 = vld [vmem:[%s16914_s29 + $0x27c0] ss:$16 sps:$4 sm:$0xff]  }
 0x530   : > { %10793 = vmatmul.mubr.bf16.vlgmr.msra.gmra.mrb[0].mxu0 %v601_v23  ;;  %11818 = vmatmul.mubr.bf16.vlgmr.msra.gmra.mrb[0].mxu1 %v601_v23  ;;  %v16072_v23 = vld [vmem:[%s16914_s29 + $0x27e4] ss:$16 sps:$4 sm:$0xff]  }
 0x531   : > { %10802 = vmatpush1.bf16.msra.mxu0 %v15980_v7  ;;  %11827 = vmatpush1.bf16.msra.mxu1 %v15983_v24  ;;  %v16075_v7 = vld [vmem:[%s16914_s29 + $0x27ec] ss:$16 sps:$4 sm:$0xff]   ;;  %v18416_v24 = vrot.slane %v18408_v21, %v16988_v50 }
 0x532   : > { %10803 = vmatprep.subr.bf16.mxu0 %v15988_v10  ;;  %11828 = vmatprep.subr.bf16.mxu1 %v15991_v28  ;;  %v16070_v10 = vld [vmem:[%s16914_s29 + $0x27e0] ss:$16 sps:$4 sm:$0xff]   ;;  %v16073_v28 = vld [vmem:[%s16914_s29 + $0x27e8] ss:$16 sps:$4 sm:$0xff]  }
 0x533   : > { %10833 = vmatprep.mubr.bf16.mxu0 %v604_v31  ;;  %11858 = vmatprep.mubr.bf16.mxu1 %v604_v31  ;;  %v16079_v31 = vld [vmem:[%s16914_s29 + $0x2804] ss:$16 sps:$4 sm:$0xff]  }
 0x535   : > { %10804 = vmatpush1.bf16.msra.mxu0 %v15986_v11  ;;  %11829 = vmatpush1.bf16.msra.mxu1 %v15989_v32  ;;  %v16082_v11 = vld [vmem:[%s16914_s29 + $0x280c] ss:$16 sps:$4 sm:$0xff]   ;;  %v490_v32 = vcombine.high %v18416_v24, %v18416_v24 }
 0x536   : > { %10805 = vmatprep.subr.bf16.mxu0 %v15994_v34  ;;  %11830 = vmatprep.subr.bf16.mxu1 %v15997_v14  ;;  %v603_v34 = vpack.c.bf16 %v18341_v19, %v18341_v19  ;;  %v16077_v14 = vld [vmem:[%s16914_s29 + $0x2800] ss:$16 sps:$4 sm:$0xff]  }
 0x537   : > { %v16083_v19 = vld [vmem:[%s16914_s29 + $0x2820] ss:$16 sps:$4 sm:$0xff]  }
 0x539   : > { %10806 = vmatpush1.bf16.msra.mxu0 %v15992_v35  ;;  %11831 = vmatpush1.bf16.msra.mxu1 %v15995_v36  ;;  %v16080_v35 = vld [vmem:[%s16914_s29 + $0x2808] ss:$16 sps:$4 sm:$0xff]   ;;  %v16085_v36 = vld [vmem:[%s16914_s29 + $0x2824] ss:$16 sps:$4 sm:$0xff]  }
 0x53a   : > { %10807 = vmatprep.subr.bf16.mxu0 %v16000_v27  ;;  %11832 = vmatprep.subr.bf16.mxu1 %v16003_v37  ;;  %v16088_v27 = vld [vmem:[%s16914_s29 + $0x282c] ss:$16 sps:$4 sm:$0xff]   ;;  %v606_v37 = vpack.c.bf16 %v490_v32, %v490_v32  ;;  %v16161_v32 = vld [vmem:[%s16914_s29 + $0x29c0] ss:$16 sps:$4 sm:$0xff]  }
 0x53d   : > { %10808 = vmatpush1.bf16.msra.mxu0 %v15998_v25  ;;  %11833 = vmatpush1.bf16.msra.mxu1 %v16001_v39  ;;  %v16086_v25 = vld [vmem:[%s16914_s29 + $0x2828] ss:$16 sps:$4 sm:$0xff]   ;;  %v16091_v39 = vld [vmem:[%s16914_s29 + $0x2844] ss:$16 sps:$4 sm:$0xff]  }
 0x53e   : > { %10809 = vmatprep.subr.bf16.mxu0 %v16006_v22  ;;  %11834 = vmatprep.subr.bf16.mxu1 %v16009_v29  ;;  %v16094_v22 = vld [vmem:[%s16914_s29 + $0x284c] ss:$16 sps:$4 sm:$0xff]   ;;  %v16089_v29 = vld [vmem:[%s16914_s29 + $0x2840] ss:$16 sps:$4 sm:$0xff]  }
 0x541   : > { %10810 = vmatpush1.bf16.msra.mxu0 %v16004_v42  ;;  %11835 = vmatpush1.bf16.msra.mxu1 %v16007_v45  ;;  %v16092_v42 = vld [vmem:[%s16914_s29 + $0x2848] ss:$16 sps:$4 sm:$0xff]   ;;  %v16097_v45 = vld [vmem:[%s16914_s29 + $0x2864] ss:$16 sps:$4 sm:$0xff]  }
 0x542   : > { %10811 = vmatprep.subr.bf16.mxu0 %v16012_v26  ;;  %11836 = vmatprep.subr.bf16.mxu1 %v16015_v47  ;;  %v16100_v26 = vld [vmem:[%s16914_s29 + $0x286c] ss:$16 sps:$4 sm:$0xff]   ;;  %v16095_v47 = vld [vmem:[%s16914_s29 + $0x2860] ss:$16 sps:$4 sm:$0xff]  }
 0x545   : > { %10812 = vmatpush1.bf16.msra.mxu0 %v16010_v49  ;;  %11837 = vmatpush1.bf16.msra.mxu1 %v16013_v30  ;;  %v16098_v49 = vld [vmem:[%s16914_s29 + $0x2868] ss:$16 sps:$4 sm:$0xff]   ;;  %v16103_v30 = vld [vmem:[%s16914_s29 + $0x2884] ss:$16 sps:$4 sm:$0xff]  }
 0x546   : > { %10813 = vmatprep.subr.bf16.mxu0 %v16018_v51  ;;  %11838 = vmatprep.subr.bf16.mxu1 %v16021_v52  ;;  %v16106_v51 = vld [vmem:[%s16914_s29 + $0x288c] ss:$16 sps:$4 sm:$0xff]   ;;  %v16101_v52 = vld [vmem:[%s16914_s29 + $0x2880] ss:$16 sps:$4 sm:$0xff]  }
 0x549   : > { %10814 = vmatpush1.bf16.msra.mxu0 %v16016_v33  ;;  %11839 = vmatpush1.bf16.msra.mxu1 %v16019_v53  ;;  %v16104_v33 = vld [vmem:[%s16914_s29 + $0x2888] ss:$16 sps:$4 sm:$0xff]   ;;  %v16109_v53 = vld [vmem:[%s16914_s29 + $0x28a4] ss:$16 sps:$4 sm:$0xff]  }
 0x54a   : > { %10815 = vmatprep.subr.bf16.mxu0 %v16024_v40  ;;  %11840 = vmatprep.subr.bf16.mxu1 %v16027_v55  ;;  %v16112_v40 = vld [vmem:[%s16914_s29 + $0x28ac] ss:$16 sps:$4 sm:$0xff]   ;;  %v16107_v55 = vld [vmem:[%s16914_s29 + $0x28a0] ss:$16 sps:$4 sm:$0xff]  }
 0x54d   : > { %10816 = vmatpush1.bf16.msra.mxu0 %v16022_v38  ;;  %11841 = vmatpush1.bf16.msra.mxu1 %v16025_v43  ;;  %v16110_v38 = vld [vmem:[%s16914_s29 + $0x28a8] ss:$16 sps:$4 sm:$0xff]   ;;  %v16115_v43 = vld [vmem:[%s16914_s29 + $0x28c4] ss:$16 sps:$4 sm:$0xff]  }
 0x54e   : > { %10817 = vmatprep.subr.bf16.mxu0 %v16030_v58  ;;  %11842 = vmatprep.subr.bf16.mxu1 %v16033_v41  ;;  %v16118_v58 = vld [vmem:[%s16914_s29 + $0x28cc] ss:$16 sps:$4 sm:$0xff]   ;;  %v16113_v41 = vld [vmem:[%s16914_s29 + $0x28c0] ss:$16 sps:$4 sm:$0xff]  }
 0x551   : > { %10818 = vmatpush1.bf16.msra.mxu0 %v16028_v61  ;;  %11843 = vmatpush1.bf16.msra.mxu1 %v16031_v62  ;;  %v16116_v61 = vld [vmem:[%s16914_s29 + $0x28c8] ss:$16 sps:$4 sm:$0xff]   ;;  %v16121_v62 = vld [vmem:[%s16914_s29 + $0x28e4] ss:$16 sps:$4 sm:$0xff]  }
 0x552   : > { %10819 = vmatprep.subr.bf16.mxu0 %v16036_v0  ;;  %11844 = vmatprep.subr.bf16.mxu1 %v16039_v46  ;;  %v16124_v0 = vld [vmem:[%s16914_s29 + $0x28ec] ss:$16 sps:$4 sm:$0xff]   ;;  %v16119_v46 = vld [vmem:[%s16914_s29 + $0x28e0] ss:$16 sps:$4 sm:$0xff]  }
 0x555   : > { %10820 = vmatpush1.bf16.msra.mxu0 %v16034_v1  ;;  %11845 = vmatpush1.bf16.msra.mxu1 %v16037_v2  ;;  %v16122_v1 = vld [vmem:[%s16914_s29 + $0x28e8] ss:$16 sps:$4 sm:$0xff]   ;;  %v16127_v2 = vld [vmem:[%s16914_s29 + $0x2904] ss:$16 sps:$4 sm:$0xff]  }
 0x556   : > { %10821 = vmatprep.subr.bf16.mxu0 %v16042_v48  ;;  %11846 = vmatprep.subr.bf16.mxu1 %v16045_v3  ;;  %v16130_v48 = vld [vmem:[%s16914_s29 + $0x290c] ss:$16 sps:$4 sm:$0xff]   ;;  %v16125_v3 = vld [vmem:[%s16914_s29 + $0x2900] ss:$16 sps:$4 sm:$0xff]  }
 0x559   : > { %10822 = vmatpush1.bf16.msra.mxu0 %v16040_v56  ;;  %11847 = vmatpush1.bf16.msra.mxu1 %v16043_v5  ;;  %v16128_v56 = vld [vmem:[%s16914_s29 + $0x2908] ss:$16 sps:$4 sm:$0xff]   ;;  %v16133_v5 = vld [vmem:[%s16914_s29 + $0x2924] ss:$16 sps:$4 sm:$0xff]  }
 0x55a   : > { %10823 = vmatprep.subr.bf16.mxu0 %v16048_v54  ;;  %11848 = vmatprep.subr.bf16.mxu1 %v16051_v59  ;;  %v16136_v54 = vld [vmem:[%s16914_s29 + $0x292c] ss:$16 sps:$4 sm:$0xff]   ;;  %v16131_v59 = vld [vmem:[%s16914_s29 + $0x2920] ss:$16 sps:$4 sm:$0xff]  }
 0x55d   : > { %10824 = vmatpush1.bf16.msra.mxu0 %v16046_v8  ;;  %11849 = vmatpush1.bf16.msra.mxu1 %v16049_v57  ;;  %v16134_v8 = vld [vmem:[%s16914_s29 + $0x2928] ss:$16 sps:$4 sm:$0xff]   ;;  %v16139_v57 = vld [vmem:[%s16914_s29 + $0x2944] ss:$16 sps:$4 sm:$0xff]  }
 0x55e   : > { %10825 = vmatprep.subr.bf16.mxu0 %v16054_v12  ;;  %11850 = vmatprep.subr.bf16.mxu1 %v16057_v13  ;;  %v16142_v12 = vld [vmem:[%s16914_s29 + $0x294c] ss:$16 sps:$4 sm:$0xff]   ;;  %v16137_v13 = vld [vmem:[%s16914_s29 + $0x2940] ss:$16 sps:$4 sm:$0xff]  }
 0x561   : > { %10826 = vmatpush1.bf16.msra.mxu0 %v16052_v15  ;;  %11851 = vmatpush1.bf16.msra.mxu1 %v16055_v60  ;;  %v16140_v15 = vld [vmem:[%s16914_s29 + $0x2948] ss:$16 sps:$4 sm:$0xff]   ;;  %v16145_v60 = vld [vmem:[%s16914_s29 + $0x2964] ss:$16 sps:$4 sm:$0xff]  }
 0x562   : > { %10827 = vmatprep.subr.bf16.mxu0 %v16060_v16  ;;  %11852 = vmatprep.subr.bf16.mxu1 %v16063_v17  ;;  %v16148_v16 = vld [vmem:[%s16914_s29 + $0x296c] ss:$16 sps:$4 sm:$0xff]   ;;  %v16143_v17 = vld [vmem:[%s16914_s29 + $0x2960] ss:$16 sps:$4 sm:$0xff]  }
 0x565   : > { %10828 = vmatpush1.bf16.msra.mxu0 %v16058_v63  ;;  %11853 = vmatpush1.bf16.msra.mxu1 %v16061_v18  ;;  %v16146_v63 = vld [vmem:[%s16914_s29 + $0x2968] ss:$16 sps:$4 sm:$0xff]   ;;  %v16151_v18 = vld [vmem:[%s16914_s29 + $0x2984] ss:$16 sps:$4 sm:$0xff]  }
 0x566   : > { %10829 = vmatprep.subr.bf16.mxu0 %v16066_v6  ;;  %11854 = vmatprep.subr.bf16.mxu1 %v16069_v20  ;;  %v16154_v6 = vld [vmem:[%s16914_s29 + $0x298c] ss:$16 sps:$4 sm:$0xff]   ;;  %v16149_v20 = vld [vmem:[%s16914_s29 + $0x2980] ss:$16 sps:$4 sm:$0xff]  }
 0x569   : > { %10830 = vmatpush1.bf16.msra.mxu0 %v16064_v4  ;;  %11855 = vmatpush1.bf16.msra.mxu1 %v16067_v9  ;;  %v16152_v4 = vld [vmem:[%s16914_s29 + $0x2988] ss:$16 sps:$4 sm:$0xff]   ;;  %v16157_v9 = vld [vmem:[%s16914_s29 + $0x29a4] ss:$16 sps:$4 sm:$0xff]  }
 0x56a   : > { %10831 = vmatprep.subr.bf16.mxu0 %v16072_v23  ;;  %11856 = vmatprep.subr.bf16.mxu1 %v16075_v7  ;;  %v16160_v23 = vld [vmem:[%s16914_s29 + $0x29ac] ss:$16 sps:$4 sm:$0xff]   ;;  %v16155_v7 = vld [vmem:[%s16914_s29 + $0x29a0] ss:$16 sps:$4 sm:$0xff]  }
 0x56d   : > { %10832 = vmatpush1.bf16.msra.mxu0 %v16070_v10  ;;  %11857 = vmatpush1.bf16.msra.mxu1 %v16073_v28  ;;  %v16158_v10 = vld [vmem:[%s16914_s29 + $0x29a8] ss:$16 sps:$4 sm:$0xff]   ;;  %v16163_v28 = vld [vmem:[%s16914_s29 + $0x29c4] ss:$16 sps:$4 sm:$0xff]  }
 0x56e   : > { %10842 = vmatprep.subr.bf16.mxu0 %v16079_v31  ;;  %11867 = vmatprep.subr.bf16.mxu1 %v16082_v11  ;;  %v16166_v31 = vld [vmem:[%s16914_s29 + $0x29cc] ss:$16 sps:$4 sm:$0xff]   ;;  %v475_v11 = vcombine.high %v18408_v21, %v18408_v21  ;;  %v16167_v21 = vld [vmem:[%s16914_s29 + $0x29e0] ss:$16 sps:$4 sm:$0xff]  }
 0x570   : > { %10834 = vmatmul.mubr.bf16.vlgmr.msra.gmra.mrb[0].mxu0 %v603_v34  ;;  %11859 = vmatmul.mubr.bf16.vlgmr.msra.gmra.mrb[0].mxu1 %v603_v34  ;;  %v16164_v34 = vld [vmem:[%s16914_s29 + $0x29c8] ss:$16 sps:$4 sm:$0xff]  }
 0x571   : > { %10843 = vmatpush1.bf16.msra.mxu0 %v16077_v14  ;;  %11868 = vmatpush1.bf16.msra.mxu1 %v16080_v35  ;;  %v16169_v14 = vld [vmem:[%s16914_s29 + $0x29e4] ss:$16 sps:$4 sm:$0xff]   ;;  %v16172_v35 = vld [vmem:[%s16914_s29 + $0x29ec] ss:$16 sps:$4 sm:$0xff]  }
 0x572   : > { %10844 = vmatprep.subr.bf16.mxu0 %v16085_v36  ;;  %11869 = vmatprep.subr.bf16.mxu1 %v16088_v27  ;;  %v18489_v36 = vrot.slane %v475_v11, %v16988_v50  ;;  %v16170_v27 = vld [vmem:[%s16914_s29 + $0x29e8] ss:$16 sps:$4 sm:$0xff]  }
 0x573   : > { %10874 = vmatprep.mubr.bf16.mxu0 %v606_v37  ;;  %11899 = vmatprep.mubr.bf16.mxu1 %v606_v37  ;;  %v16175_v37 = vld [vmem:[%s16914_s29 + $0x2a04] ss:$16 sps:$4 sm:$0xff]   ;;  %v16248_v11 = vld [vmem:[%s16914_s29 + $0x2b88] ss:$16 sps:$4 sm:$0xff]  }
 0x575   : > { %10845 = vmatpush1.bf16.msra.mxu0 %v16083_v19  ;;  %11870 = vmatpush1.bf16.msra.mxu1 %v16086_v25  ;;  %v16178_v19 = vld [vmem:[%s16914_s29 + $0x2a0c] ss:$16 sps:$4 sm:$0xff]   ;;  %v491_v25 = vcombine.high %v18489_v36, %v18489_v36 }
 0x576   : > { %10846 = vmatprep.subr.bf16.mxu0 %v16091_v39  ;;  %11871 = vmatprep.subr.bf16.mxu1 %v16094_v22  ;;  %v605_v39 = vpack.c.bf16 %v18416_v24, %v18416_v24  ;;  %v16173_v22 = vld [vmem:[%s16914_s29 + $0x2a00] ss:$16 sps:$4 sm:$0xff]  }
 0x577   : > { %v16179_v24 = vld [vmem:[%s16914_s29 + $0x2a20] ss:$16 sps:$4 sm:$0xff]  }
 0x579   : > { %10847 = vmatpush1.bf16.msra.mxu0 %v16089_v29  ;;  %11872 = vmatpush1.bf16.msra.mxu1 %v16092_v42  ;;  %v16176_v29 = vld [vmem:[%s16914_s29 + $0x2a08] ss:$16 sps:$4 sm:$0xff]   ;;  %v16181_v42 = vld [vmem:[%s16914_s29 + $0x2a24] ss:$16 sps:$4 sm:$0xff]  }
 0x57a   : > { %10848 = vmatprep.subr.bf16.mxu0 %v16097_v45  ;;  %11873 = vmatprep.subr.bf16.mxu1 %v16100_v26  ;;  %v16184_v45 = vld [vmem:[%s16914_s29 + $0x2a2c] ss:$16 sps:$4 sm:$0xff]   ;;  %v608_v26 = vpack.c.bf16 %v491_v25, %v491_v25  ;;  %v16260_v25 = vld [vmem:[%s16914_s29 + $0x2bc8] ss:$16 sps:$4 sm:$0xff]  }
 0x57d   : > { %10849 = vmatpush1.bf16.msra.mxu0 %v16095_v47  ;;  %11874 = vmatpush1.bf16.msra.mxu1 %v16098_v49  ;;  %v16182_v47 = vld [vmem:[%s16914_s29 + $0x2a28] ss:$16 sps:$4 sm:$0xff]   ;;  %v16187_v49 = vld [vmem:[%s16914_s29 + $0x2a44] ss:$16 sps:$4 sm:$0xff]  }
 0x57e   : > { %10850 = vmatprep.subr.bf16.mxu0 %v16103_v30  ;;  %11875 = vmatprep.subr.bf16.mxu1 %v16106_v51  ;;  %v16190_v30 = vld [vmem:[%s16914_s29 + $0x2a4c] ss:$16 sps:$4 sm:$0xff]   ;;  %v16185_v51 = vld [vmem:[%s16914_s29 + $0x2a40] ss:$16 sps:$4 sm:$0xff]  }
 0x581   : > { %10851 = vmatpush1.bf16.msra.mxu0 %v16101_v52  ;;  %11876 = vmatpush1.bf16.msra.mxu1 %v16104_v33  ;;  %v16188_v52 = vld [vmem:[%s16914_s29 + $0x2a48] ss:$16 sps:$4 sm:$0xff]   ;;  %v16193_v33 = vld [vmem:[%s16914_s29 + $0x2a64] ss:$16 sps:$4 sm:$0xff]  }
 0x582   : > { %10852 = vmatprep.subr.bf16.mxu0 %v16109_v53  ;;  %11877 = vmatprep.subr.bf16.mxu1 %v16112_v40  ;;  %v16196_v53 = vld [vmem:[%s16914_s29 + $0x2a6c] ss:$16 sps:$4 sm:$0xff]   ;;  %v16191_v40 = vld [vmem:[%s16914_s29 + $0x2a60] ss:$16 sps:$4 sm:$0xff]  }
 0x585   : > { %10853 = vmatpush1.bf16.msra.mxu0 %v16107_v55  ;;  %11878 = vmatpush1.bf16.msra.mxu1 %v16110_v38  ;;  %v16194_v55 = vld [vmem:[%s16914_s29 + $0x2a68] ss:$16 sps:$4 sm:$0xff]   ;;  %v16199_v38 = vld [vmem:[%s16914_s29 + $0x2a84] ss:$16 sps:$4 sm:$0xff]  }
 0x586   : > { %10854 = vmatprep.subr.bf16.mxu0 %v16115_v43  ;;  %11879 = vmatprep.subr.bf16.mxu1 %v16118_v58  ;;  %v16202_v43 = vld [vmem:[%s16914_s29 + $0x2a8c] ss:$16 sps:$4 sm:$0xff]   ;;  %v16197_v58 = vld [vmem:[%s16914_s29 + $0x2a80] ss:$16 sps:$4 sm:$0xff]  }
 0x589   : > { %10855 = vmatpush1.bf16.msra.mxu0 %v16113_v41  ;;  %11880 = vmatpush1.bf16.msra.mxu1 %v16116_v61  ;;  %v16200_v41 = vld [vmem:[%s16914_s29 + $0x2a88] ss:$16 sps:$4 sm:$0xff]   ;;  %v16205_v61 = vld [vmem:[%s16914_s29 + $0x2aa4] ss:$16 sps:$4 sm:$0xff]  }
 0x58a   : > { %10856 = vmatprep.subr.bf16.mxu0 %v16121_v62  ;;  %11881 = vmatprep.subr.bf16.mxu1 %v16124_v0  ;;  %v16208_v62 = vld [vmem:[%s16914_s29 + $0x2aac] ss:$16 sps:$4 sm:$0xff]   ;;  %v16203_v0 = vld [vmem:[%s16914_s29 + $0x2aa0] ss:$16 sps:$4 sm:$0xff]  }
 0x58d   : > { %10857 = vmatpush1.bf16.msra.mxu0 %v16119_v46  ;;  %11882 = vmatpush1.bf16.msra.mxu1 %v16122_v1  ;;  %v16206_v46 = vld [vmem:[%s16914_s29 + $0x2aa8] ss:$16 sps:$4 sm:$0xff]   ;;  %v16211_v1 = vld [vmem:[%s16914_s29 + $0x2ac4] ss:$16 sps:$4 sm:$0xff]  }
 0x58e   : > { %10858 = vmatprep.subr.bf16.mxu0 %v16127_v2  ;;  %11883 = vmatprep.subr.bf16.mxu1 %v16130_v48  ;;  %v16214_v2 = vld [vmem:[%s16914_s29 + $0x2acc] ss:$16 sps:$4 sm:$0xff]   ;;  %v16209_v48 = vld [vmem:[%s16914_s29 + $0x2ac0] ss:$16 sps:$4 sm:$0xff]  }
 0x591   : > { %10859 = vmatpush1.bf16.msra.mxu0 %v16125_v3  ;;  %11884 = vmatpush1.bf16.msra.mxu1 %v16128_v56  ;;  %v16212_v3 = vld [vmem:[%s16914_s29 + $0x2ac8] ss:$16 sps:$4 sm:$0xff]   ;;  %v16217_v56 = vld [vmem:[%s16914_s29 + $0x2ae4] ss:$16 sps:$4 sm:$0xff]  }
 0x592   : > { %10860 = vmatprep.subr.bf16.mxu0 %v16133_v5  ;;  %11885 = vmatprep.subr.bf16.mxu1 %v16136_v54  ;;  %v16220_v5 = vld [vmem:[%s16914_s29 + $0x2aec] ss:$16 sps:$4 sm:$0xff]   ;;  %v16215_v54 = vld [vmem:[%s16914_s29 + $0x2ae0] ss:$16 sps:$4 sm:$0xff]  }
 0x595   : > { %10861 = vmatpush1.bf16.msra.mxu0 %v16131_v59  ;;  %11886 = vmatpush1.bf16.msra.mxu1 %v16134_v8  ;;  %v16218_v59 = vld [vmem:[%s16914_s29 + $0x2ae8] ss:$16 sps:$4 sm:$0xff]   ;;  %v16223_v8 = vld [vmem:[%s16914_s29 + $0x2b04] ss:$16 sps:$4 sm:$0xff]  }
 0x596   : > { %10862 = vmatprep.subr.bf16.mxu0 %v16139_v57  ;;  %11887 = vmatprep.subr.bf16.mxu1 %v16142_v12  ;;  %v16226_v57 = vld [vmem:[%s16914_s29 + $0x2b0c] ss:$16 sps:$4 sm:$0xff]   ;;  %v16221_v12 = vld [vmem:[%s16914_s29 + $0x2b00] ss:$16 sps:$4 sm:$0xff]  }
 0x599   : > { %10863 = vmatpush1.bf16.msra.mxu0 %v16137_v13  ;;  %11888 = vmatpush1.bf16.msra.mxu1 %v16140_v15  ;;  %v16224_v13 = vld [vmem:[%s16914_s29 + $0x2b08] ss:$16 sps:$4 sm:$0xff]   ;;  %v16229_v15 = vld [vmem:[%s16914_s29 + $0x2b24] ss:$16 sps:$4 sm:$0xff]  }
 0x59a   : > { %10864 = vmatprep.subr.bf16.mxu0 %v16145_v60  ;;  %11889 = vmatprep.subr.bf16.mxu1 %v16148_v16  ;;  %v16232_v60 = vld [vmem:[%s16914_s29 + $0x2b2c] ss:$16 sps:$4 sm:$0xff]   ;;  %v16227_v16 = vld [vmem:[%s16914_s29 + $0x2b20] ss:$16 sps:$4 sm:$0xff]  }
 0x59d   : > { %10865 = vmatpush1.bf16.msra.mxu0 %v16143_v17  ;;  %11890 = vmatpush1.bf16.msra.mxu1 %v16146_v63  ;;  %v16230_v17 = vld [vmem:[%s16914_s29 + $0x2b28] ss:$16 sps:$4 sm:$0xff]   ;;  %v16235_v63 = vld [vmem:[%s16914_s29 + $0x2b44] ss:$16 sps:$4 sm:$0xff]  }
 0x59e   : > { %10866 = vmatprep.subr.bf16.mxu0 %v16151_v18  ;;  %11891 = vmatprep.subr.bf16.mxu1 %v16154_v6  ;;  %v16238_v18 = vld [vmem:[%s16914_s29 + $0x2b4c] ss:$16 sps:$4 sm:$0xff]   ;;  %v16233_v6 = vld [vmem:[%s16914_s29 + $0x2b40] ss:$16 sps:$4 sm:$0xff]  }
 0x5a1   : > { %10867 = vmatpush1.bf16.msra.mxu0 %v16149_v20  ;;  %11892 = vmatpush1.bf16.msra.mxu1 %v16152_v4  ;;  %v16236_v20 = vld [vmem:[%s16914_s29 + $0x2b48] ss:$16 sps:$4 sm:$0xff]   ;;  %v16241_v4 = vld [vmem:[%s16914_s29 + $0x2b64] ss:$16 sps:$4 sm:$0xff]  }
 0x5a2   : > { %10868 = vmatprep.subr.bf16.mxu0 %v16157_v9  ;;  %11893 = vmatprep.subr.bf16.mxu1 %v16160_v23  ;;  %v16244_v9 = vld [vmem:[%s16914_s29 + $0x2b6c] ss:$16 sps:$4 sm:$0xff]   ;;  %v16239_v23 = vld [vmem:[%s16914_s29 + $0x2b60] ss:$16 sps:$4 sm:$0xff]  }
 0x5a5   : > { %10869 = vmatpush1.bf16.msra.mxu0 %v16155_v7  ;;  %11894 = vmatpush1.bf16.msra.mxu1 %v16158_v10  ;;  %v16242_v7 = vld [vmem:[%s16914_s29 + $0x2b68] ss:$16 sps:$4 sm:$0xff]   ;;  %v16247_v10 = vld [vmem:[%s16914_s29 + $0x2b84] ss:$16 sps:$4 sm:$0xff]  }
 0x5a6   : > { %10870 = vmatprep.subr.bf16.mxu0 %v16163_v28  ;;  %11895 = vmatprep.subr.bf16.mxu1 %v16166_v31  ;;  %v16250_v28 = vld [vmem:[%s16914_s29 + $0x2b8c] ss:$16 sps:$4 sm:$0xff]   ;;  %v16245_v31 = vld [vmem:[%s16914_s29 + $0x2b80] ss:$16 sps:$4 sm:$0xff]  }
 0x5a9   : > { %10871 = vmatpush1.bf16.msra.mxu0 %v16161_v32  ;;  %11896 = vmatpush1.bf16.msra.mxu1 %v16164_v34  ;;  %v16253_v32 = vld [vmem:[%s16914_s29 + $0x2ba4] ss:$16 sps:$4 sm:$0xff]   ;;  %v16256_v34 = vld [vmem:[%s16914_s29 + $0x2bac] ss:$16 sps:$4 sm:$0xff]  }
 0x5aa   : > { %10872 = vmatprep.subr.bf16.mxu0 %v16169_v14  ;;  %11897 = vmatprep.subr.bf16.mxu1 %v16172_v35  ;;  %v16251_v14 = vld [vmem:[%s16914_s29 + $0x2ba0] ss:$16 sps:$4 sm:$0xff]   ;;  %v16254_v35 = vld [vmem:[%s16914_s29 + $0x2ba8] ss:$16 sps:$4 sm:$0xff]  }
 0x5ad   : > { %10873 = vmatpush1.bf16.msra.mxu0 %v16167_v21  ;;  %11898 = vmatpush1.bf16.msra.mxu1 %v16170_v27  ;;  %v16259_v21 = vld [vmem:[%s16914_s29 + $0x2bc4] ss:$16 sps:$4 sm:$0xff]   ;;  %v16262_v27 = vld [vmem:[%s16914_s29 + $0x2bcc] ss:$16 sps:$4 sm:$0xff]  }
 0x5ae   : > { %10883 = vmatprep.subr.bf16.mxu0 %v16175_v37  ;;  %11908 = vmatprep.subr.bf16.mxu1 %v16178_v19  ;;  %v18556_v37 = vld [vmem:[%s16938_s9 + $0x58] sm:$0xff] }
 0x5af   : > { %v16257_v19 = vld [vmem:[%s16914_s29 + $0x2bc0] ss:$16 sps:$4 sm:$0xff]  }
 0x5b0   : > { %10875 = vmatmul.mubr.bf16.vlgmr.msra.gmra.mrb[0].mxu0 %v605_v39  ;;  %11900 = vmatmul.mubr.bf16.vlgmr.msra.gmra.mrb[0].mxu1 %v605_v39  ;;  %v16265_v39 = vld [vmem:[%s16914_s29 + $0x2be4] ss:$16 sps:$4 sm:$0xff]  }
 0x5b1   : > { %10884 = vmatpush1.bf16.msra.mxu0 %v16173_v22  ;;  %11909 = vmatpush1.bf16.msra.mxu1 %v16176_v29  ;;  %v16268_v22 = vld [vmem:[%s16914_s29 + $0x2bec] ss:$16 sps:$4 sm:$0xff]   ;;  %v18564_v29 = vrot.slane %v18556_v37, %v16988_v50 }
 0x5b2   : > { %10885 = vmatprep.subr.bf16.mxu0 %v16181_v42  ;;  %11910 = vmatprep.subr.bf16.mxu1 %v16184_v45  ;;  %v16263_v42 = vld [vmem:[%s16914_s29 + $0x2be0] ss:$16 sps:$4 sm:$0xff]   ;;  %v16266_v45 = vld [vmem:[%s16914_s29 + $0x2be8] ss:$16 sps:$4 sm:$0xff]  }
 0x5b3   : > { %10915 = vmatprep.mubr.bf16.mxu0 %v608_v26  ;;  %11940 = vmatprep.mubr.bf16.mxu1 %v608_v26  ;;  %v16272_v26 = vld [vmem:[%s16914_s29 + $0x2c04] ss:$16 sps:$4 sm:$0xff]  }
 0x5b5   : > { %10886 = vmatpush1.bf16.msra.mxu0 %v16179_v24  ;;  %11911 = vmatpush1.bf16.msra.mxu1 %v16182_v47  ;;  %v16275_v24 = vld [vmem:[%s16914_s29 + $0x2c0c] ss:$16 sps:$4 sm:$0xff]   ;;  %v507_v47 = vcombine.high %v18564_v29, %v18564_v29 }
 0x5b6   : > { %10887 = vmatprep.subr.bf16.mxu0 %v16187_v49  ;;  %11912 = vmatprep.subr.bf16.mxu1 %v16190_v30  ;;  %v607_v49 = vpack.c.bf16 %v18489_v36, %v18489_v36  ;;  %v16270_v30 = vld [vmem:[%s16914_s29 + $0x2c00] ss:$16 sps:$4 sm:$0xff]  }
 0x5b7   : > { %v16276_v36 = vld [vmem:[%s16914_s29 + $0x2c20] ss:$16 sps:$4 sm:$0xff]  }
 0x5b9   : > { %10888 = vmatpush1.bf16.msra.mxu0 %v16185_v51  ;;  %11913 = vmatpush1.bf16.msra.mxu1 %v16188_v52  ;;  %v16273_v51 = vld [vmem:[%s16914_s29 + $0x2c08] ss:$16 sps:$4 sm:$0xff]   ;;  %v16278_v52 = vld [vmem:[%s16914_s29 + $0x2c24] ss:$16 sps:$4 sm:$0xff]  }
 0x5ba   : > { %10889 = vmatprep.subr.bf16.mxu0 %v16193_v33  ;;  %11914 = vmatprep.subr.bf16.mxu1 %v16196_v53  ;;  %v16281_v33 = vld [vmem:[%s16914_s29 + $0x2c2c] ss:$16 sps:$4 sm:$0xff]   ;;  %v610_v53 = vpack.c.bf16 %v507_v47, %v507_v47  ;;  %v16354_v47 = vld [vmem:[%s16914_s29 + $0x2dc0] ss:$16 sps:$4 sm:$0xff]  }
 0x5bd   : > { %10890 = vmatpush1.bf16.msra.mxu0 %v16191_v40  ;;  %11915 = vmatpush1.bf16.msra.mxu1 %v16194_v55  ;;  %v16279_v40 = vld [vmem:[%s16914_s29 + $0x2c28] ss:$16 sps:$4 sm:$0xff]   ;;  %v16284_v55 = vld [vmem:[%s16914_s29 + $0x2c44] ss:$16 sps:$4 sm:$0xff]  }
 0x5be   : > { %10891 = vmatprep.subr.bf16.mxu0 %v16199_v38  ;;  %11916 = vmatprep.subr.bf16.mxu1 %v16202_v43  ;;  %v16287_v38 = vld [vmem:[%s16914_s29 + $0x2c4c] ss:$16 sps:$4 sm:$0xff]   ;;  %v16282_v43 = vld [vmem:[%s16914_s29 + $0x2c40] ss:$16 sps:$4 sm:$0xff]  }
 0x5c1   : > { %10892 = vmatpush1.bf16.msra.mxu0 %v16197_v58  ;;  %11917 = vmatpush1.bf16.msra.mxu1 %v16200_v41  ;;  %v16285_v58 = vld [vmem:[%s16914_s29 + $0x2c48] ss:$16 sps:$4 sm:$0xff]   ;;  %v16290_v41 = vld [vmem:[%s16914_s29 + $0x2c64] ss:$16 sps:$4 sm:$0xff]  }
 0x5c2   : > { %10893 = vmatprep.subr.bf16.mxu0 %v16205_v61  ;;  %11918 = vmatprep.subr.bf16.mxu1 %v16208_v62  ;;  %v16293_v61 = vld [vmem:[%s16914_s29 + $0x2c6c] ss:$16 sps:$4 sm:$0xff]   ;;  %v16288_v62 = vld [vmem:[%s16914_s29 + $0x2c60] ss:$16 sps:$4 sm:$0xff]  }
 0x5c5   : > { %10894 = vmatpush1.bf16.msra.mxu0 %v16203_v0  ;;  %11919 = vmatpush1.bf16.msra.mxu1 %v16206_v46  ;;  %v16291_v0 = vld [vmem:[%s16914_s29 + $0x2c68] ss:$16 sps:$4 sm:$0xff]   ;;  %v16296_v46 = vld [vmem:[%s16914_s29 + $0x2c84] ss:$16 sps:$4 sm:$0xff]  }
 0x5c6   : > { %10895 = vmatprep.subr.bf16.mxu0 %v16211_v1  ;;  %11920 = vmatprep.subr.bf16.mxu1 %v16214_v2  ;;  %v16299_v1 = vld [vmem:[%s16914_s29 + $0x2c8c] ss:$16 sps:$4 sm:$0xff]   ;;  %v16294_v2 = vld [vmem:[%s16914_s29 + $0x2c80] ss:$16 sps:$4 sm:$0xff]  }
 0x5c9   : > { %10896 = vmatpush1.bf16.msra.mxu0 %v16209_v48  ;;  %11921 = vmatpush1.bf16.msra.mxu1 %v16212_v3  ;;  %v16297_v48 = vld [vmem:[%s16914_s29 + $0x2c88] ss:$16 sps:$4 sm:$0xff]   ;;  %v16302_v3 = vld [vmem:[%s16914_s29 + $0x2ca4] ss:$16 sps:$4 sm:$0xff]  }
 0x5ca   : > { %10897 = vmatprep.subr.bf16.mxu0 %v16217_v56  ;;  %11922 = vmatprep.subr.bf16.mxu1 %v16220_v5  ;;  %v16305_v56 = vld [vmem:[%s16914_s29 + $0x2cac] ss:$16 sps:$4 sm:$0xff]   ;;  %v16300_v5 = vld [vmem:[%s16914_s29 + $0x2ca0] ss:$16 sps:$4 sm:$0xff]  }
 0x5cd   : > { %10898 = vmatpush1.bf16.msra.mxu0 %v16215_v54  ;;  %11923 = vmatpush1.bf16.msra.mxu1 %v16218_v59  ;;  %v16303_v54 = vld [vmem:[%s16914_s29 + $0x2ca8] ss:$16 sps:$4 sm:$0xff]   ;;  %v16308_v59 = vld [vmem:[%s16914_s29 + $0x2cc4] ss:$16 sps:$4 sm:$0xff]  }
 0x5ce   : > { %10899 = vmatprep.subr.bf16.mxu0 %v16223_v8  ;;  %11924 = vmatprep.subr.bf16.mxu1 %v16226_v57  ;;  %v16311_v8 = vld [vmem:[%s16914_s29 + $0x2ccc] ss:$16 sps:$4 sm:$0xff]   ;;  %v16306_v57 = vld [vmem:[%s16914_s29 + $0x2cc0] ss:$16 sps:$4 sm:$0xff]  }
 0x5d1   : > { %10900 = vmatpush1.bf16.msra.mxu0 %v16221_v12  ;;  %11925 = vmatpush1.bf16.msra.mxu1 %v16224_v13  ;;  %v16309_v12 = vld [vmem:[%s16914_s29 + $0x2cc8] ss:$16 sps:$4 sm:$0xff]   ;;  %v16314_v13 = vld [vmem:[%s16914_s29 + $0x2ce4] ss:$16 sps:$4 sm:$0xff]  }
 0x5d2   : > { %10901 = vmatprep.subr.bf16.mxu0 %v16229_v15  ;;  %11926 = vmatprep.subr.bf16.mxu1 %v16232_v60  ;;  %v16317_v15 = vld [vmem:[%s16914_s29 + $0x2cec] ss:$16 sps:$4 sm:$0xff]   ;;  %v16312_v60 = vld [vmem:[%s16914_s29 + $0x2ce0] ss:$16 sps:$4 sm:$0xff]  }
 0x5d5   : > { %10902 = vmatpush1.bf16.msra.mxu0 %v16227_v16  ;;  %11927 = vmatpush1.bf16.msra.mxu1 %v16230_v17  ;;  %v16315_v16 = vld [vmem:[%s16914_s29 + $0x2ce8] ss:$16 sps:$4 sm:$0xff]   ;;  %v16320_v17 = vld [vmem:[%s16914_s29 + $0x2d04] ss:$16 sps:$4 sm:$0xff]  }
 0x5d6   : > { %10903 = vmatprep.subr.bf16.mxu0 %v16235_v63  ;;  %11928 = vmatprep.subr.bf16.mxu1 %v16238_v18  ;;  %v16323_v63 = vld [vmem:[%s16914_s29 + $0x2d0c] ss:$16 sps:$4 sm:$0xff]   ;;  %v16318_v18 = vld [vmem:[%s16914_s29 + $0x2d00] ss:$16 sps:$4 sm:$0xff]  }
 0x5d9   : > { %10904 = vmatpush1.bf16.msra.mxu0 %v16233_v6  ;;  %11929 = vmatpush1.bf16.msra.mxu1 %v16236_v20  ;;  %v16321_v6 = vld [vmem:[%s16914_s29 + $0x2d08] ss:$16 sps:$4 sm:$0xff]   ;;  %v16326_v20 = vld [vmem:[%s16914_s29 + $0x2d24] ss:$16 sps:$4 sm:$0xff]  }
 0x5da   : > { %10905 = vmatprep.subr.bf16.mxu0 %v16241_v4  ;;  %11930 = vmatprep.subr.bf16.mxu1 %v16244_v9  ;;  %v16329_v4 = vld [vmem:[%s16914_s29 + $0x2d2c] ss:$16 sps:$4 sm:$0xff]   ;;  %v16324_v9 = vld [vmem:[%s16914_s29 + $0x2d20] ss:$16 sps:$4 sm:$0xff]  }
 0x5dd   : > { %10906 = vmatpush1.bf16.msra.mxu0 %v16239_v23  ;;  %11931 = vmatpush1.bf16.msra.mxu1 %v16242_v7  ;;  %v16327_v23 = vld [vmem:[%s16914_s29 + $0x2d28] ss:$16 sps:$4 sm:$0xff]   ;;  %v16332_v7 = vld [vmem:[%s16914_s29 + $0x2d44] ss:$16 sps:$4 sm:$0xff]  }
 0x5de   : > { %10907 = vmatprep.subr.bf16.mxu0 %v16247_v10  ;;  %11932 = vmatprep.subr.bf16.mxu1 %v16250_v28  ;;  %v16335_v10 = vld [vmem:[%s16914_s29 + $0x2d4c] ss:$16 sps:$4 sm:$0xff]   ;;  %v16330_v28 = vld [vmem:[%s16914_s29 + $0x2d40] ss:$16 sps:$4 sm:$0xff]  }
 0x5e1   : > { %10908 = vmatpush1.bf16.msra.mxu0 %v16245_v31  ;;  %11933 = vmatpush1.bf16.msra.mxu1 %v16248_v11  ;;  %v16333_v31 = vld [vmem:[%s16914_s29 + $0x2d48] ss:$16 sps:$4 sm:$0xff]   ;;  %v16338_v11 = vld [vmem:[%s16914_s29 + $0x2d64] ss:$16 sps:$4 sm:$0xff]  }
 0x5e2   : > { %10909 = vmatprep.subr.bf16.mxu0 %v16253_v32  ;;  %11934 = vmatprep.subr.bf16.mxu1 %v16256_v34  ;;  %v16341_v32 = vld [vmem:[%s16914_s29 + $0x2d6c] ss:$16 sps:$4 sm:$0xff]   ;;  %v16336_v34 = vld [vmem:[%s16914_s29 + $0x2d60] ss:$16 sps:$4 sm:$0xff]  }
 0x5e5   : > { %10910 = vmatpush1.bf16.msra.mxu0 %v16251_v14  ;;  %11935 = vmatpush1.bf16.msra.mxu1 %v16254_v35  ;;  %v16339_v14 = vld [vmem:[%s16914_s29 + $0x2d68] ss:$16 sps:$4 sm:$0xff]   ;;  %v16344_v35 = vld [vmem:[%s16914_s29 + $0x2d84] ss:$16 sps:$4 sm:$0xff]  }
 0x5e6   : > { %10911 = vmatprep.subr.bf16.mxu0 %v16259_v21  ;;  %11936 = vmatprep.subr.bf16.mxu1 %v16262_v27  ;;  %v16347_v21 = vld [vmem:[%s16914_s29 + $0x2d8c] ss:$16 sps:$4 sm:$0xff]   ;;  %v16342_v27 = vld [vmem:[%s16914_s29 + $0x2d80] ss:$16 sps:$4 sm:$0xff]  }
 0x5e9   : > { %10912 = vmatpush1.bf16.msra.mxu0 %v16257_v19  ;;  %11937 = vmatpush1.bf16.msra.mxu1 %v16260_v25  ;;  %v16345_v19 = vld [vmem:[%s16914_s29 + $0x2d88] ss:$16 sps:$4 sm:$0xff]   ;;  %v16350_v25 = vld [vmem:[%s16914_s29 + $0x2da4] ss:$16 sps:$4 sm:$0xff]  }
 0x5ea   : > { %10913 = vmatprep.subr.bf16.mxu0 %v16265_v39  ;;  %11938 = vmatprep.subr.bf16.mxu1 %v16268_v22  ;;  %v16353_v39 = vld [vmem:[%s16914_s29 + $0x2dac] ss:$16 sps:$4 sm:$0xff]   ;;  %v16348_v22 = vld [vmem:[%s16914_s29 + $0x2da0] ss:$16 sps:$4 sm:$0xff]  }
 0x5ed   : > { %10914 = vmatpush1.bf16.msra.mxu0 %v16263_v42  ;;  %11939 = vmatpush1.bf16.msra.mxu1 %v16266_v45  ;;  %v16351_v42 = vld [vmem:[%s16914_s29 + $0x2da8] ss:$16 sps:$4 sm:$0xff]   ;;  %v16356_v45 = vld [vmem:[%s16914_s29 + $0x2dc4] ss:$16 sps:$4 sm:$0xff]  }
 0x5ee   : > { %10924 = vmatprep.subr.bf16.mxu0 %v16272_v26  ;;  %11949 = vmatprep.subr.bf16.mxu1 %v16275_v24  ;;  %v16359_v26 = vld [vmem:[%s16914_s29 + $0x2dcc] ss:$16 sps:$4 sm:$0xff]   ;;  %v492_v24 = vcombine.high %v18556_v37, %v18556_v37  ;;  %v16360_v37 = vld [vmem:[%s16914_s29 + $0x2de0] ss:$16 sps:$4 sm:$0xff]  }
 0x5f0   : > { %10916 = vmatmul.mubr.bf16.vlgmr.msra.gmra.mrb[0].mxu0 %v607_v49  ;;  %11941 = vmatmul.mubr.bf16.vlgmr.msra.gmra.mrb[0].mxu1 %v607_v49  ;;  %v16357_v49 = vld [vmem:[%s16914_s29 + $0x2dc8] ss:$16 sps:$4 sm:$0xff]  }
 0x5f1   : > { %10925 = vmatpush1.bf16.msra.mxu0 %v16270_v30  ;;  %11950 = vmatpush1.bf16.msra.mxu1 %v16273_v51  ;;  %v16362_v30 = vld [vmem:[%s16914_s29 + $0x2de4] ss:$16 sps:$4 sm:$0xff]   ;;  %v16365_v51 = vld [vmem:[%s16914_s29 + $0x2dec] ss:$16 sps:$4 sm:$0xff]  }
 0x5f2   : > { %10926 = vmatprep.subr.bf16.mxu0 %v16278_v52  ;;  %11951 = vmatprep.subr.bf16.mxu1 %v16281_v33  ;;  %v18637_v52 = vrot.slane %v492_v24, %v16988_v50  ;;  %v16363_v33 = vld [vmem:[%s16914_s29 + $0x2de8] ss:$16 sps:$4 sm:$0xff]  }
 0x5f3   : > { %10956 = vmatprep.mubr.bf16.mxu0 %v610_v53  ;;  %11981 = vmatprep.mubr.bf16.mxu1 %v610_v53  ;;  %v16368_v53 = vld [vmem:[%s16914_s29 + $0x2e04] ss:$16 sps:$4 sm:$0xff]   ;;  %v16441_v24 = vld [vmem:[%s16914_s29 + $0x2f88] ss:$16 sps:$4 sm:$0xff]  }
 0x5f5   : > { %10927 = vmatpush1.bf16.msra.mxu0 %v16276_v36  ;;  %11952 = vmatpush1.bf16.msra.mxu1 %v16279_v40  ;;  %v16371_v36 = vld [vmem:[%s16914_s29 + $0x2e0c] ss:$16 sps:$4 sm:$0xff]   ;;  %v508_v40 = vcombine.high %v18637_v52, %v18637_v52 }
 0x5f6   : > { %10928 = vmatprep.subr.bf16.mxu0 %v16284_v55  ;;  %11953 = vmatprep.subr.bf16.mxu1 %v16287_v38  ;;  %v609_v55 = vpack.c.bf16 %v18564_v29, %v18564_v29  ;;  %v16366_v38 = vld [vmem:[%s16914_s29 + $0x2e00] ss:$16 sps:$4 sm:$0xff]  }
 0x5f7   : > { %v16372_v29 = vld [vmem:[%s16914_s29 + $0x2e20] ss:$16 sps:$4 sm:$0xff]  }
 0x5f9   : > { %10929 = vmatpush1.bf16.msra.mxu0 %v16282_v43  ;;  %11954 = vmatpush1.bf16.msra.mxu1 %v16285_v58  ;;  %v16369_v43 = vld [vmem:[%s16914_s29 + $0x2e08] ss:$16 sps:$4 sm:$0xff]   ;;  %v16374_v58 = vld [vmem:[%s16914_s29 + $0x2e24] ss:$16 sps:$4 sm:$0xff]  }
 0x5fa   : > { %10930 = vmatprep.subr.bf16.mxu0 %v16290_v41  ;;  %11955 = vmatprep.subr.bf16.mxu1 %v16293_v61  ;;  %v16377_v41 = vld [vmem:[%s16914_s29 + $0x2e2c] ss:$16 sps:$4 sm:$0xff]   ;;  %v612_v61 = vpack.c.bf16 %v508_v40, %v508_v40  ;;  %v16458_v40 = vld [vmem:[%s16914_s29 + $0x2fe4] ss:$16 sps:$4 sm:$0xff]  }
 0x5fd   : > { %10931 = vmatpush1.bf16.msra.mxu0 %v16288_v62  ;;  %11956 = vmatpush1.bf16.msra.mxu1 %v16291_v0  ;;  %v16375_v62 = vld [vmem:[%s16914_s29 + $0x2e28] ss:$16 sps:$4 sm:$0xff]   ;;  %v16380_v0 = vld [vmem:[%s16914_s29 + $0x2e44] ss:$16 sps:$4 sm:$0xff]  }
 0x5fe   : > { %10932 = vmatprep.subr.bf16.mxu0 %v16296_v46  ;;  %11957 = vmatprep.subr.bf16.mxu1 %v16299_v1  ;;  %v16383_v46 = vld [vmem:[%s16914_s29 + $0x2e4c] ss:$16 sps:$4 sm:$0xff]   ;;  %v16378_v1 = vld [vmem:[%s16914_s29 + $0x2e40] ss:$16 sps:$4 sm:$0xff]  }
 0x601   : > { %10933 = vmatpush1.bf16.msra.mxu0 %v16294_v2  ;;  %11958 = vmatpush1.bf16.msra.mxu1 %v16297_v48  ;;  %v16381_v2 = vld [vmem:[%s16914_s29 + $0x2e48] ss:$16 sps:$4 sm:$0xff]   ;;  %v16386_v48 = vld [vmem:[%s16914_s29 + $0x2e64] ss:$16 sps:$4 sm:$0xff]  }
 0x602   : > { %10934 = vmatprep.subr.bf16.mxu0 %v16302_v3  ;;  %11959 = vmatprep.subr.bf16.mxu1 %v16305_v56  ;;  %v16389_v3 = vld [vmem:[%s16914_s29 + $0x2e6c] ss:$16 sps:$4 sm:$0xff]   ;;  %v16384_v56 = vld [vmem:[%s16914_s29 + $0x2e60] ss:$16 sps:$4 sm:$0xff]  }
 0x605   : > { %10935 = vmatpush1.bf16.msra.mxu0 %v16300_v5  ;;  %11960 = vmatpush1.bf16.msra.mxu1 %v16303_v54  ;;  %v16387_v5 = vld [vmem:[%s16914_s29 + $0x2e68] ss:$16 sps:$4 sm:$0xff]   ;;  %v16392_v54 = vld [vmem:[%s16914_s29 + $0x2e84] ss:$16 sps:$4 sm:$0xff]  }
 0x606   : > { %10936 = vmatprep.subr.bf16.mxu0 %v16308_v59  ;;  %11961 = vmatprep.subr.bf16.mxu1 %v16311_v8  ;;  %v16395_v59 = vld [vmem:[%s16914_s29 + $0x2e8c] ss:$16 sps:$4 sm:$0xff]   ;;  %v16390_v8 = vld [vmem:[%s16914_s29 + $0x2e80] ss:$16 sps:$4 sm:$0xff]  }
 0x609   : > { %10937 = vmatpush1.bf16.msra.mxu0 %v16306_v57  ;;  %11962 = vmatpush1.bf16.msra.mxu1 %v16309_v12  ;;  %v16393_v57 = vld [vmem:[%s16914_s29 + $0x2e88] ss:$16 sps:$4 sm:$0xff]   ;;  %v16398_v12 = vld [vmem:[%s16914_s29 + $0x2ea4] ss:$16 sps:$4 sm:$0xff]  }
 0x60a   : > { %10938 = vmatprep.subr.bf16.mxu0 %v16314_v13  ;;  %11963 = vmatprep.subr.bf16.mxu1 %v16317_v15  ;;  %v16401_v13 = vld [vmem:[%s16914_s29 + $0x2eac] ss:$16 sps:$4 sm:$0xff]   ;;  %v16396_v15 = vld [vmem:[%s16914_s29 + $0x2ea0] ss:$16 sps:$4 sm:$0xff]  }
 0x60d   : > { %10939 = vmatpush1.bf16.msra.mxu0 %v16312_v60  ;;  %11964 = vmatpush1.bf16.msra.mxu1 %v16315_v16  ;;  %v16399_v60 = vld [vmem:[%s16914_s29 + $0x2ea8] ss:$16 sps:$4 sm:$0xff]   ;;  %v16404_v16 = vld [vmem:[%s16914_s29 + $0x2ec4] ss:$16 sps:$4 sm:$0xff]  }
 0x60e   : > { %10940 = vmatprep.subr.bf16.mxu0 %v16320_v17  ;;  %11965 = vmatprep.subr.bf16.mxu1 %v16323_v63  ;;  %v16407_v17 = vld [vmem:[%s16914_s29 + $0x2ecc] ss:$16 sps:$4 sm:$0xff]   ;;  %v16402_v63 = vld [vmem:[%s16914_s29 + $0x2ec0] ss:$16 sps:$4 sm:$0xff]  }
 0x611   : > { %10941 = vmatpush1.bf16.msra.mxu0 %v16318_v18  ;;  %11966 = vmatpush1.bf16.msra.mxu1 %v16321_v6  ;;  %v16405_v18 = vld [vmem:[%s16914_s29 + $0x2ec8] ss:$16 sps:$4 sm:$0xff]   ;;  %v16410_v6 = vld [vmem:[%s16914_s29 + $0x2ee4] ss:$16 sps:$4 sm:$0xff]  }
 0x612   : > { %10942 = vmatprep.subr.bf16.mxu0 %v16326_v20  ;;  %11967 = vmatprep.subr.bf16.mxu1 %v16329_v4  ;;  %v16413_v20 = vld [vmem:[%s16914_s29 + $0x2eec] ss:$16 sps:$4 sm:$0xff]   ;;  %v16408_v4 = vld [vmem:[%s16914_s29 + $0x2ee0] ss:$16 sps:$4 sm:$0xff]  }
 0x615   : > { %10943 = vmatpush1.bf16.msra.mxu0 %v16324_v9  ;;  %11968 = vmatpush1.bf16.msra.mxu1 %v16327_v23  ;;  %v16411_v9 = vld [vmem:[%s16914_s29 + $0x2ee8] ss:$16 sps:$4 sm:$0xff]   ;;  %v16416_v23 = vld [vmem:[%s16914_s29 + $0x2f04] ss:$16 sps:$4 sm:$0xff]  }
 0x616   : > { %10944 = vmatprep.subr.bf16.mxu0 %v16332_v7  ;;  %11969 = vmatprep.subr.bf16.mxu1 %v16335_v10  ;;  %v16419_v7 = vld [vmem:[%s16914_s29 + $0x2f0c] ss:$16 sps:$4 sm:$0xff]   ;;  %v16414_v10 = vld [vmem:[%s16914_s29 + $0x2f00] ss:$16 sps:$4 sm:$0xff]  }
 0x619   : > { %10945 = vmatpush1.bf16.msra.mxu0 %v16330_v28  ;;  %11970 = vmatpush1.bf16.msra.mxu1 %v16333_v31  ;;  %v16417_v28 = vld [vmem:[%s16914_s29 + $0x2f08] ss:$16 sps:$4 sm:$0xff]   ;;  %v16422_v31 = vld [vmem:[%s16914_s29 + $0x2f24] ss:$16 sps:$4 sm:$0xff]  }
 0x61a   : > { %10946 = vmatprep.subr.bf16.mxu0 %v16338_v11  ;;  %11971 = vmatprep.subr.bf16.mxu1 %v16341_v32  ;;  %v16425_v11 = vld [vmem:[%s16914_s29 + $0x2f2c] ss:$16 sps:$4 sm:$0xff]   ;;  %v16420_v32 = vld [vmem:[%s16914_s29 + $0x2f20] ss:$16 sps:$4 sm:$0xff]  }
 0x61d   : > { %10947 = vmatpush1.bf16.msra.mxu0 %v16336_v34  ;;  %11972 = vmatpush1.bf16.msra.mxu1 %v16339_v14  ;;  %v16423_v34 = vld [vmem:[%s16914_s29 + $0x2f28] ss:$16 sps:$4 sm:$0xff]   ;;  %v16428_v14 = vld [vmem:[%s16914_s29 + $0x2f44] ss:$16 sps:$4 sm:$0xff]  }
 0x61e   : > { %10948 = vmatprep.subr.bf16.mxu0 %v16344_v35  ;;  %11973 = vmatprep.subr.bf16.mxu1 %v16347_v21  ;;  %v16431_v35 = vld [vmem:[%s16914_s29 + $0x2f4c] ss:$16 sps:$4 sm:$0xff]   ;;  %v16426_v21 = vld [vmem:[%s16914_s29 + $0x2f40] ss:$16 sps:$4 sm:$0xff]  }
 0x621   : > { %10949 = vmatpush1.bf16.msra.mxu0 %v16342_v27  ;;  %11974 = vmatpush1.bf16.msra.mxu1 %v16345_v19  ;;  %v16429_v27 = vld [vmem:[%s16914_s29 + $0x2f48] ss:$16 sps:$4 sm:$0xff]   ;;  %v16434_v19 = vld [vmem:[%s16914_s29 + $0x2f64] ss:$16 sps:$4 sm:$0xff]  }
 0x622   : > { %10950 = vmatprep.subr.bf16.mxu0 %v16350_v25  ;;  %11975 = vmatprep.subr.bf16.mxu1 %v16353_v39  ;;  %v16437_v25 = vld [vmem:[%s16914_s29 + $0x2f6c] ss:$16 sps:$4 sm:$0xff]   ;;  %v16432_v39 = vld [vmem:[%s16914_s29 + $0x2f60] ss:$16 sps:$4 sm:$0xff]  }
 0x625   : > { %10951 = vmatpush1.bf16.msra.mxu0 %v16348_v22  ;;  %11976 = vmatpush1.bf16.msra.mxu1 %v16351_v42  ;;  %v16435_v22 = vld [vmem:[%s16914_s29 + $0x2f68] ss:$16 sps:$4 sm:$0xff]   ;;  %v16440_v42 = vld [vmem:[%s16914_s29 + $0x2f84] ss:$16 sps:$4 sm:$0xff]  }
 0x626   : > { %10952 = vmatprep.subr.bf16.mxu0 %v16356_v45  ;;  %11977 = vmatprep.subr.bf16.mxu1 %v16359_v26  ;;  %v16443_v45 = vld [vmem:[%s16914_s29 + $0x2f8c] ss:$16 sps:$4 sm:$0xff]   ;;  %v16438_v26 = vld [vmem:[%s16914_s29 + $0x2f80] ss:$16 sps:$4 sm:$0xff]  }
 0x629   : > { %10953 = vmatpush1.bf16.msra.mxu0 %v16354_v47  ;;  %11978 = vmatpush1.bf16.msra.mxu1 %v16357_v49  ;;  %v16446_v47 = vld [vmem:[%s16914_s29 + $0x2fa4] ss:$16 sps:$4 sm:$0xff]   ;;  %v16449_v49 = vld [vmem:[%s16914_s29 + $0x2fac] ss:$16 sps:$4 sm:$0xff]  }
 0x62a   : > { %10954 = vmatprep.subr.bf16.mxu0 %v16362_v30  ;;  %11979 = vmatprep.subr.bf16.mxu1 %v16365_v51  ;;  %v16444_v30 = vld [vmem:[%s16914_s29 + $0x2fa0] ss:$16 sps:$4 sm:$0xff]   ;;  %v16447_v51 = vld [vmem:[%s16914_s29 + $0x2fa8] ss:$16 sps:$4 sm:$0xff]  }
 0x62d   : > { %10955 = vmatpush1.bf16.msra.mxu0 %v16360_v37  ;;  %11980 = vmatpush1.bf16.msra.mxu1 %v16363_v33  ;;  %v16452_v37 = vld [vmem:[%s16914_s29 + $0x2fc4] ss:$16 sps:$4 sm:$0xff]   ;;  %v16455_v33 = vld [vmem:[%s16914_s29 + $0x2fcc] ss:$16 sps:$4 sm:$0xff]  }
 0x62e   : > { %10965 = vmatprep.subr.bf16.mxu0 %v16368_v53  ;;  %11990 = vmatprep.subr.bf16.mxu1 %v16371_v36  ;;  %v16450_v53 = vld [vmem:[%s16914_s29 + $0x2fc0] ss:$16 sps:$4 sm:$0xff]   ;;  %v16453_v36 = vld [vmem:[%s16914_s29 + $0x2fc8] ss:$16 sps:$4 sm:$0xff]  }
 0x630   : > { %10957 = vmatmul.mubr.bf16.vlgmr.msra.gmra.mrb[0].mxu0 %v609_v55  ;;  %11982 = vmatmul.mubr.bf16.vlgmr.msra.gmra.mrb[0].mxu1 %v609_v55  ;;  %v16461_v55 = vld [vmem:[%s16914_s29 + $0x2fec] ss:$16 sps:$4 sm:$0xff]  }
 0x631   : > { %10966 = vmatpush1.bf16.msra.mxu0 %v16366_v38  ;;  %11991 = vmatpush1.bf16.msra.mxu1 %v16369_v43  ;;  %v16456_v38 = vld [vmem:[%s16914_s29 + $0x2fe0] ss:$16 sps:$4 sm:$0xff]   ;;  %v16459_v43 = vld [vmem:[%s16914_s29 + $0x2fe8] ss:$16 sps:$4 sm:$0xff]  }
 0x632   : > { %10967 = vmatprep.subr.bf16.mxu0 %v16374_v58  ;;  %11992 = vmatprep.subr.bf16.mxu1 %v16377_v41  ;;  %v16465_v58 = vld [vmem:[%s16914_s29 + $0x3004] ss:$16 sps:$4 sm:$0xff]   ;;  %v16468_v41 = vld [vmem:[%s16914_s29 + $0x300c] ss:$16 sps:$4 sm:$0xff]  }
 0x633   : > { %10997 = vmatprep.mubr.bf16.mxu0 %v612_v61  ;;  %12022 = vmatprep.mubr.bf16.mxu1 %v612_v61  ;;  %v611_v61 = vpack.c.bf16 %v18637_v52, %v18637_v52  ;;  %v16472_v52 = vld [vmem:[%s16914_s29 + $0x3028] ss:$16 sps:$4 sm:$0xff]  }
 0x635   : > { %10968 = vmatpush1.bf16.msra.mxu0 %v16372_v29  ;;  %11993 = vmatpush1.bf16.msra.mxu1 %v16375_v62  ;;  %v16463_v29 = vld [vmem:[%s16914_s29 + $0x3000] ss:$16 sps:$4 sm:$0xff]   ;;  %v16466_v62 = vld [vmem:[%s16914_s29 + $0x3008] ss:$16 sps:$4 sm:$0xff]  }
 0x636   : > { %10969 = vmatprep.subr.bf16.mxu0 %v16380_v0  ;;  %11994 = vmatprep.subr.bf16.mxu1 %v16383_v46  ;;  %v16471_v0 = vld [vmem:[%s16914_s29 + $0x3024] ss:$16 sps:$4 sm:$0xff]   ;;  %v16474_v46 = vld [vmem:[%s16914_s29 + $0x302c] ss:$16 sps:$4 sm:$0xff]  }
 0x639   : > { %10970 = vmatpush1.bf16.msra.mxu0 %v16378_v1  ;;  %11995 = vmatpush1.bf16.msra.mxu1 %v16381_v2  ;;  %v16469_v1 = vld [vmem:[%s16914_s29 + $0x3020] ss:$16 sps:$4 sm:$0xff]   ;;  %v16477_v2 = vld [vmem:[%s16914_s29 + $0x3044] ss:$16 sps:$4 sm:$0xff]  }
 0x63a   : > { %10971 = vmatprep.subr.bf16.mxu0 %v16386_v48  ;;  %11996 = vmatprep.subr.bf16.mxu1 %v16389_v3  ;;  %v16480_v48 = vld [vmem:[%s16914_s29 + $0x304c] ss:$16 sps:$4 sm:$0xff]   ;;  %v16674_v3 = vmov 0  }
 0x63d   : > { %10972 = vmatpush1.bf16.msra.mxu0 %v16384_v56  ;;  %11997 = vmatpush1.bf16.msra.mxu1 %v16387_v5  ;;  %v16475_v56 = vld [vmem:[%s16914_s29 + $0x3040] ss:$16 sps:$4 sm:$0xff]   ;;  %v16478_v5 = vld [vmem:[%s16914_s29 + $0x3048] ss:$16 sps:$4 sm:$0xff]  }
 0x63e   : > { %10973 = vmatprep.subr.bf16.mxu0 %v16392_v54  ;;  %11998 = vmatprep.subr.bf16.mxu1 %v16395_v59  ;;  %v16483_v54 = vld [vmem:[%s16914_s29 + $0x3064] ss:$16 sps:$4 sm:$0xff]   ;;  %v16486_v59 = vld [vmem:[%s16914_s29 + $0x306c] ss:$16 sps:$4 sm:$0xff]  }
 0x641   : > { %10974 = vmatpush1.bf16.msra.mxu0 %v16390_v8  ;;  %11999 = vmatpush1.bf16.msra.mxu1 %v16393_v57  ;;  %v16481_v8 = vld [vmem:[%s16914_s29 + $0x3060] ss:$16 sps:$4 sm:$0xff]   ;;  %v16484_v57 = vld [vmem:[%s16914_s29 + $0x3068] ss:$16 sps:$4 sm:$0xff]  }
 0x642   : > { %10975 = vmatprep.subr.bf16.mxu0 %v16398_v12  ;;  %12000 = vmatprep.subr.bf16.mxu1 %v16401_v13  ;;  %v16489_v12 = vld [vmem:[%s16914_s29 + $0x3084] ss:$16 sps:$4 sm:$0xff]   ;;  %v16492_v13 = vld [vmem:[%s16914_s29 + $0x308c] ss:$16 sps:$4 sm:$0xff]  }
 0x645   : > { %10976 = vmatpush1.bf16.msra.mxu0 %v16396_v15  ;;  %12001 = vmatpush1.bf16.msra.mxu1 %v16399_v60  ;;  %v16487_v15 = vld [vmem:[%s16914_s29 + $0x3080] ss:$16 sps:$4 sm:$0xff]   ;;  %v16490_v60 = vld [vmem:[%s16914_s29 + $0x3088] ss:$16 sps:$4 sm:$0xff]  }
 0x646   : > { %10977 = vmatprep.subr.bf16.mxu0 %v16404_v16  ;;  %12002 = vmatprep.subr.bf16.mxu1 %v16407_v17  ;;  %v16495_v16 = vld [vmem:[%s16914_s29 + $0x30a4] ss:$16 sps:$4 sm:$0xff]   ;;  %v16498_v17 = vld [vmem:[%s16914_s29 + $0x30ac] ss:$16 sps:$4 sm:$0xff]  }
 0x649   : > { %10978 = vmatpush1.bf16.msra.mxu0 %v16402_v63  ;;  %12003 = vmatpush1.bf16.msra.mxu1 %v16405_v18  ;;  %v16493_v63 = vld [vmem:[%s16914_s29 + $0x30a0] ss:$16 sps:$4 sm:$0xff]   ;;  %v16496_v18 = vld [vmem:[%s16914_s29 + $0x30a8] ss:$16 sps:$4 sm:$0xff]  }
 0x64a   : > { %10979 = vmatprep.subr.bf16.mxu0 %v16410_v6  ;;  %12004 = vmatprep.subr.bf16.mxu1 %v16413_v20  ;;  %v16501_v6 = vld [vmem:[%s16914_s29 + $0x30c4] ss:$16 sps:$4 sm:$0xff]   ;;  %v16504_v20 = vld [vmem:[%s16914_s29 + $0x30cc] ss:$16 sps:$4 sm:$0xff]  }
 0x64d   : > { %10980 = vmatpush1.bf16.msra.mxu0 %v16408_v4  ;;  %12005 = vmatpush1.bf16.msra.mxu1 %v16411_v9  ;;  %v16499_v4 = vld [vmem:[%s16914_s29 + $0x30c0] ss:$16 sps:$4 sm:$0xff]   ;;  %v16502_v9 = vld [vmem:[%s16914_s29 + $0x30c8] ss:$16 sps:$4 sm:$0xff]  }
 0x64e   : > { %10981 = vmatprep.subr.bf16.mxu0 %v16416_v23  ;;  %12006 = vmatprep.subr.bf16.mxu1 %v16419_v7  ;;  %v16507_v23 = vld [vmem:[%s16914_s29 + $0x30e4] ss:$16 sps:$4 sm:$0xff]   ;;  %v16510_v7 = vld [vmem:[%s16914_s29 + $0x30ec] ss:$16 sps:$4 sm:$0xff]  }
 0x651   : > { %10982 = vmatpush1.bf16.msra.mxu0 %v16414_v10  ;;  %12007 = vmatpush1.bf16.msra.mxu1 %v16417_v28  ;;  %v16505_v10 = vld [vmem:[%s16914_s29 + $0x30e0] ss:$16 sps:$4 sm:$0xff]   ;;  %v16508_v28 = vld [vmem:[%s16914_s29 + $0x30e8] ss:$16 sps:$4 sm:$0xff]  }
 0x652   : > { %10983 = vmatprep.subr.bf16.mxu0 %v16422_v31  ;;  %12008 = vmatprep.subr.bf16.mxu1 %v16425_v11  ;;  %v12273_v31 = vld.sshfl [vmem:[%s16938_s9 + $0x60] sm:$0x3 pattern:$0x76325410] }
 0x653   : > { %v613_v11 = vpack.c.bf16 %v12273_v31, %v12273_v31 }
 0x655   : > { %10984 = vmatpush1.bf16.msra.mxu0 %v16420_v32  ;;  %12009 = vmatpush1.bf16.msra.mxu1 %v16423_v34 }
 0x656   : > { %10985 = vmatprep.subr.bf16.mxu0 %v16428_v14  ;;  %12010 = vmatprep.subr.bf16.mxu1 %v16431_v35 }
 0x659   : > { %10986 = vmatpush1.bf16.msra.mxu0 %v16426_v21  ;;  %12011 = vmatpush1.bf16.msra.mxu1 %v16429_v27 }
 0x65a   : > { %10987 = vmatprep.subr.bf16.mxu0 %v16434_v19  ;;  %12012 = vmatprep.subr.bf16.mxu1 %v16437_v25 }
 0x65d   : > { %10988 = vmatpush1.bf16.msra.mxu0 %v16432_v39  ;;  %12013 = vmatpush1.bf16.msra.mxu1 %v16435_v22 }
 0x65e   : > { %10989 = vmatprep.subr.bf16.mxu0 %v16440_v42  ;;  %12014 = vmatprep.subr.bf16.mxu1 %v16443_v45 }
 0x661   : > { %10990 = vmatpush1.bf16.msra.mxu0 %v16438_v26  ;;  %12015 = vmatpush1.bf16.msra.mxu1 %v16441_v24  ;;  %v278_v26 = vld [vmem:[#allocation2] sm:$0xff] }
 0x662   : > { %10991 = vmatprep.subr.bf16.mxu0 %v16446_v47  ;;  %12016 = vmatprep.subr.bf16.mxu1 %v16449_v49  ;;  %v12101_v49 = vld [vmem:[%s224_s6] sm:$0xf] (!%p13842_p3) }
 0x665   : > { %10992 = vmatpush1.bf16.msra.mxu0 %v16444_v30  ;;  %12017 = vmatpush1.bf16.msra.mxu1 %v16447_v51  ;;  %v12105_v30 = vsub.s32 (!%p13842_p3), 0, %v16980_v44  ;;  %v12109_v51 = vsub.s32 (!%p13842_p3), 1, %v16980_v44 }
 0x666   : > { %10993 = vmatprep.subr.bf16.mxu0 %v16452_v37  ;;  %12018 = vmatprep.subr.bf16.mxu1 %v16455_v33  ;;  %v12113_v37 = vsub.s32 (!%p13842_p3), 2, %v16980_v44  ;;  %v12117_v33 = vsub.s32 (!%p13842_p3), 3, %v16980_v44 }
 0x669   : > { %10994 = vmatpush1.bf16.msra.mxu0 %v16450_v53  ;;  %12019 = vmatpush1.bf16.msra.mxu1 %v16453_v36  ;;  %v12106_v53 = vrot.slane (!%p13842_p3), %v12101_v49, %v12105_v30  ;;  %v12110_v36 = vrot.slane (!%p13842_p3), %v12101_v49, %v12109_v51 }
 0x66a   : > { %10995 = vmatprep.subr.bf16.mxu0 %v16458_v40  ;;  %12020 = vmatprep.subr.bf16.mxu1 %v16461_v55  ;;  %v12114_v40 = vrot.slane (!%p13842_p3), %v12101_v49, %v12113_v37  ;;  %v12118_v55 = vrot.slane (!%p13842_p3), %v12101_v49, %v12117_v33 }
 0x66d   : > { %10996 = vmatpush1.bf16.msra.mxu0 %v16456_v38  ;;  %12021 = vmatpush1.bf16.msra.mxu1 %v16459_v43  ;;  %v12119_v38 = vcombine.low (!%p13842_p3), %v12106_v53, %v12110_v36  ;;  %v12120_v43 = vcombine.low (!%p13842_p3), %v12114_v40, %v12118_v55 }
 0x66e   : > { %11006 = vmatprep.subr.bf16.mxu0 %v16465_v58  ;;  %12031 = vmatprep.subr.bf16.mxu1 %v16468_v41 }
 0x66f   : > { %v12127_v58 = vrot.slane (!%p13842_p3), %v12119_v38, %v16988_v50  ;;  %v12134_v41 = vrot.slane (!%p13842_p3), %v12120_v43, %v16988_v50 }
 0x670   : > { %10998 = vmatmul.mubr.bf16.vlgmr.msra.gmra.mrb[0].mxu0 %v611_v61  ;;  %12023 = vmatmul.mubr.bf16.vlgmr.msra.gmra.mrb[0].mxu1 %v611_v61 }
 0x671   : > { %11007 = vmatpush1.bf16.msra.mxu0 %v16463_v29  ;;  %12032 = vmatpush1.bf16.msra.mxu1 %v16466_v62  ;;  %v12135_v29 = vcombine.low (!%p13842_p3), %v12127_v58, %v12134_v41 }
 0x672   : > { %11008 = vmatprep.subr.bf16.mxu0 %v16471_v0  ;;  %12033 = vmatprep.subr.bf16.mxu1 %v16474_v46 }
 0x673   : > { %11038 = vmatprep.mubr.bf16.mxu0 %v16674_v3  ;;  %12063 = vmatprep.mubr.bf16.mxu1 %v16674_v3 }
 0x675   : > { %11009 = vmatpush1.bf16.msra.mxu0 %v16469_v1  ;;  %12034 = vmatpush1.bf16.msra.mxu1 %v16472_v52 }
 0x676   : > { %11010 = vmatprep.subr.bf16.mxu0 %v16477_v2  ;;  %12035 = vmatprep.subr.bf16.mxu1 %v16480_v48 }
 0x679   : > { %11011 = vmatpush1.bf16.msra.mxu0 %v16475_v56  ;;  %12036 = vmatpush1.bf16.msra.mxu1 %v16478_v5 }
 0x67a   : > { %11012 = vmatprep.subr.bf16.mxu0 %v16483_v54  ;;  %12037 = vmatprep.subr.bf16.mxu1 %v16486_v59 }
 0x67d   : > { %11013 = vmatpush1.bf16.msra.mxu0 %v16481_v8  ;;  %12038 = vmatpush1.bf16.msra.mxu1 %v16484_v57 }
 0x67e   : > { %11014 = vmatprep.subr.bf16.mxu0 %v16489_v12  ;;  %12039 = vmatprep.subr.bf16.mxu1 %v16492_v13 }
 0x681   : > { %11015 = vmatpush1.bf16.msra.mxu0 %v16487_v15  ;;  %12040 = vmatpush1.bf16.msra.mxu1 %v16490_v60 }
 0x682   : > { %11016 = vmatprep.subr.bf16.mxu0 %v16495_v16  ;;  %12041 = vmatprep.subr.bf16.mxu1 %v16498_v17 }
 0x685   : > { %11017 = vmatpush1.bf16.msra.mxu0 %v16493_v63  ;;  %12042 = vmatpush1.bf16.msra.mxu1 %v16496_v18 }
 0x686   : > { %11018 = vmatprep.subr.bf16.mxu0 %v16501_v6  ;;  %12043 = vmatprep.subr.bf16.mxu1 %v16504_v20 }
 0x689   : > { %11019 = vmatpush1.bf16.msra.mxu0 %v16499_v4  ;;  %12044 = vmatpush1.bf16.msra.mxu1 %v16502_v9 }
 0x68a   : > { %11020 = vmatprep.subr.bf16.mxu0 %v16507_v23  ;;  %12045 = vmatprep.subr.bf16.mxu1 %v16510_v7 }
 0x68d   : > { %11021 = vmatpush1.bf16.msra.mxu0 %v16505_v10  ;;  %12046 = vmatpush1.bf16.msra.mxu1 %v16508_v28 }
 0x690   : > { %11039 = vmatmul.mubr.bf16.vlgmr.msra.gmra.mrb[0].mxu0 %v613_v11  ;;  %12064 = vmatmul.mubr.bf16.vlgmr.msra.gmra.mrb[0].mxu1 %v613_v11 }
 0x763   : > { %v11040_v32 = vpop.f32.mrb[0].mxu0  ;;  %v12065_v34 = vpop.f32.mrb[0].mxu1 }
 0x764   : > { %v11042_v14 = vpop.f32.mrb[1].mxu0  ;;  %v12067_v35 = vpop.f32.mrb[1].mxu1 }
 0x765   : > { %v12076_v21 = vcombine.low %v11040_v32, %v11042_v14  ;;  %v12077_v27 = vcombine.low %v12065_v34, %v12067_v35  ;;  %v11044_v19 = vpop.f32.mrb[2].mxu0  ;;  %v12069_v25 = vpop.f32.mrb[2].mxu1 }
 0x766   : > { %v11045_v39 = vpop.f32.mrb[3].mxu0  ;;  %v12070_v22 = vpop.f32.mrb[3].mxu1 }
 0x767   : > { %v12084_v42 = vrot.slane %v12076_v21, %v16988_v50  ;;  %v12091_v45 = vrot.slane %v12077_v27, %v16988_v50  ;;  %12099 = sbr.rel (%p13842_p3) target bundleno = 1914 (0x77a), region = 48 }
 0x769   : > { %v12092_v24 = vcombine.low %v12084_v42, %v12091_v45 }
 0x76b   : > { %v12094_v47 = vadd.f32 %v12092_v24, %v278_v26 }
 0x76d   : > { %12095 = vst [vmem:[#allocation2] sm:$0xff] %v12094_v47 }
 0x774   : > { %v12100_v61 = vld [vmem:[#allocation2] sm:$0xff] }
 0x775   : > { %v12137_v62 = vadd.f32 %v12135_v29, %v12100_v61 }
 0x777   : > { %v12138_v0 = vmax.f32 %v12137_v62, 0.0 }
 0x779   : > { %12139 = vst [vmem:[%s16933_s8] sm:$0xff] %v12138_v0 }
 0x77a PF: > { %s19_s22 = sadd.s32 1, %s16665_s22   ;;  %s18816_s29 = sld [smem:[#allocation9_spill]] }
 0x77b   : > { %p16_p11 = scmp.ge.s32.totalorder %s19_s22, 10   ;;  %s18817_s12 = smov %s16629_s13 }
 0x77c   : > { %s18818_s13 = smov %s16633_s14  ;;  %s18819_s14 = smov %s16863_s10 }
 0x77d   : > { %s18820_s15 = smov %s16641_s16  ;;  %s18821_s16 = smov %s16645_s17 }
 0x77e   : > { %s18822_s17 = smov %s16868_s28  ;;  %s18823_s18 = smov %s16657_s20 }
 0x77f   : > { %s18824_s19 = smov %s16661_s21  ;;  %s18825_s20 = smov %s18828_s23 }
 0x780   : > { %s18826_s21 = smov %s18816_s29  ;;  %18 = sbr.rel (!%p16_p11) target bundleno = 11 (0xb), region = 96 }
 0x787   :  { %12162 = vsyncpa [#allocation4], 1 }
 0x788   :  { %12164 = vsyncpa [#allocation4 + $0x1], 1 }
 0x789   :  { %12165 = vsyncpa [#allocation6], 1 }
 0x78a   :  { %12167 = vsyncpa [#allocation6 + $0x1], 1 }

</bundles_post_ra>
